<compile_context>
chip_gen: v7x
topology: tpu7x:2x2x1
jax: 0.10.0
libtpu: 0.0.40
codegen_flags: <defaults>
</compile_context>

<pallas_src>
import jax
import jax.numpy as jnp
from jax.experimental import pallas as pl
from jax.experimental.pallas import tpu as pltpu

EPS_NORM = 1e-8   # gvp._norm_no_nan clamp
EPS_LN = 1e-5     # nn.LayerNorm default

_MAX_TILE = 256                     # rows per grid step (fits v7x 64 MiB VMEM with margin)
_VMEM_LIMIT = 48 * 1024 * 1024      # explicit scoped-VMEM cap, valid on all generations


# ----------------------------------------------------------------------------
# In-kernel math helpers (operate on arrays already loaded from refs)
# ----------------------------------------------------------------------------
def _mmb(x, w):
    """Wide scalar-path matmul: bf16 MXU inputs, f32 accumulation."""
    return jnp.dot(x.astype(jnp.bfloat16), w, preferred_element_type=jnp.float32)


def _mmf(x, w):
    """Tiny vector channel-mixing matmul kept in f32."""
    return jnp.dot(x, w, preferred_element_type=jnp.float32)


def _gvp_core(s, v, wh, wss, wsv, bs, wv, wg, bg, scalar_act, vector_act):
    """GVP (vector_gate=True).  v is a tuple of 3 [T, vi] xyz components."""
    vh = tuple(_mmf(c, wh) for c in v)                                   # 3 x [T, h]
    vn = jnp.sqrt(jnp.maximum(vh[0] * vh[0] + vh[1] * vh[1] + vh[2] * vh[2], EPS_NORM))
    s_pre = _mmb(s, wss) + _mmb(vn, wsv) + bs                            # [T, so]
    u = tuple(_mmf(c, wv) for c in vh)                                   # 3 x [T, vo]
    gate_in = jax.nn.sigmoid(s_pre) if vector_act == "sigmoid" else s_pre
    gate = jax.nn.sigmoid(_mmb(gate_in, wg) + bg)                        # [T, vo]
    v_out = tuple(c * gate for c in u)
    s_out = jax.nn.relu(s_pre) if scalar_act == "relu" else s_pre
    return s_out, v_out


def _gvp_core_s(s, v, wh, wss, wsv, bs, scalar_act):
    """GVP with scalar-only output (vo = 0), e.g. W_out -> 20 logits."""
    vh = tuple(_mmf(c, wh) for c in v)
    vn = jnp.sqrt(jnp.maximum(vh[0] * vh[0] + vh[1] * vh[1] + vh[2] * vh[2], EPS_NORM))
    s_pre = _mmb(s, wss) + _mmb(vn, wsv) + bs
    return jax.nn.relu(s_pre) if scalar_act == "relu" else s_pre


def _ln_core(s, v, g, b):
    """gvp.LayerNorm: nn.LayerNorm on scalars + RMS-of-vector-norm scaling."""
    mu = jnp.mean(s, axis=-1, keepdims=True)
    var = jnp.mean(jnp.square(s - mu), axis=-1, keepdims=True)
    s_out = (s - mu) * jax.lax.rsqrt(var + EPS_LN) * g + b
    vn2 = jnp.maximum(v[0] * v[0] + v[1] * v[1] + v[2] * v[2], EPS_NORM)  # [T, nv]
    denom = jnp.sqrt(jnp.mean(vn2, axis=-1, keepdims=True))               # [T, 1]
    return s_out, tuple(c / denom for c in v)


# ----------------------------------------------------------------------------
# Fused Pallas kernels (each runs on a 1-D row grid; weights are resident)
# ----------------------------------------------------------------------------
def _embed_kernel(s_ref, v_ref, wh, wss, wsv, bs, wv, wg, bg, lg, lb,
                  s_out_ref, v_out_ref):
    """W_v / W_e: GVP(activations=(None, None), vector_gate) + LayerNorm."""
    s0 = s_ref[...]
    v0 = (v_ref[0], v_ref[1], v_ref[2])
    s1, v1 = _gvp_core(s0, v0, wh[...], wss[...], wsv[...], bs[...],
                       wv[...], wg[...], bg[...], None, None)
    s2, v2 = _ln_core(s1, v1, lg[...], lb[...])
    s_out_ref[...] = s2
    v_out_ref[0] = v2[0]
    v_out_ref[1] = v2[1]
    v_out_ref[2] = v2[2]


def _seq_fusion_kernel(s_ref, esm_ref, msa_ref,
                       we, be, wm, bm, wva, bva, woa, boa, fg1, fg2, fgb,
                       out_ref):
    """feat_processor + length-1 cross-attention + fusion gate, fused.

    TODO(synk): FeatureProcessor class is not provided in the source file;
    approximated as ReLU(Linear(esm)) + ReLU(Linear(msa)) -> [N, 256].
    The q/k/softmax path of nn.MultiheadAttention is removed: each query
    attends to exactly one key, so the softmax weight is identically 1 and
    the output reduces to out_proj(v_proj(value)).
    """
    s = s_ref[...]
    fused = (jax.nn.relu(_mmb(esm_ref[...], we[...]) + be[...])
             + jax.nn.relu(_mmb(msa_ref[...], wm[...]) + bm[...]))
    attn = _mmb(_mmb(fused, wva[...]) + bva[...], woa[...]) + boa[...]
    g = jax.nn.sigmoid(_mmb(s, fg1[...]) + _mmb(attn, fg2[...]) + fgb[...])
    out_ref[...] = g * s + (1.0 - g) * attn


def _message_kernel(ms_ref, mv_ref, *refs):
    """GVPConv message function: 3 chained GVPs fused in one kernel."""
    g1 = [r[...] for r in refs[0:7]]
    g2 = [r[...] for r in refs[7:14]]
    g3 = [r[...] for r in refs[14:21]]
    s_out_ref, v_out_ref = refs[21], refs[22]
    s = ms_ref[...]
    v = (mv_ref[0], mv_ref[1], mv_ref[2])
    s, v = _gvp_core(s, v, *g1, "relu", "sigmoid")
    s, v = _gvp_core(s, v, *g2, "relu", "sigmoid")
    s, v = _gvp_core(s, v, *g3, None, None)
    s_out_ref[...] = s
    v_out_ref[0] = v[0]
    v_out_ref[1] = v[1]
    v_out_ref[2] = v[2]


def _res_ln_kernel(s_ref, ds_ref, v_ref, dv_ref, lg, lb, s_out_ref, v_out_ref):
    """Residual add of the aggregated messages + gvp.LayerNorm."""
    s = s_ref[...] + ds_ref[...]
    v = (v_ref[0] + dv_ref[0], v_ref[1] + dv_ref[1], v_ref[2] + dv_ref[2])
    s2, v2 = _ln_core(s, v, lg[...], lb[...])
    s_out_ref[...] = s2
    v_out_ref[0] = v2[0]
    v_out_ref[1] = v2[1]
    v_out_ref[2] = v2[2]


def _ff_kernel(s_ref, v_ref, *refs):
    """Feed-forward (2 GVPs) + residual + gvp.LayerNorm, fused."""
    gA = [r[...] for r in refs[0:7]]
    gB = [r[...] for r in refs[7:14]]
    lg, lb = refs[14][...], refs[15][...]
    s_out_ref, v_out_ref = refs[16], refs[17]
    s0 = s_ref[...]
    v0 = (v_ref[0], v_ref[1], v_ref[2])
    s, v = _gvp_core(s0, v0, *gA, "relu", "sigmoid")
    s, v = _gvp_core(s, v, *gB, None, None)
    s2, v2 = _ln_core(s0 + s, (v0[0] + v[0], v0[1] + v[1], v0[2] + v[2]), lg, lb)
    s_out_ref[...] = s2
    v_out_ref[0] = v2[0]
    v_out_ref[1] = v2[1]
    v_out_ref[2] = v2[2]


def _decoder_kernel(s_ref, fused_ref, v_ref, w1, w2, b, wh, wss, wsv, bs, out_ref):
    """W_decoder_in (Linear on cat([h_V_s, fused])) + W_out scalar-only GVP.

    TODO(synk): W_decoder_in is referenced in the reference forward() but never
    defined in __init__; implemented as Linear(node_h[0] + 256 -> node_h[0]).
    """
    sd = _mmb(s_ref[...], w1[...]) + _mmb(fused_ref[...], w2[...]) + b[...]
    v = (v_ref[0], v_ref[1], v_ref[2])
    out_ref[...] = _gvp_core_s(sd, v, wh[...], wss[...], wsv[...], bs[...], None)


# ----------------------------------------------------------------------------
# Generic row-tiled pallas_call wrapper
# ----------------------------------------------------------------------------
def _round_up(n, m):
    return ((n + m - 1) // m) * m


def _pad_axis(x, target, axis):
    pad = target - x.shape[axis]
    if pad <= 0:
        return x
    widths = [(0, 0)] * x.ndim
    widths[axis] = (0, pad)
    return jnp.pad(x, widths)


def _const_index_map(ndim):
    return lambda i: (0,) * ndim


def _row_pallas(kernel, rows, row_args, weight_args, out_defs):
    """Run `kernel` on a 1-D row grid with auto HBM<->VMEM pipelining.

    row_args:    list of (array, kind); kind "s" -> [rows, C],
                 kind "v" -> [3, rows, C] (component-major vector features).
    weight_args: grid-invariant arrays, given full-extent resident BlockSpecs.
    out_defs:    list of (kind, channels) describing the outputs.
    """
    tile = min(_MAX_TILE, _round_up(rows, 8))
    rows_p = _round_up(rows, tile)
    grid = (rows_p // tile,)

    in_specs, args = [], []
    for arr, kind in row_args:
        if kind == "s":
            arr = _pad_axis(arr, rows_p, 0)
            in_specs.append(pl.BlockSpec((tile, arr.shape[1]), lambda i: (i, 0)))
        else:
            arr = _pad_axis(arr, rows_p, 1)
            in_specs.append(pl.BlockSpec((3, tile, arr.shape[2]), lambda i: (0, i, 0)))
        args.append(arr)
    for w in weight_args:
        in_specs.append(pl.BlockSpec(w.shape, _const_index_map(w.ndim)))
        args.append(w)

    out_shapes, out_specs = [], []
    for kind, ch in out_defs:
        if kind == "s":
            out_shapes.append(jax.ShapeDtypeStruct((rows_p, ch), jnp.float32))
            out_specs.append(pl.BlockSpec((tile, ch), lambda i: (i, 0)))
        else:
            out_shapes.append(jax.ShapeDtypeStruct((3, rows_p, ch), jnp.float32))
            out_specs.append(pl.BlockSpec((3, tile, ch), lambda i: (0, i, 0)))

    single = len(out_defs) == 1
    outs = pl.pallas_call(
        kernel,
        grid=grid,
        in_specs=in_specs,
        out_specs=out_specs[0] if single else tuple(out_specs),
        out_shape=out_shapes[0] if single else tuple(out_shapes),
        compiler_params=pltpu.CompilerParams(
            dimension_semantics=("parallel",),
            vmem_limit_bytes=_VMEM_LIMIT),
    )(*args)
    if single:
        outs = (outs,)
    trimmed = []
    for o, (kind, _) in zip(outs, out_defs):
        trimmed.append(o[:rows] if kind == "s" else o[:, :rows])
    return trimmed


# ----------------------------------------------------------------------------
# Stage wrappers
# ----------------------------------------------------------------------------
_GVP_SV_KEYS = ("wh", "ws_s", "ws_v", "bs", "wv", "wg", "bg")
_GVP_S_KEYS = ("wh", "ws_s", "ws_v", "bs")


def _gvp_args(p, vector_out=True):
    keys = _GVP_SV_KEYS if vector_out else _GVP_S_KEYS
    return [p[k] for k in keys]


def embed_apply(p, s, v):
    gvp = p["gvp"]
    weights = _gvp_args(gvp) + [p["ln"]["g"], p["ln"]["b"]]
    s_out, v_out = _row_pallas(
        _embed_kernel, s.shape[0], [(s, "s"), (v, "v")], weights,
        [("s", gvp["ws_s"].shape[1]), ("v", gvp["wv"].shape[1])])
    return s_out, v_out


def seq_fusion_apply(p, s, esm, msa):
    weights = [p["we"], p["be"], p["wm"], p["bm"],
               p["wva"], p["bva"], p["woa"], p["boa"],
               p["fg1"], p["fg2"], p["fgb"]]
    (out,) = _row_pallas(_seq_fusion_kernel, s.shape[0],
                         [(s, "s"), (esm, "s"), (msa, "s")], weights,
                         [("s", s.shape[1])])
    return out


def message_apply(gvps, ms, mv):
    weights = []
    for gp in gvps:
        weights += _gvp_args(gp)
    s_out, v_out = _row_pallas(
        _message_kernel, ms.shape[0], [(ms, "s"), (mv, "v")], weights,
        [("s", gvps[-1]["ws_s"].shape[1]), ("v", gvps[-1]["wv"].shape[1])])
    return s_out, v_out


def res_ln_apply(lnp, s, ds, v, dv):
    s_out, v_out = _row_pallas(
        _res_ln_kernel, s.shape[0],
        [(s, "s"), (ds, "s"), (v, "v"), (dv, "v")],
        [lnp["g"], lnp["b"]],
        [("s", s.shape[1]), ("v", v.shape[2])])
    return s_out, v_out


def ff_apply(gvps, lnp, s, v):
    weights = _gvp_args(gvps[0]) + _gvp_args(gvps[1]) + [lnp["g"], lnp["b"]]
    s_out, v_out = _row_pallas(
        _ff_kernel, s.shape[0], [(s, "s"), (v, "v")], weights,
        [("s", s.shape[1]), ("v", v.shape[2])])
    return s_out, v_out


def decoder_apply(dec_p, out_p, s, fused, v):
    weights = [dec_p["w1"], dec_p["w2"], dec_p["b"]] + _gvp_args(out_p, vector_out=False)
    (logits,) = _row_pallas(
        _decoder_kernel, s.shape[0],
        [(s, "s"), (fused, "s"), (v, "v")], weights,
        [("s", out_p["ws_s"].shape[1])])
    return logits


# ----------------------------------------------------------------------------
# GVPConvLayer (message passing + feed-forward).  Gather / scatter-mean stays
# in plain JAX (data-dependent indexing); the GVP stacks run in fused kernels.
# ----------------------------------------------------------------------------
def gvp_conv_layer_apply(p, s, v, edge_index, es, ev):
    src, dst = edge_index[0], edge_index[1]
    n_nodes = s.shape[0]
    n_edges = es.shape[0]

    # message input: tuple_cat((s_j, v_j), edge_attr, (s_i, v_i))  (j=src, i=dst)
    ms = jnp.concatenate([s[src], es, s[dst]], axis=-1)                  # [E, 2ns+es]
    mv = jnp.concatenate([v[:, src], ev, v[:, dst]], axis=-1)            # [3, E, 2nv+ev]

    msg_s, msg_v = message_apply(p["msg"], ms, mv)                       # [E,ns], [3,E,nv]

    # mean aggregation at target nodes (torch_geometric aggr="mean")
    ones = jnp.ones((n_edges,), jnp.float32)
    cnt = jnp.maximum(jax.ops.segment_sum(ones, dst, num_segments=n_nodes), 1.0)
    dh_s = jax.ops.segment_sum(msg_s, dst, num_segments=n_nodes) / cnt[:, None]
    dh_v = jnp.zeros_like(v).at[:, dst, :].add(msg_v) / cnt[None, :, None]

    s1, v1 = res_ln_apply(p["ln0"], s, dh_s, v, dh_v)                    # residual + norm
    return ff_apply(p["ff"], p["ln1"], s1, v1)                           # ff + residual + norm


# ----------------------------------------------------------------------------
# Parameter initialization (deterministic, synthetic)
# ----------------------------------------------------------------------------
def _w(key, shape, scale=0.05, dtype=jnp.float32):
    return (scale * jax.random.normal(key, shape, jnp.float32)).astype(dtype)


def init_gvp(key, in_dims, out_dims):
    si, vi = in_dims
    so, vo = out_dims
    h = max(vi, vo) if vo else vi
    ks = jax.random.split(key, 5)
    # wide scalar-path weights in bf16 (MXU), tiny channel-mixing weights in f32
    p = {
        "wh": _w(ks[0], (vi, h)),
        "ws_s": _w(ks[1], (si, so), dtype=jnp.bfloat16),
        "ws_v": _w(ks[2], (h, so), dtype=jnp.bfloat16),
        "bs": jnp.zeros((1, so), jnp.float32),
    }
    if vo:
        p["wv"] = _w(ks[3], (h, vo))
        p["wg"] = _w(ks[4], (so, vo), dtype=jnp.bfloat16)
        p["bg"] = jnp.zeros((1, vo), jnp.float32)
    return p


def init_ln(ns):
    return {"g": jnp.ones((1, ns), jnp.float32), "b": jnp.zeros((1, ns), jnp.float32)}


def init_conv_layer(key, node_h, edge_h):
    ks = jax.random.split(key, 5)
    ns, nv = node_h
    es, ev = edge_h
    msg_in = (2 * ns + es, 2 * nv + ev)
    hid = (4 * ns, 2 * nv)
    return {
        "msg": [init_gvp(ks[0], msg_in, node_h),
                init_gvp(ks[1], node_h, node_h),
                init_gvp(ks[2], node_h, node_h)],
        "ff": [init_gvp(ks[3], node_h, hid),
               init_gvp(ks[4], hid, node_h)],
        "ln0": init_ln(ns),
        "ln1": init_ln(ns),
    }


def init_params(key, node_in, node_h, edge_in, edge_h, num_layers,
                esm_dim=1280, msa_dim=768, embed=256):
    keys = iter(jax.random.split(key, 64))
    bf = jnp.bfloat16
    p = {}
    p["W_v"] = {"gvp": init_gvp(next(keys), node_in, node_h), "ln": init_ln(node_h[0])}
    p["W_e"] = {"gvp": init_gvp(next(keys), edge_in, edge_h), "ln": init_ln(edge_h[0])}
    p["seq_fusion"] = {
        # FeatureProcessor (approximated, see TODO in kernel)
        "we": _w(next(keys), (esm_dim, embed), dtype=bf),
        "be": jnp.zeros((1, embed), jnp.float32),
        "wm": _w(next(keys), (msa_dim, embed), dtype=bf),
        "bm": jnp.zeros((1, embed), jnp.float32),
        # cross-attention: only value / output projections are live
        # (softmax over a single key == 1, q/k path removed)
        "wva": _w(next(keys), (embed, embed), dtype=bf),
        "bva": jnp.zeros((1, embed), jnp.float32),
        "woa": _w(next(keys), (embed, embed), dtype=bf),
        "boa": jnp.zeros((1, embed), jnp.float32),
        # fusion gate: Linear(cat([h_V_s, attn])) split into two matmuls
        "fg1": _w(next(keys), (embed, embed), dtype=bf),
        "fg2": _w(next(keys), (embed, embed), dtype=bf),
        "fgb": jnp.zeros((1, embed), jnp.float32),
    }
    p["encoder_layers"] = [init_conv_layer(next(keys), node_h, edge_h)
                           for _ in range(num_layers)]
    p["W_S"] = _w(next(keys), (21, 21), scale=1.0)
    p["W_decoder_in"] = {
        "w1": _w(next(keys), (node_h[0], node_h[0]), dtype=bf),
        "w2": _w(next(keys), (embed, node_h[0]), dtype=bf),
        "b": jnp.zeros((1, node_h[0]), jnp.float32),
    }
    p["W_out"] = init_gvp(next(keys), node_h, (20, 0))
    return p


# ----------------------------------------------------------------------------
# SSEmbGNN forward
# ----------------------------------------------------------------------------
def ssemb_forward(params, h_V, edge_index, h_E, seq, fused_feats, esm2_feats, msa_feats):
    s, v_in = h_V
    n_nodes = s.shape[0]
    # component-major vector layout: [N, 3, nv] -> [3, N, nv]
    v = jnp.transpose(v_in, (1, 0, 2))

    # h_V = W_v(h_V): GVP(None, None, vector_gate) + LayerNorm  (fused kernel)
    s, v = embed_apply(params["W_v"], s, v)
    struct_vector = v

    # fused_seq = feat_processor(esm2, msa); attn = cross_attn(s, fused_seq);
    # s = gate*s + (1-gate)*attn   (all fused in one kernel)
    s = seq_fusion_apply(params["seq_fusion"], s, esm2_feats, msa_feats)

    # h_E = W_e(h_E)
    es, ev_in = h_E
    ev = jnp.transpose(ev_in, (1, 0, 2))
    es, ev = embed_apply(params["W_e"], es, ev)

    # encoder GVPConv layers
    for lp in params["encoder_layers"]:
        s, v = gvp_conv_layer_apply(lp, s, v, edge_index, es, ev)

    fused = jnp.reshape(fused_feats, (n_nodes, -1))                      # [N, 256]

    # computed-but-unused quantities kept for fidelity with the reference forward
    _struct_vector_norm = jnp.mean(jnp.sqrt(jnp.sum(struct_vector ** 2, axis=0)), axis=-1)
    h_S = params["W_S"][seq][edge_index[0]]                              # [E, 21]
    _es_aug = jnp.concatenate([es, h_S], axis=-1)                        # unused downstream

    # logits = W_out((W_decoder_in(cat([h_V_s, fused])), h_V_v))  (fused kernel)
    return decoder_apply(params["W_decoder_in"], params["W_out"], s, fused, v)


# ----------------------------------------------------------------------------
if __name__ == "__main__":
    key = jax.random.PRNGKey(0)
    ks = jax.random.split(key, 10)

    N, E = 8, 16
    node_in, node_h = (6, 3), (256, 16)      # node_h scalar dim fixed to 256 by cross_attn
    edge_in, edge_h = (32, 1), (32, 1)
    num_layers = 2                           # small config (module default is 4)

    h_V = (jax.random.normal(ks[0], (N, node_in[0]), jnp.float32),
           jax.random.normal(ks[1], (N, 3, node_in[1]), jnp.float32))
    h_E = (jax.random.normal(ks[2], (E, edge_in[0]), jnp.float32),
           jax.random.normal(ks[3], (E, 3, edge_in[1]), jnp.float32))

    src = jnp.asarray([(i + 1) % N for i in range(N)] + [(i - 1) % N for i in range(N)],
                      dtype=jnp.int32)
    dst = jnp.asarray(list(range(N)) * 2, dtype=jnp.int32)
    edge_index = jnp.stack([src, dst], axis=0)                           # [2, E]

    seq = jax.random.randint(ks[4], (N,), 0, 21, dtype=jnp.int32)
    fused_feats = jax.random.normal(ks[5], (N, 1, 256), jnp.float32)
    esm2_feats = jax.random.normal(ks[6], (N, 1280), jnp.float32)
    msa_feats = jax.random.normal(ks[7], (N, 768), jnp.float32)

    params = init_params(ks[8], node_in, node_h, edge_in, edge_h, num_layers)

    fwd = jax.jit(ssemb_forward)
    logits = fwd(params, h_V, edge_index, h_E, seq, fused_feats, esm2_feats, msa_feats)
    logits = jax.block_until_ready(logits)

    assert logits.shape == (N, 20), logits.shape
    assert bool(jnp.all(jnp.isfinite(logits)))
    print("KERNEL_OK")
</pallas_src>

<mosaic_0001>
module attributes {stable_mosaic.version = 11 : i64} {
  func.func private @main(%arg0: i32) attributes {dimension_semantics = [#tpu.dimension_semantics<core_parallel>], iteration_bounds = array<i64: 2>, tpu.core_type = #tpu.core_type<sc_scalar_subcore>, window_params = []} {
    return
  }
}

module attributes {stable_mosaic.version = 11 : i64} {
  func.func private @main(%arg0: i32) attributes {dimension_semantics = [#tpu.dimension_semantics<core_parallel>], iteration_bounds = array<i64: 2>, tpu.core_type = #tpu.core_type<sc_scalar_subcore>, window_params = []} {
    return
  }
}

module attributes {stable_mosaic.version = 11 : i64} {
  func.func @_embed_kernel(%arg0: i32, %arg1: memref<8x6xf32, #tpu.memory_space<vmem>>, %arg2: memref<3x8x3xf32, #tpu.memory_space<vmem>>, %arg3: memref<3x16xf32, #tpu.memory_space<vmem>>, %arg4: memref<6x256xbf16, #tpu.memory_space<vmem>>, %arg5: memref<16x256xbf16, #tpu.memory_space<vmem>>, %arg6: memref<1x256xf32, #tpu.memory_space<vmem>>, %arg7: memref<16x16xf32, #tpu.memory_space<vmem>>, %arg8: memref<256x16xbf16, #tpu.memory_space<vmem>>, %arg9: memref<1x16xf32, #tpu.memory_space<vmem>>, %arg10: memref<1x256xf32, #tpu.memory_space<vmem>>, %arg11: memref<1x256xf32, #tpu.memory_space<vmem>>, %arg12: memref<8x256xf32, #tpu.memory_space<vmem>>, %arg13: memref<3x8x16xf32, #tpu.memory_space<vmem>>) attributes {dimension_semantics = [#tpu.dimension_semantics<parallel>], iteration_bounds = array<i64: 1>, scalar_prefetch = 0 : i64, scratch_operands = 0 : i64, tpu.core_type = #tpu.core_type<tc>, window_params = [{transform_indices = @transform_0, window_bounds = array<i64: 8, 6>}, {transform_indices = @transform_1, window_bounds = array<i64: 3, 8, 3>}, {pipeline_mode = #tpu.pipeline_mode<synchronous>, transform_indices = @transform_2, window_bounds = array<i64: 3, 16>}, {pipeline_mode = #tpu.pipeline_mode<synchronous>, transform_indices = @transform_3, window_bounds = array<i64: 6, 256>}, {pipeline_mode = #tpu.pipeline_mode<synchronous>, transform_indices = @transform_4, window_bounds = array<i64: 16, 256>}, {pipeline_mode = #tpu.pipeline_mode<synchronous>, transform_indices = @transform_5, window_bounds = array<i64: 1, 256>}, {pipeline_mode = #tpu.pipeline_mode<synchronous>, transform_indices = @transform_6, window_bounds = array<i64: 16, 16>}, {pipeline_mode = #tpu.pipeline_mode<synchronous>, transform_indices = @transform_7, window_bounds = array<i64: 256, 16>}, {pipeline_mode = #tpu.pipeline_mode<synchronous>, transform_indices = @transform_8, window_bounds = array<i64: 1, 16>}, {pipeline_mode = #tpu.pipeline_mode<synchronous>, transform_indices = @transform_9, window_bounds = array<i64: 1, 256>}, {pipeline_mode = #tpu.pipeline_mode<synchronous>, transform_indices = @transform_10, window_bounds = array<i64: 1, 256>}, {transform_indices = @transform_11, window_bounds = array<i64: 8, 256>}, {transform_indices = @transform_12, window_bounds = array<i64: 3, 8, 16>}]} {
    %c0 = arith.constant 0 : index
    %c0_0 = arith.constant 0 : index
    %0 = vector.load %arg1[%c0, %c0_0] : memref<8x6xf32, #tpu.memory_space<vmem>>, vector<8x6xf32>
    %c0_1 = arith.constant 0 : index
    %c0_2 = arith.constant 0 : index
    %c0_3 = arith.constant 0 : index
    %1 = vector.load %arg2[%c0_1, %c0_2, %c0_3] : memref<3x8x3xf32, #tpu.memory_space<vmem>>, vector<1x8x3xf32>
    %2 = vector.shape_cast %1 : vector<1x8x3xf32> to vector<8x3xf32>
    %c1 = arith.constant 1 : index
    %c0_4 = arith.constant 0 : index
    %c0_5 = arith.constant 0 : index
    %3 = vector.load %arg2[%c1, %c0_4, %c0_5] : memref<3x8x3xf32, #tpu.memory_space<vmem>>, vector<1x8x3xf32>
    %4 = vector.shape_cast %3 : vector<1x8x3xf32> to vector<8x3xf32>
    %c2 = arith.constant 2 : index
    %c0_6 = arith.constant 0 : index
    %c0_7 = arith.constant 0 : index
    %5 = vector.load %arg2[%c2, %c0_6, %c0_7] : memref<3x8x3xf32, #tpu.memory_space<vmem>>, vector<1x8x3xf32>
    %6 = vector.shape_cast %5 : vector<1x8x3xf32> to vector<8x3xf32>
    %c0_8 = arith.constant 0 : index
    %c0_9 = arith.constant 0 : index
    %7 = vector.load %arg3[%c0_8, %c0_9] : memref<3x16xf32, #tpu.memory_space<vmem>>, vector<3x16xf32>
    %c0_10 = arith.constant 0 : index
    %c0_11 = arith.constant 0 : index
    %8 = vector.load %arg4[%c0_10, %c0_11] : memref<6x256xbf16, #tpu.memory_space<vmem>>, vector<6x256xbf16>
    %c0_12 = arith.constant 0 : index
    %c0_13 = arith.constant 0 : index
    %9 = vector.load %arg5[%c0_12, %c0_13] : memref<16x256xbf16, #tpu.memory_space<vmem>>, vector<16x256xbf16>
    %c0_14 = arith.constant 0 : index
    %c0_15 = arith.constant 0 : index
    %10 = vector.load %arg6[%c0_14, %c0_15] : memref<1x256xf32, #tpu.memory_space<vmem>>, vector<1x256xf32>
    %c0_16 = arith.constant 0 : index
    %c0_17 = arith.constant 0 : index
    %11 = vector.load %arg7[%c0_16, %c0_17] : memref<16x16xf32, #tpu.memory_space<vmem>>, vector<16x16xf32>
    %c0_18 = arith.constant 0 : index
    %c0_19 = arith.constant 0 : index
    %12 = vector.load %arg8[%c0_18, %c0_19] : memref<256x16xbf16, #tpu.memory_space<vmem>>, vector<256x16xbf16>
    %c0_20 = arith.constant 0 : index
    %c0_21 = arith.constant 0 : index
    %13 = vector.load %arg9[%c0_20, %c0_21] : memref<1x16xf32, #tpu.memory_space<vmem>>, vector<1x16xf32>
    %cst = arith.constant dense<0.000000e+00> : vector<8x16xf32>
    %14 = tpu.matmul %2, %7, %cst {dimension_numbers = #tpu.dot_dimension_numbers<[1], [0], [0], [1], [0, 0, 1, 1], [], []>} : vector<8x3xf32>, vector<3x16xf32>, vector<8x16xf32> -> vector<8x16xf32>
    %cst_22 = arith.constant dense<0.000000e+00> : vector<8x16xf32>
    %15 = tpu.matmul %4, %7, %cst_22 {dimension_numbers = #tpu.dot_dimension_numbers<[1], [0], [0], [1], [0, 0, 1, 1], [], []>} : vector<8x3xf32>, vector<3x16xf32>, vector<8x16xf32> -> vector<8x16xf32>
    %cst_23 = arith.constant dense<0.000000e+00> : vector<8x16xf32>
    %16 = tpu.matmul %6, %7, %cst_23 {dimension_numbers = #tpu.dot_dimension_numbers<[1], [0], [0], [1], [0, 0, 1, 1], [], []>} : vector<8x3xf32>, vector<3x16xf32>, vector<8x16xf32> -> vector<8x16xf32>
    %17 = arith.mulf %14, %14 : vector<8x16xf32>
    %18 = arith.mulf %15, %15 : vector<8x16xf32>
    %19 = arith.addf %17, %18 : vector<8x16xf32>
    %20 = arith.mulf %16, %16 : vector<8x16xf32>
    %21 = arith.addf %19, %20 : vector<8x16xf32>
    %cst_24 = arith.constant 9.99999993E-9 : f32
    %22 = vector.broadcast %cst_24 : f32 to vector<8x16xf32>
    %23 = arith.maximumf %21, %22 : vector<8x16xf32>
    %24 = math.sqrt %23 : vector<8x16xf32>
    %25 = arith.truncf %0 : vector<8x6xf32> to vector<8x6xbf16>
    %cst_25 = arith.constant dense<0.000000e+00> : vector<8x256xf32>
    %26 = tpu.matmul %25, %8, %cst_25 {dimension_numbers = #tpu.dot_dimension_numbers<[1], [0], [0], [1], [0, 0, 1, 1], [], []>} : vector<8x6xbf16>, vector<6x256xbf16>, vector<8x256xf32> -> vector<8x256xf32>
    %27 = arith.truncf %24 : vector<8x16xf32> to vector<8x16xbf16>
    %cst_26 = arith.constant dense<0.000000e+00> : vector<8x256xf32>
    %28 = tpu.matmul %27, %9, %cst_26 {dimension_numbers = #tpu.dot_dimension_numbers<[1], [0], [0], [1], [0, 0, 1, 1], [], []>} : vector<8x16xbf16>, vector<16x256xbf16>, vector<8x256xf32> -> vector<8x256xf32>
    %29 = arith.addf %26, %28 : vector<8x256xf32>
    %30 = vector.broadcast %10 : vector<1x256xf32> to vector<8x256xf32>
    %31 = arith.addf %29, %30 : vector<8x256xf32>
    %cst_27 = arith.constant dense<0.000000e+00> : vector<8x16xf32>
    %32 = tpu.matmul %14, %11, %cst_27 {dimension_numbers = #tpu.dot_dimension_numbers<[1], [0], [0], [1], [0, 0, 1, 1], [], []>} : vector<8x16xf32>, vector<16x16xf32>, vector<8x16xf32> -> vector<8x16xf32>
    %cst_28 = arith.constant dense<0.000000e+00> : vector<8x16xf32>
    %33 = tpu.matmul %15, %11, %cst_28 {dimension_numbers = #tpu.dot_dimension_numbers<[1], [0], [0], [1], [0, 0, 1, 1], [], []>} : vector<8x16xf32>, vector<16x16xf32>, vector<8x16xf32> -> vector<8x16xf32>
    %cst_29 = arith.constant dense<0.000000e+00> : vector<8x16xf32>
    %34 = tpu.matmul %16, %11, %cst_29 {dimension_numbers = #tpu.dot_dimension_numbers<[1], [0], [0], [1], [0, 0, 1, 1], [], []>} : vector<8x16xf32>, vector<16x16xf32>, vector<8x16xf32> -> vector<8x16xf32>
    %35 = arith.truncf %31 : vector<8x256xf32> to vector<8x256xbf16>
    %cst_30 = arith.constant dense<0.000000e+00> : vector<8x16xf32>
    %36 = tpu.matmul %35, %12, %cst_30 {dimension_numbers = #tpu.dot_dimension_numbers<[1], [0], [0], [1], [0, 0, 1, 1], [], []>} : vector<8x256xbf16>, vector<256x16xbf16>, vector<8x16xf32> -> vector<8x16xf32>
    %37 = vector.broadcast %13 : vector<1x16xf32> to vector<8x16xf32>
    %38 = arith.addf %36, %37 : vector<8x16xf32>
    %39 = arith.negf %38 : vector<8x16xf32>
    %40 = math.exp %39 : vector<8x16xf32>
    %cst_31 = arith.constant 1.000000e+00 : f32
    %41 = vector.broadcast %cst_31 : f32 to vector<8x16xf32>
    %42 = arith.addf %41, %40 : vector<8x16xf32>
    %43 = arith.divf %41, %42 : vector<8x16xf32>
    %44 = arith.mulf %32, %43 : vector<8x16xf32>
    %45 = arith.mulf %33, %43 : vector<8x16xf32>
    %46 = arith.mulf %34, %43 : vector<8x16xf32>
    %c0_32 = arith.constant 0 : index
    %c0_33 = arith.constant 0 : index
    %47 = vector.load %arg10[%c0_32, %c0_33] : memref<1x256xf32, #tpu.memory_space<vmem>>, vector<1x256xf32>
    %c0_34 = arith.constant 0 : index
    %c0_35 = arith.constant 0 : index
    %48 = vector.load %arg11[%c0_34, %c0_35] : memref<1x256xf32, #tpu.memory_space<vmem>>, vector<1x256xf32>
    %cst_36 = arith.constant dense<0.000000e+00> : vector<8xf32>
    %49 = vector.multi_reduction <add>, %31, %cst_36 [1] : vector<8x256xf32> to vector<8xf32>
    %50 = vector.shape_cast %49 : vector<8xf32> to vector<8x1xf32>
    %cst_37 = arith.constant 2.560000e+02 : f32
    %51 = vector.broadcast %cst_37 : f32 to vector<8x1xf32>
    %52 = arith.divf %50, %51 : vector<8x1xf32>
    %53 = vector.broadcast %52 : vector<8x1xf32> to vector<8x256xf32>
    %54 = arith.subf %31, %53 : vector<8x256xf32>
    %55 = arith.mulf %54, %54 : vector<8x256xf32>
    %cst_38 = arith.constant dense<0.000000e+00> : vector<8xf32>
    %56 = vector.multi_reduction <add>, %55, %cst_38 [1] : vector<8x256xf32> to vector<8xf32>
    %57 = vector.shape_cast %56 : vector<8xf32> to vector<8x1xf32>
    %cst_39 = arith.constant 2.560000e+02 : f32
    %58 = vector.broadcast %cst_39 : f32 to vector<8x1xf32>
    %59 = arith.divf %57, %58 : vector<8x1xf32>
    %60 = vector.broadcast %52 : vector<8x1xf32> to vector<8x256xf32>
    %61 = arith.subf %31, %60 : vector<8x256xf32>
    %cst_40 = arith.constant 9.99999974E-6 : f32
    %62 = vector.broadcast %cst_40 : f32 to vector<8x1xf32>
    %63 = arith.addf %59, %62 : vector<8x1xf32>
    %64 = math.rsqrt %63 : vector<8x1xf32>
    %65 = vector.broadcast %64 : vector<8x1xf32> to vector<8x256xf32>
    %66 = arith.mulf %61, %65 : vector<8x256xf32>
    %67 = vector.broadcast %47 : vector<1x256xf32> to vector<8x256xf32>
    %68 = arith.mulf %66, %67 : vector<8x256xf32>
    %69 = vector.broadcast %48 : vector<1x256xf32> to vector<8x256xf32>
    %70 = arith.addf %68, %69 : vector<8x256xf32>
    %71 = arith.mulf %44, %44 : vector<8x16xf32>
    %72 = arith.mulf %45, %45 : vector<8x16xf32>
    %73 = arith.addf %71, %72 : vector<8x16xf32>
    %74 = arith.mulf %46, %46 : vector<8x16xf32>
    %75 = arith.addf %73, %74 : vector<8x16xf32>
    %cst_41 = arith.constant 9.99999993E-9 : f32
    %76 = vector.broadcast %cst_41 : f32 to vector<8x16xf32>
    %77 = arith.maximumf %75, %76 : vector<8x16xf32>
    %cst_42 = arith.constant dense<0.000000e+00> : vector<8xf32>
    %78 = vector.multi_reduction <add>, %77, %cst_42 [1] : vector<8x16xf32> to vector<8xf32>
    %79 = vector.shape_cast %78 : vector<8xf32> to vector<8x1xf32>
    %cst_43 = arith.constant 1.600000e+01 : f32
    %80 = vector.broadcast %cst_43 : f32 to vector<8x1xf32>
    %81 = arith.divf %79, %80 : vector<8x1xf32>
    %82 = math.sqrt %81 : vector<8x1xf32>
    %83 = vector.broadcast %82 : vector<8x1xf32> to vector<8x16xf32>
    %84 = arith.divf %44, %83 : vector<8x16xf32>
    %85 = vector.broadcast %82 : vector<8x1xf32> to vector<8x16xf32>
    %86 = arith.divf %45, %85 : vector<8x16xf32>
    %87 = vector.broadcast %82 : vector<8x1xf32> to vector<8x16xf32>
    %88 = arith.divf %46, %87 : vector<8x16xf32>
    %c0_44 = arith.constant 0 : index
    %c0_45 = arith.constant 0 : index
    %89 = vector.load %arg12[%c0_44, %c0_45] : memref<8x256xf32, #tpu.memory_space<vmem>>, vector<8x256xf32>
    tpu.vector_store %arg12[%c0_44, %c0_45], %70 {strides = array<i32>} : memref<8x256xf32, #tpu.memory_space<vmem>>, vector<8x256xf32>,
    %c0_46 = arith.constant 0 : index
    %c0_47 = arith.constant 0 : index
    %c0_48 = arith.constant 0 : index
    %90 = vector.load %arg13[%c0_46, %c0_47, %c0_48] : memref<3x8x16xf32, #tpu.memory_space<vmem>>, vector<1x8x16xf32>
    %91 = vector.shape_cast %90 : vector<1x8x16xf32> to vector<8x16xf32>
    %92 = vector.shape_cast %84 : vector<8x16xf32> to vector<1x8x16xf32>
    tpu.vector_store %arg13[%c0_46, %c0_47, %c0_48], %92 {strides = array<i32>} : memref<3x8x16xf32, #tpu.memory_space<vmem>>, vector<1x8x16xf32>,
    %c1_49 = arith.constant 1 : index
    %c0_50 = arith.constant 0 : index
    %c0_51 = arith.constant 0 : index
    %93 = vector.load %arg13[%c1_49, %c0_50, %c0_51] : memref<3x8x16xf32, #tpu.memory_space<vmem>>, vector<1x8x16xf32>
    %94 = vector.shape_cast %93 : vector<1x8x16xf32> to vector<8x16xf32>
    %95 = vector.shape_cast %86 : vector<8x16xf32> to vector<1x8x16xf32>
    tpu.vector_store %arg13[%c1_49, %c0_50, %c0_51], %95 {strides = array<i32>} : memref<3x8x16xf32, #tpu.memory_space<vmem>>, vector<1x8x16xf32>,
    %c2_52 = arith.constant 2 : index
    %c0_53 = arith.constant 0 : index
    %c0_54 = arith.constant 0 : index
    %96 = vector.load %arg13[%c2_52, %c0_53, %c0_54] : memref<3x8x16xf32, #tpu.memory_space<vmem>>, vector<1x8x16xf32>
    %97 = vector.shape_cast %96 : vector<1x8x16xf32> to vector<8x16xf32>
    %98 = vector.shape_cast %88 : vector<8x16xf32> to vector<1x8x16xf32>
    tpu.vector_store %arg13[%c2_52, %c0_53, %c0_54], %98 {strides = array<i32>} : memref<3x8x16xf32, #tpu.memory_space<vmem>>, vector<1x8x16xf32>,
    return
  }
  func.func @transform_0(%arg0: i32) -> (i32, i32) {
    %c0_i32 = arith.constant 0 : i32
    %c0_i32_0 = arith.constant 0 : i32
    return %arg0, %c0_i32 : i32, i32
  }
  func.func @transform_1(%arg0: i32) -> (i32, i32, i32) {
    %c0_i32 = arith.constant 0 : i32
    %c0_i32_0 = arith.constant 0 : i32
    %c0_i32_1 = arith.constant 0 : i32
    return %c0_i32, %arg0, %c0_i32_0 : i32, i32, i32
  }
  func.func @transform_2(%arg0: i32) -> (i32, i32) {
    %c0_i32 = arith.constant 0 : i32
    %c0_i32_0 = arith.constant 0 : i32
    %c0_i32_1 = arith.constant 0 : i32
    return %c0_i32, %c0_i32_0 : i32, i32
  }
  func.func @transform_3(%arg0: i32) -> (i32, i32) {
    %c0_i32 = arith.constant 0 : i32
    %c0_i32_0 = arith.constant 0 : i32
    %c0_i32_1 = arith.constant 0 : i32
    return %c0_i32, %c0_i32_0 : i32, i32
  }
  func.func @transform_4(%arg0: i32) -> (i32, i32) {
    %c0_i32 = arith.constant 0 : i32
    %c0_i32_0 = arith.constant 0 : i32
    %c0_i32_1 = arith.constant 0 : i32
    return %c0_i32, %c0_i32_0 : i32, i32
  }
  func.func @transform_5(%arg0: i32) -> (i32, i32) {
    %c0_i32 = arith.constant 0 : i32
    %c0_i32_0 = arith.constant 0 : i32
    %c0_i32_1 = arith.constant 0 : i32
    return %c0_i32, %c0_i32_0 : i32, i32
  }
  func.func @transform_6(%arg0: i32) -> (i32, i32) {
    %c0_i32 = arith.constant 0 : i32
    %c0_i32_0 = arith.constant 0 : i32
    %c0_i32_1 = arith.constant 0 : i32
    return %c0_i32, %c0_i32_0 : i32, i32
  }
  func.func @transform_7(%arg0: i32) -> (i32, i32) {
    %c0_i32 = arith.constant 0 : i32
    %c0_i32_0 = arith.constant 0 : i32
    %c0_i32_1 = arith.constant 0 : i32
    return %c0_i32, %c0_i32_0 : i32, i32
  }
  func.func @transform_8(%arg0: i32) -> (i32, i32) {
    %c0_i32 = arith.constant 0 : i32
    %c0_i32_0 = arith.constant 0 : i32
    %c0_i32_1 = arith.constant 0 : i32
    return %c0_i32, %c0_i32_0 : i32, i32
  }
  func.func @transform_9(%arg0: i32) -> (i32, i32) {
    %c0_i32 = arith.constant 0 : i32
    %c0_i32_0 = arith.constant 0 : i32
    %c0_i32_1 = arith.constant 0 : i32
    return %c0_i32, %c0_i32_0 : i32, i32
  }
  func.func @transform_10(%arg0: i32) -> (i32, i32) {
    %c0_i32 = arith.constant 0 : i32
    %c0_i32_0 = arith.constant 0 : i32
    %c0_i32_1 = arith.constant 0 : i32
    return %c0_i32, %c0_i32_0 : i32, i32
  }
  func.func @transform_11(%arg0: i32) -> (i32, i32) {
    %c0_i32 = arith.constant 0 : i32
    %c0_i32_0 = arith.constant 0 : i32
    return %arg0, %c0_i32 : i32, i32
  }
  func.func @transform_12(%arg0: i32) -> (i32, i32, i32) {
    %c0_i32 = arith.constant 0 : i32
    %c0_i32_0 = arith.constant 0 : i32
    %c0_i32_1 = arith.constant 0 : i32
    return %c0_i32, %arg0, %c0_i32_0 : i32, i32, i32
  }
}

module attributes {stable_mosaic.version = 11 : i64} {
  func.func @_seq_fusion_kernel(%arg0: i32, %arg1: memref<8x256xf32, #tpu.memory_space<vmem>>, %arg2: memref<8x1280xf32, #tpu.memory_space<vmem>>, %arg3: memref<8x768xf32, #tpu.memory_space<vmem>>, %arg4: memref<1280x256xbf16, #tpu.memory_space<vmem>>, %arg5: memref<1x256xf32, #tpu.memory_space<vmem>>, %arg6: memref<768x256xbf16, #tpu.memory_space<vmem>>, %arg7: memref<1x256xf32, #tpu.memory_space<vmem>>, %arg8: memref<256x256xbf16, #tpu.memory_space<vmem>>, %arg9: memref<1x256xf32, #tpu.memory_space<vmem>>, %arg10: memref<256x256xbf16, #tpu.memory_space<vmem>>, %arg11: memref<1x256xf32, #tpu.memory_space<vmem>>, %arg12: memref<256x256xbf16, #tpu.memory_space<vmem>>, %arg13: memref<256x256xbf16, #tpu.memory_space<vmem>>, %arg14: memref<1x256xf32, #tpu.memory_space<vmem>>, %arg15: memref<8x256xf32, #tpu.memory_space<vmem>>) attributes {dimension_semantics = [#tpu.dimension_semantics<parallel>], iteration_bounds = array<i64: 1>, scalar_prefetch = 0 : i64, scratch_operands = 0 : i64, tpu.core_type = #tpu.core_type<tc>, window_params = [{transform_indices = @transform_0, window_bounds = array<i64: 8, 256>}, {transform_indices = @transform_1, window_bounds = array<i64: 8, 1280>}, {transform_indices = @transform_2, window_bounds = array<i64: 8, 768>}, {pipeline_mode = #tpu.pipeline_mode<synchronous>, transform_indices = @transform_3, window_bounds = array<i64: 1280, 256>}, {pipeline_mode = #tpu.pipeline_mode<synchronous>, transform_indices = @transform_4, window_bounds = array<i64: 1, 256>}, {pipeline_mode = #tpu.pipeline_mode<synchronous>, transform_indices = @transform_5, window_bounds = array<i64: 768, 256>}, {pipeline_mode = #tpu.pipeline_mode<synchronous>, transform_indices = @transform_6, window_bounds = array<i64: 1, 256>}, {pipeline_mode = #tpu.pipeline_mode<synchronous>, transform_indices = @transform_7, window_bounds = array<i64: 256, 256>}, {pipeline_mode = #tpu.pipeline_mode<synchronous>, transform_indices = @transform_8, window_bounds = array<i64: 1, 256>}, {pipeline_mode = #tpu.pipeline_mode<synchronous>, transform_indices = @transform_9, window_bounds = array<i64: 256, 256>}, {pipeline_mode = #tpu.pipeline_mode<synchronous>, transform_indices = @transform_10, window_bounds = array<i64: 1, 256>}, {pipeline_mode = #tpu.pipeline_mode<synchronous>, transform_indices = @transform_11, window_bounds = array<i64: 256, 256>}, {pipeline_mode = #tpu.pipeline_mode<synchronous>, transform_indices = @transform_12, window_bounds = array<i64: 256, 256>}, {pipeline_mode = #tpu.pipeline_mode<synchronous>, transform_indices = @transform_13, window_bounds = array<i64: 1, 256>}, {transform_indices = @transform_14, window_bounds = array<i64: 8, 256>}]} {
    %c0 = arith.constant 0 : index
    %c0_0 = arith.constant 0 : index
    %0 = vector.load %arg1[%c0, %c0_0] : memref<8x256xf32, #tpu.memory_space<vmem>>, vector<8x256xf32>
    %c0_1 = arith.constant 0 : index
    %c0_2 = arith.constant 0 : index
    %1 = vector.load %arg2[%c0_1, %c0_2] : memref<8x1280xf32, #tpu.memory_space<vmem>>, vector<8x1280xf32>
    %c0_3 = arith.constant 0 : index
    %c0_4 = arith.constant 0 : index
    %2 = vector.load %arg4[%c0_3, %c0_4] : memref<1280x256xbf16, #tpu.memory_space<vmem>>, vector<1280x256xbf16>
    %3 = arith.truncf %1 : vector<8x1280xf32> to vector<8x1280xbf16>
    %cst = arith.constant dense<0.000000e+00> : vector<8x256xf32>
    %4 = tpu.matmul %3, %2, %cst {dimension_numbers = #tpu.dot_dimension_numbers<[1], [0], [0], [1], [0, 0, 1, 1], [], []>} : vector<8x1280xbf16>, vector<1280x256xbf16>, vector<8x256xf32> -> vector<8x256xf32>
    %c0_5 = arith.constant 0 : index
    %c0_6 = arith.constant 0 : index
    %5 = vector.load %arg5[%c0_5, %c0_6] : memref<1x256xf32, #tpu.memory_space<vmem>>, vector<1x256xf32>
    %6 = vector.broadcast %5 : vector<1x256xf32> to vector<8x256xf32>
    %7 = arith.addf %4, %6 : vector<8x256xf32>
    %cst_7 = arith.constant 0.000000e+00 : f32
    %8 = vector.broadcast %cst_7 : f32 to vector<8x256xf32>
    %9 = arith.maximumf %7, %8 : vector<8x256xf32>
    %c0_8 = arith.constant 0 : index
    %c0_9 = arith.constant 0 : index
    %10 = vector.load %arg3[%c0_8, %c0_9] : memref<8x768xf32, #tpu.memory_space<vmem>>, vector<8x768xf32>
    %c0_10 = arith.constant 0 : index
    %c0_11 = arith.constant 0 : index
    %11 = vector.load %arg6[%c0_10, %c0_11] : memref<768x256xbf16, #tpu.memory_space<vmem>>, vector<768x256xbf16>
    %12 = arith.truncf %10 : vector<8x768xf32> to vector<8x768xbf16>
    %cst_12 = arith.constant dense<0.000000e+00> : vector<8x256xf32>
    %13 = tpu.matmul %12, %11, %cst_12 {dimension_numbers = #tpu.dot_dimension_numbers<[1], [0], [0], [1], [0, 0, 1, 1], [], []>} : vector<8x768xbf16>, vector<768x256xbf16>, vector<8x256xf32> -> vector<8x256xf32>
    %c0_13 = arith.constant 0 : index
    %c0_14 = arith.constant 0 : index
    %14 = vector.load %arg7[%c0_13, %c0_14] : memref<1x256xf32, #tpu.memory_space<vmem>>, vector<1x256xf32>
    %15 = vector.broadcast %14 : vector<1x256xf32> to vector<8x256xf32>
    %16 = arith.addf %13, %15 : vector<8x256xf32>
    %cst_15 = arith.constant 0.000000e+00 : f32
    %17 = vector.broadcast %cst_15 : f32 to vector<8x256xf32>
    %18 = arith.maximumf %16, %17 : vector<8x256xf32>
    %19 = arith.addf %9, %18 : vector<8x256xf32>
    %c0_16 = arith.constant 0 : index
    %c0_17 = arith.constant 0 : index
    %20 = vector.load %arg8[%c0_16, %c0_17] : memref<256x256xbf16, #tpu.memory_space<vmem>>, vector<256x256xbf16>
    %21 = arith.truncf %19 : vector<8x256xf32> to vector<8x256xbf16>
    %cst_18 = arith.constant dense<0.000000e+00> : vector<8x256xf32>
    %22 = tpu.matmul %21, %20, %cst_18 {dimension_numbers = #tpu.dot_dimension_numbers<[1], [0], [0], [1], [0, 0, 1, 1], [], []>} : vector<8x256xbf16>, vector<256x256xbf16>, vector<8x256xf32> -> vector<8x256xf32>
    %c0_19 = arith.constant 0 : index
    %c0_20 = arith.constant 0 : index
    %23 = vector.load %arg9[%c0_19, %c0_20] : memref<1x256xf32, #tpu.memory_space<vmem>>, vector<1x256xf32>
    %24 = vector.broadcast %23 : vector<1x256xf32> to vector<8x256xf32>
    %25 = arith.addf %22, %24 : vector<8x256xf32>
    %c0_21 = arith.constant 0 : index
    %c0_22 = arith.constant 0 : index
    %26 = vector.load %arg10[%c0_21, %c0_22] : memref<256x256xbf16, #tpu.memory_space<vmem>>, vector<256x256xbf16>
    %27 = arith.truncf %25 : vector<8x256xf32> to vector<8x256xbf16>
    %cst_23 = arith.constant dense<0.000000e+00> : vector<8x256xf32>
    %28 = tpu.matmul %27, %26, %cst_23 {dimension_numbers = #tpu.dot_dimension_numbers<[1], [0], [0], [1], [0, 0, 1, 1], [], []>} : vector<8x256xbf16>, vector<256x256xbf16>, vector<8x256xf32> -> vector<8x256xf32>
    %c0_24 = arith.constant 0 : index
    %c0_25 = arith.constant 0 : index
    %29 = vector.load %arg11[%c0_24, %c0_25] : memref<1x256xf32, #tpu.memory_space<vmem>>, vector<1x256xf32>
    %30 = vector.broadcast %29 : vector<1x256xf32> to vector<8x256xf32>
    %31 = arith.addf %28, %30 : vector<8x256xf32>
    %c0_26 = arith.constant 0 : index
    %c0_27 = arith.constant 0 : index
    %32 = vector.load %arg12[%c0_26, %c0_27] : memref<256x256xbf16, #tpu.memory_space<vmem>>, vector<256x256xbf16>
    %33 = arith.truncf %0 : vector<8x256xf32> to vector<8x256xbf16>
    %cst_28 = arith.constant dense<0.000000e+00> : vector<8x256xf32>
    %34 = tpu.matmul %33, %32, %cst_28 {dimension_numbers = #tpu.dot_dimension_numbers<[1], [0], [0], [1], [0, 0, 1, 1], [], []>} : vector<8x256xbf16>, vector<256x256xbf16>, vector<8x256xf32> -> vector<8x256xf32>
    %c0_29 = arith.constant 0 : index
    %c0_30 = arith.constant 0 : index
    %35 = vector.load %arg13[%c0_29, %c0_30] : memref<256x256xbf16, #tpu.memory_space<vmem>>, vector<256x256xbf16>
    %36 = arith.truncf %31 : vector<8x256xf32> to vector<8x256xbf16>
    %cst_31 = arith.constant dense<0.000000e+00> : vector<8x256xf32>
    %37 = tpu.matmul %36, %35, %cst_31 {dimension_numbers = #tpu.dot_dimension_numbers<[1], [0], [0], [1], [0, 0, 1, 1], [], []>} : vector<8x256xbf16>, vector<256x256xbf16>, vector<8x256xf32> -> vector<8x256xf32>
    %38 = arith.addf %34, %37 : vector<8x256xf32>
    %c0_32 = arith.constant 0 : index
    %c0_33 = arith.constant 0 : index
    %39 = vector.load %arg14[%c0_32, %c0_33] : memref<1x256xf32, #tpu.memory_space<vmem>>, vector<1x256xf32>
    %40 = vector.broadcast %39 : vector<1x256xf32> to vector<8x256xf32>
    %41 = arith.addf %38, %40 : vector<8x256xf32>
    %42 = arith.negf %41 : vector<8x256xf32>
    %43 = math.exp %42 : vector<8x256xf32>
    %cst_34 = arith.constant 1.000000e+00 : f32
    %44 = vector.broadcast %cst_34 : f32 to vector<8x256xf32>
    %45 = arith.addf %44, %43 : vector<8x256xf32>
    %46 = arith.divf %44, %45 : vector<8x256xf32>
    %47 = arith.mulf %46, %0 : vector<8x256xf32>
    %cst_35 = arith.constant 1.000000e+00 : f32
    %48 = vector.broadcast %cst_35 : f32 to vector<8x256xf32>
    %49 = arith.subf %48, %46 : vector<8x256xf32>
    %50 = arith.mulf %49, %31 : vector<8x256xf32>
    %51 = arith.addf %47, %50 : vector<8x256xf32>
    %c0_36 = arith.constant 0 : index
    %c0_37 = arith.constant 0 : index
    %52 = vector.load %arg15[%c0_36, %c0_37] : memref<8x256xf32, #tpu.memory_space<vmem>>, vector<8x256xf32>
    tpu.vector_store %arg15[%c0_36, %c0_37], %51 {strides = array<i32>} : memref<8x256xf32, #tpu.memory_space<vmem>>, vector<8x256xf32>,
    return
  }
  func.func @transform_0(%arg0: i32) -> (i32, i32) {
    %c0_i32 = arith.constant 0 : i32
    %c0_i32_0 = arith.constant 0 : i32
    return %arg0, %c0_i32 : i32, i32
  }
  func.func @transform_1(%arg0: i32) -> (i32, i32) {
    %c0_i32 = arith.constant 0 : i32
    %c0_i32_0 = arith.constant 0 : i32
    return %arg0, %c0_i32 : i32, i32
  }
  func.func @transform_2(%arg0: i32) -> (i32, i32) {
    %c0_i32 = arith.constant 0 : i32
    %c0_i32_0 = arith.constant 0 : i32
    return %arg0, %c0_i32 : i32, i32
  }
  func.func @transform_3(%arg0: i32) -> (i32, i32) {
    %c0_i32 = arith.constant 0 : i32
    %c0_i32_0 = arith.constant 0 : i32
    %c0_i32_1 = arith.constant 0 : i32
    return %c0_i32, %c0_i32_0 : i32, i32
  }
  func.func @transform_4(%arg0: i32) -> (i32, i32) {
    %c0_i32 = arith.constant 0 : i32
    %c0_i32_0 = arith.constant 0 : i32
    %c0_i32_1 = arith.constant 0 : i32
    return %c0_i32, %c0_i32_0 : i32, i32
  }
  func.func @transform_5(%arg0: i32) -> (i32, i32) {
    %c0_i32 = arith.constant 0 : i32
    %c0_i32_0 = arith.constant 0 : i32
    %c0_i32_1 = arith.constant 0 : i32
    return %c0_i32, %c0_i32_0 : i32, i32
  }
  func.func @transform_6(%arg0: i32) -> (i32, i32) {
    %c0_i32 = arith.constant 0 : i32
    %c0_i32_0 = arith.constant 0 : i32
    %c0_i32_1 = arith.constant 0 : i32
    return %c0_i32, %c0_i32_0 : i32, i32
  }
  func.func @transform_7(%arg0: i32) -> (i32, i32) {
    %c0_i32 = arith.constant 0 : i32
    %c0_i32_0 = arith.constant 0 : i32
    %c0_i32_1 = arith.constant 0 : i32
    return %c0_i32, %c0_i32_0 : i32, i32
  }
  func.func @transform_8(%arg0: i32) -> (i32, i32) {
    %c0_i32 = arith.constant 0 : i32
    %c0_i32_0 = arith.constant 0 : i32
    %c0_i32_1 = arith.constant 0 : i32
    return %c0_i32, %c0_i32_0 : i32, i32
  }
  func.func @transform_9(%arg0: i32) -> (i32, i32) {
    %c0_i32 = arith.constant 0 : i32
    %c0_i32_0 = arith.constant 0 : i32
    %c0_i32_1 = arith.constant 0 : i32
    return %c0_i32, %c0_i32_0 : i32, i32
  }
  func.func @transform_10(%arg0: i32) -> (i32, i32) {
    %c0_i32 = arith.constant 0 : i32
    %c0_i32_0 = arith.constant 0 : i32
    %c0_i32_1 = arith.constant 0 : i32
    return %c0_i32, %c0_i32_0 : i32, i32
  }
  func.func @transform_11(%arg0: i32) -> (i32, i32) {
    %c0_i32 = arith.constant 0 : i32
    %c0_i32_0 = arith.constant 0 : i32
    %c0_i32_1 = arith.constant 0 : i32
    return %c0_i32, %c0_i32_0 : i32, i32
  }
  func.func @transform_12(%arg0: i32) -> (i32, i32) {
    %c0_i32 = arith.constant 0 : i32
    %c0_i32_0 = arith.constant 0 : i32
    %c0_i32_1 = arith.constant 0 : i32
    return %c0_i32, %c0_i32_0 : i32, i32
  }
  func.func @transform_13(%arg0: i32) -> (i32, i32) {
    %c0_i32 = arith.constant 0 : i32
    %c0_i32_0 = arith.constant 0 : i32
    %c0_i32_1 = arith.constant 0 : i32
    return %c0_i32, %c0_i32_0 : i32, i32
  }
  func.func @transform_14(%arg0: i32) -> (i32, i32) {
    %c0_i32 = arith.constant 0 : i32
    %c0_i32_0 = arith.constant 0 : i32
    return %arg0, %c0_i32 : i32, i32
  }
}

module attributes {stable_mosaic.version = 11 : i64} {
  func.func @_embed_kernel(%arg0: i32, %arg1: memref<16x32xf32, #tpu.memory_space<vmem>>, %arg2: memref<3x16x1xf32, #tpu.memory_space<vmem>>, %arg3: memref<1x1xf32, #tpu.memory_space<vmem>>, %arg4: memref<32x32xbf16, #tpu.memory_space<vmem>>, %arg5: memref<1x32xbf16, #tpu.memory_space<vmem>>, %arg6: memref<1x32xf32, #tpu.memory_space<vmem>>, %arg7: memref<1x1xf32, #tpu.memory_space<vmem>>, %arg8: memref<32x1xbf16, #tpu.memory_space<vmem>>, %arg9: memref<1x1xf32, #tpu.memory_space<vmem>>, %arg10: memref<1x32xf32, #tpu.memory_space<vmem>>, %arg11: memref<1x32xf32, #tpu.memory_space<vmem>>, %arg12: memref<16x32xf32, #tpu.memory_space<vmem>>, %arg13: memref<3x16x1xf32, #tpu.memory_space<vmem>>) attributes {dimension_semantics = [#tpu.dimension_semantics<parallel>], iteration_bounds = array<i64: 1>, scalar_prefetch = 0 : i64, scratch_operands = 0 : i64, tpu.core_type = #tpu.core_type<tc>, window_params = [{transform_indices = @transform_0, window_bounds = array<i64: 16, 32>}, {transform_indices = @transform_1, window_bounds = array<i64: 3, 16, 1>}, {pipeline_mode = #tpu.pipeline_mode<synchronous>, transform_indices = @transform_2, window_bounds = array<i64: 1, 1>}, {pipeline_mode = #tpu.pipeline_mode<synchronous>, transform_indices = @transform_3, window_bounds = array<i64: 32, 32>}, {pipeline_mode = #tpu.pipeline_mode<synchronous>, transform_indices = @transform_4, window_bounds = array<i64: 1, 32>}, {pipeline_mode = #tpu.pipeline_mode<synchronous>, transform_indices = @transform_5, window_bounds = array<i64: 1, 32>}, {pipeline_mode = #tpu.pipeline_mode<synchronous>, transform_indices = @transform_6, window_bounds = array<i64: 1, 1>}, {pipeline_mode = #tpu.pipeline_mode<synchronous>, transform_indices = @transform_7, window_bounds = array<i64: 32, 1>}, {pipeline_mode = #tpu.pipeline_mode<synchronous>, transform_indices = @transform_8, window_bounds = array<i64: 1, 1>}, {pipeline_mode = #tpu.pipeline_mode<synchronous>, transform_indices = @transform_9, window_bounds = array<i64: 1, 32>}, {pipeline_mode = #tpu.pipeline_mode<synchronous>, transform_indices = @transform_10, window_bounds = array<i64: 1, 32>}, {transform_indices = @transform_11, window_bounds = array<i64: 16, 32>}, {transform_indices = @transform_12, window_bounds = array<i64: 3, 16, 1>}]} {
    %c0 = arith.constant 0 : index
    %c0_0 = arith.constant 0 : index
    %0 = vector.load %arg1[%c0, %c0_0] : memref<16x32xf32, #tpu.memory_space<vmem>>, vector<16x32xf32>
    %c0_1 = arith.constant 0 : index
    %c0_2 = arith.constant 0 : index
    %c0_3 = arith.constant 0 : index
    %1 = vector.load %arg2[%c0_1, %c0_2, %c0_3] : memref<3x16x1xf32, #tpu.memory_space<vmem>>, vector<1x16x1xf32>
    %2 = vector.shape_cast %1 : vector<1x16x1xf32> to vector<16x1xf32>
    %c1 = arith.constant 1 : index
    %c0_4 = arith.constant 0 : index
    %c0_5 = arith.constant 0 : index
    %3 = vector.load %arg2[%c1, %c0_4, %c0_5] : memref<3x16x1xf32, #tpu.memory_space<vmem>>, vector<1x16x1xf32>
    %4 = vector.shape_cast %3 : vector<1x16x1xf32> to vector<16x1xf32>
    %c2 = arith.constant 2 : index
    %c0_6 = arith.constant 0 : index
    %c0_7 = arith.constant 0 : index
    %5 = vector.load %arg2[%c2, %c0_6, %c0_7] : memref<3x16x1xf32, #tpu.memory_space<vmem>>, vector<1x16x1xf32>
    %6 = vector.shape_cast %5 : vector<1x16x1xf32> to vector<16x1xf32>
    %c0_8 = arith.constant 0 : index
    %c0_9 = arith.constant 0 : index
    %7 = vector.load %arg3[%c0_8, %c0_9] : memref<1x1xf32, #tpu.memory_space<vmem>>, vector<1x1xf32>
    %c0_10 = arith.constant 0 : index
    %c0_11 = arith.constant 0 : index
    %8 = vector.load %arg4[%c0_10, %c0_11] : memref<32x32xbf16, #tpu.memory_space<vmem>>, vector<32x32xbf16>
    %c0_12 = arith.constant 0 : index
    %c0_13 = arith.constant 0 : index
    %9 = vector.load %arg5[%c0_12, %c0_13] : memref<1x32xbf16, #tpu.memory_space<vmem>>, vector<1x32xbf16>
    %c0_14 = arith.constant 0 : index
    %c0_15 = arith.constant 0 : index
    %10 = vector.load %arg6[%c0_14, %c0_15] : memref<1x32xf32, #tpu.memory_space<vmem>>, vector<1x32xf32>
    %c0_16 = arith.constant 0 : index
    %c0_17 = arith.constant 0 : index
    %11 = vector.load %arg7[%c0_16, %c0_17] : memref<1x1xf32, #tpu.memory_space<vmem>>, vector<1x1xf32>
    %c0_18 = arith.constant 0 : index
    %c0_19 = arith.constant 0 : index
    %12 = vector.load %arg8[%c0_18, %c0_19] : memref<32x1xbf16, #tpu.memory_space<vmem>>, vector<32x1xbf16>
    %c0_20 = arith.constant 0 : index
    %c0_21 = arith.constant 0 : index
    %13 = vector.load %arg9[%c0_20, %c0_21] : memref<1x1xf32, #tpu.memory_space<vmem>>, vector<1x1xf32>
    %cst = arith.constant dense<0.000000e+00> : vector<16x1xf32>
    %14 = tpu.matmul %2, %7, %cst {dimension_numbers = #tpu.dot_dimension_numbers<[1], [0], [0], [1], [0, 0, 1, 1], [], []>} : vector<16x1xf32>, vector<1x1xf32>, vector<16x1xf32> -> vector<16x1xf32>
    %cst_22 = arith.constant dense<0.000000e+00> : vector<16x1xf32>
    %15 = tpu.matmul %4, %7, %cst_22 {dimension_numbers = #tpu.dot_dimension_numbers<[1], [0], [0], [1], [0, 0, 1, 1], [], []>} : vector<16x1xf32>, vector<1x1xf32>, vector<16x1xf32> -> vector<16x1xf32>
    %cst_23 = arith.constant dense<0.000000e+00> : vector<16x1xf32>
    %16 = tpu.matmul %6, %7, %cst_23 {dimension_numbers = #tpu.dot_dimension_numbers<[1], [0], [0], [1], [0, 0, 1, 1], [], []>} : vector<16x1xf32>, vector<1x1xf32>, vector<16x1xf32> -> vector<16x1xf32>
    %17 = arith.mulf %14, %14 : vector<16x1xf32>
    %18 = arith.mulf %15, %15 : vector<16x1xf32>
    %19 = arith.addf %17, %18 : vector<16x1xf32>
    %20 = arith.mulf %16, %16 : vector<16x1xf32>
    %21 = arith.addf %19, %20 : vector<16x1xf32>
    %cst_24 = arith.constant 9.99999993E-9 : f32
    %22 = vector.broadcast %cst_24 : f32 to vector<16x1xf32>
    %23 = arith.maximumf %21, %22 : vector<16x1xf32>
    %24 = math.sqrt %23 : vector<16x1xf32>
    %25 = arith.truncf %0 : vector<16x32xf32> to vector<16x32xbf16>
    %cst_25 = arith.constant dense<0.000000e+00> : vector<16x32xf32>
    %26 = tpu.matmul %25, %8, %cst_25 {dimension_numbers = #tpu.dot_dimension_numbers<[1], [0], [0], [1], [0, 0, 1, 1], [], []>} : vector<16x32xbf16>, vector<32x32xbf16>, vector<16x32xf32> -> vector<16x32xf32>
    %27 = arith.truncf %24 : vector<16x1xf32> to vector<16x1xbf16>
    %cst_26 = arith.constant dense<0.000000e+00> : vector<16x32xf32>
    %28 = tpu.matmul %27, %9, %cst_26 {dimension_numbers = #tpu.dot_dimension_numbers<[1], [0], [0], [1], [0, 0, 1, 1], [], []>} : vector<16x1xbf16>, vector<1x32xbf16>, vector<16x32xf32> -> vector<16x32xf32>
    %29 = arith.addf %26, %28 : vector<16x32xf32>
    %30 = vector.broadcast %10 : vector<1x32xf32> to vector<16x32xf32>
    %31 = arith.addf %29, %30 : vector<16x32xf32>
    %cst_27 = arith.constant dense<0.000000e+00> : vector<16x1xf32>
    %32 = tpu.matmul %14, %11, %cst_27 {dimension_numbers = #tpu.dot_dimension_numbers<[1], [0], [0], [1], [0, 0, 1, 1], [], []>} : vector<16x1xf32>, vector<1x1xf32>, vector<16x1xf32> -> vector<16x1xf32>
    %cst_28 = arith.constant dense<0.000000e+00> : vector<16x1xf32>
    %33 = tpu.matmul %15, %11, %cst_28 {dimension_numbers = #tpu.dot_dimension_numbers<[1], [0], [0], [1], [0, 0, 1, 1], [], []>} : vector<16x1xf32>, vector<1x1xf32>, vector<16x1xf32> -> vector<16x1xf32>
    %cst_29 = arith.constant dense<0.000000e+00> : vector<16x1xf32>
    %34 = tpu.matmul %16, %11, %cst_29 {dimension_numbers = #tpu.dot_dimension_numbers<[1], [0], [0], [1], [0, 0, 1, 1], [], []>} : vector<16x1xf32>, vector<1x1xf32>, vector<16x1xf32> -> vector<16x1xf32>
    %35 = arith.truncf %31 : vector<16x32xf32> to vector<16x32xbf16>
    %cst_30 = arith.constant dense<0.000000e+00> : vector<16x1xf32>
    %36 = tpu.matmul %35, %12, %cst_30 {dimension_numbers = #tpu.dot_dimension_numbers<[1], [0], [0], [1], [0, 0, 1, 1], [], []>} : vector<16x32xbf16>, vector<32x1xbf16>, vector<16x1xf32> -> vector<16x1xf32>
    %37 = vector.broadcast %13 : vector<1x1xf32> to vector<16x1xf32>
    %38 = arith.addf %36, %37 : vector<16x1xf32>
    %39 = arith.negf %38 : vector<16x1xf32>
    %40 = math.exp %39 : vector<16x1xf32>
    %cst_31 = arith.constant 1.000000e+00 : f32
    %41 = vector.broadcast %cst_31 : f32 to vector<16x1xf32>
    %42 = arith.addf %41, %40 : vector<16x1xf32>
    %43 = arith.divf %41, %42 : vector<16x1xf32>
    %44 = arith.mulf %32, %43 : vector<16x1xf32>
    %45 = arith.mulf %33, %43 : vector<16x1xf32>
    %46 = arith.mulf %34, %43 : vector<16x1xf32>
    %c0_32 = arith.constant 0 : index
    %c0_33 = arith.constant 0 : index
    %47 = vector.load %arg10[%c0_32, %c0_33] : memref<1x32xf32, #tpu.memory_space<vmem>>, vector<1x32xf32>
    %c0_34 = arith.constant 0 : index
    %c0_35 = arith.constant 0 : index
    %48 = vector.load %arg11[%c0_34, %c0_35] : memref<1x32xf32, #tpu.memory_space<vmem>>, vector<1x32xf32>
    %cst_36 = arith.constant dense<0.000000e+00> : vector<16xf32>
    %49 = vector.multi_reduction <add>, %31, %cst_36 [1] : vector<16x32xf32> to vector<16xf32>
    %50 = vector.shape_cast %49 : vector<16xf32> to vector<16x1xf32>
    %cst_37 = arith.constant 3.200000e+01 : f32
    %51 = vector.broadcast %cst_37 : f32 to vector<16x1xf32>
    %52 = arith.divf %50, %51 : vector<16x1xf32>
    %53 = vector.broadcast %52 : vector<16x1xf32> to vector<16x32xf32>
    %54 = arith.subf %31, %53 : vector<16x32xf32>
    %55 = arith.mulf %54, %54 : vector<16x32xf32>
    %cst_38 = arith.constant dense<0.000000e+00> : vector<16xf32>
    %56 = vector.multi_reduction <add>, %55, %cst_38 [1] : vector<16x32xf32> to vector<16xf32>
    %57 = vector.shape_cast %56 : vector<16xf32> to vector<16x1xf32>
    %cst_39 = arith.constant 3.200000e+01 : f32
    %58 = vector.broadcast %cst_39 : f32 to vector<16x1xf32>
    %59 = arith.divf %57, %58 : vector<16x1xf32>
    %60 = vector.broadcast %52 : vector<16x1xf32> to vector<16x32xf32>
    %61 = arith.subf %31, %60 : vector<16x32xf32>
    %cst_40 = arith.constant 9.99999974E-6 : f32
    %62 = vector.broadcast %cst_40 : f32 to vector<16x1xf32>
    %63 = arith.addf %59, %62 : vector<16x1xf32>
    %64 = math.rsqrt %63 : vector<16x1xf32>
    %65 = vector.broadcast %64 : vector<16x1xf32> to vector<16x32xf32>
    %66 = arith.mulf %61, %65 : vector<16x32xf32>
    %67 = vector.broadcast %47 : vector<1x32xf32> to vector<16x32xf32>
    %68 = arith.mulf %66, %67 : vector<16x32xf32>
    %69 = vector.broadcast %48 : vector<1x32xf32> to vector<16x32xf32>
    %70 = arith.addf %68, %69 : vector<16x32xf32>
    %71 = arith.mulf %44, %44 : vector<16x1xf32>
    %72 = arith.mulf %45, %45 : vector<16x1xf32>
    %73 = arith.addf %71, %72 : vector<16x1xf32>
    %74 = arith.mulf %46, %46 : vector<16x1xf32>
    %75 = arith.addf %73, %74 : vector<16x1xf32>
    %cst_41 = arith.constant 9.99999993E-9 : f32
    %76 = vector.broadcast %cst_41 : f32 to vector<16x1xf32>
    %77 = arith.maximumf %75, %76 : vector<16x1xf32>
    %cst_42 = arith.constant dense<0.000000e+00> : vector<16xf32>
    %78 = vector.multi_reduction <add>, %77, %cst_42 [1] : vector<16x1xf32> to vector<16xf32>
    %79 = vector.shape_cast %78 : vector<16xf32> to vector<16x1xf32>
    %cst_43 = arith.constant 1.000000e+00 : f32
    %80 = vector.broadcast %cst_43 : f32 to vector<16x1xf32>
    %81 = arith.divf %79, %80 : vector<16x1xf32>
    %82 = math.sqrt %81 : vector<16x1xf32>
    %83 = arith.divf %44, %82 : vector<16x1xf32>
    %84 = arith.divf %45, %82 : vector<16x1xf32>
    %85 = arith.divf %46, %82 : vector<16x1xf32>
    %c0_44 = arith.constant 0 : index
    %c0_45 = arith.constant 0 : index
    %86 = vector.load %arg12[%c0_44, %c0_45] : memref<16x32xf32, #tpu.memory_space<vmem>>, vector<16x32xf32>
    tpu.vector_store %arg12[%c0_44, %c0_45], %70 {strides = array<i32>} : memref<16x32xf32, #tpu.memory_space<vmem>>, vector<16x32xf32>,
    %c0_46 = arith.constant 0 : index
    %c0_47 = arith.constant 0 : index
    %c0_48 = arith.constant 0 : index
    %87 = vector.load %arg13[%c0_46, %c0_47, %c0_48] : memref<3x16x1xf32, #tpu.memory_space<vmem>>, vector<1x16x1xf32>
    %88 = vector.shape_cast %87 : vector<1x16x1xf32> to vector<16x1xf32>
    %89 = vector.shape_cast %83 : vector<16x1xf32> to vector<1x16x1xf32>
    tpu.vector_store %arg13[%c0_46, %c0_47, %c0_48], %89 {strides = array<i32>} : memref<3x16x1xf32, #tpu.memory_space<vmem>>, vector<1x16x1xf32>,
    %c1_49 = arith.constant 1 : index
    %c0_50 = arith.constant 0 : index
    %c0_51 = arith.constant 0 : index
    %90 = vector.load %arg13[%c1_49, %c0_50, %c0_51] : memref<3x16x1xf32, #tpu.memory_space<vmem>>, vector<1x16x1xf32>
    %91 = vector.shape_cast %90 : vector<1x16x1xf32> to vector<16x1xf32>
    %92 = vector.shape_cast %84 : vector<16x1xf32> to vector<1x16x1xf32>
    tpu.vector_store %arg13[%c1_49, %c0_50, %c0_51], %92 {strides = array<i32>} : memref<3x16x1xf32, #tpu.memory_space<vmem>>, vector<1x16x1xf32>,
    %c2_52 = arith.constant 2 : index
    %c0_53 = arith.constant 0 : index
    %c0_54 = arith.constant 0 : index
    %93 = vector.load %arg13[%c2_52, %c0_53, %c0_54] : memref<3x16x1xf32, #tpu.memory_space<vmem>>, vector<1x16x1xf32>
    %94 = vector.shape_cast %93 : vector<1x16x1xf32> to vector<16x1xf32>
    %95 = vector.shape_cast %85 : vector<16x1xf32> to vector<1x16x1xf32>
    tpu.vector_store %arg13[%c2_52, %c0_53, %c0_54], %95 {strides = array<i32>} : memref<3x16x1xf32, #tpu.memory_space<vmem>>, vector<1x16x1xf32>,
    return
  }
  func.func @transform_0(%arg0: i32) -> (i32, i32) {
    %c0_i32 = arith.constant 0 : i32
    %c0_i32_0 = arith.constant 0 : i32
    return %arg0, %c0_i32 : i32, i32
  }
  func.func @transform_1(%arg0: i32) -> (i32, i32, i32) {
    %c0_i32 = arith.constant 0 : i32
    %c0_i32_0 = arith.constant 0 : i32
    %c0_i32_1 = arith.constant 0 : i32
    return %c0_i32, %arg0, %c0_i32_0 : i32, i32, i32
  }
  func.func @transform_2(%arg0: i32) -> (i32, i32) {
    %c0_i32 = arith.constant 0 : i32
    %c0_i32_0 = arith.constant 0 : i32
    %c0_i32_1 = arith.constant 0 : i32
    return %c0_i32, %c0_i32_0 : i32, i32
  }
  func.func @transform_3(%arg0: i32) -> (i32, i32) {
    %c0_i32 = arith.constant 0 : i32
    %c0_i32_0 = arith.constant 0 : i32
    %c0_i32_1 = arith.constant 0 : i32
    return %c0_i32, %c0_i32_0 : i32, i32
  }
  func.func @transform_4(%arg0: i32) -> (i32, i32) {
    %c0_i32 = arith.constant 0 : i32
    %c0_i32_0 = arith.constant 0 : i32
    %c0_i32_1 = arith.constant 0 : i32
    return %c0_i32, %c0_i32_0 : i32, i32
  }
  func.func @transform_5(%arg0: i32) -> (i32, i32) {
    %c0_i32 = arith.constant 0 : i32
    %c0_i32_0 = arith.constant 0 : i32
    %c0_i32_1 = arith.constant 0 : i32
    return %c0_i32, %c0_i32_0 : i32, i32
  }
  func.func @transform_6(%arg0: i32) -> (i32, i32) {
    %c0_i32 = arith.constant 0 : i32
    %c0_i32_0 = arith.constant 0 : i32
    %c0_i32_1 = arith.constant 0 : i32
    return %c0_i32, %c0_i32_0 : i32, i32
  }
  func.func @transform_7(%arg0: i32) -> (i32, i32) {
    %c0_i32 = arith.constant 0 : i32
    %c0_i32_0 = arith.constant 0 : i32
    %c0_i32_1 = arith.constant 0 : i32
    return %c0_i32, %c0_i32_0 : i32, i32
  }
  func.func @transform_8(%arg0: i32) -> (i32, i32) {
    %c0_i32 = arith.constant 0 : i32
    %c0_i32_0 = arith.constant 0 : i32
    %c0_i32_1 = arith.constant 0 : i32
    return %c0_i32, %c0_i32_0 : i32, i32
  }
  func.func @transform_9(%arg0: i32) -> (i32, i32) {
    %c0_i32 = arith.constant 0 : i32
    %c0_i32_0 = arith.constant 0 : i32
    %c0_i32_1 = arith.constant 0 : i32
    return %c0_i32, %c0_i32_0 : i32, i32
  }
  func.func @transform_10(%arg0: i32) -> (i32, i32) {
    %c0_i32 = arith.constant 0 : i32
    %c0_i32_0 = arith.constant 0 : i32
    %c0_i32_1 = arith.constant 0 : i32
    return %c0_i32, %c0_i32_0 : i32, i32
  }
  func.func @transform_11(%arg0: i32) -> (i32, i32) {
    %c0_i32 = arith.constant 0 : i32
    %c0_i32_0 = arith.constant 0 : i32
    return %arg0, %c0_i32 : i32, i32
  }
  func.func @transform_12(%arg0: i32) -> (i32, i32, i32) {
    %c0_i32 = arith.constant 0 : i32
    %c0_i32_0 = arith.constant 0 : i32
    %c0_i32_1 = arith.constant 0 : i32
    return %c0_i32, %arg0, %c0_i32_0 : i32, i32, i32
  }
}

module attributes {stable_mosaic.version = 11 : i64} {
  func.func @_message_kernel(%arg0: i32, %arg1: memref<16x544xf32, #tpu.memory_space<vmem>>, %arg2: memref<3x16x33xf32, #tpu.memory_space<vmem>>, %arg3: memref<33x33xf32, #tpu.memory_space<vmem>>, %arg4: memref<544x256xbf16, #tpu.memory_space<vmem>>, %arg5: memref<33x256xbf16, #tpu.memory_space<vmem>>, %arg6: memref<1x256xf32, #tpu.memory_space<vmem>>, %arg7: memref<33x16xf32, #tpu.memory_space<vmem>>, %arg8: memref<256x16xbf16, #tpu.memory_space<vmem>>, %arg9: memref<1x16xf32, #tpu.memory_space<vmem>>, %arg10: memref<16x16xf32, #tpu.memory_space<vmem>>, %arg11: memref<256x256xbf16, #tpu.memory_space<vmem>>, %arg12: memref<16x256xbf16, #tpu.memory_space<vmem>>, %arg13: memref<1x256xf32, #tpu.memory_space<vmem>>, %arg14: memref<16x16xf32, #tpu.memory_space<vmem>>, %arg15: memref<256x16xbf16, #tpu.memory_space<vmem>>, %arg16: memref<1x16xf32, #tpu.memory_space<vmem>>, %arg17: memref<16x16xf32, #tpu.memory_space<vmem>>, %arg18: memref<256x256xbf16, #tpu.memory_space<vmem>>, %arg19: memref<16x256xbf16, #tpu.memory_space<vmem>>, %arg20: memref<1x256xf32, #tpu.memory_space<vmem>>, %arg21: memref<16x16xf32, #tpu.memory_space<vmem>>, %arg22: memref<256x16xbf16, #tpu.memory_space<vmem>>, %arg23: memref<1x16xf32, #tpu.memory_space<vmem>>, %arg24: memref<16x256xf32, #tpu.memory_space<vmem>>, %arg25: memref<3x16x16xf32, #tpu.memory_space<vmem>>) attributes {dimension_semantics = [#tpu.dimension_semantics<parallel>], iteration_bounds = array<i64: 1>, scalar_prefetch = 0 : i64, scratch_operands = 0 : i64, tpu.core_type = #tpu.core_type<tc>, window_params = [{transform_indices = @transform_0, window_bounds = array<i64: 16, 544>}, {transform_indices = @transform_1, window_bounds = array<i64: 3, 16, 33>}, {pipeline_mode = #tpu.pipeline_mode<synchronous>, transform_indices = @transform_2, window_bounds = array<i64: 33, 33>}, {pipeline_mode = #tpu.pipeline_mode<synchronous>, transform_indices = @transform_3, window_bounds = array<i64: 544, 256>}, {pipeline_mode = #tpu.pipeline_mode<synchronous>, transform_indices = @transform_4, window_bounds = array<i64: 33, 256>}, {pipeline_mode = #tpu.pipeline_mode<synchronous>, transform_indices = @transform_5, window_bounds = array<i64: 1, 256>}, {pipeline_mode = #tpu.pipeline_mode<synchronous>, transform_indices = @transform_6, window_bounds = array<i64: 33, 16>}, {pipeline_mode = #tpu.pipeline_mode<synchronous>, transform_indices = @transform_7, window_bounds = array<i64: 256, 16>}, {pipeline_mode = #tpu.pipeline_mode<synchronous>, transform_indices = @transform_8, window_bounds = array<i64: 1, 16>}, {pipeline_mode = #tpu.pipeline_mode<synchronous>, transform_indices = @transform_9, window_bounds = array<i64: 16, 16>}, {pipeline_mode = #tpu.pipeline_mode<synchronous>, transform_indices = @transform_10, window_bounds = array<i64: 256, 256>}, {pipeline_mode = #tpu.pipeline_mode<synchronous>, transform_indices = @transform_11, window_bounds = array<i64: 16, 256>}, {pipeline_mode = #tpu.pipeline_mode<synchronous>, transform_indices = @transform_12, window_bounds = array<i64: 1, 256>}, {pipeline_mode = #tpu.pipeline_mode<synchronous>, transform_indices = @transform_13, window_bounds = array<i64: 16, 16>}, {pipeline_mode = #tpu.pipeline_mode<synchronous>, transform_indices = @transform_14, window_bounds = array<i64: 256, 16>}, {pipeline_mode = #tpu.pipeline_mode<synchronous>, transform_indices = @transform_15, window_bounds = array<i64: 1, 16>}, {pipeline_mode = #tpu.pipeline_mode<synchronous>, transform_indices = @transform_16, window_bounds = array<i64: 16, 16>}, {pipeline_mode = #tpu.pipeline_mode<synchronous>, transform_indices = @transform_17, window_bounds = array<i64: 256, 256>}, {pipeline_mode = #tpu.pipeline_mode<synchronous>, transform_indices = @transform_18, window_bounds = array<i64: 16, 256>}, {pipeline_mode = #tpu.pipeline_mode<synchronous>, transform_indices = @transform_19, window_bounds = array<i64: 1, 256>}, {pipeline_mode = #tpu.pipeline_mode<synchronous>, transform_indices = @transform_20, window_bounds = array<i64: 16, 16>}, {pipeline_mode = #tpu.pipeline_mode<synchronous>, transform_indices = @transform_21, window_bounds = array<i64: 256, 16>}, {pipeline_mode = #tpu.pipeline_mode<synchronous>, transform_indices = @transform_22, window_bounds = array<i64: 1, 16>}, {transform_indices = @transform_23, window_bounds = array<i64: 16, 256>}, {transform_indices = @transform_24, window_bounds = array<i64: 3, 16, 16>}]} {
    %c0 = arith.constant 0 : index
    %c0_0 = arith.constant 0 : index
    %0 = vector.load %arg3[%c0, %c0_0] : memref<33x33xf32, #tpu.memory_space<vmem>>, vector<33x33xf32>
    %c0_1 = arith.constant 0 : index
    %c0_2 = arith.constant 0 : index
    %1 = vector.load %arg4[%c0_1, %c0_2] : memref<544x256xbf16, #tpu.memory_space<vmem>>, vector<544x256xbf16>
    %c0_3 = arith.constant 0 : index
    %c0_4 = arith.constant 0 : index
    %2 = vector.load %arg5[%c0_3, %c0_4] : memref<33x256xbf16, #tpu.memory_space<vmem>>, vector<33x256xbf16>
    %c0_5 = arith.constant 0 : index
    %c0_6 = arith.constant 0 : index
    %3 = vector.load %arg6[%c0_5, %c0_6] : memref<1x256xf32, #tpu.memory_space<vmem>>, vector<1x256xf32>
    %c0_7 = arith.constant 0 : index
    %c0_8 = arith.constant 0 : index
    %4 = vector.load %arg7[%c0_7, %c0_8] : memref<33x16xf32, #tpu.memory_space<vmem>>, vector<33x16xf32>
    %c0_9 = arith.constant 0 : index
    %c0_10 = arith.constant 0 : index
    %5 = vector.load %arg8[%c0_9, %c0_10] : memref<256x16xbf16, #tpu.memory_space<vmem>>, vector<256x16xbf16>
    %c0_11 = arith.constant 0 : index
    %c0_12 = arith.constant 0 : index
    %6 = vector.load %arg9[%c0_11, %c0_12] : memref<1x16xf32, #tpu.memory_space<vmem>>, vector<1x16xf32>
    %c0_13 = arith.constant 0 : index
    %c0_14 = arith.constant 0 : index
    %7 = vector.load %arg10[%c0_13, %c0_14] : memref<16x16xf32, #tpu.memory_space<vmem>>, vector<16x16xf32>
    %c0_15 = arith.constant 0 : index
    %c0_16 = arith.constant 0 : index
    %8 = vector.load %arg11[%c0_15, %c0_16] : memref<256x256xbf16, #tpu.memory_space<vmem>>, vector<256x256xbf16>
    %c0_17 = arith.constant 0 : index
    %c0_18 = arith.constant 0 : index
    %9 = vector.load %arg12[%c0_17, %c0_18] : memref<16x256xbf16, #tpu.memory_space<vmem>>, vector<16x256xbf16>
    %c0_19 = arith.constant 0 : index
    %c0_20 = arith.constant 0 : index
    %10 = vector.load %arg13[%c0_19, %c0_20] : memref<1x256xf32, #tpu.memory_space<vmem>>, vector<1x256xf32>
    %c0_21 = arith.constant 0 : index
    %c0_22 = arith.constant 0 : index
    %11 = vector.load %arg14[%c0_21, %c0_22] : memref<16x16xf32, #tpu.memory_space<vmem>>, vector<16x16xf32>
    %c0_23 = arith.constant 0 : index
    %c0_24 = arith.constant 0 : index
    %12 = vector.load %arg15[%c0_23, %c0_24] : memref<256x16xbf16, #tpu.memory_space<vmem>>, vector<256x16xbf16>
    %c0_25 = arith.constant 0 : index
    %c0_26 = arith.constant 0 : index
    %13 = vector.load %arg16[%c0_25, %c0_26] : memref<1x16xf32, #tpu.memory_space<vmem>>, vector<1x16xf32>
    %c0_27 = arith.constant 0 : index
    %c0_28 = arith.constant 0 : index
    %14 = vector.load %arg17[%c0_27, %c0_28] : memref<16x16xf32, #tpu.memory_space<vmem>>, vector<16x16xf32>
    %c0_29 = arith.constant 0 : index
    %c0_30 = arith.constant 0 : index
    %15 = vector.load %arg18[%c0_29, %c0_30] : memref<256x256xbf16, #tpu.memory_space<vmem>>, vector<256x256xbf16>
    %c0_31 = arith.constant 0 : index
    %c0_32 = arith.constant 0 : index
    %16 = vector.load %arg19[%c0_31, %c0_32] : memref<16x256xbf16, #tpu.memory_space<vmem>>, vector<16x256xbf16>
    %c0_33 = arith.constant 0 : index
    %c0_34 = arith.constant 0 : index
    %17 = vector.load %arg20[%c0_33, %c0_34] : memref<1x256xf32, #tpu.memory_space<vmem>>, vector<1x256xf32>
    %c0_35 = arith.constant 0 : index
    %c0_36 = arith.constant 0 : index
    %18 = vector.load %arg21[%c0_35, %c0_36] : memref<16x16xf32, #tpu.memory_space<vmem>>, vector<16x16xf32>
    %c0_37 = arith.constant 0 : index
    %c0_38 = arith.constant 0 : index
    %19 = vector.load %arg22[%c0_37, %c0_38] : memref<256x16xbf16, #tpu.memory_space<vmem>>, vector<256x16xbf16>
    %c0_39 = arith.constant 0 : index
    %c0_40 = arith.constant 0 : index
    %20 = vector.load %arg23[%c0_39, %c0_40] : memref<1x16xf32, #tpu.memory_space<vmem>>, vector<1x16xf32>
    %c0_41 = arith.constant 0 : index
    %c0_42 = arith.constant 0 : index
    %21 = vector.load %arg1[%c0_41, %c0_42] : memref<16x544xf32, #tpu.memory_space<vmem>>, vector<16x544xf32>
    %c0_43 = arith.constant 0 : index
    %c0_44 = arith.constant 0 : index
    %c0_45 = arith.constant 0 : index
    %22 = vector.load %arg2[%c0_43, %c0_44, %c0_45] : memref<3x16x33xf32, #tpu.memory_space<vmem>>, vector<1x16x33xf32>
    %23 = vector.shape_cast %22 : vector<1x16x33xf32> to vector<16x33xf32>
    %c1 = arith.constant 1 : index
    %c0_46 = arith.constant 0 : index
    %c0_47 = arith.constant 0 : index
    %24 = vector.load %arg2[%c1, %c0_46, %c0_47] : memref<3x16x33xf32, #tpu.memory_space<vmem>>, vector<1x16x33xf32>
    %25 = vector.shape_cast %24 : vector<1x16x33xf32> to vector<16x33xf32>
    %c2 = arith.constant 2 : index
    %c0_48 = arith.constant 0 : index
    %c0_49 = arith.constant 0 : index
    %26 = vector.load %arg2[%c2, %c0_48, %c0_49] : memref<3x16x33xf32, #tpu.memory_space<vmem>>, vector<1x16x33xf32>
    %27 = vector.shape_cast %26 : vector<1x16x33xf32> to vector<16x33xf32>
    %cst = arith.constant dense<0.000000e+00> : vector<16x33xf32>
    %28 = tpu.matmul %23, %0, %cst {dimension_numbers = #tpu.dot_dimension_numbers<[1], [0], [0], [1], [0, 0, 1, 1], [], []>} : vector<16x33xf32>, vector<33x33xf32>, vector<16x33xf32> -> vector<16x33xf32>
    %cst_50 = arith.constant dense<0.000000e+00> : vector<16x33xf32>
    %29 = tpu.matmul %25, %0, %cst_50 {dimension_numbers = #tpu.dot_dimension_numbers<[1], [0], [0], [1], [0, 0, 1, 1], [], []>} : vector<16x33xf32>, vector<33x33xf32>, vector<16x33xf32> -> vector<16x33xf32>
    %cst_51 = arith.constant dense<0.000000e+00> : vector<16x33xf32>
    %30 = tpu.matmul %27, %0, %cst_51 {dimension_numbers = #tpu.dot_dimension_numbers<[1], [0], [0], [1], [0, 0, 1, 1], [], []>} : vector<16x33xf32>, vector<33x33xf32>, vector<16x33xf32> -> vector<16x33xf32>
    %31 = arith.mulf %28, %28 : vector<16x33xf32>
    %32 = arith.mulf %29, %29 : vector<16x33xf32>
    %33 = arith.addf %31, %32 : vector<16x33xf32>
    %34 = arith.mulf %30, %30 : vector<16x33xf32>
    %35 = arith.addf %33, %34 : vector<16x33xf32>
    %cst_52 = arith.constant 9.99999993E-9 : f32
    %36 = vector.broadcast %cst_52 : f32 to vector<16x33xf32>
    %37 = arith.maximumf %35, %36 : vector<16x33xf32>
    %38 = math.sqrt %37 : vector<16x33xf32>
    %39 = arith.truncf %21 : vector<16x544xf32> to vector<16x544xbf16>
    %cst_53 = arith.constant dense<0.000000e+00> : vector<16x256xf32>
    %40 = tpu.matmul %39, %1, %cst_53 {dimension_numbers = #tpu.dot_dimension_numbers<[1], [0], [0], [1], [0, 0, 1, 1], [], []>} : vector<16x544xbf16>, vector<544x256xbf16>, vector<16x256xf32> -> vector<16x256xf32>
    %41 = arith.truncf %38 : vector<16x33xf32> to vector<16x33xbf16>
    %cst_54 = arith.constant dense<0.000000e+00> : vector<16x256xf32>
    %42 = tpu.matmul %41, %2, %cst_54 {dimension_numbers = #tpu.dot_dimension_numbers<[1], [0], [0], [1], [0, 0, 1, 1], [], []>} : vector<16x33xbf16>, vector<33x256xbf16>, vector<16x256xf32> -> vector<16x256xf32>
    %43 = arith.addf %40, %42 : vector<16x256xf32>
    %44 = vector.broadcast %3 : vector<1x256xf32> to vector<16x256xf32>
    %45 = arith.addf %43, %44 : vector<16x256xf32>
    %cst_55 = arith.constant dense<0.000000e+00> : vector<16x16xf32>
    %46 = tpu.matmul %28, %4, %cst_55 {dimension_numbers = #tpu.dot_dimension_numbers<[1], [0], [0], [1], [0, 0, 1, 1], [], []>} : vector<16x33xf32>, vector<33x16xf32>, vector<16x16xf32> -> vector<16x16xf32>
    %cst_56 = arith.constant dense<0.000000e+00> : vector<16x16xf32>
    %47 = tpu.matmul %29, %4, %cst_56 {dimension_numbers = #tpu.dot_dimension_numbers<[1], [0], [0], [1], [0, 0, 1, 1], [], []>} : vector<16x33xf32>, vector<33x16xf32>, vector<16x16xf32> -> vector<16x16xf32>
    %cst_57 = arith.constant dense<0.000000e+00> : vector<16x16xf32>
    %48 = tpu.matmul %30, %4, %cst_57 {dimension_numbers = #tpu.dot_dimension_numbers<[1], [0], [0], [1], [0, 0, 1, 1], [], []>} : vector<16x33xf32>, vector<33x16xf32>, vector<16x16xf32> -> vector<16x16xf32>
    %49 = arith.negf %45 : vector<16x256xf32>
    %50 = math.exp %49 : vector<16x256xf32>
    %cst_58 = arith.constant 1.000000e+00 : f32
    %51 = vector.broadcast %cst_58 : f32 to vector<16x256xf32>
    %52 = arith.addf %51, %50 : vector<16x256xf32>
    %53 = arith.divf %51, %52 : vector<16x256xf32>
    %54 = arith.truncf %53 : vector<16x256xf32> to vector<16x256xbf16>
    %cst_59 = arith.constant dense<0.000000e+00> : vector<16x16xf32>
    %55 = tpu.matmul %54, %5, %cst_59 {dimension_numbers = #tpu.dot_dimension_numbers<[1], [0], [0], [1], [0, 0, 1, 1], [], []>} : vector<16x256xbf16>, vector<256x16xbf16>, vector<16x16xf32> -> vector<16x16xf32>
    %56 = vector.broadcast %6 : vector<1x16xf32> to vector<16x16xf32>
    %57 = arith.addf %55, %56 : vector<16x16xf32>
    %58 = arith.negf %57 : vector<16x16xf32>
    %59 = math.exp %58 : vector<16x16xf32>
    %cst_60 = arith.constant 1.000000e+00 : f32
    %60 = vector.broadcast %cst_60 : f32 to vector<16x16xf32>
    %61 = arith.addf %60, %59 : vector<16x16xf32>
    %62 = arith.divf %60, %61 : vector<16x16xf32>
    %63 = arith.mulf %46, %62 : vector<16x16xf32>
    %64 = arith.mulf %47, %62 : vector<16x16xf32>
    %65 = arith.mulf %48, %62 : vector<16x16xf32>
    %cst_61 = arith.constant 0.000000e+00 : f32
    %66 = vector.broadcast %cst_61 : f32 to vector<16x256xf32>
    %67 = arith.maximumf %45, %66 : vector<16x256xf32>
    %cst_62 = arith.constant dense<0.000000e+00> : vector<16x16xf32>
    %68 = tpu.matmul %63, %7, %cst_62 {dimension_numbers = #tpu.dot_dimension_numbers<[1], [0], [0], [1], [0, 0, 1, 1], [], []>} : vector<16x16xf32>, vector<16x16xf32>, vector<16x16xf32> -> vector<16x16xf32>
    %cst_63 = arith.constant dense<0.000000e+00> : vector<16x16xf32>
    %69 = tpu.matmul %64, %7, %cst_63 {dimension_numbers = #tpu.dot_dimension_numbers<[1], [0], [0], [1], [0, 0, 1, 1], [], []>} : vector<16x16xf32>, vector<16x16xf32>, vector<16x16xf32> -> vector<16x16xf32>
    %cst_64 = arith.constant dense<0.000000e+00> : vector<16x16xf32>
    %70 = tpu.matmul %65, %7, %cst_64 {dimension_numbers = #tpu.dot_dimension_numbers<[1], [0], [0], [1], [0, 0, 1, 1], [], []>} : vector<16x16xf32>, vector<16x16xf32>, vector<16x16xf32> -> vector<16x16xf32>
    %71 = arith.mulf %68, %68 : vector<16x16xf32>
    %72 = arith.mulf %69, %69 : vector<16x16xf32>
    %73 = arith.addf %71, %72 : vector<16x16xf32>
    %74 = arith.mulf %70, %70 : vector<16x16xf32>
    %75 = arith.addf %73, %74 : vector<16x16xf32>
    %cst_65 = arith.constant 9.99999993E-9 : f32
    %76 = vector.broadcast %cst_65 : f32 to vector<16x16xf32>
    %77 = arith.maximumf %75, %76 : vector<16x16xf32>
    %78 = math.sqrt %77 : vector<16x16xf32>
    %79 = arith.truncf %67 : vector<16x256xf32> to vector<16x256xbf16>
    %cst_66 = arith.constant dense<0.000000e+00> : vector<16x256xf32>
    %80 = tpu.matmul %79, %8, %cst_66 {dimension_numbers = #tpu.dot_dimension_numbers<[1], [0], [0], [1], [0, 0, 1, 1], [], []>} : vector<16x256xbf16>, vector<256x256xbf16>, vector<16x256xf32> -> vector<16x256xf32>
    %81 = arith.truncf %78 : vector<16x16xf32> to vector<16x16xbf16>
    %cst_67 = arith.constant dense<0.000000e+00> : vector<16x256xf32>
    %82 = tpu.matmul %81, %9, %cst_67 {dimension_numbers = #tpu.dot_dimension_numbers<[1], [0], [0], [1], [0, 0, 1, 1], [], []>} : vector<16x16xbf16>, vector<16x256xbf16>, vector<16x256xf32> -> vector<16x256xf32>
    %83 = arith.addf %80, %82 : vector<16x256xf32>
    %84 = vector.broadcast %10 : vector<1x256xf32> to vector<16x256xf32>
    %85 = arith.addf %83, %84 : vector<16x256xf32>
    %cst_68 = arith.constant dense<0.000000e+00> : vector<16x16xf32>
    %86 = tpu.matmul %68, %11, %cst_68 {dimension_numbers = #tpu.dot_dimension_numbers<[1], [0], [0], [1], [0, 0, 1, 1], [], []>} : vector<16x16xf32>, vector<16x16xf32>, vector<16x16xf32> -> vector<16x16xf32>
    %cst_69 = arith.constant dense<0.000000e+00> : vector<16x16xf32>
    %87 = tpu.matmul %69, %11, %cst_69 {dimension_numbers = #tpu.dot_dimension_numbers<[1], [0], [0], [1], [0, 0, 1, 1], [], []>} : vector<16x16xf32>, vector<16x16xf32>, vector<16x16xf32> -> vector<16x16xf32>
    %cst_70 = arith.constant dense<0.000000e+00> : vector<16x16xf32>
    %88 = tpu.matmul %70, %11, %cst_70 {dimension_numbers = #tpu.dot_dimension_numbers<[1], [0], [0], [1], [0, 0, 1, 1], [], []>} : vector<16x16xf32>, vector<16x16xf32>, vector<16x16xf32> -> vector<16x16xf32>
    %89 = arith.negf %85 : vector<16x256xf32>
    %90 = math.exp %89 : vector<16x256xf32>
    %cst_71 = arith.constant 1.000000e+00 : f32
    %91 = vector.broadcast %cst_71 : f32 to vector<16x256xf32>
    %92 = arith.addf %91, %90 : vector<16x256xf32>
    %93 = arith.divf %91, %92 : vector<16x256xf32>
    %94 = arith.truncf %93 : vector<16x256xf32> to vector<16x256xbf16>
    %cst_72 = arith.constant dense<0.000000e+00> : vector<16x16xf32>
    %95 = tpu.matmul %94, %12, %cst_72 {dimension_numbers = #tpu.dot_dimension_numbers<[1], [0], [0], [1], [0, 0, 1, 1], [], []>} : vector<16x256xbf16>, vector<256x16xbf16>, vector<16x16xf32> -> vector<16x16xf32>
    %96 = vector.broadcast %13 : vector<1x16xf32> to vector<16x16xf32>
    %97 = arith.addf %95, %96 : vector<16x16xf32>
    %98 = arith.negf %97 : vector<16x16xf32>
    %99 = math.exp %98 : vector<16x16xf32>
    %cst_73 = arith.constant 1.000000e+00 : f32
    %100 = vector.broadcast %cst_73 : f32 to vector<16x16xf32>
    %101 = arith.addf %100, %99 : vector<16x16xf32>
    %102 = arith.divf %100, %101 : vector<16x16xf32>
    %103 = arith.mulf %86, %102 : vector<16x16xf32>
    %104 = arith.mulf %87, %102 : vector<16x16xf32>
    %105 = arith.mulf %88, %102 : vector<16x16xf32>
    %cst_74 = arith.constant 0.000000e+00 : f32
    %106 = vector.broadcast %cst_74 : f32 to vector<16x256xf32>
    %107 = arith.maximumf %85, %106 : vector<16x256xf32>
    %cst_75 = arith.constant dense<0.000000e+00> : vector<16x16xf32>
    %108 = tpu.matmul %103, %14, %cst_75 {dimension_numbers = #tpu.dot_dimension_numbers<[1], [0], [0], [1], [0, 0, 1, 1], [], []>} : vector<16x16xf32>, vector<16x16xf32>, vector<16x16xf32> -> vector<16x16xf32>
    %cst_76 = arith.constant dense<0.000000e+00> : vector<16x16xf32>
    %109 = tpu.matmul %104, %14, %cst_76 {dimension_numbers = #tpu.dot_dimension_numbers<[1], [0], [0], [1], [0, 0, 1, 1], [], []>} : vector<16x16xf32>, vector<16x16xf32>, vector<16x16xf32> -> vector<16x16xf32>
    %cst_77 = arith.constant dense<0.000000e+00> : vector<16x16xf32>
    %110 = tpu.matmul %105, %14, %cst_77 {dimension_numbers = #tpu.dot_dimension_numbers<[1], [0], [0], [1], [0, 0, 1, 1], [], []>} : vector<16x16xf32>, vector<16x16xf32>, vector<16x16xf32> -> vector<16x16xf32>
    %111 = arith.mulf %108, %108 : vector<16x16xf32>
    %112 = arith.mulf %109, %109 : vector<16x16xf32>
    %113 = arith.addf %111, %112 : vector<16x16xf32>
    %114 = arith.mulf %110, %110 : vector<16x16xf32>
    %115 = arith.addf %113, %114 : vector<16x16xf32>
    %cst_78 = arith.constant 9.99999993E-9 : f32
    %116 = vector.broadcast %cst_78 : f32 to vector<16x16xf32>
    %117 = arith.maximumf %115, %116 : vector<16x16xf32>
    %118 = math.sqrt %117 : vector<16x16xf32>
    %119 = arith.truncf %107 : vector<16x256xf32> to vector<16x256xbf16>
    %cst_79 = arith.constant dense<0.000000e+00> : vector<16x256xf32>
    %120 = tpu.matmul %119, %15, %cst_79 {dimension_numbers = #tpu.dot_dimension_numbers<[1], [0], [0], [1], [0, 0, 1, 1], [], []>} : vector<16x256xbf16>, vector<256x256xbf16>, vector<16x256xf32> -> vector<16x256xf32>
    %121 = arith.truncf %118 : vector<16x16xf32> to vector<16x16xbf16>
    %cst_80 = arith.constant dense<0.000000e+00> : vector<16x256xf32>
    %122 = tpu.matmul %121, %16, %cst_80 {dimension_numbers = #tpu.dot_dimension_numbers<[1], [0], [0], [1], [0, 0, 1, 1], [], []>} : vector<16x16xbf16>, vector<16x256xbf16>, vector<16x256xf32> -> vector<16x256xf32>
    %123 = arith.addf %120, %122 : vector<16x256xf32>
    %124 = vector.broadcast %17 : vector<1x256xf32> to vector<16x256xf32>
    %125 = arith.addf %123, %124 : vector<16x256xf32>
    %cst_81 = arith.constant dense<0.000000e+00> : vector<16x16xf32>
    %126 = tpu.matmul %108, %18, %cst_81 {dimension_numbers = #tpu.dot_dimension_numbers<[1], [0], [0], [1], [0, 0, 1, 1], [], []>} : vector<16x16xf32>, vector<16x16xf32>, vector<16x16xf32> -> vector<16x16xf32>
    %cst_82 = arith.constant dense<0.000000e+00> : vector<16x16xf32>
    %127 = tpu.matmul %109, %18, %cst_82 {dimension_numbers = #tpu.dot_dimension_numbers<[1], [0], [0], [1], [0, 0, 1, 1], [], []>} : vector<16x16xf32>, vector<16x16xf32>, vector<16x16xf32> -> vector<16x16xf32>
    %cst_83 = arith.constant dense<0.000000e+00> : vector<16x16xf32>
    %128 = tpu.matmul %110, %18, %cst_83 {dimension_numbers = #tpu.dot_dimension_numbers<[1], [0], [0], [1], [0, 0, 1, 1], [], []>} : vector<16x16xf32>, vector<16x16xf32>, vector<16x16xf32> -> vector<16x16xf32>
    %129 = arith.truncf %125 : vector<16x256xf32> to vector<16x256xbf16>
    %cst_84 = arith.constant dense<0.000000e+00> : vector<16x16xf32>
    %130 = tpu.matmul %129, %19, %cst_84 {dimension_numbers = #tpu.dot_dimension_numbers<[1], [0], [0], [1], [0, 0, 1, 1], [], []>} : vector<16x256xbf16>, vector<256x16xbf16>, vector<16x16xf32> -> vector<16x16xf32>
    %131 = vector.broadcast %20 : vector<1x16xf32> to vector<16x16xf32>
    %132 = arith.addf %130, %131 : vector<16x16xf32>
    %133 = arith.negf %132 : vector<16x16xf32>
    %134 = math.exp %133 : vector<16x16xf32>
    %cst_85 = arith.constant 1.000000e+00 : f32
    %135 = vector.broadcast %cst_85 : f32 to vector<16x16xf32>
    %136 = arith.addf %135, %134 : vector<16x16xf32>
    %137 = arith.divf %135, %136 : vector<16x16xf32>
    %138 = arith.mulf %126, %137 : vector<16x16xf32>
    %139 = arith.mulf %127, %137 : vector<16x16xf32>
    %140 = arith.mulf %128, %137 : vector<16x16xf32>
    %c0_86 = arith.constant 0 : index
    %c0_87 = arith.constant 0 : index
    %141 = vector.load %arg24[%c0_86, %c0_87] : memref<16x256xf32, #tpu.memory_space<vmem>>, vector<16x256xf32>
    tpu.vector_store %arg24[%c0_86, %c0_87], %125 {strides = array<i32>} : memref<16x256xf32, #tpu.memory_space<vmem>>, vector<16x256xf32>,
    %c0_88 = arith.constant 0 : index
    %c0_89 = arith.constant 0 : index
    %c0_90 = arith.constant 0 : index
    %142 = vector.load %arg25[%c0_88, %c0_89, %c0_90] : memref<3x16x16xf32, #tpu.memory_space<vmem>>, vector<1x16x16xf32>
    %143 = vector.shape_cast %142 : vector<1x16x16xf32> to vector<16x16xf32>
    %144 = vector.shape_cast %138 : vector<16x16xf32> to vector<1x16x16xf32>
    tpu.vector_store %arg25[%c0_88, %c0_89, %c0_90], %144 {strides = array<i32>} : memref<3x16x16xf32, #tpu.memory_space<vmem>>, vector<1x16x16xf32>,
    %c1_91 = arith.constant 1 : index
    %c0_92 = arith.constant 0 : index
    %c0_93 = arith.constant 0 : index
    %145 = vector.load %arg25[%c1_91, %c0_92, %c0_93] : memref<3x16x16xf32, #tpu.memory_space<vmem>>, vector<1x16x16xf32>
    %146 = vector.shape_cast %145 : vector<1x16x16xf32> to vector<16x16xf32>
    %147 = vector.shape_cast %139 : vector<16x16xf32> to vector<1x16x16xf32>
    tpu.vector_store %arg25[%c1_91, %c0_92, %c0_93], %147 {strides = array<i32>} : memref<3x16x16xf32, #tpu.memory_space<vmem>>, vector<1x16x16xf32>,
    %c2_94 = arith.constant 2 : index
    %c0_95 = arith.constant 0 : index
    %c0_96 = arith.constant 0 : index
    %148 = vector.load %arg25[%c2_94, %c0_95, %c0_96] : memref<3x16x16xf32, #tpu.memory_space<vmem>>, vector<1x16x16xf32>
    %149 = vector.shape_cast %148 : vector<1x16x16xf32> to vector<16x16xf32>
    %150 = vector.shape_cast %140 : vector<16x16xf32> to vector<1x16x16xf32>
    tpu.vector_store %arg25[%c2_94, %c0_95, %c0_96], %150 {strides = array<i32>} : memref<3x16x16xf32, #tpu.memory_space<vmem>>, vector<1x16x16xf32>,
    return
  }
  func.func @transform_0(%arg0: i32) -> (i32, i32) {
    %c0_i32 = arith.constant 0 : i32
    %c0_i32_0 = arith.constant 0 : i32
    return %arg0, %c0_i32 : i32, i32
  }
  func.func @transform_1(%arg0: i32) -> (i32, i32, i32) {
    %c0_i32 = arith.constant 0 : i32
    %c0_i32_0 = arith.constant 0 : i32
    %c0_i32_1 = arith.constant 0 : i32
    return %c0_i32, %arg0, %c0_i32_0 : i32, i32, i32
  }
  func.func @transform_2(%arg0: i32) -> (i32, i32) {
    %c0_i32 = arith.constant 0 : i32
    %c0_i32_0 = arith.constant 0 : i32
    %c0_i32_1 = arith.constant 0 : i32
    return %c0_i32, %c0_i32_0 : i32, i32
  }
  func.func @transform_3(%arg0: i32) -> (i32, i32) {
    %c0_i32 = arith.constant 0 : i32
    %c0_i32_0 = arith.constant 0 : i32
    %c0_i32_1 = arith.constant 0 : i32
    return %c0_i32, %c0_i32_0 : i32, i32
  }
  func.func @transform_4(%arg0: i32) -> (i32, i32) {
    %c0_i32 = arith.constant 0 : i32
    %c0_i32_0 = arith.constant 0 : i32
    %c0_i32_1 = arith.constant 0 : i32
    return %c0_i32, %c0_i32_0 : i32, i32
  }
  func.func @transform_5(%arg0: i32) -> (i32, i32) {
    %c0_i32 = arith.constant 0 : i32
    %c0_i32_0 = arith.constant 0 : i32
    %c0_i32_1 = arith.constant 0 : i32
    return %c0_i32, %c0_i32_0 : i32, i32
  }
  func.func @transform_6(%arg0: i32) -> (i32, i32) {
    %c0_i32 = arith.constant 0 : i32
    %c0_i32_0 = arith.constant 0 : i32
    %c0_i32_1 = arith.constant 0 : i32
    return %c0_i32, %c0_i32_0 : i32, i32
  }
  func.func @transform_7(%arg0: i32) -> (i32, i32) {
    %c0_i32 = arith.constant 0 : i32
    %c0_i32_0 = arith.constant 0 : i32
    %c0_i32_1 = arith.constant 0 : i32
    return %c0_i32, %c0_i32_0 : i32, i32
  }
  func.func @transform_8(%arg0: i32) -> (i32, i32) {
    %c0_i32 = arith.constant 0 : i32
    %c0_i32_0 = arith.constant 0 : i32
    %c0_i32_1 = arith.constant 0 : i32
    return %c0_i32, %c0_i32_0 : i32, i32
  }
  func.func @transform_9(%arg0: i32) -> (i32, i32) {
    %c0_i32 = arith.constant 0 : i32
    %c0_i32_0 = arith.constant 0 : i32
    %c0_i32_1 = arith.constant 0 : i32
    return %c0_i32, %c0_i32_0 : i32, i32
  }
  func.func @transform_10(%arg0: i32) -> (i32, i32) {
    %c0_i32 = arith.constant 0 : i32
    %c0_i32_0 = arith.constant 0 : i32
    %c0_i32_1 = arith.constant 0 : i32
    return %c0_i32, %c0_i32_0 : i32, i32
  }
  func.func @transform_11(%arg0: i32) -> (i32, i32) {
    %c0_i32 = arith.constant 0 : i32
    %c0_i32_0 = arith.constant 0 : i32
    %c0_i32_1 = arith.constant 0 : i32
    return %c0_i32, %c0_i32_0 : i32, i32
  }
  func.func @transform_12(%arg0: i32) -> (i32, i32) {
    %c0_i32 = arith.constant 0 : i32
    %c0_i32_0 = arith.constant 0 : i32
    %c0_i32_1 = arith.constant 0 : i32
    return %c0_i32, %c0_i32_0 : i32, i32
  }
  func.func @transform_13(%arg0: i32) -> (i32, i32) {
    %c0_i32 = arith.constant 0 : i32
    %c0_i32_0 = arith.constant 0 : i32
    %c0_i32_1 = arith.constant 0 : i32
    return %c0_i32, %c0_i32_0 : i32, i32
  }
  func.func @transform_14(%arg0: i32) -> (i32, i32) {
    %c0_i32 = arith.constant 0 : i32
    %c0_i32_0 = arith.constant 0 : i32
    %c0_i32_1 = arith.constant 0 : i32
    return %c0_i32, %c0_i32_0 : i32, i32
  }
  func.func @transform_15(%arg0: i32) -> (i32, i32) {
    %c0_i32 = arith.constant 0 : i32
    %c0_i32_0 = arith.constant 0 : i32
    %c0_i32_1 = arith.constant 0 : i32
    return %c0_i32, %c0_i32_0 : i32, i32
  }
  func.func @transform_16(%arg0: i32) -> (i32, i32) {
    %c0_i32 = arith.constant 0 : i32
    %c0_i32_0 = arith.constant 0 : i32
    %c0_i32_1 = arith.constant 0 : i32
    return %c0_i32, %c0_i32_0 : i32, i32
  }
  func.func @transform_17(%arg0: i32) -> (i32, i32) {
    %c0_i32 = arith.constant 0 : i32
    %c0_i32_0 = arith.constant 0 : i32
    %c0_i32_1 = arith.constant 0 : i32
    return %c0_i32, %c0_i32_0 : i32, i32
  }
  func.func @transform_18(%arg0: i32) -> (i32, i32) {
    %c0_i32 = arith.constant 0 : i32
    %c0_i32_0 = arith.constant 0 : i32
    %c0_i32_1 = arith.constant 0 : i32
    return %c0_i32, %c0_i32_0 : i32, i32
  }
  func.func @transform_19(%arg0: i32) -> (i32, i32) {
    %c0_i32 = arith.constant 0 : i32
    %c0_i32_0 = arith.constant 0 : i32
    %c0_i32_1 = arith.constant 0 : i32
    return %c0_i32, %c0_i32_0 : i32, i32
  }
  func.func @transform_20(%arg0: i32) -> (i32, i32) {
    %c0_i32 = arith.constant 0 : i32
    %c0_i32_0 = arith.constant 0 : i32
    %c0_i32_1 = arith.constant 0 : i32
    return %c0_i32, %c0_i32_0 : i32, i32
  }
  func.func @transform_21(%arg0: i32) -> (i32, i32) {
    %c0_i32 = arith.constant 0 : i32
    %c0_i32_0 = arith.constant 0 : i32
    %c0_i32_1 = arith.constant 0 : i32
    return %c0_i32, %c0_i32_0 : i32, i32
  }
  func.func @transform_22(%arg0: i32) -> (i32, i32) {
    %c0_i32 = arith.constant 0 : i32
    %c0_i32_0 = arith.constant 0 : i32
    %c0_i32_1 = arith.constant 0 : i32
    return %c0_i32, %c0_i32_0 : i32, i32
  }
  func.func @transform_23(%arg0: i32) -> (i32, i32) {
    %c0_i32 = arith.constant 0 : i32
    %c0_i32_0 = arith.constant 0 : i32
    return %arg0, %c0_i32 : i32, i32
  }
  func.func @transform_24(%arg0: i32) -> (i32, i32, i32) {
    %c0_i32 = arith.constant 0 : i32
    %c0_i32_0 = arith.constant 0 : i32
    %c0_i32_1 = arith.constant 0 : i32
    return %c0_i32, %arg0, %c0_i32_0 : i32, i32, i32
  }
}

module attributes {stable_mosaic.version = 11 : i64} {
  func.func @_ff_kernel(%arg0: i32, %arg1: memref<8x256xf32, #tpu.memory_space<vmem>>, %arg2: memref<3x8x16xf32, #tpu.memory_space<vmem>>, %arg3: memref<16x32xf32, #tpu.memory_space<vmem>>, %arg4: memref<256x1024xbf16, #tpu.memory_space<vmem>>, %arg5: memref<32x1024xbf16, #tpu.memory_space<vmem>>, %arg6: memref<1x1024xf32, #tpu.memory_space<vmem>>, %arg7: memref<32x32xf32, #tpu.memory_space<vmem>>, %arg8: memref<1024x32xbf16, #tpu.memory_space<vmem>>, %arg9: memref<1x32xf32, #tpu.memory_space<vmem>>, %arg10: memref<32x32xf32, #tpu.memory_space<vmem>>, %arg11: memref<1024x256xbf16, #tpu.memory_space<vmem>>, %arg12: memref<32x256xbf16, #tpu.memory_space<vmem>>, %arg13: memref<1x256xf32, #tpu.memory_space<vmem>>, %arg14: memref<32x16xf32, #tpu.memory_space<vmem>>, %arg15: memref<256x16xbf16, #tpu.memory_space<vmem>>, %arg16: memref<1x16xf32, #tpu.memory_space<vmem>>, %arg17: memref<1x256xf32, #tpu.memory_space<vmem>>, %arg18: memref<1x256xf32, #tpu.memory_space<vmem>>, %arg19: memref<8x256xf32, #tpu.memory_space<vmem>>, %arg20: memref<3x8x16xf32, #tpu.memory_space<vmem>>) attributes {dimension_semantics = [#tpu.dimension_semantics<parallel>], iteration_bounds = array<i64: 1>, scalar_prefetch = 0 : i64, scratch_operands = 0 : i64, tpu.core_type = #tpu.core_type<tc>, window_params = [{transform_indices = @transform_0, window_bounds = array<i64: 8, 256>}, {transform_indices = @transform_1, window_bounds = array<i64: 3, 8, 16>}, {pipeline_mode = #tpu.pipeline_mode<synchronous>, transform_indices = @transform_2, window_bounds = array<i64: 16, 32>}, {pipeline_mode = #tpu.pipeline_mode<synchronous>, transform_indices = @transform_3, window_bounds = array<i64: 256, 1024>}, {pipeline_mode = #tpu.pipeline_mode<synchronous>, transform_indices = @transform_4, window_bounds = array<i64: 32, 1024>}, {pipeline_mode = #tpu.pipeline_mode<synchronous>, transform_indices = @transform_5, window_bounds = array<i64: 1, 1024>}, {pipeline_mode = #tpu.pipeline_mode<synchronous>, transform_indices = @transform_6, window_bounds = array<i64: 32, 32>}, {pipeline_mode = #tpu.pipeline_mode<synchronous>, transform_indices = @transform_7, window_bounds = array<i64: 1024, 32>}, {pipeline_mode = #tpu.pipeline_mode<synchronous>, transform_indices = @transform_8, window_bounds = array<i64: 1, 32>}, {pipeline_mode = #tpu.pipeline_mode<synchronous>, transform_indices = @transform_9, window_bounds = array<i64: 32, 32>}, {pipeline_mode = #tpu.pipeline_mode<synchronous>, transform_indices = @transform_10, window_bounds = array<i64: 1024, 256>}, {pipeline_mode = #tpu.pipeline_mode<synchronous>, transform_indices = @transform_11, window_bounds = array<i64: 32, 256>}, {pipeline_mode = #tpu.pipeline_mode<synchronous>, transform_indices = @transform_12, window_bounds = array<i64: 1, 256>}, {pipeline_mode = #tpu.pipeline_mode<synchronous>, transform_indices = @transform_13, window_bounds = array<i64: 32, 16>}, {pipeline_mode = #tpu.pipeline_mode<synchronous>, transform_indices = @transform_14, window_bounds = array<i64: 256, 16>}, {pipeline_mode = #tpu.pipeline_mode<synchronous>, transform_indices = @transform_15, window_bounds = array<i64: 1, 16>}, {pipeline_mode = #tpu.pipeline_mode<synchronous>, transform_indices = @transform_16, window_bounds = array<i64: 1, 256>}, {pipeline_mode = #tpu.pipeline_mode<synchronous>, transform_indices = @transform_17, window_bounds = array<i64: 1, 256>}, {transform_indices = @transform_18, window_bounds = array<i64: 8, 256>}, {transform_indices = @transform_19, window_bounds = array<i64: 3, 8, 16>}]} {
    %c0 = arith.constant 0 : index
    %c0_0 = arith.constant 0 : index
    %0 = vector.load %arg3[%c0, %c0_0] : memref<16x32xf32, #tpu.memory_space<vmem>>, vector<16x32xf32>
    %c0_1 = arith.constant 0 : index
    %c0_2 = arith.constant 0 : index
    %1 = vector.load %arg4[%c0_1, %c0_2] : memref<256x1024xbf16, #tpu.memory_space<vmem>>, vector<256x1024xbf16>
    %c0_3 = arith.constant 0 : index
    %c0_4 = arith.constant 0 : index
    %2 = vector.load %arg5[%c0_3, %c0_4] : memref<32x1024xbf16, #tpu.memory_space<vmem>>, vector<32x1024xbf16>
    %c0_5 = arith.constant 0 : index
    %c0_6 = arith.constant 0 : index
    %3 = vector.load %arg6[%c0_5, %c0_6] : memref<1x1024xf32, #tpu.memory_space<vmem>>, vector<1x1024xf32>
    %c0_7 = arith.constant 0 : index
    %c0_8 = arith.constant 0 : index
    %4 = vector.load %arg7[%c0_7, %c0_8] : memref<32x32xf32, #tpu.memory_space<vmem>>, vector<32x32xf32>
    %c0_9 = arith.constant 0 : index
    %c0_10 = arith.constant 0 : index
    %5 = vector.load %arg8[%c0_9, %c0_10] : memref<1024x32xbf16, #tpu.memory_space<vmem>>, vector<1024x32xbf16>
    %c0_11 = arith.constant 0 : index
    %c0_12 = arith.constant 0 : index
    %6 = vector.load %arg9[%c0_11, %c0_12] : memref<1x32xf32, #tpu.memory_space<vmem>>, vector<1x32xf32>
    %c0_13 = arith.constant 0 : index
    %c0_14 = arith.constant 0 : index
    %7 = vector.load %arg10[%c0_13, %c0_14] : memref<32x32xf32, #tpu.memory_space<vmem>>, vector<32x32xf32>
    %c0_15 = arith.constant 0 : index
    %c0_16 = arith.constant 0 : index
    %8 = vector.load %arg11[%c0_15, %c0_16] : memref<1024x256xbf16, #tpu.memory_space<vmem>>, vector<1024x256xbf16>
    %c0_17 = arith.constant 0 : index
    %c0_18 = arith.constant 0 : index
    %9 = vector.load %arg12[%c0_17, %c0_18] : memref<32x256xbf16, #tpu.memory_space<vmem>>, vector<32x256xbf16>
    %c0_19 = arith.constant 0 : index
    %c0_20 = arith.constant 0 : index
    %10 = vector.load %arg13[%c0_19, %c0_20] : memref<1x256xf32, #tpu.memory_space<vmem>>, vector<1x256xf32>
    %c0_21 = arith.constant 0 : index
    %c0_22 = arith.constant 0 : index
    %11 = vector.load %arg14[%c0_21, %c0_22] : memref<32x16xf32, #tpu.memory_space<vmem>>, vector<32x16xf32>
    %c0_23 = arith.constant 0 : index
    %c0_24 = arith.constant 0 : index
    %12 = vector.load %arg15[%c0_23, %c0_24] : memref<256x16xbf16, #tpu.memory_space<vmem>>, vector<256x16xbf16>
    %c0_25 = arith.constant 0 : index
    %c0_26 = arith.constant 0 : index
    %13 = vector.load %arg16[%c0_25, %c0_26] : memref<1x16xf32, #tpu.memory_space<vmem>>, vector<1x16xf32>
    %c0_27 = arith.constant 0 : index
    %c0_28 = arith.constant 0 : index
    %14 = vector.load %arg17[%c0_27, %c0_28] : memref<1x256xf32, #tpu.memory_space<vmem>>, vector<1x256xf32>
    %c0_29 = arith.constant 0 : index
    %c0_30 = arith.constant 0 : index
    %15 = vector.load %arg18[%c0_29, %c0_30] : memref<1x256xf32, #tpu.memory_space<vmem>>, vector<1x256xf32>
    %c0_31 = arith.constant 0 : index
    %c0_32 = arith.constant 0 : index
    %16 = vector.load %arg1[%c0_31, %c0_32] : memref<8x256xf32, #tpu.memory_space<vmem>>, vector<8x256xf32>
    %c0_33 = arith.constant 0 : index
    %c0_34 = arith.constant 0 : index
    %c0_35 = arith.constant 0 : index
    %17 = vector.load %arg2[%c0_33, %c0_34, %c0_35] : memref<3x8x16xf32, #tpu.memory_space<vmem>>, vector<1x8x16xf32>
    %18 = vector.shape_cast %17 : vector<1x8x16xf32> to vector<8x16xf32>
    %c1 = arith.constant 1 : index
    %c0_36 = arith.constant 0 : index
    %c0_37 = arith.constant 0 : index
    %19 = vector.load %arg2[%c1, %c0_36, %c0_37] : memref<3x8x16xf32, #tpu.memory_space<vmem>>, vector<1x8x16xf32>
    %20 = vector.shape_cast %19 : vector<1x8x16xf32> to vector<8x16xf32>
    %c2 = arith.constant 2 : index
    %c0_38 = arith.constant 0 : index
    %c0_39 = arith.constant 0 : index
    %21 = vector.load %arg2[%c2, %c0_38, %c0_39] : memref<3x8x16xf32, #tpu.memory_space<vmem>>, vector<1x8x16xf32>
    %22 = vector.shape_cast %21 : vector<1x8x16xf32> to vector<8x16xf32>
    %cst = arith.constant dense<0.000000e+00> : vector<8x32xf32>
    %23 = tpu.matmul %18, %0, %cst {dimension_numbers = #tpu.dot_dimension_numbers<[1], [0], [0], [1], [0, 0, 1, 1], [], []>} : vector<8x16xf32>, vector<16x32xf32>, vector<8x32xf32> -> vector<8x32xf32>
    %cst_40 = arith.constant dense<0.000000e+00> : vector<8x32xf32>
    %24 = tpu.matmul %20, %0, %cst_40 {dimension_numbers = #tpu.dot_dimension_numbers<[1], [0], [0], [1], [0, 0, 1, 1], [], []>} : vector<8x16xf32>, vector<16x32xf32>, vector<8x32xf32> -> vector<8x32xf32>
    %cst_41 = arith.constant dense<0.000000e+00> : vector<8x32xf32>
    %25 = tpu.matmul %22, %0, %cst_41 {dimension_numbers = #tpu.dot_dimension_numbers<[1], [0], [0], [1], [0, 0, 1, 1], [], []>} : vector<8x16xf32>, vector<16x32xf32>, vector<8x32xf32> -> vector<8x32xf32>
    %26 = arith.mulf %23, %23 : vector<8x32xf32>
    %27 = arith.mulf %24, %24 : vector<8x32xf32>
    %28 = arith.addf %26, %27 : vector<8x32xf32>
    %29 = arith.mulf %25, %25 : vector<8x32xf32>
    %30 = arith.addf %28, %29 : vector<8x32xf32>
    %cst_42 = arith.constant 9.99999993E-9 : f32
    %31 = vector.broadcast %cst_42 : f32 to vector<8x32xf32>
    %32 = arith.maximumf %30, %31 : vector<8x32xf32>
    %33 = math.sqrt %32 : vector<8x32xf32>
    %34 = arith.truncf %16 : vector<8x256xf32> to vector<8x256xbf16>
    %cst_43 = arith.constant dense<0.000000e+00> : vector<8x1024xf32>
    %35 = tpu.matmul %34, %1, %cst_43 {dimension_numbers = #tpu.dot_dimension_numbers<[1], [0], [0], [1], [0, 0, 1, 1], [], []>} : vector<8x256xbf16>, vector<256x1024xbf16>, vector<8x1024xf32> -> vector<8x1024xf32>
    %36 = arith.truncf %33 : vector<8x32xf32> to vector<8x32xbf16>
    %cst_44 = arith.constant dense<0.000000e+00> : vector<8x1024xf32>
    %37 = tpu.matmul %36, %2, %cst_44 {dimension_numbers = #tpu.dot_dimension_numbers<[1], [0], [0], [1], [0, 0, 1, 1], [], []>} : vector<8x32xbf16>, vector<32x1024xbf16>, vector<8x1024xf32> -> vector<8x1024xf32>
    %38 = arith.addf %35, %37 : vector<8x1024xf32>
    %39 = vector.broadcast %3 : vector<1x1024xf32> to vector<8x1024xf32>
    %40 = arith.addf %38, %39 : vector<8x1024xf32>
    %cst_45 = arith.constant dense<0.000000e+00> : vector<8x32xf32>
    %41 = tpu.matmul %23, %4, %cst_45 {dimension_numbers = #tpu.dot_dimension_numbers<[1], [0], [0], [1], [0, 0, 1, 1], [], []>} : vector<8x32xf32>, vector<32x32xf32>, vector<8x32xf32> -> vector<8x32xf32>
    %cst_46 = arith.constant dense<0.000000e+00> : vector<8x32xf32>
    %42 = tpu.matmul %24, %4, %cst_46 {dimension_numbers = #tpu.dot_dimension_numbers<[1], [0], [0], [1], [0, 0, 1, 1], [], []>} : vector<8x32xf32>, vector<32x32xf32>, vector<8x32xf32> -> vector<8x32xf32>
    %cst_47 = arith.constant dense<0.000000e+00> : vector<8x32xf32>
    %43 = tpu.matmul %25, %4, %cst_47 {dimension_numbers = #tpu.dot_dimension_numbers<[1], [0], [0], [1], [0, 0, 1, 1], [], []>} : vector<8x32xf32>, vector<32x32xf32>, vector<8x32xf32> -> vector<8x32xf32>
    %44 = arith.negf %40 : vector<8x1024xf32>
    %45 = math.exp %44 : vector<8x1024xf32>
    %cst_48 = arith.constant 1.000000e+00 : f32
    %46 = vector.broadcast %cst_48 : f32 to vector<8x1024xf32>
    %47 = arith.addf %46, %45 : vector<8x1024xf32>
    %48 = arith.divf %46, %47 : vector<8x1024xf32>
    %49 = arith.truncf %48 : vector<8x1024xf32> to vector<8x1024xbf16>
    %cst_49 = arith.constant dense<0.000000e+00> : vector<8x32xf32>
    %50 = tpu.matmul %49, %5, %cst_49 {dimension_numbers = #tpu.dot_dimension_numbers<[1], [0], [0], [1], [0, 0, 1, 1], [], []>} : vector<8x1024xbf16>, vector<1024x32xbf16>, vector<8x32xf32> -> vector<8x32xf32>
    %51 = vector.broadcast %6 : vector<1x32xf32> to vector<8x32xf32>
    %52 = arith.addf %50, %51 : vector<8x32xf32>
    %53 = arith.negf %52 : vector<8x32xf32>
    %54 = math.exp %53 : vector<8x32xf32>
    %cst_50 = arith.constant 1.000000e+00 : f32
    %55 = vector.broadcast %cst_50 : f32 to vector<8x32xf32>
    %56 = arith.addf %55, %54 : vector<8x32xf32>
    %57 = arith.divf %55, %56 : vector<8x32xf32>
    %58 = arith.mulf %41, %57 : vector<8x32xf32>
    %59 = arith.mulf %42, %57 : vector<8x32xf32>
    %60 = arith.mulf %43, %57 : vector<8x32xf32>
    %cst_51 = arith.constant 0.000000e+00 : f32
    %61 = vector.broadcast %cst_51 : f32 to vector<8x1024xf32>
    %62 = arith.maximumf %40, %61 : vector<8x1024xf32>
    %cst_52 = arith.constant dense<0.000000e+00> : vector<8x32xf32>
    %63 = tpu.matmul %58, %7, %cst_52 {dimension_numbers = #tpu.dot_dimension_numbers<[1], [0], [0], [1], [0, 0, 1, 1], [], []>} : vector<8x32xf32>, vector<32x32xf32>, vector<8x32xf32> -> vector<8x32xf32>
    %cst_53 = arith.constant dense<0.000000e+00> : vector<8x32xf32>
    %64 = tpu.matmul %59, %7, %cst_53 {dimension_numbers = #tpu.dot_dimension_numbers<[1], [0], [0], [1], [0, 0, 1, 1], [], []>} : vector<8x32xf32>, vector<32x32xf32>, vector<8x32xf32> -> vector<8x32xf32>
    %cst_54 = arith.constant dense<0.000000e+00> : vector<8x32xf32>
    %65 = tpu.matmul %60, %7, %cst_54 {dimension_numbers = #tpu.dot_dimension_numbers<[1], [0], [0], [1], [0, 0, 1, 1], [], []>} : vector<8x32xf32>, vector<32x32xf32>, vector<8x32xf32> -> vector<8x32xf32>
    %66 = arith.mulf %63, %63 : vector<8x32xf32>
    %67 = arith.mulf %64, %64 : vector<8x32xf32>
    %68 = arith.addf %66, %67 : vector<8x32xf32>
    %69 = arith.mulf %65, %65 : vector<8x32xf32>
    %70 = arith.addf %68, %69 : vector<8x32xf32>
    %cst_55 = arith.constant 9.99999993E-9 : f32
    %71 = vector.broadcast %cst_55 : f32 to vector<8x32xf32>
    %72 = arith.maximumf %70, %71 : vector<8x32xf32>
    %73 = math.sqrt %72 : vector<8x32xf32>
    %74 = arith.truncf %62 : vector<8x1024xf32> to vector<8x1024xbf16>
    %cst_56 = arith.constant dense<0.000000e+00> : vector<8x256xf32>
    %75 = tpu.matmul %74, %8, %cst_56 {dimension_numbers = #tpu.dot_dimension_numbers<[1], [0], [0], [1], [0, 0, 1, 1], [], []>} : vector<8x1024xbf16>, vector<1024x256xbf16>, vector<8x256xf32> -> vector<8x256xf32>
    %76 = arith.truncf %73 : vector<8x32xf32> to vector<8x32xbf16>
    %cst_57 = arith.constant dense<0.000000e+00> : vector<8x256xf32>
    %77 = tpu.matmul %76, %9, %cst_57 {dimension_numbers = #tpu.dot_dimension_numbers<[1], [0], [0], [1], [0, 0, 1, 1], [], []>} : vector<8x32xbf16>, vector<32x256xbf16>, vector<8x256xf32> -> vector<8x256xf32>
    %78 = arith.addf %75, %77 : vector<8x256xf32>
    %79 = vector.broadcast %10 : vector<1x256xf32> to vector<8x256xf32>
    %80 = arith.addf %78, %79 : vector<8x256xf32>
    %cst_58 = arith.constant dense<0.000000e+00> : vector<8x16xf32>
    %81 = tpu.matmul %63, %11, %cst_58 {dimension_numbers = #tpu.dot_dimension_numbers<[1], [0], [0], [1], [0, 0, 1, 1], [], []>} : vector<8x32xf32>, vector<32x16xf32>, vector<8x16xf32> -> vector<8x16xf32>
    %cst_59 = arith.constant dense<0.000000e+00> : vector<8x16xf32>
    %82 = tpu.matmul %64, %11, %cst_59 {dimension_numbers = #tpu.dot_dimension_numbers<[1], [0], [0], [1], [0, 0, 1, 1], [], []>} : vector<8x32xf32>, vector<32x16xf32>, vector<8x16xf32> -> vector<8x16xf32>
    %cst_60 = arith.constant dense<0.000000e+00> : vector<8x16xf32>
    %83 = tpu.matmul %65, %11, %cst_60 {dimension_numbers = #tpu.dot_dimension_numbers<[1], [0], [0], [1], [0, 0, 1, 1], [], []>} : vector<8x32xf32>, vector<32x16xf32>, vector<8x16xf32> -> vector<8x16xf32>
    %84 = arith.truncf %80 : vector<8x256xf32> to vector<8x256xbf16>
    %cst_61 = arith.constant dense<0.000000e+00> : vector<8x16xf32>
    %85 = tpu.matmul %84, %12, %cst_61 {dimension_numbers = #tpu.dot_dimension_numbers<[1], [0], [0], [1], [0, 0, 1, 1], [], []>} : vector<8x256xbf16>, vector<256x16xbf16>, vector<8x16xf32> -> vector<8x16xf32>
    %86 = vector.broadcast %13 : vector<1x16xf32> to vector<8x16xf32>
    %87 = arith.addf %85, %86 : vector<8x16xf32>
    %88 = arith.negf %87 : vector<8x16xf32>
    %89 = math.exp %88 : vector<8x16xf32>
    %cst_62 = arith.constant 1.000000e+00 : f32
    %90 = vector.broadcast %cst_62 : f32 to vector<8x16xf32>
    %91 = arith.addf %90, %89 : vector<8x16xf32>
    %92 = arith.divf %90, %91 : vector<8x16xf32>
    %93 = arith.mulf %81, %92 : vector<8x16xf32>
    %94 = arith.mulf %82, %92 : vector<8x16xf32>
    %95 = arith.mulf %83, %92 : vector<8x16xf32>
    %96 = arith.addf %16, %80 : vector<8x256xf32>
    %97 = arith.addf %18, %93 : vector<8x16xf32>
    %98 = arith.addf %20, %94 : vector<8x16xf32>
    %99 = arith.addf %22, %95 : vector<8x16xf32>
    %cst_63 = arith.constant dense<0.000000e+00> : vector<8xf32>
    %100 = vector.multi_reduction <add>, %96, %cst_63 [1] : vector<8x256xf32> to vector<8xf32>
    %101 = vector.shape_cast %100 : vector<8xf32> to vector<8x1xf32>
    %cst_64 = arith.constant 2.560000e+02 : f32
    %102 = vector.broadcast %cst_64 : f32 to vector<8x1xf32>
    %103 = arith.divf %101, %102 : vector<8x1xf32>
    %104 = vector.broadcast %103 : vector<8x1xf32> to vector<8x256xf32>
    %105 = arith.subf %96, %104 : vector<8x256xf32>
    %106 = arith.mulf %105, %105 : vector<8x256xf32>
    %cst_65 = arith.constant dense<0.000000e+00> : vector<8xf32>
    %107 = vector.multi_reduction <add>, %106, %cst_65 [1] : vector<8x256xf32> to vector<8xf32>
    %108 = vector.shape_cast %107 : vector<8xf32> to vector<8x1xf32>
    %cst_66 = arith.constant 2.560000e+02 : f32
    %109 = vector.broadcast %cst_66 : f32 to vector<8x1xf32>
    %110 = arith.divf %108, %109 : vector<8x1xf32>
    %111 = vector.broadcast %103 : vector<8x1xf32> to vector<8x256xf32>
    %112 = arith.subf %96, %111 : vector<8x256xf32>
    %cst_67 = arith.constant 9.99999974E-6 : f32
    %113 = vector.broadcast %cst_67 : f32 to vector<8x1xf32>
    %114 = arith.addf %110, %113 : vector<8x1xf32>
    %115 = math.rsqrt %114 : vector<8x1xf32>
    %116 = vector.broadcast %115 : vector<8x1xf32> to vector<8x256xf32>
    %117 = arith.mulf %112, %116 : vector<8x256xf32>
    %118 = vector.broadcast %14 : vector<1x256xf32> to vector<8x256xf32>
    %119 = arith.mulf %117, %118 : vector<8x256xf32>
    %120 = vector.broadcast %15 : vector<1x256xf32> to vector<8x256xf32>
    %121 = arith.addf %119, %120 : vector<8x256xf32>
    %122 = arith.mulf %97, %97 : vector<8x16xf32>
    %123 = arith.mulf %98, %98 : vector<8x16xf32>
    %124 = arith.addf %122, %123 : vector<8x16xf32>
    %125 = arith.mulf %99, %99 : vector<8x16xf32>
    %126 = arith.addf %124, %125 : vector<8x16xf32>
    %cst_68 = arith.constant 9.99999993E-9 : f32
    %127 = vector.broadcast %cst_68 : f32 to vector<8x16xf32>
    %128 = arith.maximumf %126, %127 : vector<8x16xf32>
    %cst_69 = arith.constant dense<0.000000e+00> : vector<8xf32>
    %129 = vector.multi_reduction <add>, %128, %cst_69 [1] : vector<8x16xf32> to vector<8xf32>
    %130 = vector.shape_cast %129 : vector<8xf32> to vector<8x1xf32>
    %cst_70 = arith.constant 1.600000e+01 : f32
    %131 = vector.broadcast %cst_70 : f32 to vector<8x1xf32>
    %132 = arith.divf %130, %131 : vector<8x1xf32>
    %133 = math.sqrt %132 : vector<8x1xf32>
    %134 = vector.broadcast %133 : vector<8x1xf32> to vector<8x16xf32>
    %135 = arith.divf %97, %134 : vector<8x16xf32>
    %136 = vector.broadcast %133 : vector<8x1xf32> to vector<8x16xf32>
    %137 = arith.divf %98, %136 : vector<8x16xf32>
    %138 = vector.broadcast %133 : vector<8x1xf32> to vector<8x16xf32>
    %139 = arith.divf %99, %138 : vector<8x16xf32>
    %c0_71 = arith.constant 0 : index
    %c0_72 = arith.constant 0 : index
    %140 = vector.load %arg19[%c0_71, %c0_72] : memref<8x256xf32, #tpu.memory_space<vmem>>, vector<8x256xf32>
    tpu.vector_store %arg19[%c0_71, %c0_72], %121 {strides = array<i32>} : memref<8x256xf32, #tpu.memory_space<vmem>>, vector<8x256xf32>,
    %c0_73 = arith.constant 0 : index
    %c0_74 = arith.constant 0 : index
    %c0_75 = arith.constant 0 : index
    %141 = vector.load %arg20[%c0_73, %c0_74, %c0_75] : memref<3x8x16xf32, #tpu.memory_space<vmem>>, vector<1x8x16xf32>
    %142 = vector.shape_cast %141 : vector<1x8x16xf32> to vector<8x16xf32>
    %143 = vector.shape_cast %135 : vector<8x16xf32> to vector<1x8x16xf32>
    tpu.vector_store %arg20[%c0_73, %c0_74, %c0_75], %143 {strides = array<i32>} : memref<3x8x16xf32, #tpu.memory_space<vmem>>, vector<1x8x16xf32>,
    %c1_76 = arith.constant 1 : index
    %c0_77 = arith.constant 0 : index
    %c0_78 = arith.constant 0 : index
    %144 = vector.load %arg20[%c1_76, %c0_77, %c0_78] : memref<3x8x16xf32, #tpu.memory_space<vmem>>, vector<1x8x16xf32>
    %145 = vector.shape_cast %144 : vector<1x8x16xf32> to vector<8x16xf32>
    %146 = vector.shape_cast %137 : vector<8x16xf32> to vector<1x8x16xf32>
    tpu.vector_store %arg20[%c1_76, %c0_77, %c0_78], %146 {strides = array<i32>} : memref<3x8x16xf32, #tpu.memory_space<vmem>>, vector<1x8x16xf32>,
    %c2_79 = arith.constant 2 : index
    %c0_80 = arith.constant 0 : index
    %c0_81 = arith.constant 0 : index
    %147 = vector.load %arg20[%c2_79, %c0_80, %c0_81] : memref<3x8x16xf32, #tpu.memory_space<vmem>>, vector<1x8x16xf32>
    %148 = vector.shape_cast %147 : vector<1x8x16xf32> to vector<8x16xf32>
    %149 = vector.shape_cast %139 : vector<8x16xf32> to vector<1x8x16xf32>
    tpu.vector_store %arg20[%c2_79, %c0_80, %c0_81], %149 {strides = array<i32>} : memref<3x8x16xf32, #tpu.memory_space<vmem>>, vector<1x8x16xf32>,
    return
  }
  func.func @transform_0(%arg0: i32) -> (i32, i32) {
    %c0_i32 = arith.constant 0 : i32
    %c0_i32_0 = arith.constant 0 : i32
    return %arg0, %c0_i32 : i32, i32
  }
  func.func @transform_1(%arg0: i32) -> (i32, i32, i32) {
    %c0_i32 = arith.constant 0 : i32
    %c0_i32_0 = arith.constant 0 : i32
    %c0_i32_1 = arith.constant 0 : i32
    return %c0_i32, %arg0, %c0_i32_0 : i32, i32, i32
  }
  func.func @transform_2(%arg0: i32) -> (i32, i32) {
    %c0_i32 = arith.constant 0 : i32
    %c0_i32_0 = arith.constant 0 : i32
    %c0_i32_1 = arith.constant 0 : i32
    return %c0_i32, %c0_i32_0 : i32, i32
  }
  func.func @transform_3(%arg0: i32) -> (i32, i32) {
    %c0_i32 = arith.constant 0 : i32
    %c0_i32_0 = arith.constant 0 : i32
    %c0_i32_1 = arith.constant 0 : i32
    return %c0_i32, %c0_i32_0 : i32, i32
  }
  func.func @transform_4(%arg0: i32) -> (i32, i32) {
    %c0_i32 = arith.constant 0 : i32
    %c0_i32_0 = arith.constant 0 : i32
    %c0_i32_1 = arith.constant 0 : i32
    return %c0_i32, %c0_i32_0 : i32, i32
  }
  func.func @transform_5(%arg0: i32) -> (i32, i32) {
    %c0_i32 = arith.constant 0 : i32
    %c0_i32_0 = arith.constant 0 : i32
    %c0_i32_1 = arith.constant 0 : i32
    return %c0_i32, %c0_i32_0 : i32, i32
  }
  func.func @transform_6(%arg0: i32) -> (i32, i32) {
    %c0_i32 = arith.constant 0 : i32
    %c0_i32_0 = arith.constant 0 : i32
    %c0_i32_1 = arith.constant 0 : i32
    return %c0_i32, %c0_i32_0 : i32, i32
  }
  func.func @transform_7(%arg0: i32) -> (i32, i32) {
    %c0_i32 = arith.constant 0 : i32
    %c0_i32_0 = arith.constant 0 : i32
    %c0_i32_1 = arith.constant 0 : i32
    return %c0_i32, %c0_i32_0 : i32, i32
  }
  func.func @transform_8(%arg0: i32) -> (i32, i32) {
    %c0_i32 = arith.constant 0 : i32
    %c0_i32_0 = arith.constant 0 : i32
    %c0_i32_1 = arith.constant 0 : i32
    return %c0_i32, %c0_i32_0 : i32, i32
  }
  func.func @transform_9(%arg0: i32) -> (i32, i32) {
    %c0_i32 = arith.constant 0 : i32
    %c0_i32_0 = arith.constant 0 : i32
    %c0_i32_1 = arith.constant 0 : i32
    return %c0_i32, %c0_i32_0 : i32, i32
  }
  func.func @transform_10(%arg0: i32) -> (i32, i32) {
    %c0_i32 = arith.constant 0 : i32
    %c0_i32_0 = arith.constant 0 : i32
    %c0_i32_1 = arith.constant 0 : i32
    return %c0_i32, %c0_i32_0 : i32, i32
  }
  func.func @transform_11(%arg0: i32) -> (i32, i32) {
    %c0_i32 = arith.constant 0 : i32
    %c0_i32_0 = arith.constant 0 : i32
    %c0_i32_1 = arith.constant 0 : i32
    return %c0_i32, %c0_i32_0 : i32, i32
  }
  func.func @transform_12(%arg0: i32) -> (i32, i32) {
    %c0_i32 = arith.constant 0 : i32
    %c0_i32_0 = arith.constant 0 : i32
    %c0_i32_1 = arith.constant 0 : i32
    return %c0_i32, %c0_i32_0 : i32, i32
  }
  func.func @transform_13(%arg0: i32) -> (i32, i32) {
    %c0_i32 = arith.constant 0 : i32
    %c0_i32_0 = arith.constant 0 : i32
    %c0_i32_1 = arith.constant 0 : i32
    return %c0_i32, %c0_i32_0 : i32, i32
  }
  func.func @transform_14(%arg0: i32) -> (i32, i32) {
    %c0_i32 = arith.constant 0 : i32
    %c0_i32_0 = arith.constant 0 : i32
    %c0_i32_1 = arith.constant 0 : i32
    return %c0_i32, %c0_i32_0 : i32, i32
  }
  func.func @transform_15(%arg0: i32) -> (i32, i32) {
    %c0_i32 = arith.constant 0 : i32
    %c0_i32_0 = arith.constant 0 : i32
    %c0_i32_1 = arith.constant 0 : i32
    return %c0_i32, %c0_i32_0 : i32, i32
  }
  func.func @transform_16(%arg0: i32) -> (i32, i32) {
    %c0_i32 = arith.constant 0 : i32
    %c0_i32_0 = arith.constant 0 : i32
    %c0_i32_1 = arith.constant 0 : i32
    return %c0_i32, %c0_i32_0 : i32, i32
  }
  func.func @transform_17(%arg0: i32) -> (i32, i32) {
    %c0_i32 = arith.constant 0 : i32
    %c0_i32_0 = arith.constant 0 : i32
    %c0_i32_1 = arith.constant 0 : i32
    return %c0_i32, %c0_i32_0 : i32, i32
  }
  func.func @transform_18(%arg0: i32) -> (i32, i32) {
    %c0_i32 = arith.constant 0 : i32
    %c0_i32_0 = arith.constant 0 : i32
    return %arg0, %c0_i32 : i32, i32
  }
  func.func @transform_19(%arg0: i32) -> (i32, i32, i32) {
    %c0_i32 = arith.constant 0 : i32
    %c0_i32_0 = arith.constant 0 : i32
    %c0_i32_1 = arith.constant 0 : i32
    return %c0_i32, %arg0, %c0_i32_0 : i32, i32, i32
  }
}

module attributes {stable_mosaic.version = 11 : i64} {
  func.func @_res_ln_kernel(%arg0: i32, %arg1: memref<8x256xf32, #tpu.memory_space<vmem>>, %arg2: memref<8x256xf32, #tpu.memory_space<vmem>>, %arg3: memref<3x8x16xf32, #tpu.memory_space<vmem>>, %arg4: memref<3x8x16xf32, #tpu.memory_space<vmem>>, %arg5: memref<1x256xf32, #tpu.memory_space<vmem>>, %arg6: memref<1x256xf32, #tpu.memory_space<vmem>>, %arg7: memref<8x256xf32, #tpu.memory_space<vmem>>, %arg8: memref<3x8x16xf32, #tpu.memory_space<vmem>>) attributes {dimension_semantics = [#tpu.dimension_semantics<parallel>], iteration_bounds = array<i64: 1>, scalar_prefetch = 0 : i64, scratch_operands = 0 : i64, tpu.core_type = #tpu.core_type<tc>, window_params = [{transform_indices = @transform_0, window_bounds = array<i64: 8, 256>}, {transform_indices = @transform_1, window_bounds = array<i64: 8, 256>}, {transform_indices = @transform_2, window_bounds = array<i64: 3, 8, 16>}, {transform_indices = @transform_3, window_bounds = array<i64: 3, 8, 16>}, {pipeline_mode = #tpu.pipeline_mode<synchronous>, transform_indices = @transform_4, window_bounds = array<i64: 1, 256>}, {pipeline_mode = #tpu.pipeline_mode<synchronous>, transform_indices = @transform_5, window_bounds = array<i64: 1, 256>}, {transform_indices = @transform_6, window_bounds = array<i64: 8, 256>}, {transform_indices = @transform_7, window_bounds = array<i64: 3, 8, 16>}]} {
    %c0 = arith.constant 0 : index
    %c0_0 = arith.constant 0 : index
    %0 = vector.load %arg1[%c0, %c0_0] : memref<8x256xf32, #tpu.memory_space<vmem>>, vector<8x256xf32>
    %c0_1 = arith.constant 0 : index
    %c0_2 = arith.constant 0 : index
    %1 = vector.load %arg2[%c0_1, %c0_2] : memref<8x256xf32, #tpu.memory_space<vmem>>, vector<8x256xf32>
    %2 = arith.addf %0, %1 : vector<8x256xf32>
    %c0_3 = arith.constant 0 : index
    %c0_4 = arith.constant 0 : index
    %c0_5 = arith.constant 0 : index
    %3 = vector.load %arg3[%c0_3, %c0_4, %c0_5] : memref<3x8x16xf32, #tpu.memory_space<vmem>>, vector<1x8x16xf32>
    %4 = vector.shape_cast %3 : vector<1x8x16xf32> to vector<8x16xf32>
    %c0_6 = arith.constant 0 : index
    %c0_7 = arith.constant 0 : index
    %c0_8 = arith.constant 0 : index
    %5 = vector.load %arg4[%c0_6, %c0_7, %c0_8] : memref<3x8x16xf32, #tpu.memory_space<vmem>>, vector<1x8x16xf32>
    %6 = vector.shape_cast %5 : vector<1x8x16xf32> to vector<8x16xf32>
    %7 = arith.addf %4, %6 : vector<8x16xf32>
    %c1 = arith.constant 1 : index
    %c0_9 = arith.constant 0 : index
    %c0_10 = arith.constant 0 : index
    %8 = vector.load %arg3[%c1, %c0_9, %c0_10] : memref<3x8x16xf32, #tpu.memory_space<vmem>>, vector<1x8x16xf32>
    %9 = vector.shape_cast %8 : vector<1x8x16xf32> to vector<8x16xf32>
    %c1_11 = arith.constant 1 : index
    %c0_12 = arith.constant 0 : index
    %c0_13 = arith.constant 0 : index
    %10 = vector.load %arg4[%c1_11, %c0_12, %c0_13] : memref<3x8x16xf32, #tpu.memory_space<vmem>>, vector<1x8x16xf32>
    %11 = vector.shape_cast %10 : vector<1x8x16xf32> to vector<8x16xf32>
    %12 = arith.addf %9, %11 : vector<8x16xf32>
    %c2 = arith.constant 2 : index
    %c0_14 = arith.constant 0 : index
    %c0_15 = arith.constant 0 : index
    %13 = vector.load %arg3[%c2, %c0_14, %c0_15] : memref<3x8x16xf32, #tpu.memory_space<vmem>>, vector<1x8x16xf32>
    %14 = vector.shape_cast %13 : vector<1x8x16xf32> to vector<8x16xf32>
    %c2_16 = arith.constant 2 : index
    %c0_17 = arith.constant 0 : index
    %c0_18 = arith.constant 0 : index
    %15 = vector.load %arg4[%c2_16, %c0_17, %c0_18] : memref<3x8x16xf32, #tpu.memory_space<vmem>>, vector<1x8x16xf32>
    %16 = vector.shape_cast %15 : vector<1x8x16xf32> to vector<8x16xf32>
    %17 = arith.addf %14, %16 : vector<8x16xf32>
    %c0_19 = arith.constant 0 : index
    %c0_20 = arith.constant 0 : index
    %18 = vector.load %arg5[%c0_19, %c0_20] : memref<1x256xf32, #tpu.memory_space<vmem>>, vector<1x256xf32>
    %c0_21 = arith.constant 0 : index
    %c0_22 = arith.constant 0 : index
    %19 = vector.load %arg6[%c0_21, %c0_22] : memref<1x256xf32, #tpu.memory_space<vmem>>, vector<1x256xf32>
    %cst = arith.constant dense<0.000000e+00> : vector<8xf32>
    %20 = vector.multi_reduction <add>, %2, %cst [1] : vector<8x256xf32> to vector<8xf32>
    %21 = vector.shape_cast %20 : vector<8xf32> to vector<8x1xf32>
    %cst_23 = arith.constant 2.560000e+02 : f32
    %22 = vector.broadcast %cst_23 : f32 to vector<8x1xf32>
    %23 = arith.divf %21, %22 : vector<8x1xf32>
    %24 = vector.broadcast %23 : vector<8x1xf32> to vector<8x256xf32>
    %25 = arith.subf %2, %24 : vector<8x256xf32>
    %26 = arith.mulf %25, %25 : vector<8x256xf32>
    %cst_24 = arith.constant dense<0.000000e+00> : vector<8xf32>
    %27 = vector.multi_reduction <add>, %26, %cst_24 [1] : vector<8x256xf32> to vector<8xf32>
    %28 = vector.shape_cast %27 : vector<8xf32> to vector<8x1xf32>
    %cst_25 = arith.constant 2.560000e+02 : f32
    %29 = vector.broadcast %cst_25 : f32 to vector<8x1xf32>
    %30 = arith.divf %28, %29 : vector<8x1xf32>
    %31 = vector.broadcast %23 : vector<8x1xf32> to vector<8x256xf32>
    %32 = arith.subf %2, %31 : vector<8x256xf32>
    %cst_26 = arith.constant 9.99999974E-6 : f32
    %33 = vector.broadcast %cst_26 : f32 to vector<8x1xf32>
    %34 = arith.addf %30, %33 : vector<8x1xf32>
    %35 = math.rsqrt %34 : vector<8x1xf32>
    %36 = vector.broadcast %35 : vector<8x1xf32> to vector<8x256xf32>
    %37 = arith.mulf %32, %36 : vector<8x256xf32>
    %38 = vector.broadcast %18 : vector<1x256xf32> to vector<8x256xf32>
    %39 = arith.mulf %37, %38 : vector<8x256xf32>
    %40 = vector.broadcast %19 : vector<1x256xf32> to vector<8x256xf32>
    %41 = arith.addf %39, %40 : vector<8x256xf32>
    %42 = arith.mulf %7, %7 : vector<8x16xf32>
    %43 = arith.mulf %12, %12 : vector<8x16xf32>
    %44 = arith.addf %42, %43 : vector<8x16xf32>
    %45 = arith.mulf %17, %17 : vector<8x16xf32>
    %46 = arith.addf %44, %45 : vector<8x16xf32>
    %cst_27 = arith.constant 9.99999993E-9 : f32
    %47 = vector.broadcast %cst_27 : f32 to vector<8x16xf32>
    %48 = arith.maximumf %46, %47 : vector<8x16xf32>
    %cst_28 = arith.constant dense<0.000000e+00> : vector<8xf32>
    %49 = vector.multi_reduction <add>, %48, %cst_28 [1] : vector<8x16xf32> to vector<8xf32>
    %50 = vector.shape_cast %49 : vector<8xf32> to vector<8x1xf32>
    %cst_29 = arith.constant 1.600000e+01 : f32
    %51 = vector.broadcast %cst_29 : f32 to vector<8x1xf32>
    %52 = arith.divf %50, %51 : vector<8x1xf32>
    %53 = math.sqrt %52 : vector<8x1xf32>
    %54 = vector.broadcast %53 : vector<8x1xf32> to vector<8x16xf32>
    %55 = arith.divf %7, %54 : vector<8x16xf32>
    %56 = vector.broadcast %53 : vector<8x1xf32> to vector<8x16xf32>
    %57 = arith.divf %12, %56 : vector<8x16xf32>
    %58 = vector.broadcast %53 : vector<8x1xf32> to vector<8x16xf32>
    %59 = arith.divf %17, %58 : vector<8x16xf32>
    %c0_30 = arith.constant 0 : index
    %c0_31 = arith.constant 0 : index
    %60 = vector.load %arg7[%c0_30, %c0_31] : memref<8x256xf32, #tpu.memory_space<vmem>>, vector<8x256xf32>
    tpu.vector_store %arg7[%c0_30, %c0_31], %41 {strides = array<i32>} : memref<8x256xf32, #tpu.memory_space<vmem>>, vector<8x256xf32>,
    %c0_32 = arith.constant 0 : index
    %c0_33 = arith.constant 0 : index
    %c0_34 = arith.constant 0 : index
    %61 = vector.load %arg8[%c0_32, %c0_33, %c0_34] : memref<3x8x16xf32, #tpu.memory_space<vmem>>, vector<1x8x16xf32>
    %62 = vector.shape_cast %61 : vector<1x8x16xf32> to vector<8x16xf32>
    %63 = vector.shape_cast %55 : vector<8x16xf32> to vector<1x8x16xf32>
    tpu.vector_store %arg8[%c0_32, %c0_33, %c0_34], %63 {strides = array<i32>} : memref<3x8x16xf32, #tpu.memory_space<vmem>>, vector<1x8x16xf32>,
    %c1_35 = arith.constant 1 : index
    %c0_36 = arith.constant 0 : index
    %c0_37 = arith.constant 0 : index
    %64 = vector.load %arg8[%c1_35, %c0_36, %c0_37] : memref<3x8x16xf32, #tpu.memory_space<vmem>>, vector<1x8x16xf32>
    %65 = vector.shape_cast %64 : vector<1x8x16xf32> to vector<8x16xf32>
    %66 = vector.shape_cast %57 : vector<8x16xf32> to vector<1x8x16xf32>
    tpu.vector_store %arg8[%c1_35, %c0_36, %c0_37], %66 {strides = array<i32>} : memref<3x8x16xf32, #tpu.memory_space<vmem>>, vector<1x8x16xf32>,
    %c2_38 = arith.constant 2 : index
    %c0_39 = arith.constant 0 : index
    %c0_40 = arith.constant 0 : index
    %67 = vector.load %arg8[%c2_38, %c0_39, %c0_40] : memref<3x8x16xf32, #tpu.memory_space<vmem>>, vector<1x8x16xf32>
    %68 = vector.shape_cast %67 : vector<1x8x16xf32> to vector<8x16xf32>
    %69 = vector.shape_cast %59 : vector<8x16xf32> to vector<1x8x16xf32>
    tpu.vector_store %arg8[%c2_38, %c0_39, %c0_40], %69 {strides = array<i32>} : memref<3x8x16xf32, #tpu.memory_space<vmem>>, vector<1x8x16xf32>,
    return
  }
  func.func @transform_0(%arg0: i32) -> (i32, i32) {
    %c0_i32 = arith.constant 0 : i32
    %c0_i32_0 = arith.constant 0 : i32
    return %arg0, %c0_i32 : i32, i32
  }
  func.func @transform_1(%arg0: i32) -> (i32, i32) {
    %c0_i32 = arith.constant 0 : i32
    %c0_i32_0 = arith.constant 0 : i32
    return %arg0, %c0_i32 : i32, i32
  }
  func.func @transform_2(%arg0: i32) -> (i32, i32, i32) {
    %c0_i32 = arith.constant 0 : i32
    %c0_i32_0 = arith.constant 0 : i32
    %c0_i32_1 = arith.constant 0 : i32
    return %c0_i32, %arg0, %c0_i32_0 : i32, i32, i32
  }
  func.func @transform_3(%arg0: i32) -> (i32, i32, i32) {
    %c0_i32 = arith.constant 0 : i32
    %c0_i32_0 = arith.constant 0 : i32
    %c0_i32_1 = arith.constant 0 : i32
    return %c0_i32, %arg0, %c0_i32_0 : i32, i32, i32
  }
  func.func @transform_4(%arg0: i32) -> (i32, i32) {
    %c0_i32 = arith.constant 0 : i32
    %c0_i32_0 = arith.constant 0 : i32
    %c0_i32_1 = arith.constant 0 : i32
    return %c0_i32, %c0_i32_0 : i32, i32
  }
  func.func @transform_5(%arg0: i32) -> (i32, i32) {
    %c0_i32 = arith.constant 0 : i32
    %c0_i32_0 = arith.constant 0 : i32
    %c0_i32_1 = arith.constant 0 : i32
    return %c0_i32, %c0_i32_0 : i32, i32
  }
  func.func @transform_6(%arg0: i32) -> (i32, i32) {
    %c0_i32 = arith.constant 0 : i32
    %c0_i32_0 = arith.constant 0 : i32
    return %arg0, %c0_i32 : i32, i32
  }
  func.func @transform_7(%arg0: i32) -> (i32, i32, i32) {
    %c0_i32 = arith.constant 0 : i32
    %c0_i32_0 = arith.constant 0 : i32
    %c0_i32_1 = arith.constant 0 : i32
    return %c0_i32, %arg0, %c0_i32_0 : i32, i32, i32
  }
}

module attributes {stable_mosaic.version = 11 : i64} {
  func.func @_decoder_kernel(%arg0: i32, %arg1: memref<8x256xf32, #tpu.memory_space<vmem>>, %arg2: memref<8x256xf32, #tpu.memory_space<vmem>>, %arg3: memref<3x8x16xf32, #tpu.memory_space<vmem>>, %arg4: memref<256x256xbf16, #tpu.memory_space<vmem>>, %arg5: memref<256x256xbf16, #tpu.memory_space<vmem>>, %arg6: memref<1x256xf32, #tpu.memory_space<vmem>>, %arg7: memref<16x16xf32, #tpu.memory_space<vmem>>, %arg8: memref<256x20xbf16, #tpu.memory_space<vmem>>, %arg9: memref<16x20xbf16, #tpu.memory_space<vmem>>, %arg10: memref<1x20xf32, #tpu.memory_space<vmem>>, %arg11: memref<8x20xf32, #tpu.memory_space<vmem>>) attributes {dimension_semantics = [#tpu.dimension_semantics<parallel>], iteration_bounds = array<i64: 1>, scalar_prefetch = 0 : i64, scratch_operands = 0 : i64, tpu.core_type = #tpu.core_type<tc>, window_params = [{transform_indices = @transform_0, window_bounds = array<i64: 8, 256>}, {transform_indices = @transform_1, window_bounds = array<i64: 8, 256>}, {transform_indices = @transform_2, window_bounds = array<i64: 3, 8, 16>}, {pipeline_mode = #tpu.pipeline_mode<synchronous>, transform_indices = @transform_3, window_bounds = array<i64: 256, 256>}, {pipeline_mode = #tpu.pipeline_mode<synchronous>, transform_indices = @transform_4, window_bounds = array<i64: 256, 256>}, {pipeline_mode = #tpu.pipeline_mode<synchronous>, transform_indices = @transform_5, window_bounds = array<i64: 1, 256>}, {pipeline_mode = #tpu.pipeline_mode<synchronous>, transform_indices = @transform_6, window_bounds = array<i64: 16, 16>}, {pipeline_mode = #tpu.pipeline_mode<synchronous>, transform_indices = @transform_7, window_bounds = array<i64: 256, 20>}, {pipeline_mode = #tpu.pipeline_mode<synchronous>, transform_indices = @transform_8, window_bounds = array<i64: 16, 20>}, {pipeline_mode = #tpu.pipeline_mode<synchronous>, transform_indices = @transform_9, window_bounds = array<i64: 1, 20>}, {transform_indices = @transform_10, window_bounds = array<i64: 8, 20>}]} {
    %c0 = arith.constant 0 : index
    %c0_0 = arith.constant 0 : index
    %0 = vector.load %arg1[%c0, %c0_0] : memref<8x256xf32, #tpu.memory_space<vmem>>, vector<8x256xf32>
    %c0_1 = arith.constant 0 : index
    %c0_2 = arith.constant 0 : index
    %1 = vector.load %arg4[%c0_1, %c0_2] : memref<256x256xbf16, #tpu.memory_space<vmem>>, vector<256x256xbf16>
    %2 = arith.truncf %0 : vector<8x256xf32> to vector<8x256xbf16>
    %cst = arith.constant dense<0.000000e+00> : vector<8x256xf32>
    %3 = tpu.matmul %2, %1, %cst {dimension_numbers = #tpu.dot_dimension_numbers<[1], [0], [0], [1], [0, 0, 1, 1], [], []>} : vector<8x256xbf16>, vector<256x256xbf16>, vector<8x256xf32> -> vector<8x256xf32>
    %c0_3 = arith.constant 0 : index
    %c0_4 = arith.constant 0 : index
    %4 = vector.load %arg2[%c0_3, %c0_4] : memref<8x256xf32, #tpu.memory_space<vmem>>, vector<8x256xf32>
    %c0_5 = arith.constant 0 : index
    %c0_6 = arith.constant 0 : index
    %5 = vector.load %arg5[%c0_5, %c0_6] : memref<256x256xbf16, #tpu.memory_space<vmem>>, vector<256x256xbf16>
    %6 = arith.truncf %4 : vector<8x256xf32> to vector<8x256xbf16>
    %cst_7 = arith.constant dense<0.000000e+00> : vector<8x256xf32>
    %7 = tpu.matmul %6, %5, %cst_7 {dimension_numbers = #tpu.dot_dimension_numbers<[1], [0], [0], [1], [0, 0, 1, 1], [], []>} : vector<8x256xbf16>, vector<256x256xbf16>, vector<8x256xf32> -> vector<8x256xf32>
    %8 = arith.addf %3, %7 : vector<8x256xf32>
    %c0_8 = arith.constant 0 : index
    %c0_9 = arith.constant 0 : index
    %9 = vector.load %arg6[%c0_8, %c0_9] : memref<1x256xf32, #tpu.memory_space<vmem>>, vector<1x256xf32>
    %10 = vector.broadcast %9 : vector<1x256xf32> to vector<8x256xf32>
    %11 = arith.addf %8, %10 : vector<8x256xf32>
    %c0_10 = arith.constant 0 : index
    %c0_11 = arith.constant 0 : index
    %c0_12 = arith.constant 0 : index
    %12 = vector.load %arg3[%c0_10, %c0_11, %c0_12] : memref<3x8x16xf32, #tpu.memory_space<vmem>>, vector<1x8x16xf32>
    %13 = vector.shape_cast %12 : vector<1x8x16xf32> to vector<8x16xf32>
    %c1 = arith.constant 1 : index
    %c0_13 = arith.constant 0 : index
    %c0_14 = arith.constant 0 : index
    %14 = vector.load %arg3[%c1, %c0_13, %c0_14] : memref<3x8x16xf32, #tpu.memory_space<vmem>>, vector<1x8x16xf32>
    %15 = vector.shape_cast %14 : vector<1x8x16xf32> to vector<8x16xf32>
    %c2 = arith.constant 2 : index
    %c0_15 = arith.constant 0 : index
    %c0_16 = arith.constant 0 : index
    %16 = vector.load %arg3[%c2, %c0_15, %c0_16] : memref<3x8x16xf32, #tpu.memory_space<vmem>>, vector<1x8x16xf32>
    %17 = vector.shape_cast %16 : vector<1x8x16xf32> to vector<8x16xf32>
    %c0_17 = arith.constant 0 : index
    %c0_18 = arith.constant 0 : index
    %18 = vector.load %arg7[%c0_17, %c0_18] : memref<16x16xf32, #tpu.memory_space<vmem>>, vector<16x16xf32>
    %c0_19 = arith.constant 0 : index
    %c0_20 = arith.constant 0 : index
    %19 = vector.load %arg8[%c0_19, %c0_20] : memref<256x20xbf16, #tpu.memory_space<vmem>>, vector<256x20xbf16>
    %c0_21 = arith.constant 0 : index
    %c0_22 = arith.constant 0 : index
    %20 = vector.load %arg9[%c0_21, %c0_22] : memref<16x20xbf16, #tpu.memory_space<vmem>>, vector<16x20xbf16>
    %c0_23 = arith.constant 0 : index
    %c0_24 = arith.constant 0 : index
    %21 = vector.load %arg10[%c0_23, %c0_24] : memref<1x20xf32, #tpu.memory_space<vmem>>, vector<1x20xf32>
    %cst_25 = arith.constant dense<0.000000e+00> : vector<8x16xf32>
    %22 = tpu.matmul %13, %18, %cst_25 {dimension_numbers = #tpu.dot_dimension_numbers<[1], [0], [0], [1], [0, 0, 1, 1], [], []>} : vector<8x16xf32>, vector<16x16xf32>, vector<8x16xf32> -> vector<8x16xf32>
    %cst_26 = arith.constant dense<0.000000e+00> : vector<8x16xf32>
    %23 = tpu.matmul %15, %18, %cst_26 {dimension_numbers = #tpu.dot_dimension_numbers<[1], [0], [0], [1], [0, 0, 1, 1], [], []>} : vector<8x16xf32>, vector<16x16xf32>, vector<8x16xf32> -> vector<8x16xf32>
    %cst_27 = arith.constant dense<0.000000e+00> : vector<8x16xf32>
    %24 = tpu.matmul %17, %18, %cst_27 {dimension_numbers = #tpu.dot_dimension_numbers<[1], [0], [0], [1], [0, 0, 1, 1], [], []>} : vector<8x16xf32>, vector<16x16xf32>, vector<8x16xf32> -> vector<8x16xf32>
    %25 = arith.mulf %22, %22 : vector<8x16xf32>
    %26 = arith.mulf %23, %23 : vector<8x16xf32>
    %27 = arith.addf %25, %26 : vector<8x16xf32>
    %28 = arith.mulf %24, %24 : vector<8x16xf32>
    %29 = arith.addf %27, %28 : vector<8x16xf32>
    %cst_28 = arith.constant 9.99999993E-9 : f32
    %30 = vector.broadcast %cst_28 : f32 to vector<8x16xf32>
    %31 = arith.maximumf %29, %30 : vector<8x16xf32>
    %32 = math.sqrt %31 : vector<8x16xf32>
    %33 = arith.truncf %11 : vector<8x256xf32> to vector<8x256xbf16>
    %cst_29 = arith.constant dense<0.000000e+00> : vector<8x20xf32>
    %34 = tpu.matmul %33, %19, %cst_29 {dimension_numbers = #tpu.dot_dimension_numbers<[1], [0], [0], [1], [0, 0, 1, 1], [], []>} : vector<8x256xbf16>, vector<256x20xbf16>, vector<8x20xf32> -> vector<8x20xf32>
    %35 = arith.truncf %32 : vector<8x16xf32> to vector<8x16xbf16>
    %cst_30 = arith.constant dense<0.000000e+00> : vector<8x20xf32>
    %36 = tpu.matmul %35, %20, %cst_30 {dimension_numbers = #tpu.dot_dimension_numbers<[1], [0], [0], [1], [0, 0, 1, 1], [], []>} : vector<8x16xbf16>, vector<16x20xbf16>, vector<8x20xf32> -> vector<8x20xf32>
    %37 = arith.addf %34, %36 : vector<8x20xf32>
    %38 = vector.broadcast %21 : vector<1x20xf32> to vector<8x20xf32>
    %39 = arith.addf %37, %38 : vector<8x20xf32>
    %c0_31 = arith.constant 0 : index
    %c0_32 = arith.constant 0 : index
    %40 = vector.load %arg11[%c0_31, %c0_32] : memref<8x20xf32, #tpu.memory_space<vmem>>, vector<8x20xf32>
    tpu.vector_store %arg11[%c0_31, %c0_32], %39 {strides = array<i32>} : memref<8x20xf32, #tpu.memory_space<vmem>>, vector<8x20xf32>,
    return
  }
  func.func @transform_0(%arg0: i32) -> (i32, i32) {
    %c0_i32 = arith.constant 0 : i32
    %c0_i32_0 = arith.constant 0 : i32
    return %arg0, %c0_i32 : i32, i32
  }
  func.func @transform_1(%arg0: i32) -> (i32, i32) {
    %c0_i32 = arith.constant 0 : i32
    %c0_i32_0 = arith.constant 0 : i32
    return %arg0, %c0_i32 : i32, i32
  }
  func.func @transform_2(%arg0: i32) -> (i32, i32, i32) {
    %c0_i32 = arith.constant 0 : i32
    %c0_i32_0 = arith.constant 0 : i32
    %c0_i32_1 = arith.constant 0 : i32
    return %c0_i32, %arg0, %c0_i32_0 : i32, i32, i32
  }
  func.func @transform_3(%arg0: i32) -> (i32, i32) {
    %c0_i32 = arith.constant 0 : i32
    %c0_i32_0 = arith.constant 0 : i32
    %c0_i32_1 = arith.constant 0 : i32
    return %c0_i32, %c0_i32_0 : i32, i32
  }
  func.func @transform_4(%arg0: i32) -> (i32, i32) {
    %c0_i32 = arith.constant 0 : i32
    %c0_i32_0 = arith.constant 0 : i32
    %c0_i32_1 = arith.constant 0 : i32
    return %c0_i32, %c0_i32_0 : i32, i32
  }
  func.func @transform_5(%arg0: i32) -> (i32, i32) {
    %c0_i32 = arith.constant 0 : i32
    %c0_i32_0 = arith.constant 0 : i32
    %c0_i32_1 = arith.constant 0 : i32
    return %c0_i32, %c0_i32_0 : i32, i32
  }
  func.func @transform_6(%arg0: i32) -> (i32, i32) {
    %c0_i32 = arith.constant 0 : i32
    %c0_i32_0 = arith.constant 0 : i32
    %c0_i32_1 = arith.constant 0 : i32
    return %c0_i32, %c0_i32_0 : i32, i32
  }
  func.func @transform_7(%arg0: i32) -> (i32, i32) {
    %c0_i32 = arith.constant 0 : i32
    %c0_i32_0 = arith.constant 0 : i32
    %c0_i32_1 = arith.constant 0 : i32
    return %c0_i32, %c0_i32_0 : i32, i32
  }
  func.func @transform_8(%arg0: i32) -> (i32, i32) {
    %c0_i32 = arith.constant 0 : i32
    %c0_i32_0 = arith.constant 0 : i32
    %c0_i32_1 = arith.constant 0 : i32
    return %c0_i32, %c0_i32_0 : i32, i32
  }
  func.func @transform_9(%arg0: i32) -> (i32, i32) {
    %c0_i32 = arith.constant 0 : i32
    %c0_i32_0 = arith.constant 0 : i32
    %c0_i32_1 = arith.constant 0 : i32
    return %c0_i32, %c0_i32_0 : i32, i32
  }
  func.func @transform_10(%arg0: i32) -> (i32, i32) {
    %c0_i32 = arith.constant 0 : i32
    %c0_i32_0 = arith.constant 0 : i32
    return %arg0, %c0_i32 : i32, i32
  }
}

</mosaic_0001>

<bundles_post_ra>
// kernel: ssemb_forward.10
= control target key start
LH: loop header
LB: loop body
LE: loop exit
PB: predicated region body
PF: predicated region fallthrough
CT: control target
= control target key end

     0   :  { %vm91_vm0 = vcmask 1042432   ;;  %vm87_vm1 = vcmask 23552   ;;  %v1061_v0 = vmov 0.0   ;;  %vm1062_vm2 = vmmov 0   ;;  %s1276_s2 = inlined_call_operand.vmem [shape: f32[3,16], index: 2, kind: input, shape index: {}]   ;;  %s1277_s1 = inlined_call_operand.vmem [shape: f32[3,8,3], index: 1, kind: input, shape index: {}]   ;;  %s1278_s4 = inlined_call_operand.vmem [shape: bf16[16,256], index: 4, kind: input, shape index: {}]   ;;  %s1279_s3 = inlined_call_operand.vmem [shape: bf16[6,256], index: 3, kind: input, shape index: {}]   ;;  %s1280_s7 = inlined_call_operand.vmem [shape: bf16[256,16], index: 7, kind: input, shape index: {}]   ;;  %s1281_s0 = inlined_call_operand.vmem [shape: f32[8,6], index: 0, kind: input, shape index: {}]   ;;  %s1282_s6 = inlined_call_operand.vmem [shape: f32[16,16], index: 6, kind: input, shape index: {}]   ;;  %s1283_s5 = inlined_call_operand.vmem [shape: f32[1,256], index: 5, kind: input, shape index: {}]   ;;  %s1284_s8 = inlined_call_operand.vmem [shape: f32[1,16], index: 8, kind: input, shape index: {}]   ;;  %s1285_s9 = inlined_call_operand.vmem [shape: f32[1,256], index: 9, kind: input, shape index: {}]   ;;  %s1286_s10 = inlined_call_operand.vmem [shape: f32[1,256], index: 10, kind: input, shape index: {}]   ;;  %s1287_s11 = inlined_call_operand.vmem [shape: f32[8,256], index: 11, kind: output, shape index: {0}]   ;;  %s1288_s12 = inlined_call_operand.vmem [shape: f32[3,8,16], index: 12, kind: output, shape index: {1}]  }
   0x1   :  { %979 = vmatprep.subr.mxu1 %v1061_v0  ;;  %v47_v1 = vld [vmem:[%s1276_s2] sm:$0x7]  ;;  %981 = vmatprep.mubr.msk.f32.mxu1 %vm1062_vm2, %v1061_v0  ;;  %v905_v3 = vld [vmem:[%s1277_s1 + $0x10] sm:$0xff]  ;;  %v904_v4 = vld [vmem:[%s1277_s1 + $0x8] sm:$0xff]  ;;  %v1063_v6 = vmov 0   ;;  %vm336_vm5 = vcmask 130048   ;;  %v438_v52 = vlaneseq }
   0x2   :  { %v42_v2 = vld [vmem:[%s1277_s1] sm:$0xff]  ;;  %980 = vmatpush3.msk.msra.mxu1 %vm91_vm0, %v47_v1  ;;  %989 = vmatprep.subr.mxu0 %v1061_v0  ;;  %v1035_v12 = vld [vmem:[%s1280_s7 + $0x48] sm:$0xff]   ;;  %v1037_v14 = vld [vmem:[%s1280_s7 + $0x50] sm:$0xff]   ;;  %v1064_v39 = vmov 0.0|0.0   ;;  %vm386_vm6 = vcmask 48128  }
   0x3   :  { %982 = vmatmul.mubr.msk.f32.vlgmr.msra.gmra.mrb[0].mxu1 %vm87_vm1, %v42_v2  ;;  %984 = vmatprep.subr.mxu1 %v1061_v0  ;;  %v1028_v5 = vld [vmem:[%s1278_s4] ss:$8 sps:$4 sm:$0xff]   ;;  %v1030_v7 = vld [vmem:[%s1278_s4 + $0x4] ss:$8 sps:$4 sm:$0xff]   ;;  %v1038_v15 = vld [vmem:[%s1280_s7 + $0x10] sm:$0xff]   ;;  %v439_v53 = vshrl.u32 %v438_v52, 7 }
   0x4   :  { %985 = vmatpush3.msk.msra.mxu1 %vm91_vm0, %v47_v1  ;;  %986 = vmatprep.mubr.msk.f32.mxu1 %vm1062_vm2, %v1061_v0  ;;  %v48_v8 = vld [vmem:[%s1279_s3] sm:$0x77]  ;;  %v1036_v13 = vld [vmem:[%s1280_s7 + $0x8] sm:$0xff]   ;;  %v1039_v16 = vld [vmem:[%s1280_s7 + $0x58] sm:$0xff]  }
   0x5   :  { %990 = vmatpush3.msk.msra.mxu0 %vm91_vm0, %v47_v1  ;;  %991 = vmatprep.mubr.msk.f32.mxu0 %vm1062_vm2, %v1061_v0  ;;  %v916_v9 = vcombine.high %v48_v8, %v48_v8  ;;  %v1033_v10 = vld [vmem:[%s1280_s7 + $0x40] sm:$0xff]   ;;  %v1040_v17 = vld [vmem:[%s1280_s7 + $0x18] sm:$0xff]   ;;  %v915_v32 = vcombine.low %v48_v8, %v48_v8  ;;  %v53_v41 = vld [vmem:[%s1282_s6 + $0x8] sm:$0xff]  ;;  %v1235_v58 = vsub.s32 0, %v439_v53  ;;  %v1240_v60 = vsub.s32 1, %v439_v53 }
   0x6   :  { %992 = vmatmul.mubr.msk.f32.vlgmr.msra.gmra.mrb[0].mxu0 %vm87_vm1, %v905_v3  ;;  %340 = vmatprep.subr.bf16.mxu1 %v1030_v7  ;;  %v1034_v11 = vld [vmem:[%s1280_s7] sm:$0xff]   ;;  %v1043_v46 = vld [vmem:[%s1280_s7 + $0x68] sm:$0xff]   ;;  %v1045_v48 = vld [vmem:[%s1280_s7 + $0x70] sm:$0xff]  }
   0x7   :  { %987 = vmatmul.mubr.msk.f32.vlgmr.msra.gmra.mrb[2].mxu1 %vm87_vm1, %v904_v4  ;;  %957 = vmatprep.subr.bf16.mxu0 %v1033_v10  ;;  %v391_v37 = vsel %vm91_vm0, %v915_v32, 0  ;;  %v41_v38 = vld [vmem:[%s1281_s0] sm:$0xff]  ;;  %v1044_v47 = vld [vmem:[%s1280_s7 + $0x28] sm:$0xff]   ;;  %v1046_v49 = vld [vmem:[%s1280_s7 + $0x30] sm:$0xff]  }
   0x8   :  { %372 = vmatprep.mubr.bf16.mxu1 %v1063_v6  ;;  %341 = vmatpush1.bf16.msra.mxu1 %v1028_v5  ;;  %v52_v40 = vld [vmem:[%s1282_s6] sm:$0xff]  ;;  %v324_v42 = vpack.c.bf16 %v41_v38, %v41_v38  ;;  %v1047_v50 = vld [vmem:[%s1280_s7 + $0x78] sm:$0xff]  }
   0x9   :  { %917 = vmatprep.subr.msk.bf16.mxu1 %vm91_vm0, %v916_v9  ;;  %958 = vmatpush3.bf16.msra.mxu0 %v1034_v11  ;;  %v1016_v43 = vpack.c.bf16 %v53_v41, %v52_v40  ;;  %v1041_v44 = vld [vmem:[%s1280_s7 + $0x60] sm:$0xff]   ;;  %v1048_v51 = vld [vmem:[%s1280_s7 + $0x38] sm:$0xff]  }
   0xa   :  { %959 = vmatprep.subr.bf16.mxu0 %v1035_v12  ;;  %v1042_v45 = vld [vmem:[%s1280_s7 + $0x20] sm:$0xff]  }
   0xb   :  { %v51_v59 = vld [vmem:[%s1283_s5] sm:$0x3] }
   0xc   :  { %v441_v61 = vrot.slane %v51_v59, %v1235_v58  ;;  %v445_v63 = vrot.slane %v51_v59, %v1240_v60 }
   0xd   :  { %960 = vmatpush3.bf16.msra.mxu0 %v1036_v13 }
   0xe   :  { %961 = vmatprep.subr.bf16.mxu0 %v1037_v14 }
  0x11   :  { %962 = vmatpush3.bf16.msra.mxu0 %v1038_v15 }
  0x12   :  { %963 = vmatprep.subr.bf16.mxu0 %v1039_v16 }
  0x15   :  { %964 = vmatpush3.bf16.msra.mxu0 %v1040_v17 }
  0x16   :  { %965 = vmatprep.subr.bf16.mxu0 %v1041_v44 }
  0x19   :  { %966 = vmatpush3.bf16.msra.mxu0 %v1042_v45 }
  0x1a   :  { %967 = vmatprep.subr.bf16.mxu0 %v1043_v46 }
  0x1d   :  { %968 = vmatpush3.bf16.msra.mxu0 %v1044_v47  ;;  %v822_v47 = vld [vmem:[%s1285_s9] sm:$0x3] }
  0x1e   :  { %969 = vmatprep.subr.bf16.mxu0 %v1045_v48  ;;  %v823_v48 = vld [vmem:[%s1286_s10] sm:$0x3] }
  0x1f   :  { %v858_v52 = vrot.slane %v823_v48, %v1235_v58  ;;  %v862_v53 = vrot.slane %v823_v48, %v1240_v60 }
  0x21   :  { %970 = vmatpush3.bf16.msra.mxu0 %v1046_v49  ;;  %v845_v49 = vrot.slane %v822_v47, %v1235_v58 }
  0x22   :  { %971 = vmatprep.subr.bf16.mxu0 %v1047_v50  ;;  %v849_v50 = vrot.slane %v822_v47, %v1240_v60 }
  0x25   :  { %972 = vmatpush3.bf16.msra.mxu0 %v1048_v51 }
  0xd6   :  { %v161_v18 = vpop.f32.mrb[0].mxu1 }
  0xd7   :  { %v983_v19 = vpop.f32.mrb[1].mxu1  ;;  %v311_v23 = vmul.f32 %v161_v18, %v161_v18 }
  0xd9   :  { %v307_v20 = vpop.f32.mrb[0].mxu0 }
  0xda   :  { %v234_v21 = vpop.f32.mrb[2].mxu1  ;;  %v993_v22 = vpop.f32.mrb[1].mxu0  ;;  %v314_v26 = vmul.f32 %v307_v20, %v307_v20 }
  0xdb   :  { %v312_v24 = vmul.f32 %v234_v21, %v234_v21  ;;  %v988_v25 = vpop.f32.mrb[3].mxu1 }
  0xdd   :  { %v313_v27 = vadd.f32 %v312_v24, %v311_v23  ;;  %v922_v24 = vld [vmem:[%s1284_s8] ss:$0 sm:$0xff] }
  0xdf   :  { %v315_v28 = vadd.f32 %v314_v26, %v313_v27 }
  0xe1   :  { %v316_v29 = vmax.f32 %v315_v28, 1e-08 }
  0xe3   :  { %1049 = vrsqrt.f32 %v316_v29  ;;  %vm319_vm3 = vcmp.eq.f32.partialorder %v316_v29, inf  ;;  %v322_v33 = vand.u32 2147483648, %v316_v29  ;;  %vm321_vm4 = vcmp.eq.f32.partialorder %v316_v29, 0.0 }
  0xed   :  { %v1050_v30 = vpop.eup %1049 }
  0xee   :  { %v318_v31 = vmul.f32 %v1050_v30, %v316_v29 }
  0xf0   :  { %v320_v34 = vsel %vm319_vm3, %v316_v29, %v318_v31 }
  0xf1   :  { %v323_v35 = vsel %vm321_vm4, %v322_v33, %v320_v34 }
  0xf2   :  { %v325_v36 = vpack.c.bf16 %v323_v35, %v323_v35 }
  0xf4   :  { %914 = vmatmul.mubr.msk.bf16.vlgmr.msra.gmra.mrb[4].mxu1 %vm336_vm5, %v325_v36 }
  0xf5   :  { %397 = vmatpush1.bf16.msra.mxu1 %v391_v37  ;;  %428 = vmatprep.mubr.bf16.mxu1 %v1063_v6 }
  0xf6   :  { %1015 = vmatprep.subr.bf16.mxu1 %v1064_v39 }
  0xfc   :  { %918 = vmatmul.mubr.msk.bf16.vlgmr.msra.gmra.mrb[8].mxu1 %vm386_vm6, %v324_v42 }
  0xfd   :  { %1017 = vmatpush3.bf16.msra.mxu1 %v1016_v43  ;;  %998 = vmatprep.mubr.msk.f32.mxu1 %vm1062_vm2, %v1061_v0 }
  0xfe   :  { %1018 = vmatprep.subr.bf16.mxu1 %v1064_v39 }
 0x104   :  { %999 = vmatmul.mubr.msk.f32.vlgmr.msra.gmra.mrb[12].mxu1 %vm336_vm5, %v161_v18 }
 0x105   :  { %1020 = vmatpush3.bf16.msra.mxu1 %v1016_v43  ;;  %1005 = vmatprep.mubr.msk.f32.mxu1 %vm1062_vm2, %v1061_v0 }
 0x106   :  { %1021 = vmatprep.subr.bf16.mxu1 %v1064_v39 }
 0x108   :  { %1006 = vmatmul.mubr.msk.f32.vlgmr.msra.gmra.mrb[14].mxu1 %vm336_vm5, %v234_v21 }
 0x109   :  { %1023 = vmatpush3.bf16.msra.mxu1 %v1016_v43  ;;  %1012 = vmatprep.mubr.msk.f32.mxu1 %vm1062_vm2, %v1061_v0 }
 0x10c   :  { %1013 = vmatmul.mubr.msk.f32.vlgmr.msra.gmra.mrb[16].mxu1 %vm336_vm5, %v307_v20 }
 0x1c7   :  { %v374_v54 = vpop.f32.mrb[4].mxu1 }
 0x1c8   :  { %v376_v55 = vpop.f32.mrb[5].mxu1 }
 0x1c9   :  { %v378_v56 = vpop.f32.mrb[6].mxu1 }
 0x1ca   :  { %v379_v57 = vpop.f32.mrb[7].mxu1 }
 0x1cf   :  { %v430_v62 = vpop.f32.mrb[8].mxu1 }
 0x1d0   :  { %v431_v0 = vadd.f32 %v430_v62, %v374_v54  ;;  %v432_v1 = vpop.f32.mrb[9].mxu1 }
 0x1d1   :  { %v433_v2 = vadd.f32 %v432_v1, %v376_v55  ;;  %v434_v3 = vpop.f32.mrb[10].mxu1 }
 0x1d2   :  { %v448_v4 = vadd.f32 %v441_v61, %v431_v0  ;;  %v435_v5 = vpop.f32.mrb[11].mxu1 }
 0x1d3   :  { %v449_v6 = vadd.f32 %v445_v63, %v433_v2 }
 0x1d4   :  { %v669_v9 = vpack.c.bf16 %v448_v4, %v448_v4 }
 0x1d5   :  { %v670_v7 = vpack.c.bf16 %v449_v6, %v449_v6  ;;  %v824_v8 = vadd.f32 %v449_v6, %v448_v4 }
 0x1d7   :  { %v519_v10 = vpop.f32.mrb[12].mxu1  ;;  %805 = vmatprep.mubr.bf16.mxu0 %v670_v7  ;;  %825 = vadd.xlane.f32.xlu0 %v824_v8 }
 0x1d8   :  { %v1000_v11 = vpop.f32.mrb[13].mxu1  ;;  %806 = vmatmul.mubr.bf16.vlgmr.msra.gmra.mrb[4].mxu0 %v669_v9 }
 0x1db   :  { %v592_v12 = vpop.f32.mrb[14].mxu1 }
 0x1dc   :  { %v1007_v13 = vpop.f32.mrb[15].mxu1 }
 0x1df   :  { %v665_v14 = vpop.f32.mrb[16].mxu1 }
 0x1e0   :  { %v1014_v15 = vpop.f32.mrb[17].mxu1 }
 0x264   :  { %v826_v16 = vpop.xlane.xlu0 %825 }
 0x265   :  { %v828_v17 = vmul.f32 0.00390625, %v826_v16 }
 0x267   :  { %v829_v18 = vsub.f32 %v448_v4, %v828_v17  ;;  %v830_v19 = vsub.f32 %v449_v6, %v828_v17 }
 0x269   :  { %v831_v20 = vmul.f32 %v829_v18, %v829_v18  ;;  %v832_v21 = vmul.f32 %v830_v19, %v830_v19 }
 0x26b   :  { %v833_v22 = vadd.f32 %v832_v21, %v831_v20 }
 0x26d   :  { %834 = vadd.xlane.f32.xlu1 %v833_v22 }
 0x2ab   :  { %v973_v23 = vpop.f32.mrb[4].mxu0 }
 0x2ac   :  { %v974_v25 = vpop.f32.mrb[5].mxu0 }
 0x2ad   :  { %v975_v26 = vadd.f32 %v974_v25, %v973_v23  ;;  %v976_v27 = vpop.f32.mrb[6].mxu0 }
 0x2ae   :  { %v977_v28 = vpop.f32.mrb[7].mxu0 }
 0x2af   :  { %v808_v29 = vadd.f32 %v975_v26, %v922_v24 }
 0x2b1   :  { %v939_v30 = vmul.f32 -1.442695, %v808_v29 }
 0x2b3   :  { %1051 = vpow2.f32 %v939_v30 }
 0x2bd   :  { %v1052_v31 = vpop.eup %1051 }
 0x2be   :  { %v816_v32 = vadd.f32 1.0, %v1052_v31 }
 0x2c0   :  { %1053 = vrcp.f32 %v816_v32 }
 0x2ca   :  { %v1054_v33 = vpop.eup %1053 }
 0x2cb   :  { %v819_v34 = vmul.f32 %v1054_v33, %v519_v10  ;;  %v820_v35 = vmul.f32 %v1054_v33, %v592_v12  ;;  %v821_v36 = vmul.f32 %v1054_v33, %v665_v14 }
 0x2cd   :  { %v867_v37 = vmul.f32 %v819_v34, %v819_v34  ;;  %v868_v38 = vmul.f32 %v820_v35, %v820_v35  ;;  %v870_v40 = vmul.f32 %v821_v36, %v821_v36 }
 0x2cf   :  { %v869_v39 = vadd.f32 %v868_v38, %v867_v37 }
 0x2d1   :  { %v871_v41 = vadd.f32 %v870_v40, %v869_v39 }
 0x2d3   :  { %v872_v42 = vmax.f32 %v871_v41, 1e-08 }
 0x2d5   :  { %v873_v43 = vsel %vm336_vm5, %v872_v42, 0.0 }
 0x2d6   :  { %874 = vadd.xlane.f32.xlu0 %v873_v43 }
 0x2fa   :  { %v835_v44 = vpop.xlane.xlu1 %834 }
 0x2fb   :  { %v836_v45 = vmul.f32 0.00390625, %v835_v44 }
 0x2fd   :  { %v837_v46 = vadd.f32 1e-05, %v836_v45 }
 0x2ff   :  { %1055 = vrsqrt.f32 %v837_v46 }
 0x309   :  { %v1056_v51 = vpop.eup %1055 }
 0x30a   :  { %v839_v54 = vmul.f32 %v1056_v51, %v829_v18  ;;  %v840_v55 = vmul.f32 %v1056_v51, %v830_v19 }
 0x30c   :  { %v852_v56 = vmul.f32 %v845_v49, %v839_v54  ;;  %v853_v57 = vmul.f32 %v849_v50, %v840_v55 }
 0x30e   :  { %v865_v59 = vadd.f32 %v858_v52, %v852_v56  ;;  %v866_v61 = vadd.f32 %v862_v53, %v853_v57 }
 0x310   :  { %889 = vst [vmem:[%s1287_s11] sm:$0xff] %v865_v59  ;;  %890 = vst [vmem:[%s1287_s11 + $0x8] sm:$0xff] %v866_v61 }
 0x363   :  { %v875_v62 = vpop.xlane.xlu0 %874 }
 0x364   :  { %v877_v63 = vmul.f32 0.0625, %v875_v62 }
 0x366   :  { %1057 = vrsqrt.f32 %v877_v63  ;;  %vm880_vm7 = vcmp.eq.f32.partialorder %v877_v63, inf  ;;  %v883_v60 = vand.u32 2147483648, %v877_v63  ;;  %vm882_vm8 = vcmp.eq.f32.partialorder %v877_v63, 0.0 }
 0x370   :  { %v1058_v58 = vpop.eup %1057 }
 0x371   :  { %v879_v0 = vmul.f32 %v1058_v58, %v877_v63 }
 0x373   :  { %v881_v1 = vsel %vm880_vm7, %v877_v63, %v879_v0 }
 0x374   :  { %v884_v2 = vsel %vm882_vm8, %v883_v60, %v881_v1 }
 0x375   :  { %1059 = vrcp.f32 %v884_v2 }
 0x37f   :  { %v1060_v3 = vpop.eup %1059 }
 0x380   :  { %v886_v4 = vmul.f32 %v1060_v3, %v819_v34  ;;  %v887_v5 = vmul.f32 %v1060_v3, %v820_v35  ;;  %v888_v6 = vmul.f32 %v1060_v3, %v821_v36 }
 0x382   :  { %891 = vst.msk [vmem:[%s1288_s12] sm:$0xff] %vm336_vm5, %v886_v4  ;;  %940 = vst.msk [vmem:[%s1288_s12 + $0x8] sm:$0xff] %vm336_vm5, %v887_v5 }
 0x383   :  { %941 = vst.msk [vmem:[%s1288_s12 + $0x10] sm:$0xff] %vm336_vm5, %v888_v6 }

// kernel: ssemb_forward.12
= control target key start
LH: loop header
LB: loop body
LE: loop exit
PB: predicated region body
PF: predicated region fallthrough
CT: control target
= control target key end

     0   :  { %vm70_vm0 = vcmask 7168   ;;  %vm77_vm1 = vcmask 1040384   ;;  %v1034_v10 = vmov 0.0   ;;  %v1035_v12 = vmov 0   ;;  %s1258_s2 = inlined_call_operand.<no memory space> [shape: f32[1,1], index: 2, kind: input, shape index: {}]   ;;  %s1259_s1 = inlined_call_operand.vmem [shape: f32[3,16,1], index: 1, kind: input, shape index: {}]   ;;  %s1260_s6 = inlined_call_operand.<no memory space> [shape: f32[1,1], index: 6, kind: input, shape index: {}]   ;;  %s1261_s4 = inlined_call_operand.vmem [shape: bf16[1,32], index: 4, kind: input, shape index: {}]   ;;  %s1262_s3 = inlined_call_operand.vmem [shape: bf16[32,32], index: 3, kind: input, shape index: {}]   ;;  %s1263_s0 = inlined_call_operand.vmem [shape: f32[16,32], index: 0, kind: input, shape index: {}]   ;;  %s1264_s7 = inlined_call_operand.vmem [shape: bf16[32,1], index: 7, kind: input, shape index: {}]   ;;  %s1265_s5 = inlined_call_operand.vmem [shape: f32[1,32], index: 5, kind: input, shape index: {}]   ;;  %s1266_s8 = inlined_call_operand.<no memory space> [shape: f32[1,1], index: 8, kind: input, shape index: {}]   ;;  %s1267_s12 = inlined_call_operand.vmem [shape: f32[3,16,1], index: 12, kind: output, shape index: {1}]   ;;  %s1268_s9 = inlined_call_operand.vmem [shape: f32[1,32], index: 9, kind: input, shape index: {}]   ;;  %s1269_s10 = inlined_call_operand.vmem [shape: f32[1,32], index: 10, kind: input, shape index: {}]   ;;  %s1270_s11 = inlined_call_operand.vmem [shape: f32[16,32], index: 11, kind: output, shape index: {0}]  }
   0x1   :  { %v18_v0 = vstv %s1258_s2  ;;  %v49_v1 = vld [vmem:[%s1259_s1] sm:$0xff]  ;;  %v886_v2 = vld [vmem:[%s1259_s1 + $0x10] sm:$0xff]  ;;  %v50_v4 = vld [vmem:[%s1259_s1 + $0x8] sm:$0xff]  ;;  %v350_v13 = vsel %vm77_vm1, 65535, %v1035_v12  ;;  %vm1036_vm2 = vmmov 0   ;;  %vm407_vm7 = vcmask 261120  }
   0x2   :  { %19 = vst [vmem:[#allocation2] sm:$0x1] %v18_v0  ;;  %953 = vmatprep.mubr.msk.f32.mxu0 %vm70_vm0, %v49_v1  ;;  %958 = vmatprep.mubr.msk.f32.mxu1 %vm70_vm0, %v886_v2  ;;  %v887_v5 = vld [vmem:[%s1259_s1 + $0x18] sm:$0xff]  ;;  %v888_v6 = vld [vmem:[%s1259_s1 + $0x20] sm:$0xff]  ;;  %v889_v7 = vld [vmem:[%s1259_s1 + $0x28] sm:$0xff]  ;;  %v20_v8 = vstv %s1260_s6 }
   0x3   :  { %21 = vst [vmem:[#allocation3] sm:$0x1] %v20_v8  ;;  %v62_v11 = vld [vmem:[%s1261_s4] sm:$0x1]  ;;  %v1007_v45 = vld [vmem:[%s1262_s3 + $0x8] sm:$0xff]  }
   0x4   :  { %v352_v14 = vand.u32 %v350_v13, %v62_v11  ;;  %v1006_v43 = vld [vmem:[%s1262_s3] sm:$0xff]   ;;  %v48_v47 = vld [vmem:[%s1263_s0 + $0x8] sm:$0xff] }
   0x5   :  { %v47_v46 = vld [vmem:[%s1263_s0] sm:$0xff]  ;;  %v1009_v50 = vld [vmem:[%s1264_s7 + $0x8] sm:$0xff]  }
   0x6   :  { %v344_v48 = vpack.c.bf16 %v48_v47, %v47_v46  ;;  %v1008_v49 = vld [vmem:[%s1264_s7] sm:$0xff]  }
   0x7   :  { %v903_v59 = vld [vmem:[%s1265_s5] ss:$0 sm:$0xff] }
   0x9   :  { %v57_v3 = vld [vmem:[#allocation2] sm:$0x1] }
   0xa   :  { %951 = vmatprep.subr.msk.mxu0 %vm77_vm1, %v57_v3  ;;  %956 = vmatprep.subr.msk.mxu1 %vm77_vm1, %v57_v3  ;;  %v1138_v9 = vld [vmem:[#allocation3] sm:$0x1] }
   0xb   :  { %952 = vmatpush3.msk.msra.mxu0 %vm77_vm1, %v57_v3  ;;  %957 = vmatpush3.msk.msra.mxu1 %vm77_vm1, %v57_v3 }
   0xc   :  { %954 = vmatmul.mubr.msk.f32.vlgmr.msra.gmra.mrb[0].mxu0 %vm70_vm0, %v50_v4  ;;  %959 = vmatmul.mubr.msk.f32.vlgmr.msra.gmra.mrb[0].mxu1 %vm70_vm0, %v887_v5 }
   0xd   :  { %961 = vmatprep.subr.msk.mxu0 %vm77_vm1, %v57_v3  ;;  %963 = vmatprep.mubr.msk.f32.mxu0 %vm70_vm0, %v888_v6 }
   0xe   :  { %962 = vmatpush3.msk.msra.mxu0 %vm77_vm1, %v57_v3  ;;  %980 = vmatprep.subr.msk.mxu1 %vm77_vm1, %v1138_v9 }
   0xf   :  { %981 = vmatpush3.msk.msra.mxu1 %vm77_vm1, %v1138_v9  ;;  %966 = vmatprep.subr.bf16.mxu0 %v1034_v10 }
  0x10   :  { %964 = vmatmul.mubr.msk.f32.vlgmr.msra.gmra.mrb[2].mxu0 %vm70_vm0, %v889_v7  ;;  %985 = vmatprep.subr.msk.mxu1 %vm77_vm1, %v1138_v9 }
  0x11   :  { %968 = vmatprep.mubr.msk.bf16.mxu0 %vm1036_vm2, %v1034_v10  ;;  %967 = vmatpush3.bf16.msra.mxu0 %v352_v14 }
  0x12   :  { %972 = vmatprep.subr.bf16.mxu0 %v1034_v10 }
  0xdf   :  { %v955_v15 = vpop.f32.mrb[0].mxu0  ;;  %v960_v16 = vpop.f32.mrb[0].mxu1 }
  0xe0   :  { %v319_v17 = vmul.f32 %v955_v15, %v955_v15  ;;  %v321_v18 = vmul.f32 %v960_v16, %v960_v16  ;;  %v147_v19 = vpop.f32.mrb[1].mxu0  ;;  %v228_v20 = vpop.f32.mrb[1].mxu1 }
  0xe1   :  { %v318_v21 = vmul.f32 %v147_v19, %v147_v19  ;;  %v320_v22 = vmul.f32 %v228_v20, %v228_v20  ;;  %982 = vmatprep.mubr.msk.f32.mxu1 %vm70_vm0, %v147_v19 }
  0xe2   :  { %v323_v23 = vadd.f32 %v321_v18, %v319_v17  ;;  %983 = vmatmul.mubr.msk.f32.vlgmr.msra.gmra.mrb[2].mxu1 %vm70_vm0, %v955_v15 }
  0xe3   :  { %v322_v24 = vadd.f32 %v320_v22, %v318_v21  ;;  %v965_v25 = vpop.f32.mrb[2].mxu0  ;;  %987 = vmatprep.mubr.msk.f32.mxu1 %vm70_vm0, %v228_v20  ;;  %986 = vmatpush3.msk.msra.mxu1 %vm77_vm1, %v1138_v9 }
  0xe4   :  { %v325_v26 = vmul.f32 %v965_v25, %v965_v25  ;;  %v309_v27 = vpop.f32.mrb[3].mxu0  ;;  %995 = vmatprep.subr.bf16.mxu1 %v1034_v10 }
  0xe5   :  { %v324_v28 = vmul.f32 %v309_v27, %v309_v27 }
  0xe6   :  { %v327_v29 = vadd.f32 %v325_v26, %v323_v23  ;;  %988 = vmatmul.mubr.msk.f32.vlgmr.msra.gmra.mrb[4].mxu1 %vm70_vm0, %v960_v16 }
  0xe7   :  { %v326_v30 = vadd.f32 %v324_v28, %v322_v24  ;;  %999 = vmatprep.mubr.msk.bf16.mxu1 %vm1036_vm2, %v1034_v10  ;;  %996 = vmatpush3.bf16.msra.mxu1 %v1008_v49 }
  0xe8   :  { %v329_v31 = vmax.f32 %v327_v29, 1e-08  ;;  %997 = vmatprep.subr.bf16.mxu1 %v1034_v10 }
  0xe9   :  { %v328_v32 = vmax.f32 %v326_v30, 1e-08 }
  0xea   :  { %1010 = vrsqrt.f32 %v329_v31  ;;  %vm339_vm3 = vcmp.eq.f32.partialorder %v329_v31, inf  ;;  %v342_v37 = vand.u32 2147483648, %v329_v31  ;;  %vm341_vm5 = vcmp.eq.f32.partialorder %v329_v31, 0.0 }
  0xeb   :  { %1012 = vrsqrt.f32 %v328_v32  ;;  %vm332_vm4 = vcmp.eq.f32.partialorder %v328_v32, inf  ;;  %v335_v38 = vand.u32 2147483648, %v328_v32  ;;  %vm334_vm6 = vcmp.eq.f32.partialorder %v328_v32, 0.0  ;;  %998 = vmatpush3.bf16.msra.mxu1 %v1009_v50 }
  0xf4   :  { %v1011_v33 = vpop.eup %1010 }
  0xf5   :  { %v1013_v34 = vpop.eup %1012  ;;  %v338_v35 = vmul.f32 %v1011_v33, %v329_v31 }
  0xf6   :  { %v331_v36 = vmul.f32 %v1013_v34, %v328_v32 }
  0xf7   :  { %v340_v39 = vsel %vm339_vm3, %v329_v31, %v338_v35 }
  0xf8   :  { %v333_v40 = vsel %vm332_vm4, %v328_v32, %v331_v36  ;;  %v343_v41 = vsel %vm341_vm5, %v342_v37, %v340_v39 }
  0xf9   :  { %v336_v42 = vsel %vm334_vm6, %v335_v38, %v333_v40 }
  0xfa   :  { %v345_v44 = vpack.c.bf16 %v343_v41, %v336_v42 }
  0xfc   :  { %969 = vmatmul.mubr.msk.bf16.vlgmr.msra.gmra.mrb[4].mxu0 %vm70_vm0, %v345_v44 }
  0xfd   :  { %973 = vmatpush3.bf16.msra.mxu0 %v1006_v43  ;;  %976 = vmatprep.mubr.msk.bf16.mxu0 %vm1036_vm2, %v1034_v10 }
  0xfe   :  { %974 = vmatprep.subr.bf16.mxu0 %v1034_v10 }
 0x101   :  { %975 = vmatpush3.bf16.msra.mxu0 %v1007_v45 }
 0x102   :  { %990 = vmatprep.subr.msk.mxu0 %vm77_vm1, %v1138_v9 }
 0x104   :  { %977 = vmatmul.mubr.msk.bf16.vlgmr.msra.gmra.mrb[8].mxu0 %vm407_vm7, %v344_v48 }
 0x105   :  { %992 = vmatprep.mubr.msk.f32.mxu0 %vm70_vm0, %v309_v27  ;;  %991 = vmatpush3.msk.msra.mxu0 %vm77_vm1, %v1138_v9  ;;  %v22_v9 = vstv %s1266_s8 }
 0x106   :  { %23 = vst [vmem:[#allocation4] sm:$0x1] %v22_v9 }
 0x10c   :  { %993 = vmatmul.mubr.msk.f32.vlgmr.msra.gmra.mrb[12].mxu0 %vm70_vm0, %v965_v25 }
 0x10d   :  { %v913_v20 = vld [vmem:[#allocation4] ss:$0 sm:$0xff] }
 0x1b5   :  { %v1193_v51 = vpop.f32.mrb[2].mxu1 }
 0x1b6   :  { %v535_v52 = vpop.f32.mrb[3].mxu1 }
 0x1b9   :  { %v1195_v53 = vpop.f32.mrb[4].mxu1 }
 0x1ba   :  { %v616_v54 = vpop.f32.mrb[5].mxu1 }
 0x1cf   :  { %v388_v55 = vpop.f32.mrb[4].mxu0 }
 0x1d0   :  { %v970_v56 = vpop.f32.mrb[5].mxu0 }
 0x1d1   :  { %v391_v57 = vpop.f32.mrb[6].mxu0 }
 0x1d2   :  { %v971_v58 = vpop.f32.mrb[7].mxu0 }
 0x1d7   :  { %v445_v60 = vpop.f32.mrb[8].mxu0 }
 0x1d8   :  { %v446_v61 = vadd.f32 %v445_v60, %v388_v55  ;;  %v978_v62 = vpop.f32.mrb[9].mxu0 }
 0x1d9   :  { %v448_v63 = vpop.f32.mrb[10].mxu0 }
 0x1da   :  { %v458_v0 = vadd.f32 %v903_v59, %v446_v61  ;;  %v449_v1 = vadd.f32 %v448_v63, %v391_v57  ;;  %v979_v2 = vpop.f32.mrb[11].mxu0 }
 0x1dc   :  { %v459_v3 = vadd.f32 %v903_v59, %v449_v1  ;;  %v789_v4 = vsel %vm407_vm7, %v458_v0, 0.0 }
 0x1dd   :  { %790 = vadd.xlane.f32.xlu0 %v789_v4 }
 0x1de   :  { %v706_v5 = vpack.c.bf16 %v459_v3, %v458_v0  ;;  %v792_v8 = vsel %vm407_vm7, %v459_v3, 0.0 }
 0x1df   :  { %v994_v6 = vpop.f32.mrb[12].mxu0 }
 0x1e0   :  { %v697_v7 = vpop.f32.mrb[13].mxu0  ;;  %1000 = vmatmul.mubr.msk.bf16.vlgmr.msra.gmra.mrb[8].mxu1 %vm407_vm7, %v706_v5 }
 0x1e1   :  { %793 = vadd.xlane.f32.xlu0 %v792_v8 }
 0x26a   :  { %v791_v10 = vpop.xlane.xlu0 %790 }
 0x26b   :  { %v796_v11 = vmul.f32 0.03125, %v791_v10 }
 0x26d   :  { %v1206_v12 = vsub.f32 %v458_v0, %v796_v11 }
 0x26e   :  { %v794_v13 = vpop.xlane.xlu0 %793 }
 0x26f   :  { %v797_v14 = vmul.f32 0.03125, %v794_v13  ;;  %v800_v15 = vmul.f32 %v1206_v12, %v1206_v12 }
 0x271   :  { %v1210_v16 = vsub.f32 %v459_v3, %v797_v14  ;;  %v802_v17 = vsel %vm407_vm7, %v800_v15, 0.0  ;;  %v919_v15 = vld [vmem:[%s1268_s9] ss:$0 sm:$0xff] }
 0x272   :  { %803 = vadd.xlane.f32.xlu1 %v802_v17 }
 0x273   :  { %v801_v18 = vmul.f32 %v1210_v16, %v1210_v16 }
 0x275   :  { %v805_v19 = vsel %vm407_vm7, %v801_v18, 0.0  ;;  %v920_v18 = vld [vmem:[%s1269_s10] ss:$0 sm:$0xff] }
 0x276   :  { %806 = vadd.xlane.f32.xlu1 %v805_v19 }
 0x2b3   :  { %v762_v21 = vpop.f32.mrb[8].mxu1 }
 0x2b4   :  { %v763_v22 = vadd.f32 %v913_v20, %v762_v21  ;;  %v1001_v23 = vpop.f32.mrb[9].mxu1 }
 0x2b5   :  { %v765_v24 = vpop.f32.mrb[10].mxu1 }
 0x2b6   :  { %v917_v25 = vmul.f32 -1.442695, %v763_v22  ;;  %v766_v26 = vadd.f32 %v913_v20, %v765_v24  ;;  %v1002_v27 = vpop.f32.mrb[11].mxu1 }
 0x2b8   :  { %1014 = vpow2.f32 %v917_v25  ;;  %v918_v28 = vmul.f32 -1.442695, %v766_v26 }
 0x2ba   :  { %1016 = vpow2.f32 %v918_v28 }
 0x2c2   :  { %v1015_v29 = vpop.eup %1014 }
 0x2c3   :  { %v775_v30 = vadd.f32 1.0, %v1015_v29 }
 0x2c4   :  { %v1017_v31 = vpop.eup %1016 }
 0x2c5   :  { %1018 = vrcp.f32 %v775_v30  ;;  %v776_v32 = vadd.f32 1.0, %v1017_v31 }
 0x2c7   :  { %1020 = vrcp.f32 %v776_v32 }
 0x2cf   :  { %v1019_v33 = vpop.eup %1018 }
 0x2d0   :  { %v781_v34 = vmul.f32 %v1019_v33, %v535_v52  ;;  %v783_v35 = vmul.f32 %v1019_v33, %v616_v54  ;;  %v785_v36 = vmul.f32 %v1019_v33, %v697_v7 }
 0x2d1   :  { %v1021_v37 = vpop.eup %1020 }
 0x2d2   :  { %v832_v38 = vmul.f32 %v781_v34, %v781_v34  ;;  %v834_v39 = vmul.f32 %v783_v35, %v783_v35  ;;  %v782_v40 = vmul.f32 %v1021_v37, %v1193_v51  ;;  %v784_v41 = vmul.f32 %v1021_v37, %v1195_v53 }
 0x2d3   :  { %v786_v42 = vmul.f32 %v1021_v37, %v994_v6  ;;  %v838_v44 = vmul.f32 %v785_v36, %v785_v36 }
 0x2d4   :  { %v836_v43 = vadd.f32 %v834_v39, %v832_v38  ;;  %v833_v45 = vmul.f32 %v782_v40, %v782_v40  ;;  %v835_v46 = vmul.f32 %v784_v41, %v784_v41 }
 0x2d5   :  { %v839_v49 = vmul.f32 %v786_v42, %v786_v42 }
 0x2d6   :  { %v840_v47 = vadd.f32 %v838_v44, %v836_v43  ;;  %v837_v48 = vadd.f32 %v835_v46, %v833_v45 }
 0x2d8   :  { %v842_v50 = vmax.f32 %v840_v47, 1e-08  ;;  %v841_v55 = vadd.f32 %v839_v49, %v837_v48 }
 0x2da   :  { %1022 = vrsqrt.f32 %v842_v50  ;;  %v843_v52 = vmax.f32 %v841_v55, 1e-08  ;;  %vm848_vm8 = vcmp.eq.f32.partialorder %v842_v50, inf  ;;  %v851_v57 = vand.u32 2147483648, %v842_v50 }
 0x2db   :  { %vm850_vm9 = vcmp.eq.f32.partialorder %v842_v50, 0.0 }
 0x2dc   :  { %1024 = vrsqrt.f32 %v843_v52  ;;  %vm855_vm10 = vcmp.eq.f32.partialorder %v843_v52, inf  ;;  %v858_v60 = vand.u32 2147483648, %v843_v52  ;;  %vm857_vm11 = vcmp.eq.f32.partialorder %v843_v52, 0.0 }
 0x2e4   :  { %v1023_v54 = vpop.eup %1022 }
 0x2e5   :  { %v847_v56 = vmul.f32 %v1023_v54, %v842_v50 }
 0x2e6   :  { %v1025_v51 = vpop.eup %1024 }
 0x2e7   :  { %v849_v58 = vsel %vm848_vm8, %v842_v50, %v847_v56  ;;  %v854_v59 = vmul.f32 %v1025_v51, %v843_v52 }
 0x2e8   :  { %v852_v53 = vsel %vm850_vm9, %v851_v57, %v849_v58 }
 0x2e9   :  { %1026 = vrcp.f32 %v852_v53  ;;  %v856_v61 = vsel %vm855_vm10, %v843_v52, %v854_v59 }
 0x2ea   :  { %v859_v62 = vsel %vm857_vm11, %v858_v60, %v856_v61 }
 0x2eb   :  { %1028 = vrcp.f32 %v859_v62 }
 0x2f3   :  { %v1027_v63 = vpop.eup %1026 }
 0x2f4   :  { %v861_v0 = vmul.f32 %v1027_v63, %v781_v34  ;;  %v864_v1 = vmul.f32 %v1027_v63, %v783_v35  ;;  %v866_v2 = vmul.f32 %v1027_v63, %v785_v36 }
 0x2f5   :  { %v1029_v3 = vpop.eup %1028 }
 0x2f6   :  { %870 = vst.msk [vmem:[%s1267_s12] sm:$0xff] %vm70_vm0, %v861_v0  ;;  %921 = vst.msk [vmem:[%s1267_s12 + $0x10] sm:$0xff] %vm70_vm0, %v864_v1  ;;  %v863_v4 = vmul.f32 %v1029_v3, %v782_v40  ;;  %v865_v5 = vmul.f32 %v1029_v3, %v784_v41  ;;  %v867_v6 = vmul.f32 %v1029_v3, %v786_v42 }
 0x2f7   :  { %923 = vst.msk [vmem:[%s1267_s12 + $0x20] sm:$0xff] %vm70_vm0, %v866_v2 }
 0x2f8   :  { %871 = vst.msk [vmem:[%s1267_s12 + $0x8] sm:$0xff] %vm70_vm0, %v863_v4  ;;  %922 = vst.msk [vmem:[%s1267_s12 + $0x18] sm:$0xff] %vm70_vm0, %v865_v5 }
 0x2f9   :  { %924 = vst.msk [vmem:[%s1267_s12 + $0x28] sm:$0xff] %vm70_vm0, %v867_v6 }
 0x2ff   :  { %v804_v7 = vpop.xlane.xlu1 %803 }
 0x300   :  { %v808_v8 = vmul.f32 0.03125, %v804_v7 }
 0x302   :  { %v810_v9 = vadd.f32 1e-05, %v808_v8 }
 0x303   :  { %v807_v10 = vpop.xlane.xlu1 %806 }
 0x304   :  { %1030 = vrsqrt.f32 %v810_v9  ;;  %v809_v11 = vmul.f32 0.03125, %v807_v10 }
 0x306   :  { %v811_v13 = vadd.f32 1e-05, %v809_v11 }
 0x308   :  { %1032 = vrsqrt.f32 %v811_v13 }
 0x30e   :  { %v1031_v14 = vpop.eup %1030 }
 0x30f   :  { %v814_v17 = vmul.f32 %v1031_v14, %v1206_v12 }
 0x311   :  { %v822_v19 = vmul.f32 %v919_v15, %v814_v17 }
 0x312   :  { %v1033_v20 = vpop.eup %1032 }
 0x313   :  { %v830_v21 = vadd.f32 %v920_v18, %v822_v19  ;;  %v815_v22 = vmul.f32 %v1033_v20, %v1210_v16 }
 0x315   :  { %868 = vst.msk [vmem:[%s1270_s11] sm:$0xff] %vm407_vm7, %v830_v21  ;;  %v823_v23 = vmul.f32 %v919_v15, %v815_v22 }
 0x317   :  { %v831_v24 = vadd.f32 %v920_v18, %v823_v23 }
 0x319   :  { %869 = vst.msk [vmem:[%s1270_s11 + $0x8] sm:$0xff] %vm407_vm7, %v831_v24 }

// kernel: ssemb_forward.11
= control target key start
LH: loop header
LB: loop body
LE: loop exit
PB: predicated region body
PF: predicated region fallthrough
CT: control target
= control target key end

     0   :  { %19 = vsyncpa [#allocation3], 0  ;;  %s4571_s0 = inlined_call_operand.vmem [shape: f32[8,256], index: 0, kind: input, shape index: {}]   ;;  %s4572_s1 = inlined_call_operand.vmem [shape: f32[8,1280], index: 1, kind: input, shape index: {}]   ;;  %s4573_s2 = inlined_call_operand.vmem [shape: f32[8,768], index: 2, kind: input, shape index: {}]   ;;  %s4574_s3 = inlined_call_operand.hbm [shape: bf16[1280,256], index: 3, kind: input, shape index: {}]   ;;  %s4575_s4 = inlined_call_operand.vmem [shape: f32[1,256], index: 4, kind: input, shape index: {}]   ;;  %s4576_s5 = inlined_call_operand.hbm [shape: bf16[768,256], index: 5, kind: input, shape index: {}]   ;;  %s4577_s6 = inlined_call_operand.vmem [shape: f32[1,256], index: 6, kind: input, shape index: {}]   ;;  %s4578_s7 = inlined_call_operand.vmem [shape: bf16[256,256], index: 7, kind: input, shape index: {}]   ;;  %s4579_s8 = inlined_call_operand.vmem [shape: f32[1,256], index: 8, kind: input, shape index: {}]   ;;  %s4580_s9 = inlined_call_operand.vmem [shape: bf16[256,256], index: 9, kind: input, shape index: {}]   ;;  %s4581_s10 = inlined_call_operand.vmem [shape: f32[1,256], index: 10, kind: input, shape index: {}]   ;;  %s4582_s11 = inlined_call_operand.hbm [shape: bf16[256,256], index: 11, kind: input, shape index: {}]   ;;  %s4583_s12 = inlined_call_operand.hbm [shape: bf16[256,256], index: 12, kind: input, shape index: {}]   ;;  %s4584_s13 = inlined_call_operand.vmem [shape: f32[1,256], index: 13, kind: input, shape index: {}]   ;;  %s4585_s14 = inlined_call_operand.vmem [shape: f32[8,256], index: 14, kind: output, shape index: {}]  }
   0x1   :  { %20 = vsyncpa [#allocation5], 0 }
   0x2   :  { %21 = vsyncpa [#allocation8], 0  ;;  %s4135_s29 = smov [#allocation4]   ;;  %s4136_s15 = smov [#allocation2]  }
   0x3   :  { %s47_s30 = sshll.u32 %s4135_s29, 4  ;;  %s33_s16 = sshll.u32 %s4136_s15, 4  ;;  %s48_s30 = int_to_ptr.vmem [resolvable:$true] %s47_s30  ;;  %s4216_s16 = int_to_ptr.vmem [resolvable:$true] %s33_s16 }
   0x4   :  { %s4041_s19 = scalar_lea.hbm %s4576_s5, 12288 }
   0x5   :  { %p4042_p0 = scmp.ne.s32.totalorder %s4576_s5, %s4041_s19  ;;  %p4045_p1 = scmp.lt.u32.totalorder %s4041_s19, %s4576_s5 }
   0x7   :  { %p4047_p2 = pnand %p4045_p1, %p4042_p0 }
   0x9   :  { %4050 = shalt.err (!%p4047_p2)
}
   0xa   :  { %s4051_s24 = scalar_lea.vmem %s48_s30, 12288  ;;  %p4056_p4 = scmp.lt.s32.totalorder %s48_s30, %s48_s30 }
   0xb   :  { %p4052_p3 = scmp.ne.s32.totalorder %s48_s30, %s4051_s24  ;;  %p4057_p5 = scmp.lt.s32.totalorder %s4051_s24, %s4051_s24 }
   0xd   :  { %p4058_p6 = por %p4057_p5, %p4056_p4 }
   0xf   :  { %p4059_p7 = pnand %p4058_p6, %p4052_p3 }
  0x11   :  { %4062 = shalt.err (!%p4059_p7)
}
  0x12   :  { %s4137_s25 = smov 128   ;;  %s4138_s26 = smov 8  }
  0x13   :  { %53 = dma.hbm_to_vmem [thread:$0]  %s4576_s5, 12288, %s48_s30, [#allocation5], %s4137_s25, %s4137_s25, %s4138_s26  }
  0x14   :  { %s4063_s17 = scalar_lea.hbm %s4574_s3, 20480 }
  0x15   :  { %p4064_p8 = scmp.ne.s32.totalorder %s4574_s3, %s4063_s17  ;;  %p4067_p9 = scmp.lt.u32.totalorder %s4063_s17, %s4574_s3 }
  0x17   :  { %p4069_p10 = pnand %p4067_p9, %p4064_p8 }
  0x19   :  { %4072 = shalt.err (!%p4069_p10)
}
  0x1a   :  { %s4073_s22 = scalar_lea.vmem %s4216_s16, 20480  ;;  %p4078_p12 = scmp.lt.s32.totalorder %s4216_s16, %s4216_s16 }
  0x1b   :  { %p4074_p11 = scmp.ne.s32.totalorder %s4216_s16, %s4073_s22  ;;  %p4079_p13 = scmp.lt.s32.totalorder %s4073_s22, %s4073_s22 }
  0x1d   :  { %p4080_p0 = por %p4079_p13, %p4078_p12 }
  0x1f   :  { %p4081_p1 = pnand %p4080_p0, %p4074_p11 }
  0x21   :  { %4084 = shalt.err (!%p4081_p1)
}
  0x22   :  { %39 = dma.hbm_to_vmem [thread:$0]  %s4574_s3, 20480, %s4216_s16, [#allocation3], %s4137_s25, %s4137_s25, %s4138_s26  }
  0x23   :  { %s4139_s23 = smov [#allocation6]   ;;  %s4140_s27 = smov [#allocation7]  }
  0x24   :  { %s69_s24 = sshll.u32 %s4139_s23, 4  ;;  %s81_s28 = sshll.u32 %s4140_s27, 4  ;;  %s70_s24 = int_to_ptr.vmem [resolvable:$true] %s69_s24  ;;  %s4253_s28 = int_to_ptr.vmem [resolvable:$true] %s81_s28 }
  0x25   :  { %s4085_s17 = scalar_lea.hbm %s4582_s11, 4096 }
  0x26   :  { %p4086_p2 = scmp.ne.s32.totalorder %s4582_s11, %s4085_s17  ;;  %p4089_p3 = scmp.lt.u32.totalorder %s4085_s17, %s4582_s11 }
  0x28   :  { %p4091_p4 = pnand %p4089_p3, %p4086_p2 }
  0x2a   :  { %4094 = shalt.err (!%p4091_p4)
}
  0x2b   :  { %s4095_s3 = scalar_lea.vmem %s70_s24, 4096  ;;  %p4100_p6 = scmp.lt.s32.totalorder %s70_s24, %s70_s24 }
  0x2c   :  { %p4096_p5 = scmp.ne.s32.totalorder %s70_s24, %s4095_s3  ;;  %p4101_p7 = scmp.lt.s32.totalorder %s4095_s3, %s4095_s3 }
  0x2e   :  { %p4102_p8 = por %p4101_p7, %p4100_p6 }
  0x30   :  { %p4103_p9 = pnand %p4102_p8, %p4096_p5 }
  0x32   :  { %4106 = shalt.err (!%p4103_p9)
}
  0x33   :  { %75 = dma.hbm_to_vmem [thread:$0]  %s4582_s11, 4096, %s70_s24, [#allocation5], %s4137_s25, %s4137_s25, %s4138_s26  }
  0x34   :  { %s4107_s23 = scalar_lea.hbm %s4583_s12, 4096 }
  0x35   :  { %p4108_p10 = scmp.ne.s32.totalorder %s4583_s12, %s4107_s23  ;;  %p4111_p11 = scmp.lt.u32.totalorder %s4107_s23, %s4583_s12 }
  0x37   :  { %p4113_p12 = pnand %p4111_p11, %p4108_p10 }
  0x39   :  { %4116 = shalt.err (!%p4113_p12)
}
  0x3a   :  { %s4117_s18 = scalar_lea.vmem %s4253_s28, 4096  ;;  %p4122_p0 = scmp.lt.s32.totalorder %s4253_s28, %s4253_s28 }
  0x3b   :  { %p4118_p13 = scmp.ne.s32.totalorder %s4253_s28, %s4117_s18  ;;  %p4123_p1 = scmp.lt.s32.totalorder %s4117_s18, %s4117_s18 }
  0x3d   :  { %p4124_p2 = por %p4123_p1, %p4122_p0 }
  0x3f   :  { %p4125_p3 = pnand %p4124_p2, %p4118_p13 }
  0x41   :  { %4128 = shalt.err (!%p4125_p3)
}
  0x42   :  { %87 = dma.hbm_to_vmem [thread:$0]  %s4583_s12, 4096, %s4253_s28, [#allocation8], %s4137_s25, %s4137_s25, %s4138_s26  }
  0x43   :  { %4129 = dma.done.wait [#allocation3], 20480  }
  0x44   :  { %4130 = vsyncadd [#allocation3], 4294946816 }
  0x45   :  { %4131 = dma.done.wait [#allocation5], 16384  }
  0x46   :  { %4132 = vsyncadd [#allocation5], 4294950912 }
  0x47   :  { %4133 = dma.done.wait [#allocation8], 4096  }
  0x48   :  { %4134 = vsyncadd [#allocation8], 4294963200  ;;  %v3457_v0 = vld [vmem:[#allocation2 + $0x4] ss:$8 sps:$4 sm:$0xff]   ;;  %v3461_v2 = vld [vmem:[#allocation2] ss:$8 sps:$4 sm:$0xff]  }
  0x49   :  { %v3459_v1 = vld [vmem:[#allocation4 + $0x4] ss:$8 sps:$4 sm:$0xff]   ;;  %1096 = vmatprep.subr.bf16.mxu0 %v3457_v0  ;;  %v3462_v3 = vld [vmem:[#allocation4] ss:$8 sps:$4 sm:$0xff]   ;;  %v3463_v4 = vld [vmem:[#allocation2 + $0x14] ss:$8 sps:$4 sm:$0xff]  }
  0x4a   :  { %1903 = vmatprep.subr.bf16.mxu1 %v3459_v1  ;;  %1097 = vmatpush1.bf16.msra.mxu0 %v3461_v2  ;;  %v3465_v5 = vld [vmem:[#allocation4 + $0x14] ss:$8 sps:$4 sm:$0xff]   ;;  %v3467_v6 = vld [vmem:[#allocation2 + $0x10] ss:$8 sps:$4 sm:$0xff]   ;;  %v3469_v8 = vld [vmem:[#allocation2 + $0x24] ss:$8 sps:$4 sm:$0xff]  }
  0x4b   :  { %1904 = vmatpush1.bf16.msra.mxu1 %v3462_v3  ;;  %1098 = vmatprep.subr.bf16.mxu0 %v3463_v4  ;;  %v3468_v7 = vld [vmem:[#allocation4 + $0x10] ss:$8 sps:$4 sm:$0xff]   ;;  %v3471_v9 = vld [vmem:[#allocation4 + $0x24] ss:$8 sps:$4 sm:$0xff]   ;;  %v3473_v10 = vld [vmem:[#allocation2 + $0x20] ss:$8 sps:$4 sm:$0xff]  }
  0x4c   :  { %1905 = vmatprep.subr.bf16.mxu1 %v3465_v5  ;;  %v3474_v11 = vld [vmem:[#allocation4 + $0x20] ss:$8 sps:$4 sm:$0xff]   ;;  %v3475_v12 = vld [vmem:[#allocation2 + $0x34] ss:$8 sps:$4 sm:$0xff]   ;;  %v3479_v14 = vld [vmem:[#allocation2 + $0x30] ss:$8 sps:$4 sm:$0xff]  }
  0x4d   :  { %v3477_v13 = vld [vmem:[#allocation4 + $0x34] ss:$8 sps:$4 sm:$0xff]   ;;  %v3480_v15 = vld [vmem:[#allocation4 + $0x30] ss:$8 sps:$4 sm:$0xff]   ;;  %v3481_v16 = vld [vmem:[#allocation2 + $0x44] ss:$8 sps:$4 sm:$0xff]  }
  0x4e   :  { %1099 = vmatpush1.bf16.msra.mxu0 %v3467_v6  ;;  %v3483_v17 = vld [vmem:[#allocation4 + $0x44] ss:$8 sps:$4 sm:$0xff]   ;;  %v3485_v18 = vld [vmem:[#allocation2 + $0x40] ss:$8 sps:$4 sm:$0xff]   ;;  %v3487_v20 = vld [vmem:[#allocation2 + $0x54] ss:$8 sps:$4 sm:$0xff]  }
  0x4f   :  { %1906 = vmatpush1.bf16.msra.mxu1 %v3468_v7  ;;  %1100 = vmatprep.subr.bf16.mxu0 %v3469_v8  ;;  %v3486_v19 = vld [vmem:[#allocation4 + $0x40] ss:$8 sps:$4 sm:$0xff]   ;;  %v3489_v21 = vld [vmem:[#allocation4 + $0x54] ss:$8 sps:$4 sm:$0xff]   ;;  %v3491_v22 = vld [vmem:[#allocation2 + $0x50] ss:$8 sps:$4 sm:$0xff]  }
  0x50   :  { %1907 = vmatprep.subr.bf16.mxu1 %v3471_v9  ;;  %v3492_v23 = vld [vmem:[#allocation4 + $0x50] ss:$8 sps:$4 sm:$0xff]   ;;  %v3493_v24 = vld [vmem:[#allocation2 + $0x64] ss:$8 sps:$4 sm:$0xff]   ;;  %v3497_v26 = vld [vmem:[#allocation2 + $0x60] ss:$8 sps:$4 sm:$0xff]  }
  0x51   :  { %v3495_v25 = vld [vmem:[#allocation4 + $0x64] ss:$8 sps:$4 sm:$0xff]   ;;  %v3498_v27 = vld [vmem:[#allocation4 + $0x60] ss:$8 sps:$4 sm:$0xff]   ;;  %v3499_v28 = vld [vmem:[#allocation2 + $0x74] ss:$8 sps:$4 sm:$0xff]  }
  0x52   :  { %1101 = vmatpush1.bf16.msra.mxu0 %v3473_v10  ;;  %v3501_v29 = vld [vmem:[#allocation4 + $0x74] ss:$8 sps:$4 sm:$0xff]   ;;  %v3503_v30 = vld [vmem:[#allocation2 + $0x70] ss:$8 sps:$4 sm:$0xff]   ;;  %v3505_v32 = vld [vmem:[#allocation2 + $0x84] ss:$8 sps:$4 sm:$0xff]  }
  0x53   :  { %1908 = vmatpush1.bf16.msra.mxu1 %v3474_v11  ;;  %1102 = vmatprep.subr.bf16.mxu0 %v3475_v12  ;;  %v3504_v31 = vld [vmem:[#allocation4 + $0x70] ss:$8 sps:$4 sm:$0xff]   ;;  %v3507_v33 = vld [vmem:[#allocation4 + $0x84] ss:$8 sps:$4 sm:$0xff]   ;;  %v3509_v34 = vld [vmem:[#allocation2 + $0x80] ss:$8 sps:$4 sm:$0xff]  }
  0x54   :  { %1909 = vmatprep.subr.bf16.mxu1 %v3477_v13  ;;  %v3510_v35 = vld [vmem:[#allocation4 + $0x80] ss:$8 sps:$4 sm:$0xff]   ;;  %v3511_v36 = vld [vmem:[#allocation2 + $0x94] ss:$8 sps:$4 sm:$0xff]   ;;  %v3515_v38 = vld [vmem:[#allocation2 + $0x90] ss:$8 sps:$4 sm:$0xff]  }
  0x55   :  { %v3513_v37 = vld [vmem:[#allocation4 + $0x94] ss:$8 sps:$4 sm:$0xff]   ;;  %v3516_v39 = vld [vmem:[#allocation4 + $0x90] ss:$8 sps:$4 sm:$0xff]   ;;  %v3517_v40 = vld [vmem:[#allocation2 + $0xa4] ss:$8 sps:$4 sm:$0xff]  }
  0x56   :  { %1103 = vmatpush1.bf16.msra.mxu0 %v3479_v14  ;;  %v3519_v41 = vld [vmem:[#allocation4 + $0xa4] ss:$8 sps:$4 sm:$0xff]   ;;  %v3521_v42 = vld [vmem:[#allocation2 + $0xa0] ss:$8 sps:$4 sm:$0xff]   ;;  %v3523_v44 = vld [vmem:[#allocation2 + $0xb4] ss:$8 sps:$4 sm:$0xff]  }
  0x57   :  { %1910 = vmatpush1.bf16.msra.mxu1 %v3480_v15  ;;  %1104 = vmatprep.subr.bf16.mxu0 %v3481_v16  ;;  %v3522_v43 = vld [vmem:[#allocation4 + $0xa0] ss:$8 sps:$4 sm:$0xff]   ;;  %v3525_v45 = vld [vmem:[#allocation4 + $0xb4] ss:$8 sps:$4 sm:$0xff]   ;;  %v3527_v47 = vld [vmem:[#allocation2 + $0xb0] ss:$8 sps:$4 sm:$0xff]  }
  0x58   :  { %1911 = vmatprep.subr.bf16.mxu1 %v3483_v17  ;;  %v105_v46 = vld [vmem:[%s4572_s1 + $0x8] sm:$0xff]  ;;  %v3528_v49 = vld [vmem:[#allocation4 + $0xb0] ss:$8 sps:$4 sm:$0xff]   ;;  %v3535_v56 = vld [vmem:[#allocation2 + $0xd4] ss:$8 sps:$4 sm:$0xff]  }
  0x59   :  { %v275_v48 = vpack.c.bf16 %v105_v46, %v105_v46  ;;  %v1304_v50 = vld [vmem:[%s4573_s2 + $0x8] sm:$0xff]  ;;  %v3537_v57 = vld [vmem:[#allocation4 + $0xd4] ss:$8 sps:$4 sm:$0xff]   ;;  %v3539_v58 = vld [vmem:[#allocation2 + $0xd0] ss:$8 sps:$4 sm:$0xff]  }
  0x5a   :  { %1105 = vmatpush1.bf16.msra.mxu0 %v3485_v18  ;;  %v3529_v51 = vld [vmem:[#allocation2 + $0xc4] ss:$8 sps:$4 sm:$0xff]   ;;  %v1406_v53 = vpack.c.bf16 %v1304_v50, %v1304_v50  ;;  %v3533_v54 = vld [vmem:[#allocation2 + $0xc0] ss:$8 sps:$4 sm:$0xff]   ;;  %v3540_v59 = vld [vmem:[#allocation4 + $0xd0] ss:$8 sps:$4 sm:$0xff]  }
  0x5b   :  { %1912 = vmatpush1.bf16.msra.mxu1 %v3486_v19  ;;  %1106 = vmatprep.subr.bf16.mxu0 %v3487_v20  ;;  %v3531_v52 = vld [vmem:[#allocation4 + $0xc4] ss:$8 sps:$4 sm:$0xff]   ;;  %v3534_v55 = vld [vmem:[#allocation4 + $0xc0] ss:$8 sps:$4 sm:$0xff]   ;;  %v3547_v0 = vld [vmem:[#allocation2 + $0xf4] ss:$8 sps:$4 sm:$0xff]  }
  0x5c   :  { %1913 = vmatprep.subr.bf16.mxu1 %v3489_v21  ;;  %1128 = vmatprep.mubr.bf16.mxu0 %v275_v48  ;;  %v3541_v60 = vld [vmem:[#allocation2 + $0xe4] ss:$8 sps:$4 sm:$0xff]   ;;  %v3545_v62 = vld [vmem:[#allocation2 + $0xe0] ss:$8 sps:$4 sm:$0xff]   ;;  %v3549_v1 = vld [vmem:[#allocation4 + $0xf4] ss:$8 sps:$4 sm:$0xff]  }
  0x5d   :  { %1935 = vmatprep.mubr.bf16.mxu1 %v1406_v53  ;;  %v3543_v61 = vld [vmem:[#allocation4 + $0xe4] ss:$8 sps:$4 sm:$0xff]   ;;  %v3546_v63 = vld [vmem:[#allocation4 + $0xe0] ss:$8 sps:$4 sm:$0xff]   ;;  %v3551_v2 = vld [vmem:[#allocation2 + $0xf0] ss:$8 sps:$4 sm:$0xff]  }
  0x5e   :  { %1107 = vmatpush1.bf16.msra.mxu0 %v3491_v22  ;;  %v3552_v3 = vld [vmem:[#allocation4 + $0xf0] ss:$8 sps:$4 sm:$0xff]   ;;  %v3555_v4 = vld [vmem:[#allocation2 + $0x104] ss:$8 sps:$4 sm:$0xff]   ;;  %v3553_v8 = vld [vmem:[#allocation2 + $0x100] ss:$8 sps:$4 sm:$0xff]  }
  0x5f   :  { %1914 = vmatpush1.bf16.msra.mxu1 %v3492_v23  ;;  %1108 = vmatprep.subr.bf16.mxu0 %v3493_v24  ;;  %v104_v5 = vld [vmem:[%s4572_s1] sm:$0xff]  ;;  %v3561_v12 = vld [vmem:[#allocation2 + $0x114] ss:$8 sps:$4 sm:$0xff]   ;;  %v3559_v14 = vld [vmem:[#allocation2 + $0x110] ss:$8 sps:$4 sm:$0xff]  }
  0x60   :  { %1915 = vmatprep.subr.bf16.mxu1 %v3495_v25  ;;  %v1303_v6 = vld [vmem:[%s4573_s2] sm:$0xff]  ;;  %v274_v10 = vpack.c.bf16 %v104_v5, %v104_v5  ;;  %v3564_v13 = vld [vmem:[#allocation4 + $0x114] ss:$8 sps:$4 sm:$0xff]   ;;  %v3562_v15 = vld [vmem:[#allocation4 + $0x110] ss:$8 sps:$4 sm:$0xff]  }
  0x61   :  { %v3558_v7 = vld [vmem:[#allocation4 + $0x104] ss:$8 sps:$4 sm:$0xff]   ;;  %v3556_v9 = vld [vmem:[#allocation4 + $0x100] ss:$8 sps:$4 sm:$0xff]   ;;  %v1405_v11 = vpack.c.bf16 %v1303_v6, %v1303_v6  ;;  %v3573_v20 = vld [vmem:[#allocation2 + $0x134] ss:$8 sps:$4 sm:$0xff]  }
  0x62   :  { %1109 = vmatpush1.bf16.msra.mxu0 %v3497_v26  ;;  %v3567_v16 = vld [vmem:[#allocation2 + $0x124] ss:$8 sps:$4 sm:$0xff]   ;;  %v3565_v18 = vld [vmem:[#allocation2 + $0x120] ss:$8 sps:$4 sm:$0xff]   ;;  %v3576_v21 = vld [vmem:[#allocation4 + $0x134] ss:$8 sps:$4 sm:$0xff]  }
  0x63   :  { %1916 = vmatpush1.bf16.msra.mxu1 %v3498_v27  ;;  %1110 = vmatprep.subr.bf16.mxu0 %v3499_v28  ;;  %v3570_v17 = vld [vmem:[#allocation4 + $0x124] ss:$8 sps:$4 sm:$0xff]   ;;  %v3568_v19 = vld [vmem:[#allocation4 + $0x120] ss:$8 sps:$4 sm:$0xff]   ;;  %v3571_v22 = vld [vmem:[#allocation2 + $0x130] ss:$8 sps:$4 sm:$0xff]  }
  0x64   :  { %1917 = vmatprep.subr.bf16.mxu1 %v3501_v29  ;;  %v3574_v23 = vld [vmem:[#allocation4 + $0x130] ss:$8 sps:$4 sm:$0xff]   ;;  %v3579_v24 = vld [vmem:[#allocation2 + $0x144] ss:$8 sps:$4 sm:$0xff]   ;;  %v3577_v26 = vld [vmem:[#allocation2 + $0x140] ss:$8 sps:$4 sm:$0xff]  }
  0x65   :  { %v3582_v25 = vld [vmem:[#allocation4 + $0x144] ss:$8 sps:$4 sm:$0xff]   ;;  %v3580_v27 = vld [vmem:[#allocation4 + $0x140] ss:$8 sps:$4 sm:$0xff]   ;;  %v3585_v28 = vld [vmem:[#allocation2 + $0x154] ss:$8 sps:$4 sm:$0xff]  }
  0x66   :  { %1111 = vmatpush1.bf16.msra.mxu0 %v3503_v30  ;;  %v3588_v29 = vld [vmem:[#allocation4 + $0x154] ss:$8 sps:$4 sm:$0xff]   ;;  %v3583_v30 = vld [vmem:[#allocation2 + $0x150] ss:$8 sps:$4 sm:$0xff]   ;;  %v3601_v46 = vld [vmem:[#allocation2 + $0x180] ss:$8 sps:$4 sm:$0xff]  }
  0x67   :  { %1918 = vmatpush1.bf16.msra.mxu1 %v3504_v31  ;;  %1112 = vmatprep.subr.bf16.mxu0 %v3505_v32  ;;  %v3586_v31 = vld [vmem:[#allocation4 + $0x150] ss:$8 sps:$4 sm:$0xff]   ;;  %v3591_v32 = vld [vmem:[#allocation2 + $0x164] ss:$8 sps:$4 sm:$0xff]   ;;  %v3609_v48 = vld [vmem:[#allocation2 + $0x194] ss:$8 sps:$4 sm:$0xff]  }
  0x68   :  { %1919 = vmatprep.subr.bf16.mxu1 %v3507_v33  ;;  %v3594_v33 = vld [vmem:[#allocation4 + $0x164] ss:$8 sps:$4 sm:$0xff]   ;;  %v3607_v50 = vld [vmem:[#allocation2 + $0x190] ss:$8 sps:$4 sm:$0xff]   ;;  %v3637_v6 = vld [vmem:[#allocation2 + $0x1e0] ss:$8 sps:$4 sm:$0xff]  }
  0x69   :  { %v3618_v53 = vld [vmem:[#allocation4 + $0x1a4] ss:$8 sps:$4 sm:$0xff]  }
  0x6a   :  { %1113 = vmatpush1.bf16.msra.mxu0 %v3509_v34  ;;  %v107_v34 = vld [vmem:[%s4572_s1 + $0x18] sm:$0xff]  ;;  %v3642_v5 = vld [vmem:[#allocation4 + $0x1e4] ss:$8 sps:$4 sm:$0xff]  }
  0x6b   :  { %1920 = vmatpush1.bf16.msra.mxu1 %v3510_v35  ;;  %1114 = vmatprep.subr.bf16.mxu0 %v3511_v36  ;;  %v3589_v35 = vld [vmem:[#allocation2 + $0x160] ss:$8 sps:$4 sm:$0xff]   ;;  %v277_v36 = vpack.c.bf16 %v107_v34, %v107_v34  ;;  %v3667_v34 = vld [vmem:[#allocation2 + $0x230] ss:$8 sps:$4 sm:$0xff]  }
  0x6c   :  { %1921 = vmatprep.subr.bf16.mxu1 %v3513_v37  ;;  %v3592_v37 = vld [vmem:[#allocation4 + $0x160] ss:$8 sps:$4 sm:$0xff]  }
  0x6e   :  { %1115 = vmatpush1.bf16.msra.mxu0 %v3515_v38  ;;  %v1306_v38 = vld [vmem:[%s4573_s2 + $0x18] sm:$0xff] }
  0x6f   :  { %1922 = vmatpush1.bf16.msra.mxu1 %v3516_v39  ;;  %1116 = vmatprep.subr.bf16.mxu0 %v3517_v40  ;;  %v3597_v39 = vld [vmem:[#allocation2 + $0x174] ss:$8 sps:$4 sm:$0xff]  }
  0x70   :  { %1923 = vmatprep.subr.bf16.mxu1 %v3519_v41  ;;  %v3600_v40 = vld [vmem:[#allocation4 + $0x174] ss:$8 sps:$4 sm:$0xff]   ;;  %v1408_v41 = vpack.c.bf16 %v1306_v38, %v1306_v38  ;;  %v3673_v38 = vld [vmem:[#allocation2 + $0x240] ss:$8 sps:$4 sm:$0xff]  }
  0x72   :  { %1117 = vmatpush1.bf16.msra.mxu0 %v3521_v42  ;;  %v3595_v42 = vld [vmem:[#allocation2 + $0x170] ss:$8 sps:$4 sm:$0xff]  }
  0x73   :  { %1924 = vmatpush1.bf16.msra.mxu1 %v3522_v43  ;;  %1118 = vmatprep.subr.bf16.mxu0 %v3523_v44  ;;  %v3598_v43 = vld [vmem:[#allocation4 + $0x170] ss:$8 sps:$4 sm:$0xff]   ;;  %v3603_v44 = vld [vmem:[#allocation2 + $0x184] ss:$8 sps:$4 sm:$0xff]  }
  0x74   :  { %1925 = vmatprep.subr.bf16.mxu1 %v3525_v45  ;;  %v3606_v45 = vld [vmem:[#allocation4 + $0x184] ss:$8 sps:$4 sm:$0xff]  }
  0x76   :  { %1119 = vmatpush1.bf16.msra.mxu0 %v3527_v47  ;;  %v3604_v47 = vld [vmem:[#allocation4 + $0x180] ss:$8 sps:$4 sm:$0xff]  }
  0x77   :  { %1926 = vmatpush1.bf16.msra.mxu1 %v3528_v49  ;;  %1120 = vmatprep.subr.bf16.mxu0 %v3529_v51  ;;  %v3612_v49 = vld [vmem:[#allocation4 + $0x194] ss:$8 sps:$4 sm:$0xff]   ;;  %v3610_v51 = vld [vmem:[#allocation4 + $0x190] ss:$8 sps:$4 sm:$0xff]  }
  0x78   :  { %1927 = vmatprep.subr.bf16.mxu1 %v3531_v52  ;;  %v3615_v52 = vld [vmem:[#allocation2 + $0x1a4] ss:$8 sps:$4 sm:$0xff]  }
  0x7a   :  { %1121 = vmatpush1.bf16.msra.mxu0 %v3533_v54  ;;  %v3613_v54 = vld [vmem:[#allocation2 + $0x1a0] ss:$8 sps:$4 sm:$0xff]  }
  0x7b   :  { %1928 = vmatpush1.bf16.msra.mxu1 %v3534_v55  ;;  %1122 = vmatprep.subr.bf16.mxu0 %v3535_v56  ;;  %v3616_v55 = vld [vmem:[#allocation4 + $0x1a0] ss:$8 sps:$4 sm:$0xff]   ;;  %v3621_v56 = vld [vmem:[#allocation2 + $0x1b4] ss:$8 sps:$4 sm:$0xff]  }
  0x7c   :  { %1929 = vmatprep.subr.bf16.mxu1 %v3537_v57  ;;  %v3624_v57 = vld [vmem:[#allocation4 + $0x1b4] ss:$8 sps:$4 sm:$0xff]  }
  0x7e   :  { %1123 = vmatpush1.bf16.msra.mxu0 %v3539_v58  ;;  %v3619_v58 = vld [vmem:[#allocation2 + $0x1b0] ss:$8 sps:$4 sm:$0xff]  }
  0x7f   :  { %1930 = vmatpush1.bf16.msra.mxu1 %v3540_v59  ;;  %1124 = vmatprep.subr.bf16.mxu0 %v3541_v60  ;;  %v3622_v59 = vld [vmem:[#allocation4 + $0x1b0] ss:$8 sps:$4 sm:$0xff]   ;;  %v3627_v60 = vld [vmem:[#allocation2 + $0x1c4] ss:$8 sps:$4 sm:$0xff]  }
  0x80   :  { %1931 = vmatprep.subr.bf16.mxu1 %v3543_v61  ;;  %v3630_v61 = vld [vmem:[#allocation4 + $0x1c4] ss:$8 sps:$4 sm:$0xff]  }
  0x82   :  { %1125 = vmatpush1.bf16.msra.mxu0 %v3545_v62  ;;  %v3625_v62 = vld [vmem:[#allocation2 + $0x1c0] ss:$8 sps:$4 sm:$0xff]  }
  0x83   :  { %1932 = vmatpush1.bf16.msra.mxu1 %v3546_v63  ;;  %1126 = vmatprep.subr.bf16.mxu0 %v3547_v0  ;;  %v3628_v63 = vld [vmem:[#allocation4 + $0x1c0] ss:$8 sps:$4 sm:$0xff]   ;;  %v3633_v0 = vld [vmem:[#allocation2 + $0x1d4] ss:$8 sps:$4 sm:$0xff]  }
  0x84   :  { %1933 = vmatprep.subr.bf16.mxu1 %v3549_v1  ;;  %v3636_v1 = vld [vmem:[#allocation4 + $0x1d4] ss:$8 sps:$4 sm:$0xff]  }
  0x86   :  { %1127 = vmatpush1.bf16.msra.mxu0 %v3551_v2  ;;  %v3631_v2 = vld [vmem:[#allocation2 + $0x1d0] ss:$8 sps:$4 sm:$0xff]  }
  0x87   :  { %1934 = vmatpush1.bf16.msra.mxu1 %v3552_v3  ;;  %1137 = vmatprep.subr.bf16.mxu0 %v3555_v4  ;;  %v3634_v3 = vld [vmem:[#allocation4 + $0x1d0] ss:$8 sps:$4 sm:$0xff]   ;;  %v3639_v4 = vld [vmem:[#allocation2 + $0x1e4] ss:$8 sps:$4 sm:$0xff]  }
  0x88   :  { %1944 = vmatprep.subr.bf16.mxu1 %v3558_v7  ;;  %v3640_v7 = vld [vmem:[#allocation4 + $0x1e0] ss:$8 sps:$4 sm:$0xff]  }
  0x89   :  { %1129 = vmatmul.mubr.bf16.vlgmr.msra.gmra.mrb[0].mxu0 %v274_v10  ;;  %v3643_v10 = vld [vmem:[#allocation2 + $0x1f0] ss:$8 sps:$4 sm:$0xff]  }
  0x8a   :  { %1936 = vmatmul.mubr.bf16.vlgmr.msra.gmra.mrb[0].mxu1 %v1405_v11  ;;  %1138 = vmatpush1.bf16.msra.mxu0 %v3553_v8  ;;  %v3645_v8 = vld [vmem:[#allocation2 + $0x1f4] ss:$8 sps:$4 sm:$0xff]   ;;  %v3646_v11 = vld [vmem:[#allocation4 + $0x1f0] ss:$8 sps:$4 sm:$0xff]  }
  0x8b   :  { %1945 = vmatpush1.bf16.msra.mxu1 %v3556_v9  ;;  %1139 = vmatprep.subr.bf16.mxu0 %v3561_v12  ;;  %v3648_v9 = vld [vmem:[#allocation4 + $0x1f4] ss:$8 sps:$4 sm:$0xff]   ;;  %v3651_v12 = vld [vmem:[#allocation2 + $0x204] ss:$8 sps:$4 sm:$0xff]  }
  0x8c   :  { %1946 = vmatprep.subr.bf16.mxu1 %v3564_v13  ;;  %1169 = vmatprep.mubr.bf16.mxu0 %v277_v36  ;;  %v106_v13 = vld [vmem:[%s4572_s1 + $0x10] sm:$0xff]  ;;  %v3675_v36 = vld [vmem:[#allocation2 + $0x244] ss:$8 sps:$4 sm:$0xff]  }
  0x8d   :  { %1976 = vmatprep.mubr.bf16.mxu1 %v1408_v41  ;;  %v3684_v41 = vld [vmem:[#allocation4 + $0x254] ss:$8 sps:$4 sm:$0xff]  }
  0x8e   :  { %1140 = vmatpush1.bf16.msra.mxu0 %v3559_v14  ;;  %v1305_v14 = vld [vmem:[%s4573_s2 + $0x10] sm:$0xff] }
  0x8f   :  { %1947 = vmatpush1.bf16.msra.mxu1 %v3562_v15  ;;  %1141 = vmatprep.subr.bf16.mxu0 %v3567_v16  ;;  %v3654_v15 = vld [vmem:[#allocation4 + $0x204] ss:$8 sps:$4 sm:$0xff]   ;;  %v3649_v16 = vld [vmem:[#allocation2 + $0x200] ss:$8 sps:$4 sm:$0xff]  }
  0x90   :  { %1948 = vmatprep.subr.bf16.mxu1 %v3570_v17  ;;  %v3652_v17 = vld [vmem:[#allocation4 + $0x200] ss:$8 sps:$4 sm:$0xff]  }
  0x92   :  { %1142 = vmatpush1.bf16.msra.mxu0 %v3565_v18  ;;  %v276_v18 = vpack.c.bf16 %v106_v13, %v106_v13  ;;  %v3738_v13 = vld [vmem:[#allocation4 + $0x2e4] ss:$8 sps:$4 sm:$0xff]  }
  0x93   :  { %1949 = vmatpush1.bf16.msra.mxu1 %v3568_v19  ;;  %1143 = vmatprep.subr.bf16.mxu0 %v3573_v20  ;;  %v1407_v19 = vpack.c.bf16 %v1305_v14, %v1305_v14  ;;  %v3657_v20 = vld [vmem:[#allocation2 + $0x214] ss:$8 sps:$4 sm:$0xff]   ;;  %v3733_v14 = vld [vmem:[#allocation2 + $0x2e0] ss:$8 sps:$4 sm:$0xff]  }
  0x94   :  { %1950 = vmatprep.subr.bf16.mxu1 %v3576_v21  ;;  %v3660_v21 = vld [vmem:[#allocation4 + $0x214] ss:$8 sps:$4 sm:$0xff]  }
  0x96   :  { %1144 = vmatpush1.bf16.msra.mxu0 %v3571_v22  ;;  %v1308_v22 = vld [vmem:[%s4573_s2 + $0x28] sm:$0xff] }
  0x97   :  { %1951 = vmatpush1.bf16.msra.mxu1 %v3574_v23  ;;  %1145 = vmatprep.subr.bf16.mxu0 %v3579_v24  ;;  %v1410_v23 = vpack.c.bf16 %v1308_v22, %v1308_v22  ;;  %v109_v24 = vld [vmem:[%s4572_s1 + $0x28] sm:$0xff]  ;;  %v108_v22 = vld [vmem:[%s4572_s1 + $0x20] sm:$0xff] }
  0x98   :  { %1952 = vmatprep.subr.bf16.mxu1 %v3582_v25  ;;  %v3655_v25 = vld [vmem:[#allocation2 + $0x210] ss:$8 sps:$4 sm:$0xff]  }
  0x9a   :  { %1146 = vmatpush1.bf16.msra.mxu0 %v3577_v26  ;;  %v3658_v26 = vld [vmem:[#allocation4 + $0x210] ss:$8 sps:$4 sm:$0xff]  }
  0x9b   :  { %1953 = vmatpush1.bf16.msra.mxu1 %v3580_v27  ;;  %1147 = vmatprep.subr.bf16.mxu0 %v3585_v28  ;;  %v3663_v27 = vld [vmem:[#allocation2 + $0x224] ss:$8 sps:$4 sm:$0xff]   ;;  %v279_v28 = vpack.c.bf16 %v109_v24, %v109_v24  ;;  %v3745_v24 = vld [vmem:[#allocation2 + $0x300] ss:$8 sps:$4 sm:$0xff]  }
  0x9c   :  { %1954 = vmatprep.subr.bf16.mxu1 %v3588_v29  ;;  %v3666_v29 = vld [vmem:[#allocation4 + $0x224] ss:$8 sps:$4 sm:$0xff]  }
  0x9e   :  { %1148 = vmatpush1.bf16.msra.mxu0 %v3583_v30  ;;  %v3661_v30 = vld [vmem:[#allocation2 + $0x220] ss:$8 sps:$4 sm:$0xff]  }
  0x9f   :  { %1955 = vmatpush1.bf16.msra.mxu1 %v3586_v31  ;;  %1149 = vmatprep.subr.bf16.mxu0 %v3591_v32  ;;  %v3664_v31 = vld [vmem:[#allocation4 + $0x220] ss:$8 sps:$4 sm:$0xff]   ;;  %v3669_v32 = vld [vmem:[#allocation2 + $0x234] ss:$8 sps:$4 sm:$0xff]  }
  0xa0   :  { %1956 = vmatprep.subr.bf16.mxu1 %v3594_v33  ;;  %v3672_v33 = vld [vmem:[#allocation4 + $0x234] ss:$8 sps:$4 sm:$0xff]  }
  0xa2   :  { %1150 = vmatpush1.bf16.msra.mxu0 %v3589_v35  ;;  %v3670_v35 = vld [vmem:[#allocation4 + $0x230] ss:$8 sps:$4 sm:$0xff]  }
  0xa3   :  { %1957 = vmatpush1.bf16.msra.mxu1 %v3592_v37  ;;  %1151 = vmatprep.subr.bf16.mxu0 %v3597_v39  ;;  %v3678_v37 = vld [vmem:[#allocation4 + $0x244] ss:$8 sps:$4 sm:$0xff]   ;;  %v3676_v39 = vld [vmem:[#allocation4 + $0x240] ss:$8 sps:$4 sm:$0xff]  }
  0xa4   :  { %1958 = vmatprep.subr.bf16.mxu1 %v3600_v40  ;;  %v3681_v40 = vld [vmem:[#allocation2 + $0x254] ss:$8 sps:$4 sm:$0xff]  }
  0xa6   :  { %1152 = vmatpush1.bf16.msra.mxu0 %v3595_v42  ;;  %v3679_v42 = vld [vmem:[#allocation2 + $0x250] ss:$8 sps:$4 sm:$0xff]  }
  0xa7   :  { %1959 = vmatpush1.bf16.msra.mxu1 %v3598_v43  ;;  %1153 = vmatprep.subr.bf16.mxu0 %v3603_v44  ;;  %v3682_v43 = vld [vmem:[#allocation4 + $0x250] ss:$8 sps:$4 sm:$0xff]   ;;  %v3687_v44 = vld [vmem:[#allocation2 + $0x264] ss:$8 sps:$4 sm:$0xff]  }
  0xa8   :  { %1960 = vmatprep.subr.bf16.mxu1 %v3606_v45  ;;  %v3690_v45 = vld [vmem:[#allocation4 + $0x264] ss:$8 sps:$4 sm:$0xff]  }
  0xaa   :  { %1154 = vmatpush1.bf16.msra.mxu0 %v3601_v46  ;;  %v3685_v46 = vld [vmem:[#allocation2 + $0x260] ss:$8 sps:$4 sm:$0xff]  }
  0xab   :  { %1961 = vmatpush1.bf16.msra.mxu1 %v3604_v47  ;;  %1155 = vmatprep.subr.bf16.mxu0 %v3609_v48  ;;  %v3688_v47 = vld [vmem:[#allocation4 + $0x260] ss:$8 sps:$4 sm:$0xff]   ;;  %v3693_v48 = vld [vmem:[#allocation2 + $0x274] ss:$8 sps:$4 sm:$0xff]  }
  0xac   :  { %1962 = vmatprep.subr.bf16.mxu1 %v3612_v49  ;;  %v3696_v49 = vld [vmem:[#allocation4 + $0x274] ss:$8 sps:$4 sm:$0xff]  }
  0xae   :  { %1156 = vmatpush1.bf16.msra.mxu0 %v3607_v50  ;;  %v3691_v50 = vld [vmem:[#allocation2 + $0x270] ss:$8 sps:$4 sm:$0xff]  }
  0xaf   :  { %1963 = vmatpush1.bf16.msra.mxu1 %v3610_v51  ;;  %1157 = vmatprep.subr.bf16.mxu0 %v3615_v52  ;;  %v3694_v51 = vld [vmem:[#allocation4 + $0x270] ss:$8 sps:$4 sm:$0xff]   ;;  %v3699_v52 = vld [vmem:[#allocation2 + $0x284] ss:$8 sps:$4 sm:$0xff]  }
  0xb0   :  { %1964 = vmatprep.subr.bf16.mxu1 %v3618_v53  ;;  %v3702_v53 = vld [vmem:[#allocation4 + $0x284] ss:$8 sps:$4 sm:$0xff]  }
  0xb2   :  { %1158 = vmatpush1.bf16.msra.mxu0 %v3613_v54  ;;  %v3697_v54 = vld [vmem:[#allocation2 + $0x280] ss:$8 sps:$4 sm:$0xff]  }
  0xb3   :  { %1965 = vmatpush1.bf16.msra.mxu1 %v3616_v55  ;;  %1159 = vmatprep.subr.bf16.mxu0 %v3621_v56  ;;  %v3700_v55 = vld [vmem:[#allocation4 + $0x280] ss:$8 sps:$4 sm:$0xff]   ;;  %v3705_v56 = vld [vmem:[#allocation2 + $0x294] ss:$8 sps:$4 sm:$0xff]  }
  0xb4   :  { %1966 = vmatprep.subr.bf16.mxu1 %v3624_v57  ;;  %v3708_v57 = vld [vmem:[#allocation4 + $0x294] ss:$8 sps:$4 sm:$0xff]  }
  0xb6   :  { %1160 = vmatpush1.bf16.msra.mxu0 %v3619_v58  ;;  %v3703_v58 = vld [vmem:[#allocation2 + $0x290] ss:$8 sps:$4 sm:$0xff]  }
  0xb7   :  { %1967 = vmatpush1.bf16.msra.mxu1 %v3622_v59  ;;  %1161 = vmatprep.subr.bf16.mxu0 %v3627_v60  ;;  %v3706_v59 = vld [vmem:[#allocation4 + $0x290] ss:$8 sps:$4 sm:$0xff]   ;;  %v3711_v60 = vld [vmem:[#allocation2 + $0x2a4] ss:$8 sps:$4 sm:$0xff]  }
  0xb8   :  { %1968 = vmatprep.subr.bf16.mxu1 %v3630_v61  ;;  %v3714_v61 = vld [vmem:[#allocation4 + $0x2a4] ss:$8 sps:$4 sm:$0xff]  }
  0xba   :  { %1162 = vmatpush1.bf16.msra.mxu0 %v3625_v62  ;;  %v3709_v62 = vld [vmem:[#allocation2 + $0x2a0] ss:$8 sps:$4 sm:$0xff]  }
  0xbb   :  { %1969 = vmatpush1.bf16.msra.mxu1 %v3628_v63  ;;  %1163 = vmatprep.subr.bf16.mxu0 %v3633_v0  ;;  %v3712_v63 = vld [vmem:[#allocation4 + $0x2a0] ss:$8 sps:$4 sm:$0xff]   ;;  %v3717_v0 = vld [vmem:[#allocation2 + $0x2b4] ss:$8 sps:$4 sm:$0xff]  }
  0xbc   :  { %1970 = vmatprep.subr.bf16.mxu1 %v3636_v1  ;;  %v3720_v1 = vld [vmem:[#allocation4 + $0x2b4] ss:$8 sps:$4 sm:$0xff]  }
  0xbe   :  { %1164 = vmatpush1.bf16.msra.mxu0 %v3631_v2  ;;  %v3715_v2 = vld [vmem:[#allocation2 + $0x2b0] ss:$8 sps:$4 sm:$0xff]  }
  0xbf   :  { %1971 = vmatpush1.bf16.msra.mxu1 %v3634_v3  ;;  %1165 = vmatprep.subr.bf16.mxu0 %v3639_v4  ;;  %v3718_v3 = vld [vmem:[#allocation4 + $0x2b0] ss:$8 sps:$4 sm:$0xff]   ;;  %v3723_v4 = vld [vmem:[#allocation2 + $0x2c4] ss:$8 sps:$4 sm:$0xff]  }
  0xc0   :  { %1972 = vmatprep.subr.bf16.mxu1 %v3642_v5  ;;  %v3726_v5 = vld [vmem:[#allocation4 + $0x2c4] ss:$8 sps:$4 sm:$0xff]  }
  0xc2   :  { %1166 = vmatpush1.bf16.msra.mxu0 %v3637_v6  ;;  %v3721_v6 = vld [vmem:[#allocation2 + $0x2c0] ss:$8 sps:$4 sm:$0xff]  }
  0xc3   :  { %1973 = vmatpush1.bf16.msra.mxu1 %v3640_v7  ;;  %1167 = vmatprep.subr.bf16.mxu0 %v3645_v8  ;;  %v3724_v7 = vld [vmem:[#allocation4 + $0x2c0] ss:$8 sps:$4 sm:$0xff]   ;;  %v3729_v8 = vld [vmem:[#allocation2 + $0x2d4] ss:$8 sps:$4 sm:$0xff]  }
  0xc4   :  { %1974 = vmatprep.subr.bf16.mxu1 %v3648_v9  ;;  %v3732_v9 = vld [vmem:[#allocation4 + $0x2d4] ss:$8 sps:$4 sm:$0xff]  }
  0xc6   :  { %1168 = vmatpush1.bf16.msra.mxu0 %v3643_v10  ;;  %v3727_v10 = vld [vmem:[#allocation2 + $0x2d0] ss:$8 sps:$4 sm:$0xff]  }
  0xc7   :  { %1975 = vmatpush1.bf16.msra.mxu1 %v3646_v11  ;;  %1178 = vmatprep.subr.bf16.mxu0 %v3651_v12  ;;  %v3730_v11 = vld [vmem:[#allocation4 + $0x2d0] ss:$8 sps:$4 sm:$0xff]   ;;  %v3735_v12 = vld [vmem:[#allocation2 + $0x2e4] ss:$8 sps:$4 sm:$0xff]  }
  0xc8   :  { %1985 = vmatprep.subr.bf16.mxu1 %v3654_v15  ;;  %v3736_v15 = vld [vmem:[#allocation4 + $0x2e0] ss:$8 sps:$4 sm:$0xff]  }
  0xc9   :  { %1170 = vmatmul.mubr.bf16.vlgmr.msra.gmra.mrb[0].mxu0 %v276_v18  ;;  %v3739_v18 = vld [vmem:[#allocation2 + $0x2f0] ss:$8 sps:$4 sm:$0xff]  }
  0xca   :  { %1977 = vmatmul.mubr.bf16.vlgmr.msra.gmra.mrb[0].mxu1 %v1407_v19  ;;  %1179 = vmatpush1.bf16.msra.mxu0 %v3649_v16  ;;  %v3741_v16 = vld [vmem:[#allocation2 + $0x2f4] ss:$8 sps:$4 sm:$0xff]   ;;  %v3742_v19 = vld [vmem:[#allocation4 + $0x2f0] ss:$8 sps:$4 sm:$0xff]  }
  0xcb   :  { %1986 = vmatpush1.bf16.msra.mxu1 %v3652_v17  ;;  %1180 = vmatprep.subr.bf16.mxu0 %v3657_v20  ;;  %v3744_v17 = vld [vmem:[#allocation4 + $0x2f4] ss:$8 sps:$4 sm:$0xff]   ;;  %v1307_v20 = vld [vmem:[%s4573_s2 + $0x20] sm:$0xff] }
  0xcc   :  { %1987 = vmatprep.subr.bf16.mxu1 %v3660_v21  ;;  %2017 = vmatprep.mubr.bf16.mxu1 %v1410_v23  ;;  %v3747_v21 = vld [vmem:[#allocation2 + $0x304] ss:$8 sps:$4 sm:$0xff]   ;;  %v111_v23 = vld [vmem:[%s4572_s1 + $0x38] sm:$0xff] }
  0xcd   :  { %1210 = vmatprep.mubr.bf16.mxu0 %v279_v28  ;;  %v281_v28 = vpack.c.bf16 %v111_v23, %v111_v23  ;;  %v3852_v23 = vld [vmem:[%s4578_s7 + $0x34] ss:$8 sps:$4 sm:$0xff]  }
  0xce   :  { %1181 = vmatpush1.bf16.msra.mxu0 %v3655_v25  ;;  %v1409_v25 = vpack.c.bf16 %v1307_v20, %v1307_v20  ;;  %v3817_v20 = vld [vmem:[#allocation2 + $0x480] ss:$8 sps:$4 sm:$0xff]  }
  0xcf   :  { %1988 = vmatpush1.bf16.msra.mxu1 %v3658_v26  ;;  %1182 = vmatprep.subr.bf16.mxu0 %v3663_v27  ;;  %v278_v26 = vpack.c.bf16 %v108_v22, %v108_v22  ;;  %v3750_v27 = vld [vmem:[#allocation2 + $0x314] ss:$8 sps:$4 sm:$0xff]   ;;  %v3847_v22 = vld [vmem:[%s4578_s7 + $0x20] ss:$8 sps:$4 sm:$0xff]  }
  0xd0   :  { %1989 = vmatprep.subr.bf16.mxu1 %v3666_v29  ;;  %v3748_v29 = vld [vmem:[#allocation2 + $0x310] ss:$8 sps:$4 sm:$0xff]  }
  0xd2   :  { %1183 = vmatpush1.bf16.msra.mxu0 %v3661_v30  ;;  %v3753_v30 = vld [vmem:[#allocation2 + $0x324] ss:$8 sps:$4 sm:$0xff]  }
  0xd3   :  { %1990 = vmatpush1.bf16.msra.mxu1 %v3664_v31  ;;  %1184 = vmatprep.subr.bf16.mxu0 %v3669_v32  ;;  %v3751_v31 = vld [vmem:[#allocation2 + $0x320] ss:$8 sps:$4 sm:$0xff]   ;;  %v3756_v32 = vld [vmem:[#allocation2 + $0x334] ss:$8 sps:$4 sm:$0xff]  }
  0xd4   :  { %1991 = vmatprep.subr.bf16.mxu1 %v3672_v33  ;;  %v3754_v33 = vld [vmem:[#allocation2 + $0x330] ss:$8 sps:$4 sm:$0xff]  }
  0xd6   :  { %1185 = vmatpush1.bf16.msra.mxu0 %v3667_v34  ;;  %v3759_v34 = vld [vmem:[#allocation2 + $0x344] ss:$8 sps:$4 sm:$0xff]  }
  0xd7   :  { %1992 = vmatpush1.bf16.msra.mxu1 %v3670_v35  ;;  %1186 = vmatprep.subr.bf16.mxu0 %v3675_v36  ;;  %v3757_v35 = vld [vmem:[#allocation2 + $0x340] ss:$8 sps:$4 sm:$0xff]   ;;  %v3762_v36 = vld [vmem:[#allocation2 + $0x354] ss:$8 sps:$4 sm:$0xff]  }
  0xd8   :  { %1993 = vmatprep.subr.bf16.mxu1 %v3678_v37  ;;  %v3760_v37 = vld [vmem:[#allocation2 + $0x350] ss:$8 sps:$4 sm:$0xff]  }
  0xda   :  { %1187 = vmatpush1.bf16.msra.mxu0 %v3673_v38  ;;  %v3765_v38 = vld [vmem:[#allocation2 + $0x364] ss:$8 sps:$4 sm:$0xff]  }
  0xdb   :  { %1994 = vmatpush1.bf16.msra.mxu1 %v3676_v39  ;;  %1188 = vmatprep.subr.bf16.mxu0 %v3681_v40  ;;  %v3763_v39 = vld [vmem:[#allocation2 + $0x360] ss:$8 sps:$4 sm:$0xff]   ;;  %v3768_v40 = vld [vmem:[#allocation2 + $0x374] ss:$8 sps:$4 sm:$0xff]  }
  0xdc   :  { %1995 = vmatprep.subr.bf16.mxu1 %v3684_v41  ;;  %v3766_v41 = vld [vmem:[#allocation2 + $0x370] ss:$8 sps:$4 sm:$0xff]  }
  0xde   :  { %1189 = vmatpush1.bf16.msra.mxu0 %v3679_v42  ;;  %v3771_v42 = vld [vmem:[#allocation2 + $0x384] ss:$8 sps:$4 sm:$0xff]  }
  0xdf   :  { %1996 = vmatpush1.bf16.msra.mxu1 %v3682_v43  ;;  %1190 = vmatprep.subr.bf16.mxu0 %v3687_v44  ;;  %v3769_v43 = vld [vmem:[#allocation2 + $0x380] ss:$8 sps:$4 sm:$0xff]   ;;  %v3774_v44 = vld [vmem:[#allocation2 + $0x394] ss:$8 sps:$4 sm:$0xff]  }
  0xe0   :  { %1997 = vmatprep.subr.bf16.mxu1 %v3690_v45  ;;  %v3772_v45 = vld [vmem:[#allocation2 + $0x390] ss:$8 sps:$4 sm:$0xff]  }
  0xe2   :  { %1191 = vmatpush1.bf16.msra.mxu0 %v3685_v46  ;;  %v3777_v46 = vld [vmem:[#allocation2 + $0x3a4] ss:$8 sps:$4 sm:$0xff]  }
  0xe3   :  { %1998 = vmatpush1.bf16.msra.mxu1 %v3688_v47  ;;  %1192 = vmatprep.subr.bf16.mxu0 %v3693_v48  ;;  %v3775_v47 = vld [vmem:[#allocation2 + $0x3a0] ss:$8 sps:$4 sm:$0xff]   ;;  %v3780_v48 = vld [vmem:[#allocation2 + $0x3b4] ss:$8 sps:$4 sm:$0xff]  }
  0xe4   :  { %1999 = vmatprep.subr.bf16.mxu1 %v3696_v49  ;;  %v3778_v49 = vld [vmem:[#allocation2 + $0x3b0] ss:$8 sps:$4 sm:$0xff]  }
  0xe6   :  { %1193 = vmatpush1.bf16.msra.mxu0 %v3691_v50  ;;  %v3783_v50 = vld [vmem:[#allocation2 + $0x3c4] ss:$8 sps:$4 sm:$0xff]  }
  0xe7   :  { %2000 = vmatpush1.bf16.msra.mxu1 %v3694_v51  ;;  %1194 = vmatprep.subr.bf16.mxu0 %v3699_v52  ;;  %v3781_v51 = vld [vmem:[#allocation2 + $0x3c0] ss:$8 sps:$4 sm:$0xff]   ;;  %v3786_v52 = vld [vmem:[#allocation2 + $0x3d4] ss:$8 sps:$4 sm:$0xff]  }
  0xe8   :  { %2001 = vmatprep.subr.bf16.mxu1 %v3702_v53  ;;  %v3784_v53 = vld [vmem:[#allocation2 + $0x3d0] ss:$8 sps:$4 sm:$0xff]  }
  0xea   :  { %1195 = vmatpush1.bf16.msra.mxu0 %v3697_v54  ;;  %v3789_v54 = vld [vmem:[#allocation2 + $0x3e4] ss:$8 sps:$4 sm:$0xff]  }
  0xeb   :  { %2002 = vmatpush1.bf16.msra.mxu1 %v3700_v55  ;;  %1196 = vmatprep.subr.bf16.mxu0 %v3705_v56  ;;  %v3787_v55 = vld [vmem:[#allocation2 + $0x3e0] ss:$8 sps:$4 sm:$0xff]   ;;  %v3792_v56 = vld [vmem:[#allocation2 + $0x3f4] ss:$8 sps:$4 sm:$0xff]  }
  0xec   :  { %2003 = vmatprep.subr.bf16.mxu1 %v3708_v57  ;;  %v3790_v57 = vld [vmem:[#allocation2 + $0x3f0] ss:$8 sps:$4 sm:$0xff]  }
  0xee   :  { %1197 = vmatpush1.bf16.msra.mxu0 %v3703_v58  ;;  %v110_v58 = vld [vmem:[%s4572_s1 + $0x30] sm:$0xff] }
  0xef   :  { %2004 = vmatpush1.bf16.msra.mxu1 %v3706_v59  ;;  %1198 = vmatprep.subr.bf16.mxu0 %v3711_v60  ;;  %v3795_v59 = vld [vmem:[#allocation2 + $0x404] ss:$8 sps:$4 sm:$0xff]  }
  0xf0   :  { %2005 = vmatprep.subr.bf16.mxu1 %v3714_v61  ;;  %v113_v60 = vld [vmem:[%s4572_s1 + $0x48] sm:$0xff]  ;;  %v280_v61 = vpack.c.bf16 %v110_v58, %v110_v58  ;;  %v3882_v58 = vld [vmem:[%s4578_s7 + $0xd4] ss:$8 sps:$4 sm:$0xff]  }
  0xf2   :  { %1199 = vmatpush1.bf16.msra.mxu0 %v3709_v62  ;;  %v3793_v62 = vld [vmem:[#allocation2 + $0x400] ss:$8 sps:$4 sm:$0xff]  }
  0xf3   :  { %2006 = vmatpush1.bf16.msra.mxu1 %v3712_v63  ;;  %1200 = vmatprep.subr.bf16.mxu0 %v3717_v0  ;;  %v283_v63 = vpack.c.bf16 %v113_v60, %v113_v60  ;;  %v3798_v0 = vld [vmem:[#allocation2 + $0x414] ss:$8 sps:$4 sm:$0xff]  }
  0xf4   :  { %2007 = vmatprep.subr.bf16.mxu1 %v3720_v1  ;;  %v3796_v1 = vld [vmem:[#allocation2 + $0x410] ss:$8 sps:$4 sm:$0xff]  }
  0xf6   :  { %1201 = vmatpush1.bf16.msra.mxu0 %v3715_v2  ;;  %v3801_v2 = vld [vmem:[#allocation2 + $0x424] ss:$8 sps:$4 sm:$0xff]  }
  0xf7   :  { %2008 = vmatpush1.bf16.msra.mxu1 %v3718_v3  ;;  %1202 = vmatprep.subr.bf16.mxu0 %v3723_v4  ;;  %v3799_v3 = vld [vmem:[#allocation2 + $0x420] ss:$8 sps:$4 sm:$0xff]   ;;  %v3804_v4 = vld [vmem:[#allocation2 + $0x434] ss:$8 sps:$4 sm:$0xff]  }
  0xf8   :  { %2009 = vmatprep.subr.bf16.mxu1 %v3726_v5  ;;  %v3802_v5 = vld [vmem:[#allocation2 + $0x430] ss:$8 sps:$4 sm:$0xff]  }
  0xfa   :  { %1203 = vmatpush1.bf16.msra.mxu0 %v3721_v6  ;;  %v3807_v6 = vld [vmem:[#allocation2 + $0x444] ss:$8 sps:$4 sm:$0xff]  }
  0xfb   :  { %2010 = vmatpush1.bf16.msra.mxu1 %v3724_v7  ;;  %1204 = vmatprep.subr.bf16.mxu0 %v3729_v8  ;;  %v3805_v7 = vld [vmem:[#allocation2 + $0x440] ss:$8 sps:$4 sm:$0xff]   ;;  %v3810_v8 = vld [vmem:[#allocation2 + $0x454] ss:$8 sps:$4 sm:$0xff]  }
  0xfc   :  { %2011 = vmatprep.subr.bf16.mxu1 %v3732_v9  ;;  %v3808_v9 = vld [vmem:[#allocation2 + $0x450] ss:$8 sps:$4 sm:$0xff]  }
  0xfe   :  { %1205 = vmatpush1.bf16.msra.mxu0 %v3727_v10  ;;  %v3813_v10 = vld [vmem:[#allocation2 + $0x464] ss:$8 sps:$4 sm:$0xff]  }
  0xff   :  { %2012 = vmatpush1.bf16.msra.mxu1 %v3730_v11  ;;  %1206 = vmatprep.subr.bf16.mxu0 %v3735_v12  ;;  %v3811_v11 = vld [vmem:[#allocation2 + $0x460] ss:$8 sps:$4 sm:$0xff]   ;;  %v3816_v12 = vld [vmem:[#allocation2 + $0x474] ss:$8 sps:$4 sm:$0xff]  }
 0x100   :  { %2013 = vmatprep.subr.bf16.mxu1 %v3738_v13  ;;  %v3841_v13 = vld [vmem:[%s4578_s7] ss:$8 sps:$4 sm:$0xff]  }
 0x102   :  { %1207 = vmatpush1.bf16.msra.mxu0 %v3733_v14  ;;  %v3843_v14 = vld [vmem:[%s4578_s7 + $0x4] ss:$8 sps:$4 sm:$0xff]  }
 0x103   :  { %2014 = vmatpush1.bf16.msra.mxu1 %v3736_v15  ;;  %1208 = vmatprep.subr.bf16.mxu0 %v3741_v16  ;;  %v3846_v15 = vld [vmem:[%s4578_s7 + $0x14] ss:$8 sps:$4 sm:$0xff]   ;;  %v3814_v16 = vld [vmem:[#allocation2 + $0x470] ss:$8 sps:$4 sm:$0xff]  }
 0x104   :  { %2015 = vmatprep.subr.bf16.mxu1 %v3744_v17  ;;  %v3819_v17 = vld [vmem:[#allocation2 + $0x484] ss:$8 sps:$4 sm:$0xff]  }
 0x106   :  { %1209 = vmatpush1.bf16.msra.mxu0 %v3739_v18  ;;  %v3844_v18 = vld [vmem:[%s4578_s7 + $0x10] ss:$8 sps:$4 sm:$0xff]  }
 0x107   :  { %2016 = vmatpush1.bf16.msra.mxu1 %v3742_v19  ;;  %1219 = vmatprep.subr.bf16.mxu0 %v3747_v21  ;;  %v3849_v19 = vld [vmem:[%s4578_s7 + $0x24] ss:$8 sps:$4 sm:$0xff]   ;;  %v3822_v21 = vld [vmem:[#allocation2 + $0x494] ss:$8 sps:$4 sm:$0xff]  }
 0x108   :  { %2236 = vmatprep.subr.bf16.mxu1 %v3843_v14 }
 0x109   :  { %1211 = vmatmul.mubr.bf16.vlgmr.msra.gmra.mrb[0].mxu0 %v278_v26  ;;  %v3850_v26 = vld [vmem:[%s4578_s7 + $0x30] ss:$8 sps:$4 sm:$0xff]  }
 0x10a   :  { %2018 = vmatmul.mubr.bf16.vlgmr.msra.gmra.mrb[0].mxu1 %v1409_v25  ;;  %1220 = vmatpush1.bf16.msra.mxu0 %v3745_v24  ;;  %v3820_v24 = vld [vmem:[#allocation2 + $0x490] ss:$8 sps:$4 sm:$0xff]   ;;  %v3825_v25 = vld [vmem:[#allocation2 + $0x4a4] ss:$8 sps:$4 sm:$0xff]  }
 0x10b   :  { %1251 = vmatprep.mubr.bf16.mxu0 %v281_v28  ;;  %1221 = vmatprep.subr.bf16.mxu0 %v3750_v27  ;;  %v3855_v27 = vld [vmem:[%s4578_s7 + $0x44] ss:$8 sps:$4 sm:$0xff]   ;;  %v3823_v28 = vld [vmem:[#allocation2 + $0x4a0] ss:$8 sps:$4 sm:$0xff]  }
 0x10c   :  { %2237 = vmatpush1.bf16.msra.mxu1 %v3841_v13 }
 0x10d   :  { %2238 = vmatprep.subr.bf16.mxu1 %v3846_v15 }
 0x10e   :  { %1222 = vmatpush1.bf16.msra.mxu0 %v3748_v29  ;;  %v3828_v29 = vld [vmem:[#allocation2 + $0x4b4] ss:$8 sps:$4 sm:$0xff]  }
 0x10f   :  { %1223 = vmatprep.subr.bf16.mxu0 %v3753_v30  ;;  %v3853_v30 = vld [vmem:[%s4578_s7 + $0x40] ss:$8 sps:$4 sm:$0xff]  }
 0x110   :  { %2239 = vmatpush1.bf16.msra.mxu1 %v3844_v18 }
 0x111   :  { %2240 = vmatprep.subr.bf16.mxu1 %v3849_v19 }
 0x112   :  { %1224 = vmatpush1.bf16.msra.mxu0 %v3751_v31  ;;  %v3858_v31 = vld [vmem:[%s4578_s7 + $0x54] ss:$8 sps:$4 sm:$0xff]  }
 0x113   :  { %1225 = vmatprep.subr.bf16.mxu0 %v3756_v32  ;;  %v3826_v32 = vld [vmem:[#allocation2 + $0x4b0] ss:$8 sps:$4 sm:$0xff]  }
 0x114   :  { %2241 = vmatpush1.bf16.msra.mxu1 %v3847_v22 }
 0x115   :  { %2242 = vmatprep.subr.bf16.mxu1 %v3852_v23 }
 0x116   :  { %1226 = vmatpush1.bf16.msra.mxu0 %v3754_v33  ;;  %v3831_v33 = vld [vmem:[#allocation2 + $0x4c4] ss:$8 sps:$4 sm:$0xff]  }
 0x117   :  { %1227 = vmatprep.subr.bf16.mxu0 %v3759_v34  ;;  %v3856_v34 = vld [vmem:[%s4578_s7 + $0x50] ss:$8 sps:$4 sm:$0xff]  }
 0x118   :  { %2243 = vmatpush1.bf16.msra.mxu1 %v3850_v26 }
 0x119   :  { %2244 = vmatprep.subr.bf16.mxu1 %v3855_v27 }
 0x11a   :  { %1228 = vmatpush1.bf16.msra.mxu0 %v3757_v35  ;;  %v3861_v35 = vld [vmem:[%s4578_s7 + $0x64] ss:$8 sps:$4 sm:$0xff]  }
 0x11b   :  { %1229 = vmatprep.subr.bf16.mxu0 %v3762_v36  ;;  %v3829_v36 = vld [vmem:[#allocation2 + $0x4c0] ss:$8 sps:$4 sm:$0xff]  }
 0x11c   :  { %2245 = vmatpush1.bf16.msra.mxu1 %v3853_v30  ;;  %v3889_v30 = vld [vmem:[%s4580_s9] ss:$8 sps:$4 sm:$0xff]  }
 0x11d   :  { %2246 = vmatprep.subr.bf16.mxu1 %v3858_v31 }
 0x11e   :  { %1230 = vmatpush1.bf16.msra.mxu0 %v3760_v37  ;;  %v3834_v37 = vld [vmem:[#allocation2 + $0x4d4] ss:$8 sps:$4 sm:$0xff]  }
 0x11f   :  { %1231 = vmatprep.subr.bf16.mxu0 %v3765_v38  ;;  %v3859_v38 = vld [vmem:[%s4578_s7 + $0x60] ss:$8 sps:$4 sm:$0xff]  }
 0x120   :  { %2247 = vmatpush1.bf16.msra.mxu1 %v3856_v34  ;;  %v3897_v34 = vld [vmem:[%s4580_s9 + $0x24] ss:$8 sps:$4 sm:$0xff]  }
 0x121   :  { %2248 = vmatprep.subr.bf16.mxu1 %v3861_v35  ;;  %v3895_v35 = vld [vmem:[%s4580_s9 + $0x20] ss:$8 sps:$4 sm:$0xff]  }
 0x122   :  { %1232 = vmatpush1.bf16.msra.mxu0 %v3763_v39  ;;  %v3864_v39 = vld [vmem:[%s4578_s7 + $0x74] ss:$8 sps:$4 sm:$0xff]  }
 0x123   :  { %1233 = vmatprep.subr.bf16.mxu0 %v3768_v40  ;;  %v3832_v40 = vld [vmem:[#allocation2 + $0x4d0] ss:$8 sps:$4 sm:$0xff]  }
 0x124   :  { %2249 = vmatpush1.bf16.msra.mxu1 %v3859_v38  ;;  %v3903_v38 = vld [vmem:[%s4580_s9 + $0x44] ss:$8 sps:$4 sm:$0xff]  }
 0x125   :  { %2250 = vmatprep.subr.bf16.mxu1 %v3864_v39  ;;  %v3901_v39 = vld [vmem:[%s4580_s9 + $0x40] ss:$8 sps:$4 sm:$0xff]  }
 0x126   :  { %1234 = vmatpush1.bf16.msra.mxu0 %v3766_v41  ;;  %v3837_v41 = vld [vmem:[#allocation2 + $0x4e4] ss:$8 sps:$4 sm:$0xff]  }
 0x127   :  { %1235 = vmatprep.subr.bf16.mxu0 %v3771_v42  ;;  %v3862_v42 = vld [vmem:[%s4578_s7 + $0x70] ss:$8 sps:$4 sm:$0xff]  }
 0x128   :  { %2251 = vmatpush1.bf16.msra.mxu1 %v3862_v42  ;;  %v3909_v42 = vld [vmem:[%s4580_s9 + $0x64] ss:$8 sps:$4 sm:$0xff]  }
 0x12a   :  { %1236 = vmatpush1.bf16.msra.mxu0 %v3769_v43  ;;  %v3867_v43 = vld [vmem:[%s4578_s7 + $0x84] ss:$8 sps:$4 sm:$0xff]  }
 0x12b   :  { %1237 = vmatprep.subr.bf16.mxu0 %v3774_v44  ;;  %v3835_v44 = vld [vmem:[#allocation2 + $0x4e0] ss:$8 sps:$4 sm:$0xff]   ;;  %2252 = vmatprep.subr.bf16.mxu1 %v3867_v43 }
 0x12c   :  { %v3907_v43 = vld [vmem:[%s4580_s9 + $0x60] ss:$8 sps:$4 sm:$0xff]  }
 0x12e   :  { %1238 = vmatpush1.bf16.msra.mxu0 %v3772_v45  ;;  %v3840_v45 = vld [vmem:[#allocation2 + $0x4f4] ss:$8 sps:$4 sm:$0xff]  }
 0x12f   :  { %1239 = vmatprep.subr.bf16.mxu0 %v3777_v46  ;;  %v3865_v46 = vld [vmem:[%s4578_s7 + $0x80] ss:$8 sps:$4 sm:$0xff]  }
 0x130   :  { %2253 = vmatpush1.bf16.msra.mxu1 %v3865_v46  ;;  %v3915_v46 = vld [vmem:[%s4580_s9 + $0x84] ss:$8 sps:$4 sm:$0xff]  }
 0x132   :  { %1240 = vmatpush1.bf16.msra.mxu0 %v3775_v47  ;;  %v3870_v47 = vld [vmem:[%s4578_s7 + $0x94] ss:$8 sps:$4 sm:$0xff]  }
 0x133   :  { %1241 = vmatprep.subr.bf16.mxu0 %v3780_v48  ;;  %v3838_v48 = vld [vmem:[#allocation2 + $0x4f0] ss:$8 sps:$4 sm:$0xff]   ;;  %2254 = vmatprep.subr.bf16.mxu1 %v3870_v47  ;;  %v3913_v47 = vld [vmem:[%s4580_s9 + $0x80] ss:$8 sps:$4 sm:$0xff]  }
 0x136   :  { %1242 = vmatpush1.bf16.msra.mxu0 %v3778_v49  ;;  %v112_v49 = vld [vmem:[%s4572_s1 + $0x40] sm:$0xff] }
 0x137   :  { %1243 = vmatprep.subr.bf16.mxu0 %v3783_v50  ;;  %v3868_v50 = vld [vmem:[%s4578_s7 + $0x90] ss:$8 sps:$4 sm:$0xff]  }
 0x138   :  { %2255 = vmatpush1.bf16.msra.mxu1 %v3868_v50  ;;  %v3921_v50 = vld [vmem:[%s4580_s9 + $0xa4] ss:$8 sps:$4 sm:$0xff]  }
 0x13a   :  { %1244 = vmatpush1.bf16.msra.mxu0 %v3781_v51  ;;  %v3873_v51 = vld [vmem:[%s4578_s7 + $0xa4] ss:$8 sps:$4 sm:$0xff]  }
 0x13b   :  { %1245 = vmatprep.subr.bf16.mxu0 %v3786_v52  ;;  %v282_v52 = vpack.c.bf16 %v112_v49, %v112_v49  ;;  %2256 = vmatprep.subr.bf16.mxu1 %v3873_v51  ;;  %v3916_v49 = vld [vmem:[%s4580_s9 + $0x90] ss:$8 sps:$4 sm:$0xff]   ;;  %v3919_v51 = vld [vmem:[%s4580_s9 + $0xa0] ss:$8 sps:$4 sm:$0xff]  }
 0x13e   :  { %1246 = vmatpush1.bf16.msra.mxu0 %v3784_v53  ;;  %v3871_v53 = vld [vmem:[%s4578_s7 + $0xa0] ss:$8 sps:$4 sm:$0xff]  }
 0x13f   :  { %1247 = vmatprep.subr.bf16.mxu0 %v3789_v54  ;;  %v3876_v54 = vld [vmem:[%s4578_s7 + $0xb4] ss:$8 sps:$4 sm:$0xff]   ;;  %2257 = vmatpush1.bf16.msra.mxu1 %v3871_v53  ;;  %v3922_v53 = vld [vmem:[%s4580_s9 + $0xb0] ss:$8 sps:$4 sm:$0xff]  }
 0x140   :  { %2258 = vmatprep.subr.bf16.mxu1 %v3876_v54  ;;  %v3927_v54 = vld [vmem:[%s4580_s9 + $0xc4] ss:$8 sps:$4 sm:$0xff]  }
 0x142   :  { %1248 = vmatpush1.bf16.msra.mxu0 %v3787_v55  ;;  %v3874_v55 = vld [vmem:[%s4578_s7 + $0xb0] ss:$8 sps:$4 sm:$0xff]  }
 0x143   :  { %1249 = vmatprep.subr.bf16.mxu0 %v3792_v56  ;;  %v3879_v56 = vld [vmem:[%s4578_s7 + $0xc4] ss:$8 sps:$4 sm:$0xff]   ;;  %2259 = vmatpush1.bf16.msra.mxu1 %v3874_v55  ;;  %v3925_v55 = vld [vmem:[%s4580_s9 + $0xc0] ss:$8 sps:$4 sm:$0xff]  }
 0x144   :  { %2260 = vmatprep.subr.bf16.mxu1 %v3879_v56  ;;  %v3930_v56 = vld [vmem:[%s4580_s9 + $0xd4] ss:$8 sps:$4 sm:$0xff]  }
 0x146   :  { %1250 = vmatpush1.bf16.msra.mxu0 %v3790_v57  ;;  %v3877_v57 = vld [vmem:[%s4578_s7 + $0xc0] ss:$8 sps:$4 sm:$0xff]  }
 0x147   :  { %1260 = vmatprep.subr.bf16.mxu0 %v3795_v59  ;;  %2261 = vmatpush1.bf16.msra.mxu1 %v3877_v57  ;;  %v3880_v59 = vld [vmem:[%s4578_s7 + $0xd0] ss:$8 sps:$4 sm:$0xff]  }
 0x148   :  { %2262 = vmatprep.subr.bf16.mxu1 %v3882_v58  ;;  %v3928_v57 = vld [vmem:[%s4580_s9 + $0xd0] ss:$8 sps:$4 sm:$0xff]   ;;  %v3933_v58 = vld [vmem:[%s4580_s9 + $0xe4] ss:$8 sps:$4 sm:$0xff]  }
 0x149   :  { %1252 = vmatmul.mubr.bf16.vlgmr.msra.gmra.mrb[0].mxu0 %v280_v61 }
 0x14a   :  { %1261 = vmatpush1.bf16.msra.mxu0 %v3793_v62  ;;  %1292 = vmatprep.mubr.bf16.mxu0 %v283_v63  ;;  %v3885_v62 = vld [vmem:[%s4578_s7 + $0xe4] ss:$8 sps:$4 sm:$0xff]  }
 0x14b   :  { %1262 = vmatprep.subr.bf16.mxu0 %v3798_v0  ;;  %2263 = vmatpush1.bf16.msra.mxu1 %v3880_v59  ;;  %v3883_v0 = vld [vmem:[%s4578_s7 + $0xe0] ss:$8 sps:$4 sm:$0xff]  }
 0x14c   :  { %2264 = vmatprep.subr.bf16.mxu1 %v3885_v62  ;;  %v3931_v59 = vld [vmem:[%s4580_s9 + $0xe0] ss:$8 sps:$4 sm:$0xff]   ;;  %v3939_v62 = vld [vmem:[#allocation6 + $0x4] ss:$8 sps:$4 sm:$0xff]  }
 0x14e   :  { %1263 = vmatpush1.bf16.msra.mxu0 %v3796_v1 }
 0x14f   :  { %1264 = vmatprep.subr.bf16.mxu0 %v3801_v2  ;;  %2265 = vmatpush1.bf16.msra.mxu1 %v3883_v0  ;;  %v3888_v2 = vld [vmem:[%s4578_s7 + $0xf4] ss:$8 sps:$4 sm:$0xff]   ;;  %v3942_v0 = vld [vmem:[#allocation7 + $0x4] ss:$8 sps:$4 sm:$0xff]  }
 0x150   :  { %2266 = vmatprep.subr.bf16.mxu1 %v3888_v2  ;;  %v3948_v2 = vld [vmem:[#allocation7 + $0x14] ss:$8 sps:$4 sm:$0xff]  }
 0x152   :  { %1265 = vmatpush1.bf16.msra.mxu0 %v3799_v3  ;;  %v3886_v3 = vld [vmem:[%s4578_s7 + $0xf0] ss:$8 sps:$4 sm:$0xff]  }
 0x153   :  { %1266 = vmatprep.subr.bf16.mxu0 %v3804_v4  ;;  %2267 = vmatpush1.bf16.msra.mxu1 %v3886_v3  ;;  %v3891_v4 = vld [vmem:[%s4580_s9 + $0x4] ss:$8 sps:$4 sm:$0xff]   ;;  %v3952_v3 = vld [vmem:[#allocation7 + $0x20] ss:$8 sps:$4 sm:$0xff]  }
 0x154   :  { %2483 = vmatprep.subr.bf16.mxu1 %v3891_v4  ;;  %v3954_v4 = vld [vmem:[#allocation7 + $0x24] ss:$8 sps:$4 sm:$0xff]  }
 0x156   :  { %1267 = vmatpush1.bf16.msra.mxu0 %v3802_v5  ;;  %v286_v5 = vlaneseq }
 0x157   :  { %1268 = vmatprep.subr.bf16.mxu0 %v3807_v6 }
 0x158   :  { %v287_v6 = vshrl.u32 %v286_v5, 7  ;;  %v3958_v5 = vld [vmem:[#allocation7 + $0x30] ss:$8 sps:$4 sm:$0xff]  }
 0x15a   :  { %1269 = vmatpush1.bf16.msra.mxu0 %v3805_v7  ;;  %v4437_v7 = vsub.s32 0, %v287_v6 }
 0x15b   :  { %1270 = vmatprep.subr.bf16.mxu0 %v3810_v8  ;;  %v1411_v8 = vld [vmem:[%s4577_s6] sm:$0x3] }
 0x15e   :  { %1271 = vmatpush1.bf16.msra.mxu0 %v3808_v9  ;;  %v4442_v9 = vsub.s32 1, %v287_v6  ;;  %v3960_v6 = vld [vmem:[#allocation7 + $0x34] ss:$8 sps:$4 sm:$0xff]  }
 0x15f   :  { %1272 = vmatprep.subr.bf16.mxu0 %v3813_v10  ;;  %v284_v10 = vld [vmem:[%s4575_s4] sm:$0x3] }
 0x160   :  { %v289_v13 = vrot.slane %v284_v10, %v4437_v7  ;;  %v293_v14 = vrot.slane %v284_v10, %v4442_v9  ;;  %v3966_v10 = vld [vmem:[#allocation7 + $0x44] ss:$8 sps:$4 sm:$0xff]  }
 0x162   :  { %1273 = vmatpush1.bf16.msra.mxu0 %v3811_v11  ;;  %v1416_v11 = vrot.slane %v1411_v8, %v4437_v7 }
 0x163   :  { %1274 = vmatprep.subr.bf16.mxu0 %v3816_v12  ;;  %v1420_v12 = vrot.slane %v1411_v8, %v4442_v9  ;;  %v3964_v8 = vld [vmem:[#allocation7 + $0x40] ss:$8 sps:$4 sm:$0xff]  }
 0x166   :  { %1275 = vmatpush1.bf16.msra.mxu0 %v3814_v16 }
 0x167   :  { %1276 = vmatprep.subr.bf16.mxu0 %v3819_v17 }
 0x16a   :  { %1277 = vmatpush1.bf16.msra.mxu0 %v3817_v20 }
 0x16b   :  { %1278 = vmatprep.subr.bf16.mxu0 %v3822_v21 }
 0x16e   :  { %1279 = vmatpush1.bf16.msra.mxu0 %v3820_v24 }
 0x16f   :  { %1280 = vmatprep.subr.bf16.mxu0 %v3825_v25 }
 0x172   :  { %1281 = vmatpush1.bf16.msra.mxu0 %v3823_v28 }
 0x173   :  { %1282 = vmatprep.subr.bf16.mxu0 %v3828_v29 }
 0x176   :  { %1283 = vmatpush1.bf16.msra.mxu0 %v3826_v32  ;;  %v3894_v32 = vld [vmem:[%s4580_s9 + $0x14] ss:$8 sps:$4 sm:$0xff]  }
 0x177   :  { %1284 = vmatprep.subr.bf16.mxu0 %v3831_v33  ;;  %v3892_v33 = vld [vmem:[%s4580_s9 + $0x10] ss:$8 sps:$4 sm:$0xff]  }
 0x17a   :  { %1285 = vmatpush1.bf16.msra.mxu0 %v3829_v36  ;;  %v3900_v36 = vld [vmem:[%s4580_s9 + $0x34] ss:$8 sps:$4 sm:$0xff]  }
 0x17b   :  { %1286 = vmatprep.subr.bf16.mxu0 %v3834_v37  ;;  %v3898_v37 = vld [vmem:[%s4580_s9 + $0x30] ss:$8 sps:$4 sm:$0xff]  }
 0x17e   :  { %1287 = vmatpush1.bf16.msra.mxu0 %v3832_v40  ;;  %v3906_v40 = vld [vmem:[%s4580_s9 + $0x54] ss:$8 sps:$4 sm:$0xff]  }
 0x17f   :  { %1288 = vmatprep.subr.bf16.mxu0 %v3837_v41  ;;  %v3904_v41 = vld [vmem:[%s4580_s9 + $0x50] ss:$8 sps:$4 sm:$0xff]  }
 0x182   :  { %1289 = vmatpush1.bf16.msra.mxu0 %v3835_v44  ;;  %v3912_v44 = vld [vmem:[%s4580_s9 + $0x74] ss:$8 sps:$4 sm:$0xff]  }
 0x183   :  { %1290 = vmatprep.subr.bf16.mxu0 %v3840_v45  ;;  %v3910_v45 = vld [vmem:[%s4580_s9 + $0x70] ss:$8 sps:$4 sm:$0xff]  }
 0x186   :  { %1291 = vmatpush1.bf16.msra.mxu0 %v3838_v48  ;;  %v3918_v48 = vld [vmem:[%s4580_s9 + $0x94] ss:$8 sps:$4 sm:$0xff]  }
 0x187   :  { %2752 = vmatprep.subr.bf16.mxu0 %v3942_v0  ;;  %v4003_v0 = vld [vmem:[#allocation6 + $0xb0] ss:$8 sps:$4 sm:$0xff]  }
 0x189   :  { %1293 = vmatmul.mubr.bf16.vlgmr.msra.gmra.mrb[0].mxu0 %v282_v52  ;;  %v3924_v52 = vld [vmem:[%s4580_s9 + $0xb4] ss:$8 sps:$4 sm:$0xff]  }
 0x1dd   :  { %v2019_v60 = vpop.f32.mrb[0].mxu1 }
 0x1de   :  { %v2021_v61 = vpop.f32.mrb[1].mxu1  ;;  %v3425_v15 = vadd.f32 %v2019_v60, %v1416_v11  ;;  %v3936_v60 = vld [vmem:[%s4580_s9 + $0xf4] ss:$8 sps:$4 sm:$0xff]   ;;  %v3970_v11 = vld [vmem:[#allocation7 + $0x50] ss:$8 sps:$4 sm:$0xff]  }
 0x1df   :  { %v2023_v63 = vpop.f32.mrb[2].mxu1  ;;  %v3426_v16 = vadd.f32 %v2021_v61, %v1420_v12  ;;  %v3934_v61 = vld [vmem:[%s4580_s9 + $0xf0] ss:$8 sps:$4 sm:$0xff]   ;;  %v3972_v12 = vld [vmem:[#allocation7 + $0x54] ss:$8 sps:$4 sm:$0xff]  }
 0x1e0   :  { %v2024_v1 = vpop.f32.mrb[3].mxu1  ;;  %v2026_v22 = vmax.f32 %v3425_v15, 0.0  ;;  %v3940_v63 = vld [vmem:[#allocation7] ss:$8 sps:$4 sm:$0xff]   ;;  %v3982_v15 = vld [vmem:[#allocation7 + $0x70] ss:$8 sps:$4 sm:$0xff]  }
 0x1e1   :  { %v2027_v25 = vmax.f32 %v3426_v16, 0.0  ;;  %2753 = vmatpush1.bf16.msra.mxu0 %v3940_v63  ;;  %v3946_v1 = vld [vmem:[#allocation7 + $0x10] ss:$8 sps:$4 sm:$0xff]   ;;  %v3984_v16 = vld [vmem:[#allocation7 + $0x74] ss:$8 sps:$4 sm:$0xff]  }
 0x1e2   :  { %2754 = vmatprep.subr.bf16.mxu0 %v3948_v2  ;;  %v4005_v63 = vld [vmem:[#allocation6 + $0xb4] ss:$8 sps:$4 sm:$0xff]   ;;  %v4009_v2 = vld [vmem:[#allocation6 + $0xc0] ss:$8 sps:$4 sm:$0xff]  }
 0x1e5   :  { %2755 = vmatpush1.bf16.msra.mxu0 %v3946_v1  ;;  %v4011_v1 = vld [vmem:[#allocation6 + $0xc4] ss:$8 sps:$4 sm:$0xff]  }
 0x1e6   :  { %2756 = vmatprep.subr.bf16.mxu0 %v3954_v4  ;;  %v4015_v4 = vld [vmem:[#allocation6 + $0xd0] ss:$8 sps:$4 sm:$0xff]  }
 0x1e9   :  { %2757 = vmatpush1.bf16.msra.mxu0 %v3952_v3  ;;  %v4017_v3 = vld [vmem:[#allocation6 + $0xd4] ss:$8 sps:$4 sm:$0xff]  }
 0x1ea   :  { %2758 = vmatprep.subr.bf16.mxu0 %v3960_v6  ;;  %v4021_v6 = vld [vmem:[#allocation6 + $0xe0] ss:$8 sps:$4 sm:$0xff]  }
 0x1ed   :  { %2759 = vmatpush1.bf16.msra.mxu0 %v3958_v5  ;;  %v4023_v5 = vld [vmem:[#allocation6 + $0xe4] ss:$8 sps:$4 sm:$0xff]  }
 0x1ee   :  { %2760 = vmatprep.subr.bf16.mxu0 %v3966_v10  ;;  %v4027_v10 = vld [vmem:[#allocation6 + $0xf0] ss:$8 sps:$4 sm:$0xff]  }
 0x1f1   :  { %2761 = vmatpush1.bf16.msra.mxu0 %v3964_v8  ;;  %v4029_v8 = vld [vmem:[#allocation6 + $0xf4] ss:$8 sps:$4 sm:$0xff]  }
 0x1f2   :  { %2762 = vmatprep.subr.bf16.mxu0 %v3972_v12  ;;  %v4032_v12 = vld [vmem:[#allocation7 + $0xf4] ss:$8 sps:$4 sm:$0xff]  }
 0x1f5   :  { %2763 = vmatpush1.bf16.msra.mxu0 %v3970_v11  ;;  %v103_v11 = vld [vmem:[%s4571_s0 + $0x8] sm:$0xff] }
 0x25c   :  { %v1294_v17 = vpop.f32.mrb[0].mxu0 }
 0x25d   :  { %v3423_v18 = vadd.f32 %v1294_v17, %v289_v13  ;;  %v1296_v19 = vpop.f32.mrb[1].mxu0  ;;  %v3976_v13 = vld [vmem:[#allocation7 + $0x60] ss:$8 sps:$4 sm:$0xff]  }
 0x25e   :  { %v3424_v20 = vadd.f32 %v1296_v19, %v293_v14  ;;  %v1298_v21 = vpop.f32.mrb[2].mxu0  ;;  %v3978_v14 = vld [vmem:[#allocation7 + $0x64] ss:$8 sps:$4 sm:$0xff]   ;;  %v3988_v17 = vld [vmem:[#allocation7 + $0x80] ss:$8 sps:$4 sm:$0xff]  }
 0x25f   :  { %v1301_v23 = vmax.f32 %v3423_v18, 0.0  ;;  %v1299_v24 = vpop.f32.mrb[3].mxu0  ;;  %2764 = vmatprep.subr.bf16.mxu0 %v3978_v14  ;;  %v3990_v18 = vld [vmem:[#allocation7 + $0x84] ss:$8 sps:$4 sm:$0xff]   ;;  %v3994_v19 = vld [vmem:[#allocation7 + $0x90] ss:$8 sps:$4 sm:$0xff]  }
 0x260   :  { %v1302_v26 = vmax.f32 %v3424_v20, 0.0  ;;  %2765 = vmatpush1.bf16.msra.mxu0 %v3976_v13  ;;  %v3996_v20 = vld [vmem:[#allocation7 + $0x94] ss:$8 sps:$4 sm:$0xff]   ;;  %v4000_v21 = vld [vmem:[#allocation7 + $0xa0] ss:$8 sps:$4 sm:$0xff]   ;;  %v2557_v13 = vpack.c.bf16 %v103_v11, %v103_v11 }
 0x261   :  { %v2028_v27 = vadd.f32 %v2026_v22, %v1301_v23  ;;  %2766 = vmatprep.subr.bf16.mxu0 %v3984_v16  ;;  %v4002_v22 = vld [vmem:[#allocation7 + $0xa4] ss:$8 sps:$4 sm:$0xff]   ;;  %v4006_v23 = vld [vmem:[#allocation7 + $0xb0] ss:$8 sps:$4 sm:$0xff]   ;;  %v4008_v24 = vld [vmem:[#allocation7 + $0xb4] ss:$8 sps:$4 sm:$0xff]  }
 0x262   :  { %v2029_v28 = vadd.f32 %v2027_v25, %v1302_v26  ;;  %v4012_v25 = vld [vmem:[#allocation7 + $0xc0] ss:$8 sps:$4 sm:$0xff]   ;;  %v4014_v26 = vld [vmem:[#allocation7 + $0xc4] ss:$8 sps:$4 sm:$0xff]  }
 0x263   :  { %v2062_v31 = vpack.c.bf16 %v2028_v27, %v2028_v27  ;;  %v4018_v27 = vld [vmem:[#allocation7 + $0xd0] ss:$8 sps:$4 sm:$0xff]   ;;  %v102_v14 = vld [vmem:[%s4571_s0] sm:$0xff] }
 0x264   :  { %v2063_v29 = vpack.c.bf16 %v2029_v28, %v2029_v28  ;;  %2767 = vmatpush1.bf16.msra.mxu0 %v3982_v15  ;;  %v4020_v28 = vld [vmem:[#allocation7 + $0xd4] ss:$8 sps:$4 sm:$0xff]   ;;  %v4030_v15 = vld [vmem:[#allocation7 + $0xf0] ss:$8 sps:$4 sm:$0xff]   ;;  %v2556_v16 = vpack.c.bf16 %v102_v14, %v102_v14 }
 0x265   :  { %2768 = vmatprep.subr.bf16.mxu0 %v3990_v18 }
 0x266   :  { %2268 = vmatprep.mubr.bf16.mxu1 %v2063_v29  ;;  %v4024_v29 = vld [vmem:[#allocation7 + $0xe0] ss:$8 sps:$4 sm:$0xff]  }
 0x267   :  { %2269 = vmatmul.mubr.bf16.vlgmr.msra.gmra.mrb[4].mxu1 %v2062_v31  ;;  %v2064_v31 = vld [vmem:[%s4579_s8] sm:$0x3] }
 0x268   :  { %2484 = vmatpush1.bf16.msra.mxu1 %v3889_v30  ;;  %2769 = vmatpush1.bf16.msra.mxu0 %v3988_v17  ;;  %v4026_v30 = vld [vmem:[#allocation7 + $0xe4] ss:$8 sps:$4 sm:$0xff]   ;;  %v2311_v17 = vld [vmem:[%s4581_s10] sm:$0x3] }
 0x269   :  { %2485 = vmatprep.subr.bf16.mxu1 %v3894_v32  ;;  %2770 = vmatprep.subr.bf16.mxu0 %v3996_v20  ;;  %v2069_v32 = vrot.slane %v2064_v31, %v4437_v7  ;;  %v2316_v18 = vrot.slane %v2311_v17, %v4437_v7 }
 0x26c   :  { %2486 = vmatpush1.bf16.msra.mxu1 %v3892_v33  ;;  %2771 = vmatpush1.bf16.msra.mxu0 %v3994_v19  ;;  %v2073_v33 = vrot.slane %v2064_v31, %v4442_v9  ;;  %v2320_v19 = vrot.slane %v2311_v17, %v4442_v9 }
 0x26d   :  { %2487 = vmatprep.subr.bf16.mxu1 %v3897_v34  ;;  %2772 = vmatprep.subr.bf16.mxu0 %v4002_v22 }
 0x270   :  { %2488 = vmatpush1.bf16.msra.mxu1 %v3895_v35  ;;  %2773 = vmatpush1.bf16.msra.mxu0 %v4000_v21 }
 0x271   :  { %2489 = vmatprep.subr.bf16.mxu1 %v3900_v36  ;;  %2774 = vmatprep.subr.bf16.mxu0 %v4008_v24 }
 0x274   :  { %2490 = vmatpush1.bf16.msra.mxu1 %v3898_v37  ;;  %2775 = vmatpush1.bf16.msra.mxu0 %v4006_v23 }
 0x275   :  { %2491 = vmatprep.subr.bf16.mxu1 %v3903_v38  ;;  %2776 = vmatprep.subr.bf16.mxu0 %v4014_v26 }
 0x278   :  { %2492 = vmatpush1.bf16.msra.mxu1 %v3901_v39  ;;  %2777 = vmatpush1.bf16.msra.mxu0 %v4012_v25 }
 0x279   :  { %2493 = vmatprep.subr.bf16.mxu1 %v3906_v40  ;;  %2778 = vmatprep.subr.bf16.mxu0 %v4020_v28 }
 0x27c   :  { %2494 = vmatpush1.bf16.msra.mxu1 %v3904_v41  ;;  %2779 = vmatpush1.bf16.msra.mxu0 %v4018_v27  ;;  %v3937_v41 = vld [vmem:[#allocation6] ss:$8 sps:$4 sm:$0xff]  }
 0x27d   :  { %2495 = vmatprep.subr.bf16.mxu1 %v3909_v42  ;;  %2780 = vmatprep.subr.bf16.mxu0 %v4026_v30 }
 0x280   :  { %2496 = vmatpush1.bf16.msra.mxu1 %v3907_v43  ;;  %2781 = vmatpush1.bf16.msra.mxu0 %v4024_v29  ;;  %v3945_v43 = vld [vmem:[#allocation6 + $0x14] ss:$8 sps:$4 sm:$0xff]  }
 0x281   :  { %2497 = vmatprep.subr.bf16.mxu1 %v3912_v44  ;;  %v3943_v44 = vld [vmem:[#allocation6 + $0x10] ss:$8 sps:$4 sm:$0xff]   ;;  %2782 = vmatprep.subr.bf16.mxu0 %v4032_v12 }
 0x284   :  { %2498 = vmatpush1.bf16.msra.mxu1 %v3910_v45  ;;  %v3951_v45 = vld [vmem:[#allocation6 + $0x24] ss:$8 sps:$4 sm:$0xff]   ;;  %2783 = vmatpush1.bf16.msra.mxu0 %v4030_v15 }
 0x285   :  { %2499 = vmatprep.subr.bf16.mxu1 %v3915_v46  ;;  %v3949_v46 = vld [vmem:[#allocation6 + $0x20] ss:$8 sps:$4 sm:$0xff]  }
 0x288   :  { %2500 = vmatpush1.bf16.msra.mxu1 %v3913_v47  ;;  %v3957_v47 = vld [vmem:[#allocation6 + $0x34] ss:$8 sps:$4 sm:$0xff]  }
 0x289   :  { %2501 = vmatprep.subr.bf16.mxu1 %v3918_v48  ;;  %v3955_v48 = vld [vmem:[#allocation6 + $0x30] ss:$8 sps:$4 sm:$0xff]  }
 0x28c   :  { %2502 = vmatpush1.bf16.msra.mxu1 %v3916_v49  ;;  %v3963_v49 = vld [vmem:[#allocation6 + $0x44] ss:$8 sps:$4 sm:$0xff]  }
 0x28d   :  { %2503 = vmatprep.subr.bf16.mxu1 %v3921_v50  ;;  %v3961_v50 = vld [vmem:[#allocation6 + $0x40] ss:$8 sps:$4 sm:$0xff]  }
 0x290   :  { %2504 = vmatpush1.bf16.msra.mxu1 %v3919_v51  ;;  %v3969_v51 = vld [vmem:[#allocation6 + $0x54] ss:$8 sps:$4 sm:$0xff]  }
 0x291   :  { %2505 = vmatprep.subr.bf16.mxu1 %v3924_v52  ;;  %v3967_v52 = vld [vmem:[#allocation6 + $0x50] ss:$8 sps:$4 sm:$0xff]  }
 0x294   :  { %2506 = vmatpush1.bf16.msra.mxu1 %v3922_v53  ;;  %v3975_v53 = vld [vmem:[#allocation6 + $0x64] ss:$8 sps:$4 sm:$0xff]  }
 0x295   :  { %2507 = vmatprep.subr.bf16.mxu1 %v3927_v54  ;;  %v3973_v54 = vld [vmem:[#allocation6 + $0x60] ss:$8 sps:$4 sm:$0xff]  }
 0x298   :  { %2508 = vmatpush1.bf16.msra.mxu1 %v3925_v55  ;;  %v3981_v55 = vld [vmem:[#allocation6 + $0x74] ss:$8 sps:$4 sm:$0xff]  }
 0x299   :  { %2509 = vmatprep.subr.bf16.mxu1 %v3930_v56  ;;  %v3979_v56 = vld [vmem:[#allocation6 + $0x70] ss:$8 sps:$4 sm:$0xff]  }
 0x29c   :  { %2510 = vmatpush1.bf16.msra.mxu1 %v3928_v57  ;;  %v3987_v57 = vld [vmem:[#allocation6 + $0x84] ss:$8 sps:$4 sm:$0xff]  }
 0x29d   :  { %2511 = vmatprep.subr.bf16.mxu1 %v3933_v58  ;;  %v3985_v58 = vld [vmem:[#allocation6 + $0x80] ss:$8 sps:$4 sm:$0xff]  }
 0x2a0   :  { %2512 = vmatpush1.bf16.msra.mxu1 %v3931_v59  ;;  %v3993_v59 = vld [vmem:[#allocation6 + $0x94] ss:$8 sps:$4 sm:$0xff]  }
 0x2a1   :  { %2513 = vmatprep.subr.bf16.mxu1 %v3936_v60  ;;  %v3991_v60 = vld [vmem:[#allocation6 + $0x90] ss:$8 sps:$4 sm:$0xff]  }
 0x2a4   :  { %2514 = vmatpush1.bf16.msra.mxu1 %v3934_v61  ;;  %v3999_v61 = vld [vmem:[#allocation6 + $0xa4] ss:$8 sps:$4 sm:$0xff]  }
 0x2a5   :  { %2953 = vmatprep.subr.bf16.mxu1 %v3939_v62  ;;  %v3997_v62 = vld [vmem:[#allocation6 + $0xa0] ss:$8 sps:$4 sm:$0xff]  }
 0x33a   :  { %v2270_v34 = vpop.f32.mrb[4].mxu1 }
 0x33b   :  { %v2271_v35 = vadd.f32 %v2270_v34, %v2069_v32  ;;  %v2272_v36 = vpop.f32.mrb[5].mxu1  ;;  %v2994_v32 = vld [vmem:[%s4584_s13] sm:$0x3] }
 0x33c   :  { %v2273_v37 = vadd.f32 %v2272_v36, %v2073_v33  ;;  %v2274_v38 = vpop.f32.mrb[6].mxu1  ;;  %v2999_v33 = vrot.slane %v2994_v32, %v4437_v7 }
 0x33d   :  { %v2275_v39 = vpop.f32.mrb[7].mxu1  ;;  %v2309_v42 = vpack.c.bf16 %v2271_v35, %v2271_v35  ;;  %v3003_v35 = vrot.slane %v2994_v32, %v4442_v9 }
 0x33e   :  { %v2310_v40 = vpack.c.bf16 %v2273_v37, %v2273_v37 }
 0x340   :  { %2515 = vmatprep.mubr.bf16.mxu1 %v2310_v40 }
 0x341   :  { %2516 = vmatmul.mubr.bf16.vlgmr.msra.gmra.mrb[8].mxu1 %v2309_v42 }
 0x342   :  { %2954 = vmatpush1.bf16.msra.mxu1 %v3937_v41  ;;  %2985 = vmatprep.mubr.bf16.mxu1 %v2557_v13 }
 0x343   :  { %2955 = vmatprep.subr.bf16.mxu1 %v3945_v43 }
 0x346   :  { %2956 = vmatpush1.bf16.msra.mxu1 %v3943_v44 }
 0x347   :  { %2957 = vmatprep.subr.bf16.mxu1 %v3951_v45 }
 0x34a   :  { %2958 = vmatpush1.bf16.msra.mxu1 %v3949_v46 }
 0x34b   :  { %2959 = vmatprep.subr.bf16.mxu1 %v3957_v47 }
 0x34e   :  { %2960 = vmatpush1.bf16.msra.mxu1 %v3955_v48 }
 0x34f   :  { %2961 = vmatprep.subr.bf16.mxu1 %v3963_v49 }
 0x352   :  { %2962 = vmatpush1.bf16.msra.mxu1 %v3961_v50 }
 0x353   :  { %2963 = vmatprep.subr.bf16.mxu1 %v3969_v51 }
 0x356   :  { %2964 = vmatpush1.bf16.msra.mxu1 %v3967_v52 }
 0x357   :  { %2965 = vmatprep.subr.bf16.mxu1 %v3975_v53 }
 0x35a   :  { %2966 = vmatpush1.bf16.msra.mxu1 %v3973_v54 }
 0x35b   :  { %2967 = vmatprep.subr.bf16.mxu1 %v3981_v55 }
 0x35e   :  { %2968 = vmatpush1.bf16.msra.mxu1 %v3979_v56 }
 0x35f   :  { %2969 = vmatprep.subr.bf16.mxu1 %v3987_v57 }
 0x362   :  { %2970 = vmatpush1.bf16.msra.mxu1 %v3985_v58 }
 0x363   :  { %2971 = vmatprep.subr.bf16.mxu1 %v3993_v59 }
 0x366   :  { %2972 = vmatpush1.bf16.msra.mxu1 %v3991_v60 }
 0x367   :  { %2973 = vmatprep.subr.bf16.mxu1 %v3999_v61 }
 0x36a   :  { %2974 = vmatpush1.bf16.msra.mxu1 %v3997_v62 }
 0x36b   :  { %2975 = vmatprep.subr.bf16.mxu1 %v4005_v63 }
 0x36e   :  { %2976 = vmatpush1.bf16.msra.mxu1 %v4003_v0 }
 0x36f   :  { %2977 = vmatprep.subr.bf16.mxu1 %v4011_v1 }
 0x372   :  { %2978 = vmatpush1.bf16.msra.mxu1 %v4009_v2 }
 0x373   :  { %2979 = vmatprep.subr.bf16.mxu1 %v4017_v3 }
 0x376   :  { %2980 = vmatpush1.bf16.msra.mxu1 %v4015_v4 }
 0x377   :  { %2981 = vmatprep.subr.bf16.mxu1 %v4023_v5 }
 0x37a   :  { %2982 = vmatpush1.bf16.msra.mxu1 %v4021_v6 }
 0x37b   :  { %2983 = vmatprep.subr.bf16.mxu1 %v4029_v8 }
 0x37e   :  { %2984 = vmatpush1.bf16.msra.mxu1 %v4027_v10 }
 0x381   :  { %2986 = vmatmul.mubr.bf16.vlgmr.msra.gmra.mrb[12].mxu1 %v2556_v16 }
 0x414   :  { %v2517_v20 = vpop.f32.mrb[8].mxu1 }
 0x415   :  { %v2518_v21 = vadd.f32 %v2517_v20, %v2316_v18  ;;  %v2519_v22 = vpop.f32.mrb[9].mxu1 }
 0x416   :  { %v2520_v23 = vadd.f32 %v2519_v22, %v2320_v19  ;;  %v2521_v24 = vpop.f32.mrb[10].mxu1 }
 0x417   :  { %v2522_v25 = vpop.f32.mrb[11].mxu1  ;;  %v2590_v27 = vpack.c.bf16 %v2518_v21, %v2518_v21 }
 0x418   :  { %v2591_v26 = vpack.c.bf16 %v2520_v23, %v2520_v23 }
 0x41a   :  { %2784 = vmatprep.mubr.bf16.mxu0 %v2591_v26 }
 0x41b   :  { %2785 = vmatmul.mubr.bf16.vlgmr.msra.gmra.mrb[4].mxu0 %v2590_v27 }
 0x454   :  { %v2987_v28 = vpop.f32.mrb[12].mxu1 }
 0x455   :  { %v2989_v29 = vpop.f32.mrb[13].mxu1 }
 0x456   :  { %v2991_v30 = vpop.f32.mrb[14].mxu1 }
 0x457   :  { %v2992_v31 = vpop.f32.mrb[15].mxu1 }
 0x4ee   :  { %v2786_v34 = vpop.f32.mrb[4].mxu0 }
 0x4ef   :  { %v2988_v36 = vadd.f32 %v2987_v28, %v2786_v34  ;;  %v2788_v37 = vpop.f32.mrb[5].mxu0 }
 0x4f0   :  { %v2990_v38 = vadd.f32 %v2989_v29, %v2788_v37  ;;  %v2790_v39 = vpop.f32.mrb[6].mxu0 }
 0x4f1   :  { %v3006_v40 = vadd.f32 %v2999_v33, %v2988_v36  ;;  %v2791_v41 = vpop.f32.mrb[7].mxu0 }
 0x4f2   :  { %v3007_v42 = vadd.f32 %v3003_v35, %v2990_v38 }
 0x4f3   :  { %v3421_v43 = vmul.f32 -1.442695, %v3006_v40 }
 0x4f4   :  { %v3422_v44 = vmul.f32 -1.442695, %v3007_v42 }
 0x4f5   :  { %4033 = vpow2.f32 %v3421_v43 }
 0x4f6   :  { %4035 = vpow2.f32 %v3422_v44 }
 0x4ff   :  { %v4034_v45 = vpop.eup %4033 }
 0x500   :  { %v4036_v46 = vpop.eup %4035  ;;  %v3014_v47 = vadd.f32 1.0, %v4034_v45 }
 0x501   :  { %v3015_v48 = vadd.f32 1.0, %v4036_v46 }
 0x502   :  { %4037 = vrcp.f32 %v3014_v47 }
 0x503   :  { %4039 = vrcp.f32 %v3015_v48 }
 0x50c   :  { %v4038_v7 = vpop.eup %4037 }
 0x50d   :  { %v4040_v49 = vpop.eup %4039  ;;  %v3022_v9 = vsub.f32 1.0, %v4038_v7  ;;  %v3020_v51 = vmul.f32 %v4038_v7, %v102_v14 }
 0x50e   :  { %v3023_v50 = vsub.f32 1.0, %v4040_v49  ;;  %v3021_v53 = vmul.f32 %v4040_v49, %v103_v11 }
 0x50f   :  { %v3024_v52 = vmul.f32 %v3022_v9, %v2518_v21 }
 0x510   :  { %v3025_v54 = vmul.f32 %v3023_v50, %v2520_v23 }
 0x511   :  { %v3026_v55 = vadd.f32 %v3024_v52, %v3020_v51 }
 0x512   :  { %v3027_v56 = vadd.f32 %v3025_v54, %v3021_v53 }
 0x513   :  { %3028 = vst [vmem:[%s4585_s14] sm:$0xff] %v3026_v55 }
 0x514   :  { %3029 = vst [vmem:[%s4585_s14 + $0x8] sm:$0xff] %v3027_v56 }
 0x515   :  { %3034 = vsyncpa [#allocation3], 1 }
 0x516   :  { %3035 = vsyncpa [#allocation5], 1 }
 0x517   :  { %3036 = vsyncpa [#allocation8], 1 }

// kernel: ssemb_forward.13
= control target key start
LH: loop header
LB: loop body
LE: loop exit
PB: predicated region body
PF: predicated region fallthrough
CT: control target
= control target key end

     0   :  { %vm356_vm0 = vcmask 269312   ;;  %vm363_vm1 = vcmask 1040384   ;;  %v4617_v27 = vmov 0   ;;  %vm1055_vm6 = vcmask 261120   ;;  %s5612_s2 = inlined_call_operand.vmem [shape: f32[33,33], index: 2, kind: input, shape index: {}]   ;;  %s5613_s1 = inlined_call_operand.vmem [shape: f32[3,16,33], index: 1, kind: input, shape index: {}]   ;;  %s5614_s6 = inlined_call_operand.vmem [shape: f32[33,16], index: 6, kind: input, shape index: {}]   ;;  %s5615_s4 = inlined_call_operand.vmem [shape: bf16[33,256], index: 4, kind: input, shape index: {}]   ;;  %s5616_s3 = inlined_call_operand.vmem [shape: bf16[544,256], index: 3, kind: input, shape index: {}]   ;;  %s5617_s0 = inlined_call_operand.vmem [shape: f32[16,544], index: 0, kind: input, shape index: {}]   ;;  %s5618_s7 = inlined_call_operand.vmem [shape: bf16[256,16], index: 7, kind: input, shape index: {}]   ;;  %s5619_s5 = inlined_call_operand.vmem [shape: f32[1,256], index: 5, kind: input, shape index: {}]   ;;  %s5620_s9 = inlined_call_operand.vmem [shape: f32[16,16], index: 9, kind: input, shape index: {}]   ;;  %s5621_s13 = inlined_call_operand.vmem [shape: f32[16,16], index: 13, kind: input, shape index: {}]   ;;  %s5622_s8 = inlined_call_operand.vmem [shape: f32[1,16], index: 8, kind: input, shape index: {}]   ;;  %s5623_s11 = inlined_call_operand.vmem [shape: bf16[16,256], index: 11, kind: input, shape index: {}]   ;;  %s5624_s10 = inlined_call_operand.vmem [shape: bf16[256,256], index: 10, kind: input, shape index: {}]   ;;  %s5625_s14 = inlined_call_operand.vmem [shape: bf16[256,16], index: 14, kind: input, shape index: {}]   ;;  %s5626_s12 = inlined_call_operand.vmem [shape: f32[1,256], index: 12, kind: input, shape index: {}]   ;;  %s5627_s16 = inlined_call_operand.vmem [shape: f32[16,16], index: 16, kind: input, shape index: {}]   ;;  %s5628_s20 = inlined_call_operand.vmem [shape: f32[16,16], index: 20, kind: input, shape index: {}]   ;;  %s5629_s15 = inlined_call_operand.vmem [shape: f32[1,16], index: 15, kind: input, shape index: {}]   ;;  %s5630_s18 = inlined_call_operand.vmem [shape: bf16[16,256], index: 18, kind: input, shape index: {}]   ;;  %s5631_s17 = inlined_call_operand.vmem [shape: bf16[256,256], index: 17, kind: input, shape index: {}]   ;;  %s5632_s21 = inlined_call_operand.vmem [shape: bf16[256,16], index: 21, kind: input, shape index: {}]   ;;  %s5633_s19 = inlined_call_operand.vmem [shape: f32[1,256], index: 19, kind: input, shape index: {}]   ;;  %s5634_s23 = inlined_call_operand.vmem [shape: f32[16,256], index: 23, kind: output, shape index: {0}]   ;;  %s5635_s22 = inlined_call_operand.vmem [shape: f32[1,16], index: 22, kind: input, shape index: {}]   ;;  %s5636_s24 = inlined_call_operand.vmem [shape: f32[3,16,16], index: 24, kind: output, shape index: {1}]  }
   0x1   :  { %5645 = sst [smem:[#allocation2_spill]] %s5612_s2  ;;  %v665_v28 = vsel %vm363_vm1, 65535, %v4617_v27  ;;  %vm1640_vm7 = vcmask 130048  }
   0x2   :  { %5646 = sst [smem:[#allocation3_spill]] %s5613_s1  ;;  %s5654_s27 = sld [smem:[#allocation2_spill]] }
   0x3   :  { %5647 = sst [smem:[#allocation4_spill]] %s5614_s6  ;;  %s5655_s25 = sld [smem:[#allocation3_spill]] }
   0x4   :  { %5648 = sst [smem:[#allocation5_spill]] %s5615_s4  ;;  %s5656_s30 = sld [smem:[#allocation4_spill]] }
   0x5   :  { %5649 = sst [smem:[#allocation6_spill]] %s5616_s3 }
   0x6   :  { %5650 = sst [smem:[#allocation7_spill]] %s5617_s0  ;;  %s5658_s6 = sld [smem:[#allocation6_spill]] }
   0x7   :  { %5651 = sst [smem:[#allocation8_spill]] %s5618_s7  ;;  %s5659_s2 = sld [smem:[#allocation7_spill]] }
   0x8   :  { %5652 = sst [smem:[#allocation9_spill]] %s5619_s5  ;;  %v77_v0 = vld [vmem:[%s5654_s27] sm:$0xff]  ;;  %v78_v1 = vld [vmem:[%s5654_s27 + $0x8] sm:$0xff]  ;;  %v79_v2 = vld [vmem:[%s5654_s27 + $0x10] sm:$0xff]  ;;  %s5660_s7 = sld [smem:[#allocation8_spill]] }
   0x9   :  { %5653 = sst [smem:[#allocation10_spill]] %s5620_s9  ;;  %v4172_v3 = vpack.c.bf16 %v78_v1, %v77_v0  ;;  %v80_v4 = vld [vmem:[%s5654_s27 + $0x18] sm:$0xff]  ;;  %v348_v5 = vld [vmem:[%s5655_s25] sm:$0xff]  ;;  %v3593_v7 = vld [vmem:[%s5655_s25 + $0x10] sm:$0xff]  ;;  %s5661_s5 = sld [smem:[#allocation9_spill]] }
   0xa   :  { %v4176_v6 = vpack.c.bf16 %v80_v4, %v79_v2  ;;  %4020 = vmatprep.mubr.msk.f32.mxu0 %vm356_vm0, %v348_v5  ;;  %v81_v8 = vld [vmem:[%s5654_s27 + $0x20] sm:$0x1]  ;;  %4033 = vmatprep.mubr.msk.f32.mxu1 %vm356_vm0, %v3593_v7  ;;  %v349_v9 = vld [vmem:[%s5655_s25 + $0x8] sm:$0xff]  ;;  %v3594_v10 = vld [vmem:[%s5655_s25 + $0x18] sm:$0xff]  ;;  %s5657_s27 = sld [smem:[#allocation5_spill]]  ;;  %s5662_s9 = sld [smem:[#allocation10_spill]] }
   0xb   :  { %4173 = vmatprep.subr.bf16.mxu0 %v4172_v3  ;;  %4181 = vmatprep.subr.bf16.mxu1 %v4172_v3  ;;  %v3595_v11 = vld [vmem:[%s5655_s25 + $0x20] sm:$0xff]  ;;  %v157_v13 = vld [vmem:[%s5656_s30 + $0x8] sm:$0xff]  ;;  %v158_v14 = vld [vmem:[%s5656_s30 + $0x10] sm:$0xff] }
   0xc   :  { %4175 = vmatpush3.bf16.msra.mxu0 %v4172_v3  ;;  %4183 = vmatpush3.bf16.msra.mxu1 %v4172_v3  ;;  %v156_v12 = vld [vmem:[%s5656_s30] sm:$0xff]  ;;  %v159_v15 = vld [vmem:[%s5656_s30 + $0x18] sm:$0xff]  ;;  %v3596_v17 = vld [vmem:[%s5655_s25 + $0x28] sm:$0xff] }
   0xd   :  { %4177 = vmatprep.subr.bf16.mxu0 %v4176_v6  ;;  %4185 = vmatprep.subr.bf16.mxu1 %v4176_v6  ;;  %v4196_v16 = vpack.c.bf16 %v157_v13, %v156_v12  ;;  %v4798_v18 = vpack.c.bf16 %v159_v15, %v158_v14  ;;  %v160_v19 = vld [vmem:[%s5656_s30 + $0x20] sm:$0x1]  ;;  %v4299_v30 = vld [vmem:[%s5658_s6 + $0x4] ss:$8 sps:$4 sm:$0xff]   ;;  %v344_v56 = vld [vmem:[%s5659_s2 + $0x30] sm:$0xff] }
   0xe   :  { %v339_v55 = vld [vmem:[%s5659_s2 + $0x8] sm:$0xff]  ;;  %v4302_v1 = vld [vmem:[%s5658_s6 + $0x14] ss:$8 sps:$4 sm:$0xff]   ;;  %v4300_v2 = vld [vmem:[%s5658_s6 + $0x10] ss:$8 sps:$4 sm:$0xff]  }
   0xf   :  { %v4297_v61 = vld [vmem:[%s5658_s6] ss:$8 sps:$4 sm:$0xff]   ;;  %v631_v63 = vpack.c.bf16 %v344_v56, %v339_v55  ;;  %v4308_v5 = vld [vmem:[%s5658_s6 + $0x34] ss:$8 sps:$4 sm:$0xff]   ;;  %v4311_v7 = vld [vmem:[%s5658_s6 + $0x44] ss:$8 sps:$4 sm:$0xff]  }
  0x10   :  { %4179 = vmatpush3.bf16.msra.mxu0 %v4176_v6  ;;  %4187 = vmatpush3.bf16.msra.mxu1 %v4176_v6  ;;  %v4291_v20 = vld [vmem:[%s5657_s27 + $0x4] ss:$8 sps:$4 sm:$0xff]   ;;  %v4289_v21 = vld [vmem:[%s5657_s27] ss:$8 sps:$4 sm:$0xff]   ;;  %v4294_v22 = vld [vmem:[%s5657_s27 + $0x14] ss:$8 sps:$4 sm:$0xff]  }
  0x11   :  { %4018 = vmatprep.subr.msk.mxu0 %vm363_vm1, %v81_v8  ;;  %4031 = vmatprep.subr.msk.mxu1 %vm363_vm1, %v81_v8  ;;  %v154_v23 = vld [vmem:[%s5657_s27 + $0x20] sm:$0x11]  ;;  %v4292_v24 = vld [vmem:[%s5657_s27 + $0x10] ss:$8 sps:$4 sm:$0xff]   ;;  %v4320_v13 = vld [vmem:[%s5658_s6 + $0x74] ss:$8 sps:$4 sm:$0xff]  }
  0x12   :  { %v3610_v25 = vcombine.low %v154_v23, %v154_v23  ;;  %v3611_v26 = vcombine.high %v154_v23, %v154_v23  ;;  %v4303_v4 = vld [vmem:[%s5658_s6 + $0x20] ss:$8 sps:$4 sm:$0xff]   ;;  %v4318_v14 = vld [vmem:[%s5658_s6 + $0x70] ss:$8 sps:$4 sm:$0xff]   ;;  %v4323_v15 = vld [vmem:[%s5658_s6 + $0x84] ss:$8 sps:$4 sm:$0xff]  }
  0x13   :  { %v4315_v12 = vld [vmem:[%s5658_s6 + $0x60] ss:$8 sps:$4 sm:$0xff]   ;;  %v4335_v23 = vld [vmem:[%s5658_s6 + $0xc4] ss:$8 sps:$4 sm:$0xff]   ;;  %v4374_v56 = vld [vmem:[%s5658_s6 + $0x194] ss:$8 sps:$4 sm:$0xff]  }
  0x14   :  { %4019 = vmatpush3.msk.msra.mxu0 %vm363_vm1, %v81_v8  ;;  %4032 = vmatpush3.msk.msra.mxu1 %vm363_vm1, %v81_v8  ;;  %v670_v29 = vand.u32 %v3611_v26, %v665_v28  ;;  %v667_v31 = vand.u32 %v3610_v25, %v665_v28  ;;  %v4338_v25 = vld [vmem:[%s5658_s6 + $0xd4] ss:$8 sps:$4 sm:$0xff]   ;;  %v4336_v26 = vld [vmem:[%s5658_s6 + $0xd0] ss:$8 sps:$4 sm:$0xff]   ;;  %v4341_v28 = vld [vmem:[%s5658_s6 + $0xe4] ss:$8 sps:$4 sm:$0xff]  }
  0x15   :  { %4021 = vmatmul.mubr.msk.f32.vlgmr.msra.gmra.mrb[0].mxu0 %vm356_vm0, %v349_v9  ;;  %4034 = vmatmul.mubr.msk.f32.vlgmr.msra.gmra.mrb[0].mxu1 %vm356_vm0, %v3594_v10  ;;  %v4314_v9 = vld [vmem:[%s5658_s6 + $0x54] ss:$8 sps:$4 sm:$0xff]   ;;  %v4312_v10 = vld [vmem:[%s5658_s6 + $0x50] ss:$8 sps:$4 sm:$0xff]   ;;  %v4369_v55 = vld [vmem:[%s5658_s6 + $0x180] ss:$8 sps:$4 sm:$0xff]  }
  0x16   :  { %4189 = vmatprep.subr.bf16.mxu0 %v4172_v3  ;;  %4046 = vmatprep.mubr.msk.f32.mxu0 %vm356_vm0, %v3595_v11  ;;  %v4317_v11 = vld [vmem:[%s5658_s6 + $0x64] ss:$8 sps:$4 sm:$0xff]  }
  0x17   :  { %4191 = vmatpush3.bf16.msra.mxu0 %v4172_v3  ;;  %672 = vmatprep.subr.bf16.mxu1 %v4291_v20  ;;  %v4305_v3 = vld [vmem:[%s5658_s6 + $0x24] ss:$8 sps:$4 sm:$0xff]   ;;  %v4327_v20 = vld [vmem:[%s5658_s6 + $0xa0] ss:$8 sps:$4 sm:$0xff]  }
  0x18   :  { %4193 = vmatprep.subr.bf16.mxu0 %v4176_v6  ;;  %673 = vmatpush1.bf16.msra.mxu1 %v4289_v21  ;;  %v4332_v21 = vld [vmem:[%s5658_s6 + $0xb4] ss:$8 sps:$4 sm:$0xff]  }
  0x19   :  { %674 = vmatprep.subr.bf16.mxu1 %v4294_v22  ;;  %704 = vmatprep.mubr.bf16.mxu1 %v4617_v27  ;;  %v4330_v22 = vld [vmem:[%s5658_s6 + $0xb0] ss:$8 sps:$4 sm:$0xff]  }
  0x1b   :  { %4195 = vmatpush3.bf16.msra.mxu0 %v4176_v6  ;;  %v4306_v6 = vld [vmem:[%s5658_s6 + $0x30] ss:$8 sps:$4 sm:$0xff]  }
  0x1c   :  { %4044 = vmatprep.subr.msk.mxu0 %vm363_vm1, %v81_v8  ;;  %675 = vmatpush1.bf16.msra.mxu1 %v4292_v24  ;;  %v4333_v24 = vld [vmem:[%s5658_s6 + $0xc0] ss:$8 sps:$4 sm:$0xff]  }
  0x1d   :  { %676 = vmatprep.subr.bf16.mxu1 %v670_v29  ;;  %v4339_v29 = vld [vmem:[%s5658_s6 + $0xe0] ss:$8 sps:$4 sm:$0xff]  }
  0x1f   :  { %4045 = vmatpush3.msk.msra.mxu0 %vm363_vm1, %v81_v8  ;;  %v4309_v8 = vld [vmem:[%s5658_s6 + $0x40] ss:$8 sps:$4 sm:$0xff]  }
  0x20   :  { %4047 = vmatmul.mubr.msk.f32.vlgmr.msra.gmra.mrb[2].mxu0 %vm356_vm0, %v3596_v17  ;;  %4197 = vmatprep.subr.bf16.mxu0 %v4196_v16  ;;  %v4326_v17 = vld [vmem:[%s5658_s6 + $0x94] ss:$8 sps:$4 sm:$0xff]  }
  0x21   :  { %4199 = vmatpush3.bf16.msra.mxu0 %v4196_v16  ;;  %677 = vmatpush1.bf16.msra.mxu1 %v667_v31  ;;  %v4342_v31 = vld [vmem:[%s5658_s6 + $0xf0] ss:$8 sps:$4 sm:$0xff]  }
  0x22   :  { %4201 = vmatprep.subr.bf16.mxu0 %v4798_v18  ;;  %1059 = vmatprep.subr.bf16.mxu1 %v4299_v30  ;;  %v4344_v30 = vld [vmem:[%s5658_s6 + $0xf4] ss:$8 sps:$4 sm:$0xff]  }
  0x25   :  { %4203 = vmatpush3.bf16.msra.mxu0 %v4798_v18 }
  0x26   :  { %4057 = vmatprep.subr.msk.mxu0 %vm363_vm1, %v160_v19 }
  0x29   :  { %4058 = vmatpush3.msk.msra.mxu0 %vm363_vm1, %v160_v19 }
  0x2a   :  { %4205 = vmatprep.subr.bf16.mxu0 %v4196_v16 }
  0xe8   :  { %v4022_v32 = vpop.f32.mrb[0].mxu0  ;;  %v4035_v33 = vpop.f32.mrb[0].mxu1 }
  0xe9   :  { %v605_v34 = vmul.f32 %v4022_v32, %v4022_v32  ;;  %v607_v35 = vmul.f32 %v4035_v33, %v4035_v33  ;;  %v433_v36 = vpop.f32.mrb[1].mxu0  ;;  %v514_v37 = vpop.f32.mrb[1].mxu1 }
  0xea   :  { %v604_v38 = vmul.f32 %v433_v36, %v433_v36  ;;  %v606_v39 = vmul.f32 %v514_v37, %v514_v37  ;;  %4059 = vmatprep.mubr.msk.f32.mxu0 %vm356_vm0, %v433_v36  ;;  %v346_v36 = vld [vmem:[%s5659_s2 + $0x40] sm:$0xff] }
  0xeb   :  { %v609_v40 = vadd.f32 %v607_v35, %v605_v34  ;;  %4060 = vmatmul.mubr.msk.f32.vlgmr.msra.gmra.mrb[4].mxu0 %vm356_vm0, %v4022_v32  ;;  %v338_v32 = vld [vmem:[%s5659_s2] sm:$0xff]  ;;  %v341_v35 = vld [vmem:[%s5659_s2 + $0x18] sm:$0xff] }
  0xec   :  { %v608_v41 = vadd.f32 %v606_v39, %v604_v38  ;;  %4207 = vmatpush3.bf16.msra.mxu0 %v4196_v16  ;;  %4072 = vmatprep.mubr.msk.f32.mxu0 %vm356_vm0, %v514_v37  ;;  %v4347_v34 = vld [vmem:[%s5658_s6 + $0x104] ss:$8 sps:$4 sm:$0xff]   ;;  %v4345_v38 = vld [vmem:[%s5658_s6 + $0x100] ss:$8 sps:$4 sm:$0xff]   ;;  %v633_v39 = vpack.c.bf16 %v346_v36, %v341_v35  ;;  %v4411_v35 = vld [vmem:[%s5660_s7 + $0x70] sm:$0xff]  }
  0xed   :  { %4209 = vmatprep.subr.bf16.mxu0 %v4798_v18  ;;  %v4412_v36 = vld [vmem:[%s5660_s7 + $0x30] sm:$0xff]  }
  0xf0   :  { %4211 = vmatpush3.bf16.msra.mxu0 %v4798_v18 }
  0xf1   :  { %4070 = vmatprep.subr.msk.mxu0 %vm363_vm1, %v160_v19 }
  0xf3   :  { %v4048_v42 = vpop.f32.mrb[2].mxu0 }
  0xf4   :  { %v611_v43 = vmul.f32 %v4048_v42, %v4048_v42  ;;  %v595_v44 = vpop.f32.mrb[3].mxu0  ;;  %4071 = vmatpush3.msk.msra.mxu0 %vm363_vm1, %v160_v19 }
  0xf5   :  { %v610_v45 = vmul.f32 %v595_v44, %v595_v44  ;;  %4073 = vmatmul.mubr.msk.f32.vlgmr.msra.gmra.mrb[6].mxu0 %vm356_vm0, %v4035_v33  ;;  %4213 = vmatprep.subr.bf16.mxu0 %v4196_v16  ;;  %v343_v33 = vld [vmem:[%s5659_s2 + $0x28] sm:$0xff] }
  0xf6   :  { %v613_v46 = vadd.f32 %v611_v43, %v609_v40  ;;  %4215 = vmatpush3.bf16.msra.mxu0 %v4196_v16  ;;  %4085 = vmatprep.mubr.msk.f32.mxu0 %vm356_vm0, %v595_v44  ;;  %v4321_v16 = vld [vmem:[%s5658_s6 + $0x80] ss:$8 sps:$4 sm:$0xff]   ;;  %v630_v37 = vpack.c.bf16 %v343_v33, %v338_v32  ;;  %v4350_v40 = vld [vmem:[%s5658_s6 + $0x114] ss:$8 sps:$4 sm:$0xff]  }
  0xf7   :  { %v612_v47 = vadd.f32 %v610_v45, %v608_v41  ;;  %4217 = vmatprep.subr.bf16.mxu0 %v4798_v18  ;;  %v4348_v41 = vld [vmem:[%s5658_s6 + $0x110] ss:$8 sps:$4 sm:$0xff]   ;;  %v4351_v43 = vld [vmem:[%s5658_s6 + $0x120] ss:$8 sps:$4 sm:$0xff]   ;;  %v4356_v44 = vld [vmem:[%s5658_s6 + $0x134] ss:$8 sps:$4 sm:$0xff]  }
  0xf8   :  { %v615_v48 = vmax.f32 %v613_v46, 1e-08  ;;  %v4354_v45 = vld [vmem:[%s5658_s6 + $0x130] ss:$8 sps:$4 sm:$0xff]   ;;  %v4359_v46 = vld [vmem:[%s5658_s6 + $0x144] ss:$8 sps:$4 sm:$0xff]  }
  0xf9   :  { %v614_v49 = vmax.f32 %v612_v47, 1e-08  ;;  %v4357_v47 = vld [vmem:[%s5658_s6 + $0x140] ss:$8 sps:$4 sm:$0xff]  }
  0xfa   :  { %4549 = vrsqrt.f32 %v615_v48  ;;  %4219 = vmatpush3.bf16.msra.mxu0 %v4798_v18  ;;  %vm625_vm2 = vcmp.eq.f32.partialorder %v615_v48, inf  ;;  %v628_v54 = vand.u32 2147483648, %v615_v48  ;;  %vm627_vm4 = vcmp.eq.f32.partialorder %v615_v48, 0.0  ;;  %v4324_v18 = vld [vmem:[%s5658_s6 + $0x90] ss:$8 sps:$4 sm:$0xff]   ;;  %v4408_v32 = vld [vmem:[%s5660_s7 + $0x20] sm:$0xff]  }
  0xfb   :  { %4551 = vrsqrt.f32 %v614_v49  ;;  %4083 = vmatprep.subr.msk.mxu0 %vm363_vm1, %v160_v19  ;;  %vm618_vm3 = vcmp.eq.f32.partialorder %v614_v49, inf  ;;  %v621_v57 = vand.u32 2147483648, %v614_v49  ;;  %vm620_vm5 = vcmp.eq.f32.partialorder %v614_v49, 0.0  ;;  %v4409_v33 = vld [vmem:[%s5660_s7 + $0x68] sm:$0xff]  }
  0xfe   :  { %4084 = vmatpush3.msk.msra.mxu0 %vm363_vm1, %v160_v19  ;;  %v4329_v19 = vld [vmem:[%s5658_s6 + $0xa4] ss:$8 sps:$4 sm:$0xff]  }
  0xff   :  { %4086 = vmatmul.mubr.msk.f32.vlgmr.msra.gmra.mrb[8].mxu0 %vm356_vm0, %v4048_v42  ;;  %v4353_v42 = vld [vmem:[%s5658_s6 + $0x124] ss:$8 sps:$4 sm:$0xff]  }
 0x104   :  { %v4550_v50 = vpop.eup %4549 }
 0x105   :  { %v4552_v51 = vpop.eup %4551  ;;  %v624_v52 = vmul.f32 %v4550_v50, %v615_v48  ;;  %v4365_v50 = vld [vmem:[%s5658_s6 + $0x164] ss:$8 sps:$4 sm:$0xff]  }
 0x106   :  { %v617_v53 = vmul.f32 %v4552_v51, %v614_v49  ;;  %v4363_v51 = vld [vmem:[%s5658_s6 + $0x160] ss:$8 sps:$4 sm:$0xff]  }
 0x107   :  { %v626_v58 = vsel %vm625_vm2, %v615_v48, %v624_v52  ;;  %v4362_v48 = vld [vmem:[%s5658_s6 + $0x154] ss:$8 sps:$4 sm:$0xff]  }
 0x108   :  { %v619_v59 = vsel %vm618_vm3, %v614_v49, %v617_v53  ;;  %v629_v60 = vsel %vm627_vm4, %v628_v54, %v626_v58  ;;  %v4360_v49 = vld [vmem:[%s5658_s6 + $0x150] ss:$8 sps:$4 sm:$0xff]   ;;  %v4368_v52 = vld [vmem:[%s5658_s6 + $0x174] ss:$8 sps:$4 sm:$0xff]   ;;  %v4371_v54 = vld [vmem:[%s5658_s6 + $0x184] ss:$8 sps:$4 sm:$0xff]  }
 0x109   :  { %v622_v62 = vsel %vm620_vm5, %v621_v57, %v619_v59  ;;  %v4366_v53 = vld [vmem:[%s5658_s6 + $0x170] ss:$8 sps:$4 sm:$0xff]   ;;  %v4377_v58 = vld [vmem:[%s5658_s6 + $0x1a4] ss:$8 sps:$4 sm:$0xff]   ;;  %v4375_v59 = vld [vmem:[%s5658_s6 + $0x1a0] ss:$8 sps:$4 sm:$0xff]  }
 0x10a   :  { %v635_v0 = vpack.c.bf16 %v629_v60, %v622_v62  ;;  %v4372_v57 = vld [vmem:[%s5658_s6 + $0x190] ss:$8 sps:$4 sm:$0xff]   ;;  %v4380_v60 = vld [vmem:[%s5658_s6 + $0x1b4] ss:$8 sps:$4 sm:$0xff]   ;;  %v4383_v62 = vld [vmem:[%s5658_s6 + $0x1c4] ss:$8 sps:$4 sm:$0xff]  }
 0x10c   :  { %3612 = vmatmul.mubr.msk.bf16.vlgmr.msra.gmra.mrb[4].mxu1 %vm356_vm0, %v635_v0  ;;  %v4386_v0 = vld [vmem:[%s5658_s6 + $0x1d4] ss:$8 sps:$4 sm:$0xff]  }
 0x10d   :  { %1060 = vmatpush1.bf16.msra.mxu1 %v4297_v61  ;;  %1091 = vmatprep.mubr.bf16.mxu1 %v631_v63  ;;  %v4378_v61 = vld [vmem:[%s5658_s6 + $0x1b0] ss:$8 sps:$4 sm:$0xff]   ;;  %v4381_v63 = vld [vmem:[%s5658_s6 + $0x1c0] ss:$8 sps:$4 sm:$0xff]  }
 0x10e   :  { %1061 = vmatprep.subr.bf16.mxu1 %v4302_v1  ;;  %v4384_v1 = vld [vmem:[%s5658_s6 + $0x1d0] ss:$8 sps:$4 sm:$0xff]  }
 0x111   :  { %1062 = vmatpush1.bf16.msra.mxu1 %v4300_v2  ;;  %v4389_v2 = vld [vmem:[%s5658_s6 + $0x1e4] ss:$8 sps:$4 sm:$0xff]  }
 0x112   :  { %1063 = vmatprep.subr.bf16.mxu1 %v4305_v3  ;;  %v4387_v3 = vld [vmem:[%s5658_s6 + $0x1e0] ss:$8 sps:$4 sm:$0xff]  }
 0x115   :  { %1064 = vmatpush1.bf16.msra.mxu1 %v4303_v4  ;;  %v4392_v4 = vld [vmem:[%s5658_s6 + $0x1f4] ss:$8 sps:$4 sm:$0xff]  }
 0x116   :  { %1065 = vmatprep.subr.bf16.mxu1 %v4308_v5  ;;  %v4390_v5 = vld [vmem:[%s5658_s6 + $0x1f0] ss:$8 sps:$4 sm:$0xff]  }
 0x119   :  { %1066 = vmatpush1.bf16.msra.mxu1 %v4306_v6  ;;  %v340_v6 = vld [vmem:[%s5659_s2 + $0x10] sm:$0xff] }
 0x11a   :  { %1067 = vmatprep.subr.bf16.mxu1 %v4311_v7  ;;  %v345_v7 = vld [vmem:[%s5659_s2 + $0x38] sm:$0xff] }
 0x11d   :  { %1068 = vmatpush1.bf16.msra.mxu1 %v4309_v8  ;;  %v4395_v8 = vld [vmem:[%s5658_s6 + $0x204] ss:$8 sps:$4 sm:$0xff]  }
 0x11e   :  { %1069 = vmatprep.subr.bf16.mxu1 %v4314_v9  ;;  %v632_v9 = vpack.c.bf16 %v345_v7, %v340_v6 }
 0x121   :  { %1070 = vmatpush1.bf16.msra.mxu1 %v4312_v10  ;;  %v4393_v10 = vld [vmem:[%s5658_s6 + $0x200] ss:$8 sps:$4 sm:$0xff]  }
 0x122   :  { %1071 = vmatprep.subr.bf16.mxu1 %v4317_v11  ;;  %v4398_v11 = vld [vmem:[%s5658_s6 + $0x214] ss:$8 sps:$4 sm:$0xff]  }
 0x125   :  { %1072 = vmatpush1.bf16.msra.mxu1 %v4315_v12  ;;  %v4396_v12 = vld [vmem:[%s5658_s6 + $0x210] ss:$8 sps:$4 sm:$0xff]  }
 0x126   :  { %1073 = vmatprep.subr.bf16.mxu1 %v4320_v13  ;;  %v342_v13 = vld [vmem:[%s5659_s2 + $0x20] sm:$0xff] }
 0x129   :  { %1074 = vmatpush1.bf16.msra.mxu1 %v4318_v14  ;;  %v347_v14 = vld [vmem:[%s5659_s2 + $0x48] sm:$0xff] }
 0x12a   :  { %1075 = vmatprep.subr.bf16.mxu1 %v4323_v15  ;;  %v634_v15 = vpack.c.bf16 %v347_v14, %v342_v13  ;;  %v194_v14 = vld [vmem:[%s5662_s9] sm:$0xff] }
 0x12d   :  { %1076 = vmatpush1.bf16.msra.mxu1 %v4321_v16 }
 0x12e   :  { %1077 = vmatprep.subr.bf16.mxu1 %v4326_v17 }
 0x131   :  { %1078 = vmatpush1.bf16.msra.mxu1 %v4324_v18 }
 0x132   :  { %1079 = vmatprep.subr.bf16.mxu1 %v4329_v19 }
 0x135   :  { %1080 = vmatpush1.bf16.msra.mxu1 %v4327_v20 }
 0x136   :  { %1081 = vmatprep.subr.bf16.mxu1 %v4332_v21 }
 0x139   :  { %1082 = vmatpush1.bf16.msra.mxu1 %v4330_v22  ;;  %v4399_v22 = vld [vmem:[%s5660_s7 + $0x40] sm:$0xff]  }
 0x13a   :  { %1083 = vmatprep.subr.bf16.mxu1 %v4335_v23  ;;  %v4400_v23 = vld [vmem:[%s5660_s7] sm:$0xff]   ;;  %3896 = vmatprep.subr.bf16.mxu0 %v4399_v22 }
 0x13b   :  { %3897 = vmatpush3.bf16.msra.mxu0 %v4400_v23  ;;  %v231_v23 = vld [vmem:[%s5621_s13] sm:$0xff] }
 0x13d   :  { %1084 = vmatpush1.bf16.msra.mxu1 %v4333_v24  ;;  %v4401_v24 = vld [vmem:[%s5660_s7 + $0x48] sm:$0xff]  }
 0x13e   :  { %1085 = vmatprep.subr.bf16.mxu1 %v4338_v25  ;;  %v4402_v25 = vld [vmem:[%s5660_s7 + $0x8] sm:$0xff]   ;;  %3898 = vmatprep.subr.bf16.mxu0 %v4401_v24 }
 0x13f   :  { %3899 = vmatpush3.bf16.msra.mxu0 %v4402_v25  ;;  %v232_v24 = vld [vmem:[%s5621_s13 + $0x8] sm:$0xff] }
 0x140   :  { %v5162_v25 = vpack.c.bf16 %v232_v24, %v231_v23  ;;  %v4423_v23 = vld [vmem:[%s5624_s10 + $0x14] ss:$8 sps:$4 sm:$0xff]   ;;  %v4421_v24 = vld [vmem:[%s5624_s10 + $0x10] ss:$8 sps:$4 sm:$0xff]  }
 0x141   :  { %1086 = vmatpush1.bf16.msra.mxu1 %v4336_v26  ;;  %v4403_v26 = vld [vmem:[%s5660_s7 + $0x50] sm:$0xff]  }
 0x142   :  { %1087 = vmatprep.subr.bf16.mxu1 %v4341_v28  ;;  %v4404_v28 = vld [vmem:[%s5660_s7 + $0x10] sm:$0xff]   ;;  %3900 = vmatprep.subr.bf16.mxu0 %v4403_v26 }
 0x143   :  { %3901 = vmatpush3.bf16.msra.mxu0 %v4404_v28  ;;  %v3695_v28 = vld [vmem:[%s5622_s8] ss:$0 sm:$0xff] }
 0x145   :  { %1088 = vmatpush1.bf16.msra.mxu1 %v4339_v29  ;;  %v4405_v29 = vld [vmem:[%s5660_s7 + $0x58] sm:$0xff]  }
 0x146   :  { %1089 = vmatprep.subr.bf16.mxu1 %v4344_v30  ;;  %v4406_v30 = vld [vmem:[%s5660_s7 + $0x18] sm:$0xff]   ;;  %3902 = vmatprep.subr.bf16.mxu0 %v4405_v29 }
 0x147   :  { %3903 = vmatpush3.bf16.msra.mxu0 %v4406_v30 }
 0x149   :  { %1090 = vmatpush1.bf16.msra.mxu1 %v4342_v31  ;;  %v4407_v31 = vld [vmem:[%s5660_s7 + $0x60] sm:$0xff]  }
 0x14a   :  { %1102 = vmatprep.subr.bf16.mxu1 %v4347_v34  ;;  %3904 = vmatprep.subr.bf16.mxu0 %v4407_v31  ;;  %v4410_v34 = vld [vmem:[%s5660_s7 + $0x28] sm:$0xff]  }
 0x14b   :  { %3905 = vmatpush3.bf16.msra.mxu0 %v4408_v32 }
 0x14c   :  { %1092 = vmatmul.mubr.bf16.vlgmr.msra.gmra.mrb[4].mxu1 %v630_v37  ;;  %3906 = vmatprep.subr.bf16.mxu0 %v4409_v33  ;;  %v4413_v37 = vld [vmem:[%s5660_s7 + $0x78] sm:$0xff]  }
 0x14d   :  { %1103 = vmatpush1.bf16.msra.mxu1 %v4345_v38  ;;  %1134 = vmatprep.mubr.bf16.mxu1 %v633_v39  ;;  %v4414_v38 = vld [vmem:[%s5660_s7 + $0x38] sm:$0xff]   ;;  %v1189_v39 = vlaneseq }
 0x14e   :  { %1104 = vmatprep.subr.bf16.mxu1 %v4350_v40 }
 0x14f   :  { %3907 = vmatpush3.bf16.msra.mxu0 %v4410_v34  ;;  %v1190_v40 = vshrl.u32 %v1189_v39, 7 }
 0x150   :  { %3908 = vmatprep.subr.bf16.mxu0 %v4411_v35 }
 0x151   :  { %1105 = vmatpush1.bf16.msra.mxu1 %v4348_v41  ;;  %v5137_v41 = vsub.s32 0, %v1190_v40 }
 0x152   :  { %1106 = vmatprep.subr.bf16.mxu1 %v4353_v42  ;;  %v155_v42 = vld [vmem:[%s5661_s5] sm:$0x3] }
 0x153   :  { %3909 = vmatpush3.bf16.msra.mxu0 %v4412_v36 }
 0x154   :  { %3910 = vmatprep.subr.bf16.mxu0 %v4413_v37 }
 0x155   :  { %1107 = vmatpush1.bf16.msra.mxu1 %v4351_v43  ;;  %v5142_v43 = vsub.s32 1, %v1190_v40 }
 0x156   :  { %1108 = vmatprep.subr.bf16.mxu1 %v4356_v44  ;;  %v1192_v44 = vrot.slane %v155_v42, %v5137_v41 }
 0x157   :  { %3911 = vmatpush3.bf16.msra.mxu0 %v4414_v38 }
 0x159   :  { %1109 = vmatpush1.bf16.msra.mxu1 %v4354_v45  ;;  %v1196_v45 = vrot.slane %v155_v42, %v5142_v43 }
 0x15a   :  { %1110 = vmatprep.subr.bf16.mxu1 %v4359_v46 }
 0x15d   :  { %1111 = vmatpush1.bf16.msra.mxu1 %v4357_v47 }
 0x15e   :  { %1112 = vmatprep.subr.bf16.mxu1 %v4362_v48 }
 0x161   :  { %1113 = vmatpush1.bf16.msra.mxu1 %v4360_v49 }
 0x162   :  { %1114 = vmatprep.subr.bf16.mxu1 %v4365_v50 }
 0x165   :  { %1115 = vmatpush1.bf16.msra.mxu1 %v4363_v51 }
 0x166   :  { %1116 = vmatprep.subr.bf16.mxu1 %v4368_v52 }
 0x169   :  { %1117 = vmatpush1.bf16.msra.mxu1 %v4366_v53 }
 0x16a   :  { %1118 = vmatprep.subr.bf16.mxu1 %v4371_v54 }
 0x16d   :  { %1119 = vmatpush1.bf16.msra.mxu1 %v4369_v55 }
 0x16e   :  { %1120 = vmatprep.subr.bf16.mxu1 %v4374_v56 }
 0x171   :  { %1121 = vmatpush1.bf16.msra.mxu1 %v4372_v57 }
 0x172   :  { %1122 = vmatprep.subr.bf16.mxu1 %v4377_v58 }
 0x175   :  { %1123 = vmatpush1.bf16.msra.mxu1 %v4375_v59 }
 0x176   :  { %1124 = vmatprep.subr.bf16.mxu1 %v4380_v60 }
 0x179   :  { %1125 = vmatpush1.bf16.msra.mxu1 %v4378_v61 }
 0x17a   :  { %1126 = vmatprep.subr.bf16.mxu1 %v4383_v62 }
 0x17d   :  { %1127 = vmatpush1.bf16.msra.mxu1 %v4381_v63 }
 0x17e   :  { %1128 = vmatprep.subr.bf16.mxu1 %v4386_v0 }
 0x181   :  { %1129 = vmatpush1.bf16.msra.mxu1 %v4384_v1 }
 0x182   :  { %1130 = vmatprep.subr.bf16.mxu1 %v4389_v2 }
 0x185   :  { %1131 = vmatpush1.bf16.msra.mxu1 %v4387_v3 }
 0x186   :  { %1132 = vmatprep.subr.bf16.mxu1 %v4392_v4 }
 0x189   :  { %1133 = vmatpush1.bf16.msra.mxu1 %v4390_v5 }
 0x18a   :  { %1145 = vmatprep.subr.bf16.mxu1 %v4395_v8 }
 0x18c   :  { %1135 = vmatmul.mubr.bf16.vlgmr.msra.gmra.mrb[4].mxu1 %v632_v9 }
 0x18d   :  { %1146 = vmatpush1.bf16.msra.mxu1 %v4393_v10  ;;  %1177 = vmatprep.mubr.bf16.mxu1 %v4617_v27 }
 0x18e   :  { %1147 = vmatprep.subr.bf16.mxu1 %v4398_v11 }
 0x191   :  { %1148 = vmatpush1.bf16.msra.mxu1 %v4396_v12 }
 0x192   :  { %4233 = vmatprep.subr.bf16.mxu1 %v5162_v25 }
 0x198   :  { %3681 = vmatmul.mubr.msk.bf16.vlgmr.msra.gmra.mrb[4].mxu1 %vm1055_vm6, %v634_v15  ;;  %v195_v15 = vld [vmem:[%s5662_s9 + $0x8] sm:$0xff] }
 0x199   :  { %v4220_v22 = vpack.c.bf16 %v195_v15, %v194_v14  ;;  %4235 = vmatpush3.bf16.msra.mxu1 %v5162_v25  ;;  %v4418_v14 = vld [vmem:[%s5624_s10] ss:$8 sps:$4 sm:$0xff]  }
 0x19a   :  { %4237 = vmatprep.subr.bf16.mxu1 %v5162_v25 }
 0x19b   :  { %4221 = vmatprep.subr.bf16.mxu0 %v4220_v22 }
 0x1be   :  { %v5077_v16 = vpop.f32.mrb[4].mxu0 }
 0x1bf   :  { %v5079_v17 = vpop.f32.mrb[5].mxu0 }
 0x1c8   :  { %v5081_v18 = vpop.f32.mrb[6].mxu0 }
 0x1c9   :  { %v5083_v19 = vpop.f32.mrb[7].mxu0 }
 0x1d2   :  { %v5085_v20 = vpop.f32.mrb[8].mxu0 }
 0x1d3   :  { %v5087_v21 = vpop.f32.mrb[9].mxu0 }
 0x26b   :  { %v1179_v46 = vpop.f32.mrb[4].mxu1 }
 0x26c   :  { %v1199_v47 = vadd.f32 %v1192_v44, %v1179_v46  ;;  %v1181_v48 = vpop.f32.mrb[5].mxu1 }
 0x26d   :  { %v1200_v49 = vadd.f32 %v1196_v45, %v1181_v48  ;;  %v1183_v50 = vpop.f32.mrb[6].mxu1 }
 0x26e   :  { %v3691_v51 = vmul.f32 -1.442695, %v1199_v47  ;;  %v1201_v52 = vadd.f32 %v1192_v44, %v1183_v50  ;;  %v1185_v53 = vpop.f32.mrb[7].mxu1  ;;  %v1636_v56 = vmax.f32 %v1199_v47, 0.0 }
 0x26f   :  { %v3692_v54 = vmul.f32 -1.442695, %v1200_v49  ;;  %v1202_v55 = vadd.f32 %v1196_v45, %v1185_v53  ;;  %v1637_v59 = vmax.f32 %v1200_v49, 0.0 }
 0x270   :  { %4553 = vpow2.f32 %v3691_v51  ;;  %v3693_v57 = vmul.f32 -1.442695, %v1201_v52  ;;  %v1638_v58 = vmax.f32 %v1201_v52, 0.0 }
 0x271   :  { %4555 = vpow2.f32 %v3692_v54  ;;  %v3694_v60 = vmul.f32 -1.442695, %v1202_v55  ;;  %v1639_v61 = vmax.f32 %v1202_v55, 0.0 }
 0x272   :  { %4557 = vpow2.f32 %v3693_v57  ;;  %v5146_v62 = vpack.c.bf16 %v1638_v58, %v1636_v56 }
 0x273   :  { %4559 = vpow2.f32 %v3694_v60  ;;  %v5148_v63 = vpack.c.bf16 %v1639_v61, %v1637_v59 }
 0x27a   :  { %v4554_v0 = vpop.eup %4553 }
 0x27b   :  { %v4556_v1 = vpop.eup %4555  ;;  %v1461_v2 = vadd.f32 1.0, %v4554_v0 }
 0x27c   :  { %v4558_v3 = vpop.eup %4557  ;;  %v1462_v4 = vadd.f32 1.0, %v4556_v1 }
 0x27d   :  { %v4560_v5 = vpop.eup %4559  ;;  %4561 = vrcp.f32 %v1461_v2  ;;  %v1463_v6 = vadd.f32 1.0, %v4558_v3 }
 0x27e   :  { %4563 = vrcp.f32 %v1462_v4  ;;  %v1464_v7 = vadd.f32 1.0, %v4560_v5 }
 0x27f   :  { %4565 = vrcp.f32 %v1463_v6 }
 0x280   :  { %4567 = vrcp.f32 %v1464_v7 }
 0x287   :  { %v4562_v8 = vpop.eup %4561 }
 0x288   :  { %v4564_v9 = vpop.eup %4563 }
 0x289   :  { %v4566_v10 = vpop.eup %4565 }
 0x28a   :  { %v4568_v11 = vpop.eup %4567  ;;  %v1473_v12 = vpack.c.bf16 %v4566_v10, %v4562_v8 }
 0x28b   :  { %v1474_v13 = vpack.c.bf16 %v4568_v11, %v4564_v9 }
 0x28d   :  { %1609 = vmatprep.mubr.bf16.mxu0 %v1474_v13 }
 0x28e   :  { %1610 = vmatmul.mubr.bf16.vlgmr.msra.gmra.mrb[12].mxu0 %v1473_v12 }
 0x28f   :  { %4223 = vmatpush3.bf16.msra.mxu0 %v4220_v22 }
 0x290   :  { %4225 = vmatprep.subr.bf16.mxu0 %v4220_v22 }
 0x361   :  { %v3912_v26 = vpop.f32.mrb[12].mxu0 }
 0x362   :  { %v3913_v29 = vpop.f32.mrb[13].mxu0 }
 0x363   :  { %v3914_v30 = vadd.f32 %v3913_v29, %v3912_v26  ;;  %v3915_v31 = vpop.f32.mrb[14].mxu0  ;;  %v4426_v26 = vld [vmem:[%s5624_s10 + $0x24] ss:$8 sps:$4 sm:$0xff]   ;;  %v4429_v29 = vld [vmem:[%s5624_s10 + $0x34] ss:$8 sps:$4 sm:$0xff]  }
 0x364   :  { %v3916_v32 = vpop.f32.mrb[15].mxu0 }
 0x365   :  { %v1612_v33 = vadd.f32 %v3914_v30, %v3695_v28  ;;  %v3917_v34 = vadd.f32 %v3916_v32, %v3915_v31  ;;  %v4432_v30 = vld [vmem:[%s5624_s10 + $0x44] ss:$8 sps:$4 sm:$0xff]   ;;  %v4430_v31 = vld [vmem:[%s5624_s10 + $0x40] ss:$8 sps:$4 sm:$0xff]   ;;  %v4435_v32 = vld [vmem:[%s5624_s10 + $0x54] ss:$8 sps:$4 sm:$0xff]  }
 0x367   :  { %v3712_v35 = vmul.f32 -1.442695, %v1612_v33  ;;  %v1615_v36 = vadd.f32 %v3917_v34, %v3695_v28  ;;  %v4424_v28 = vld [vmem:[%s5624_s10 + $0x20] ss:$8 sps:$4 sm:$0xff]   ;;  %v4433_v33 = vld [vmem:[%s5624_s10 + $0x50] ss:$8 sps:$4 sm:$0xff]  }
 0x368   :  { %v4438_v34 = vld [vmem:[%s5624_s10 + $0x64] ss:$8 sps:$4 sm:$0xff]  }
 0x369   :  { %4569 = vpow2.f32 %v3712_v35  ;;  %v3713_v37 = vmul.f32 -1.442695, %v1615_v36  ;;  %v4436_v35 = vld [vmem:[%s5624_s10 + $0x60] ss:$8 sps:$4 sm:$0xff]   ;;  %v4441_v36 = vld [vmem:[%s5624_s10 + $0x74] ss:$8 sps:$4 sm:$0xff]  }
 0x36b   :  { %4571 = vpow2.f32 %v3713_v37  ;;  %v4439_v37 = vld [vmem:[%s5624_s10 + $0x70] ss:$8 sps:$4 sm:$0xff]  }
 0x373   :  { %v4570_v38 = vpop.eup %4569 }
 0x374   :  { %v1624_v39 = vadd.f32 1.0, %v4570_v38  ;;  %v4444_v38 = vld [vmem:[%s5624_s10 + $0x84] ss:$8 sps:$4 sm:$0xff]  }
 0x375   :  { %v4572_v40 = vpop.eup %4571 }
 0x376   :  { %4573 = vrcp.f32 %v1624_v39  ;;  %v1625_v42 = vadd.f32 1.0, %v4572_v40  ;;  %v4442_v39 = vld [vmem:[%s5624_s10 + $0x80] ss:$8 sps:$4 sm:$0xff]   ;;  %v4447_v40 = vld [vmem:[%s5624_s10 + $0x94] ss:$8 sps:$4 sm:$0xff]  }
 0x378   :  { %4575 = vrcp.f32 %v1625_v42  ;;  %v4445_v42 = vld [vmem:[%s5624_s10 + $0x90] ss:$8 sps:$4 sm:$0xff]  }
 0x380   :  { %v4574_v44 = vpop.eup %4573 }
 0x381   :  { %v1630_v45 = vmul.f32 %v4574_v44, %v5079_v17  ;;  %v1632_v46 = vmul.f32 %v4574_v44, %v5083_v19  ;;  %v1634_v47 = vmul.f32 %v4574_v44, %v5087_v21  ;;  %v4417_v17 = vld [vmem:[%s5623_s11 + $0x4] ss:$8 sps:$4 sm:$0xff]  }
 0x382   :  { %v4576_v48 = vpop.eup %4575  ;;  %v4450_v44 = vld [vmem:[%s5624_s10 + $0xa4] ss:$8 sps:$4 sm:$0xff]  }
 0x383   :  { %4092 = vmatprep.mubr.msk.f32.mxu0 %vm1640_vm7, %v1630_v45  ;;  %v1631_v49 = vmul.f32 %v4576_v48, %v5077_v16  ;;  %v1633_v50 = vmul.f32 %v4576_v48, %v5081_v18  ;;  %v1635_v51 = vmul.f32 %v4576_v48, %v5085_v20  ;;  %v4415_v16 = vld [vmem:[%s5623_s11] ss:$8 sps:$4 sm:$0xff]   ;;  %v4420_v18 = vld [vmem:[%s5624_s10 + $0x4] ss:$8 sps:$4 sm:$0xff]  }
 0x384   :  { %v4448_v45 = vld [vmem:[%s5624_s10 + $0xa0] ss:$8 sps:$4 sm:$0xff]   ;;  %v4456_v48 = vld [vmem:[%s5624_s10 + $0xc4] ss:$8 sps:$4 sm:$0xff]  }
 0x385   :  { %4093 = vmatmul.mubr.msk.f32.vlgmr.msra.gmra.mrb[10].mxu0 %vm1640_vm7, %v1631_v49  ;;  %v4454_v49 = vld [vmem:[%s5624_s10 + $0xc0] ss:$8 sps:$4 sm:$0xff]  }
 0x386   :  { %4227 = vmatpush3.bf16.msra.mxu0 %v4220_v22  ;;  %4099 = vmatprep.mubr.msk.f32.mxu0 %vm1640_vm7, %v1632_v46  ;;  %v4453_v46 = vld [vmem:[%s5624_s10 + $0xb4] ss:$8 sps:$4 sm:$0xff]  }
 0x387   :  { %4229 = vmatprep.subr.bf16.mxu0 %v4220_v22 }
 0x389   :  { %4100 = vmatmul.mubr.msk.f32.vlgmr.msra.gmra.mrb[16].mxu0 %vm1640_vm7, %v1633_v50  ;;  %v4459_v50 = vld [vmem:[%s5624_s10 + $0xd4] ss:$8 sps:$4 sm:$0xff]  }
 0x38a   :  { %4231 = vmatpush3.bf16.msra.mxu0 %v4220_v22  ;;  %4106 = vmatprep.mubr.msk.f32.mxu0 %vm1640_vm7, %v1634_v47  ;;  %v4451_v47 = vld [vmem:[%s5624_s10 + $0xb0] ss:$8 sps:$4 sm:$0xff]  }
 0x38b   :  { %1926 = vmatprep.subr.bf16.mxu0 %v4417_v17  ;;  %v4460_v17 = vld [vmem:[%s5624_s10 + $0xe0] ss:$8 sps:$4 sm:$0xff]  }
 0x38d   :  { %4107 = vmatmul.mubr.msk.f32.vlgmr.msra.gmra.mrb[18].mxu0 %vm1640_vm7, %v1635_v51  ;;  %v4457_v51 = vld [vmem:[%s5624_s10 + $0xd0] ss:$8 sps:$4 sm:$0xff]  }
 0x38e   :  { %1958 = vmatprep.mubr.bf16.mxu0 %v4617_v27  ;;  %1927 = vmatpush1.bf16.msra.mxu0 %v4415_v16  ;;  %v4462_v16 = vld [vmem:[%s5624_s10 + $0xe4] ss:$8 sps:$4 sm:$0xff]  }
 0x38f   :  { %2129 = vmatprep.subr.bf16.mxu0 %v4420_v18  ;;  %v4465_v18 = vld [vmem:[%s5624_s10 + $0xf4] ss:$8 sps:$4 sm:$0xff]  }
 0x458   :  { %v4094_v19 = vpop.f32.mrb[10].mxu0 }
 0x459   :  { %v1713_v20 = vpop.f32.mrb[11].mxu0  ;;  %v1885_v52 = vmul.f32 %v4094_v19, %v4094_v19 }
 0x45a   :  { %4113 = vmatprep.mubr.msk.f32.mxu1 %vm1640_vm7, %v1713_v20  ;;  %v1884_v55 = vmul.f32 %v1713_v20, %v1713_v20  ;;  %v4466_v20 = vld [vmem:[%s5625_s14 + $0x40] sm:$0xff]  }
 0x45b   :  { %4114 = vmatmul.mubr.msk.f32.vlgmr.msra.gmra.mrb[2].mxu1 %vm1640_vm7, %v4094_v19  ;;  %v4463_v19 = vld [vmem:[%s5624_s10 + $0xf0] ss:$8 sps:$4 sm:$0xff]  }
 0x45c   :  { %v4101_v21 = vpop.f32.mrb[16].mxu0  ;;  %4239 = vmatpush3.bf16.msra.mxu1 %v5162_v25 }
 0x45d   :  { %v1887_v53 = vmul.f32 %v4101_v21, %v4101_v21  ;;  %v1794_v54 = vpop.f32.mrb[17].mxu0  ;;  %3942 = vmatprep.subr.bf16.mxu1 %v4466_v20  ;;  %v304_v20 = vld [vmem:[%s5628_s20 + $0x8] sm:$0xff] }
 0x45e   :  { %v1886_v56 = vmul.f32 %v1794_v54, %v1794_v54  ;;  %4120 = vmatprep.mubr.msk.f32.mxu1 %vm1640_vm7, %v1794_v54  ;;  %v4472_v54 = vld [vmem:[%s5625_s14 + $0x58] sm:$0xff]  }
 0x45f   :  { %v1889_v57 = vadd.f32 %v1887_v53, %v1885_v52  ;;  %4121 = vmatmul.mubr.msk.f32.vlgmr.msra.gmra.mrb[8].mxu1 %vm1640_vm7, %v4101_v21  ;;  %v4467_v21 = vld [vmem:[%s5625_s14] sm:$0xff]   ;;  %v4470_v52 = vld [vmem:[%s5625_s14 + $0x50] sm:$0xff]  }
 0x460   :  { %v1888_v58 = vadd.f32 %v1886_v56, %v1884_v55  ;;  %v5197_v59 = vpop.f32.mrb[18].mxu0  ;;  %3943 = vmatpush3.bf16.msra.mxu1 %v4467_v21  ;;  %v4471_v53 = vld [vmem:[%s5625_s14 + $0x10] sm:$0xff]   ;;  %v4473_v55 = vld [vmem:[%s5625_s14 + $0x18] sm:$0xff]   ;;  %v4474_v56 = vld [vmem:[%s5625_s14 + $0x60] sm:$0xff]  }
 0x461   :  { %v1891_v60 = vmul.f32 %v5197_v59, %v5197_v59  ;;  %v5201_v61 = vpop.f32.mrb[19].mxu0 }
 0x462   :  { %v1890_v0 = vmul.f32 %v5201_v61, %v5201_v61 }
 0x463   :  { %v1893_v1 = vadd.f32 %v1891_v60, %v1889_v57  ;;  %v4475_v57 = vld [vmem:[%s5625_s14 + $0x20] sm:$0xff]   ;;  %v4478_v60 = vld [vmem:[%s5625_s14 + $0x70] sm:$0xff]  }
 0x464   :  { %v1892_v2 = vadd.f32 %v1890_v0, %v1888_v58  ;;  %v4476_v58 = vld [vmem:[%s5625_s14 + $0x68] sm:$0xff]   ;;  %v4480_v0 = vld [vmem:[%s5625_s14 + $0x78] sm:$0xff]  }
 0x465   :  { %v1895_v3 = vmax.f32 %v1893_v1, 1e-08  ;;  %v4481_v1 = vld [vmem:[%s5625_s14 + $0x38] sm:$0xff]  }
 0x466   :  { %v1894_v4 = vmax.f32 %v1892_v2, 1e-08 }
 0x467   :  { %4577 = vrsqrt.f32 %v1895_v3  ;;  %vm1905_vm8 = vcmp.eq.f32.partialorder %v1895_v3, inf  ;;  %v1908_v9 = vand.u32 2147483648, %v1895_v3  ;;  %vm1907_vm10 = vcmp.eq.f32.partialorder %v1895_v3, 0.0 }
 0x468   :  { %4579 = vrsqrt.f32 %v1894_v4  ;;  %vm1898_vm9 = vcmp.eq.f32.partialorder %v1894_v4, inf  ;;  %v1901_v10 = vand.u32 2147483648, %v1894_v4  ;;  %vm1900_vm11 = vcmp.eq.f32.partialorder %v1894_v4, 0.0 }
 0x471   :  { %v4578_v5 = vpop.eup %4577 }
 0x472   :  { %v4580_v6 = vpop.eup %4579  ;;  %v1904_v7 = vmul.f32 %v4578_v5, %v1895_v3 }
 0x473   :  { %v1897_v8 = vmul.f32 %v4580_v6, %v1894_v4  ;;  %v230_v6 = vld [vmem:[%s5626_s12] sm:$0x3] }
 0x474   :  { %v1906_v11 = vsel %vm1905_vm8, %v1895_v3, %v1904_v7  ;;  %v2176_v7 = vrot.slane %v230_v6, %v5137_v41 }
 0x475   :  { %v1899_v12 = vsel %vm1898_vm9, %v1894_v4, %v1897_v8  ;;  %v1909_v13 = vsel %vm1907_vm10, %v1908_v9, %v1906_v11  ;;  %v2180_v8 = vrot.slane %v230_v6, %v5142_v43 }
 0x476   :  { %v1902_v15 = vsel %vm1900_vm11, %v1901_v10, %v1899_v12 }
 0x477   :  { %v1912_v22 = vpack.c.bf16 %v1909_v13, %v1902_v15 }
 0x479   :  { %3722 = vmatmul.mubr.msk.bf16.vlgmr.msra.gmra.mrb[20].mxu0 %vm1640_vm7, %v1912_v22 }
 0x47a   :  { %2130 = vmatpush1.bf16.msra.mxu0 %v4418_v14  ;;  %2161 = vmatprep.mubr.bf16.mxu0 %v5148_v63  ;;  %v4427_v63 = vld [vmem:[%s5624_s10 + $0x30] ss:$8 sps:$4 sm:$0xff]  }
 0x47b   :  { %2131 = vmatprep.subr.bf16.mxu0 %v4423_v23 }
 0x47e   :  { %2132 = vmatpush1.bf16.msra.mxu0 %v4421_v24 }
 0x47f   :  { %2133 = vmatprep.subr.bf16.mxu0 %v4426_v26 }
 0x482   :  { %2134 = vmatpush1.bf16.msra.mxu0 %v4424_v28 }
 0x483   :  { %2135 = vmatprep.subr.bf16.mxu0 %v4429_v29 }
 0x486   :  { %2136 = vmatpush1.bf16.msra.mxu0 %v4427_v63 }
 0x487   :  { %2137 = vmatprep.subr.bf16.mxu0 %v4432_v30 }
 0x48a   :  { %2138 = vmatpush1.bf16.msra.mxu0 %v4430_v31 }
 0x48b   :  { %2139 = vmatprep.subr.bf16.mxu0 %v4435_v32 }
 0x48e   :  { %2140 = vmatpush1.bf16.msra.mxu0 %v4433_v33 }
 0x48f   :  { %2141 = vmatprep.subr.bf16.mxu0 %v4438_v34 }
 0x492   :  { %2142 = vmatpush1.bf16.msra.mxu0 %v4436_v35 }
 0x493   :  { %2143 = vmatprep.subr.bf16.mxu0 %v4441_v36 }
 0x496   :  { %2144 = vmatpush1.bf16.msra.mxu0 %v4439_v37 }
 0x497   :  { %2145 = vmatprep.subr.bf16.mxu0 %v4444_v38 }
 0x49a   :  { %2146 = vmatpush1.bf16.msra.mxu0 %v4442_v39 }
 0x49b   :  { %2147 = vmatprep.subr.bf16.mxu0 %v4447_v40 }
 0x49e   :  { %2148 = vmatpush1.bf16.msra.mxu0 %v4445_v42 }
 0x49f   :  { %2149 = vmatprep.subr.bf16.mxu0 %v4450_v44 }
 0x4a2   :  { %2150 = vmatpush1.bf16.msra.mxu0 %v4448_v45 }
 0x4a3   :  { %2151 = vmatprep.subr.bf16.mxu0 %v4453_v46 }
 0x4a6   :  { %2152 = vmatpush1.bf16.msra.mxu0 %v4451_v47 }
 0x4a7   :  { %2153 = vmatprep.subr.bf16.mxu0 %v4456_v48 }
 0x4aa   :  { %2154 = vmatpush1.bf16.msra.mxu0 %v4454_v49 }
 0x4ab   :  { %2155 = vmatprep.subr.bf16.mxu0 %v4459_v50 }
 0x4ae   :  { %2156 = vmatpush1.bf16.msra.mxu0 %v4457_v51 }
 0x4af   :  { %2157 = vmatprep.subr.bf16.mxu0 %v4462_v16  ;;  %v266_v16 = vld [vmem:[%s5627_s16] sm:$0xff] }
 0x4b2   :  { %2158 = vmatpush1.bf16.msra.mxu0 %v4460_v17  ;;  %v267_v17 = vld [vmem:[%s5627_s16 + $0x8] sm:$0xff] }
 0x4b3   :  { %2159 = vmatprep.subr.bf16.mxu0 %v4465_v18  ;;  %v4244_v18 = vpack.c.bf16 %v267_v17, %v266_v16 }
 0x4b6   :  { %2160 = vmatpush1.bf16.msra.mxu0 %v4463_v19  ;;  %v303_v19 = vld [vmem:[%s5628_s20] sm:$0xff] }
 0x4b7   :  { %4241 = vmatprep.subr.bf16.mxu0 %v5162_v25  ;;  %v5386_v21 = vpack.c.bf16 %v304_v20, %v303_v19  ;;  %v4488_v19 = vld [vmem:[%s5631_s17 + $0x10] ss:$8 sps:$4 sm:$0xff]   ;;  %v4493_v20 = vld [vmem:[%s5631_s17 + $0x24] ss:$8 sps:$4 sm:$0xff]  }
 0x4b9   :  { %2162 = vmatmul.mubr.bf16.vlgmr.msra.gmra.mrb[20].mxu0 %v5146_v62  ;;  %v4468_v62 = vld [vmem:[%s5625_s14 + $0x48] sm:$0xff]  }
 0x4ba   :  { %4127 = vmatprep.mubr.msk.f32.mxu0 %vm1640_vm7, %v5201_v61  ;;  %4243 = vmatpush3.bf16.msra.mxu0 %v5162_v25  ;;  %v4469_v25 = vld [vmem:[%s5625_s14 + $0x8] sm:$0xff]   ;;  %v4479_v61 = vld [vmem:[%s5625_s14 + $0x30] sm:$0xff]  }
 0x4bb   :  { %3944 = vmatprep.subr.bf16.mxu1 %v4468_v62  ;;  %4245 = vmatprep.subr.bf16.mxu0 %v4244_v18 }
 0x4bc   :  { %3945 = vmatpush3.bf16.msra.mxu1 %v4469_v25  ;;  %v3765_v25 = vld [vmem:[%s5629_s15] ss:$0 sm:$0xff] }
 0x4bd   :  { %3946 = vmatprep.subr.bf16.mxu1 %v4470_v52 }
 0x4c0   :  { %3947 = vmatpush3.bf16.msra.mxu1 %v4471_v53 }
 0x4c1   :  { %4128 = vmatmul.mubr.msk.f32.vlgmr.msra.gmra.mrb[24].mxu0 %vm1640_vm7, %v5197_v59  ;;  %3948 = vmatprep.subr.bf16.mxu1 %v4472_v54  ;;  %v4477_v59 = vld [vmem:[%s5625_s14 + $0x28] sm:$0xff]  }
 0x4c2   :  { %4247 = vmatpush3.bf16.msra.mxu0 %v4244_v18 }
 0x4c3   :  { %4249 = vmatprep.subr.bf16.mxu0 %v4244_v18 }
 0x4c4   :  { %3949 = vmatpush3.bf16.msra.mxu1 %v4473_v55 }
 0x4c5   :  { %3950 = vmatprep.subr.bf16.mxu1 %v4474_v56 }
 0x4c8   :  { %3951 = vmatpush3.bf16.msra.mxu1 %v4475_v57 }
 0x4c9   :  { %3952 = vmatprep.subr.bf16.mxu1 %v4476_v58 }
 0x4cc   :  { %3953 = vmatpush3.bf16.msra.mxu1 %v4477_v59 }
 0x4cd   :  { %3954 = vmatprep.subr.bf16.mxu1 %v4478_v60 }
 0x4d0   :  { %3955 = vmatpush3.bf16.msra.mxu1 %v4479_v61 }
 0x4d1   :  { %3956 = vmatprep.subr.bf16.mxu1 %v4480_v0 }
 0x4d4   :  { %3957 = vmatpush3.bf16.msra.mxu1 %v4481_v1 }
 0x4d5   :  { %4257 = vmatprep.subr.bf16.mxu1 %v5386_v21 }
 0x52e   :  { %v5355_v2 = vpop.f32.mrb[2].mxu1 }
 0x52f   :  { %v5357_v3 = vpop.f32.mrb[3].mxu1 }
 0x532   :  { %v5359_v4 = vpop.f32.mrb[8].mxu1 }
 0x533   :  { %v5361_v5 = vpop.f32.mrb[9].mxu1 }
 0x58c   :  { %v2163_v9 = vpop.f32.mrb[20].mxu0 }
 0x58d   :  { %v2183_v10 = vadd.f32 %v2176_v7, %v2163_v9  ;;  %v2165_v11 = vpop.f32.mrb[21].mxu0 }
 0x58e   :  { %v2184_v12 = vadd.f32 %v2180_v8, %v2165_v11  ;;  %v2167_v13 = vpop.f32.mrb[22].mxu0 }
 0x58f   :  { %v3761_v14 = vmul.f32 -1.442695, %v2183_v10  ;;  %v2185_v15 = vadd.f32 %v2176_v7, %v2167_v13  ;;  %v2169_v22 = vpop.f32.mrb[23].mxu0  ;;  %v2617_v26 = vmax.f32 %v2183_v10, 0.0 }
 0x590   :  { %v3762_v23 = vmul.f32 -1.442695, %v2184_v12  ;;  %v2186_v24 = vadd.f32 %v2180_v8, %v2169_v22  ;;  %v2618_v63 = vmax.f32 %v2184_v12, 0.0 }
 0x591   :  { %4581 = vpow2.f32 %v3761_v14  ;;  %v3763_v28 = vmul.f32 -1.442695, %v2185_v15  ;;  %v2619_v29 = vmax.f32 %v2185_v15, 0.0 }
 0x592   :  { %4583 = vpow2.f32 %v3762_v23  ;;  %v3764_v30 = vmul.f32 -1.442695, %v2186_v24  ;;  %v2620_v31 = vmax.f32 %v2186_v24, 0.0 }
 0x593   :  { %4585 = vpow2.f32 %v3763_v28  ;;  %v5368_v32 = vpack.c.bf16 %v2619_v29, %v2617_v26 }
 0x594   :  { %4587 = vpow2.f32 %v3764_v30  ;;  %v5370_v33 = vpop.f32.mrb[24].mxu0  ;;  %v5372_v34 = vpack.c.bf16 %v2620_v31, %v2618_v63 }
 0x595   :  { %v2421_v35 = vpop.f32.mrb[25].mxu0 }
 0x59b   :  { %v4582_v36 = vpop.eup %4581 }
 0x59c   :  { %v4584_v37 = vpop.eup %4583  ;;  %v2442_v38 = vadd.f32 1.0, %v4582_v36 }
 0x59d   :  { %v4586_v39 = vpop.eup %4585  ;;  %v2443_v40 = vadd.f32 1.0, %v4584_v37 }
 0x59e   :  { %v4588_v42 = vpop.eup %4587  ;;  %4589 = vrcp.f32 %v2442_v38  ;;  %v2444_v44 = vadd.f32 1.0, %v4586_v39 }
 0x59f   :  { %4591 = vrcp.f32 %v2443_v40  ;;  %v2445_v45 = vadd.f32 1.0, %v4588_v42 }
 0x5a0   :  { %4593 = vrcp.f32 %v2444_v44 }
 0x5a1   :  { %4595 = vrcp.f32 %v2445_v45 }
 0x5a8   :  { %v4590_v46 = vpop.eup %4589 }
 0x5a9   :  { %v4592_v47 = vpop.eup %4591 }
 0x5aa   :  { %v4594_v48 = vpop.eup %4593 }
 0x5ab   :  { %v4596_v49 = vpop.eup %4595  ;;  %v2454_v50 = vpack.c.bf16 %v4594_v48, %v4590_v46 }
 0x5ac   :  { %v2455_v51 = vpack.c.bf16 %v4596_v49, %v4592_v47 }
 0x5ae   :  { %2590 = vmatprep.mubr.bf16.mxu1 %v2455_v51  ;;  %v4485_v51 = vld [vmem:[%s5631_s17] ss:$8 sps:$4 sm:$0xff]  }
 0x5af   :  { %2591 = vmatmul.mubr.bf16.vlgmr.msra.gmra.mrb[12].mxu1 %v2454_v50 }
 0x5b0   :  { %4259 = vmatpush3.bf16.msra.mxu1 %v5386_v21 }
 0x5b1   :  { %4261 = vmatprep.subr.bf16.mxu1 %v5386_v21 }
 0x682   :  { %v3958_v62 = vpop.f32.mrb[12].mxu1 }
 0x683   :  { %v3959_v52 = vpop.f32.mrb[13].mxu1 }
 0x684   :  { %v3960_v53 = vadd.f32 %v3959_v52, %v3958_v62  ;;  %v3961_v54 = vpop.f32.mrb[14].mxu1  ;;  %v4496_v62 = vld [vmem:[%s5631_s17 + $0x34] ss:$8 sps:$4 sm:$0xff]   ;;  %v4497_v52 = vld [vmem:[%s5631_s17 + $0x40] ss:$8 sps:$4 sm:$0xff]  }
 0x685   :  { %v3962_v55 = vpop.f32.mrb[15].mxu1 }
 0x686   :  { %v2593_v56 = vadd.f32 %v3960_v53, %v3765_v25  ;;  %v3963_v57 = vadd.f32 %v3962_v55, %v3961_v54  ;;  %v4502_v53 = vld [vmem:[%s5631_s17 + $0x54] ss:$8 sps:$4 sm:$0xff]   ;;  %v4500_v54 = vld [vmem:[%s5631_s17 + $0x50] ss:$8 sps:$4 sm:$0xff]   ;;  %v4505_v55 = vld [vmem:[%s5631_s17 + $0x64] ss:$8 sps:$4 sm:$0xff]  }
 0x688   :  { %v3782_v58 = vmul.f32 -1.442695, %v2593_v56  ;;  %v2596_v59 = vadd.f32 %v3963_v57, %v3765_v25  ;;  %v4499_v25 = vld [vmem:[%s5631_s17 + $0x44] ss:$8 sps:$4 sm:$0xff]   ;;  %v4503_v56 = vld [vmem:[%s5631_s17 + $0x60] ss:$8 sps:$4 sm:$0xff]  }
 0x689   :  { %v4508_v57 = vld [vmem:[%s5631_s17 + $0x74] ss:$8 sps:$4 sm:$0xff]  }
 0x68a   :  { %4597 = vpow2.f32 %v3782_v58  ;;  %v3783_v60 = vmul.f32 -1.442695, %v2596_v59  ;;  %v4506_v58 = vld [vmem:[%s5631_s17 + $0x70] ss:$8 sps:$4 sm:$0xff]   ;;  %v4511_v59 = vld [vmem:[%s5631_s17 + $0x84] ss:$8 sps:$4 sm:$0xff]  }
 0x68c   :  { %4599 = vpow2.f32 %v3783_v60  ;;  %v4509_v60 = vld [vmem:[%s5631_s17 + $0x80] ss:$8 sps:$4 sm:$0xff]  }
 0x694   :  { %v4598_v61 = vpop.eup %4597 }
 0x695   :  { %v2605_v0 = vadd.f32 1.0, %v4598_v61  ;;  %v4514_v61 = vld [vmem:[%s5631_s17 + $0x94] ss:$8 sps:$4 sm:$0xff]  }
 0x696   :  { %v4600_v1 = vpop.eup %4599 }
 0x697   :  { %4601 = vrcp.f32 %v2605_v0  ;;  %v2606_v6 = vadd.f32 1.0, %v4600_v1  ;;  %v4512_v0 = vld [vmem:[%s5631_s17 + $0x90] ss:$8 sps:$4 sm:$0xff]   ;;  %v4517_v1 = vld [vmem:[%s5631_s17 + $0xa4] ss:$8 sps:$4 sm:$0xff]  }
 0x699   :  { %4603 = vrcp.f32 %v2606_v6  ;;  %v4515_v6 = vld [vmem:[%s5631_s17 + $0xa0] ss:$8 sps:$4 sm:$0xff]  }
 0x6a1   :  { %v4602_v7 = vpop.eup %4601 }
 0x6a2   :  { %v2611_v8 = vmul.f32 %v4602_v7, %v5357_v3  ;;  %v2613_v9 = vmul.f32 %v4602_v7, %v5361_v5  ;;  %v2615_v10 = vmul.f32 %v4602_v7, %v2421_v35  ;;  %v4484_v3 = vld [vmem:[%s5630_s18 + $0x4] ss:$8 sps:$4 sm:$0xff]   ;;  %v4520_v7 = vld [vmem:[%s5631_s17 + $0xb4] ss:$8 sps:$4 sm:$0xff]  }
 0x6a3   :  { %v4604_v11 = vpop.eup %4603 }
 0x6a4   :  { %4134 = vmatprep.mubr.msk.f32.mxu0 %vm1640_vm7, %v2611_v8  ;;  %v2612_v12 = vmul.f32 %v4604_v11, %v5355_v2  ;;  %v2614_v13 = vmul.f32 %v4604_v11, %v5359_v4  ;;  %v2616_v14 = vmul.f32 %v4604_v11, %v5370_v33  ;;  %v4482_v2 = vld [vmem:[%s5630_s18] ss:$8 sps:$4 sm:$0xff]   ;;  %v4487_v4 = vld [vmem:[%s5631_s17 + $0x4] ss:$8 sps:$4 sm:$0xff]   ;;  %v4518_v8 = vld [vmem:[%s5631_s17 + $0xb0] ss:$8 sps:$4 sm:$0xff]  }
 0x6a5   :  { %v4526_v11 = vld [vmem:[%s5631_s17 + $0xd4] ss:$8 sps:$4 sm:$0xff]  }
 0x6a6   :  { %4135 = vmatmul.mubr.msk.f32.vlgmr.msra.gmra.mrb[26].mxu0 %vm1640_vm7, %v2612_v12  ;;  %v4524_v12 = vld [vmem:[%s5631_s17 + $0xd0] ss:$8 sps:$4 sm:$0xff]  }
 0x6a7   :  { %4251 = vmatpush3.bf16.msra.mxu0 %v4244_v18  ;;  %4141 = vmatprep.mubr.msk.f32.mxu0 %vm1640_vm7, %v2613_v9  ;;  %v4523_v9 = vld [vmem:[%s5631_s17 + $0xc4] ss:$8 sps:$4 sm:$0xff]  }
 0x6a8   :  { %4253 = vmatprep.subr.bf16.mxu0 %v4244_v18 }
 0x6aa   :  { %4142 = vmatmul.mubr.msk.f32.vlgmr.msra.gmra.mrb[28].mxu0 %vm1640_vm7, %v2614_v13  ;;  %v4529_v13 = vld [vmem:[%s5631_s17 + $0xe4] ss:$8 sps:$4 sm:$0xff]  }
 0x6ab   :  { %4255 = vmatpush3.bf16.msra.mxu0 %v4244_v18  ;;  %4148 = vmatprep.mubr.msk.f32.mxu0 %vm1640_vm7, %v2615_v10  ;;  %v4490_v18 = vld [vmem:[%s5631_s17 + $0x14] ss:$8 sps:$4 sm:$0xff]   ;;  %v4521_v10 = vld [vmem:[%s5631_s17 + $0xc0] ss:$8 sps:$4 sm:$0xff]  }
 0x6ac   :  { %2906 = vmatprep.subr.bf16.mxu0 %v4484_v3  ;;  %v4530_v3 = vld [vmem:[%s5631_s17 + $0xf0] ss:$8 sps:$4 sm:$0xff]  }
 0x6ae   :  { %4149 = vmatmul.mubr.msk.f32.vlgmr.msra.gmra.mrb[30].mxu0 %vm1640_vm7, %v2616_v14  ;;  %v4527_v14 = vld [vmem:[%s5631_s17 + $0xe0] ss:$8 sps:$4 sm:$0xff]  }
 0x6af   :  { %2938 = vmatprep.mubr.bf16.mxu0 %v4617_v27  ;;  %2907 = vmatpush1.bf16.msra.mxu0 %v4482_v2  ;;  %v4532_v2 = vld [vmem:[%s5631_s17 + $0xf4] ss:$8 sps:$4 sm:$0xff]  }
 0x6b0   :  { %3109 = vmatprep.subr.bf16.mxu0 %v4487_v4  ;;  %v4533_v4 = vld [vmem:[%s5632_s21 + $0x40] sm:$0xff]  }
 0x779   :  { %v4136_v5 = vpop.f32.mrb[26].mxu0 }
 0x77a   :  { %v2693_v15 = vpop.f32.mrb[27].mxu0  ;;  %v2865_v22 = vmul.f32 %v4136_v5, %v4136_v5 }
 0x77b   :  { %4155 = vmatprep.mubr.msk.f32.mxu1 %vm1640_vm7, %v2693_v15  ;;  %v2864_v26 = vmul.f32 %v2693_v15, %v2693_v15  ;;  %v4535_v15 = vld [vmem:[%s5632_s21 + $0x48] sm:$0xff]  }
 0x77c   :  { %4156 = vmatmul.mubr.msk.f32.vlgmr.msra.gmra.mrb[10].mxu1 %vm1640_vm7, %v4136_v5  ;;  %v4534_v5 = vld [vmem:[%s5632_s21] sm:$0xff]  }
 0x77d   :  { %v4143_v27 = vpop.f32.mrb[28].mxu0  ;;  %4263 = vmatpush3.bf16.msra.mxu1 %v5386_v21 }
 0x77e   :  { %v2867_v23 = vmul.f32 %v4143_v27, %v4143_v27  ;;  %v2774_v24 = vpop.f32.mrb[29].mxu0  ;;  %4265 = vmatprep.subr.bf16.mxu1 %v5386_v21 }
 0x77f   :  { %v2866_v28 = vmul.f32 %v2774_v24, %v2774_v24  ;;  %4162 = vmatprep.mubr.msk.f32.mxu1 %vm1640_vm7, %v2774_v24  ;;  %v4540_v24 = vld [vmem:[%s5632_s21 + $0x18] sm:$0xff]  }
 0x780   :  { %v2869_v29 = vadd.f32 %v2867_v23, %v2865_v22  ;;  %4163 = vmatmul.mubr.msk.f32.vlgmr.msra.gmra.mrb[16].mxu1 %vm1640_vm7, %v4143_v27  ;;  %v4536_v27 = vld [vmem:[%s5632_s21 + $0x8] sm:$0xff]   ;;  %v4537_v22 = vld [vmem:[%s5632_s21 + $0x50] sm:$0xff]   ;;  %v4539_v23 = vld [vmem:[%s5632_s21 + $0x58] sm:$0xff]  }
 0x781   :  { %v2868_v63 = vadd.f32 %v2866_v28, %v2864_v26  ;;  %v4150_v30 = vpop.f32.mrb[30].mxu0  ;;  %4267 = vmatpush3.bf16.msra.mxu1 %v5386_v21  ;;  %v4491_v21 = vld [vmem:[%s5631_s17 + $0x20] ss:$8 sps:$4 sm:$0xff]  }
 0x782   :  { %v2871_v31 = vmul.f32 %v4150_v30, %v4150_v30  ;;  %v2855_v33 = vpop.f32.mrb[31].mxu0  ;;  %3988 = vmatprep.subr.bf16.mxu1 %v4533_v4  ;;  %v4541_v26 = vld [vmem:[%s5632_s21 + $0x60] sm:$0xff]  }
 0x783   :  { %v2870_v35 = vmul.f32 %v2855_v33, %v2855_v33  ;;  %4169 = vmatprep.mubr.msk.f32.mxu1 %vm1640_vm7, %v2855_v33  ;;  %v4542_v28 = vld [vmem:[%s5632_s21 + $0x20] sm:$0xff]   ;;  %v4547_v33 = vld [vmem:[%s5632_s21 + $0x78] sm:$0xff]  }
 0x784   :  { %v2873_v36 = vadd.f32 %v2871_v31, %v2869_v29  ;;  %4170 = vmatmul.mubr.msk.f32.vlgmr.msra.gmra.mrb[18].mxu1 %vm1640_vm7, %v4150_v30  ;;  %v4543_v29 = vld [vmem:[%s5632_s21 + $0x68] sm:$0xff]   ;;  %v4545_v30 = vld [vmem:[%s5632_s21 + $0x70] sm:$0xff]  }
 0x785   :  { %v2872_v37 = vadd.f32 %v2870_v35, %v2868_v63  ;;  %3989 = vmatpush3.bf16.msra.mxu1 %v4534_v5  ;;  %v4544_v63 = vld [vmem:[%s5632_s21 + $0x28] sm:$0xff]   ;;  %v4546_v31 = vld [vmem:[%s5632_s21 + $0x30] sm:$0xff]   ;;  %v4548_v35 = vld [vmem:[%s5632_s21 + $0x38] sm:$0xff]  }
 0x786   :  { %v2875_v38 = vmax.f32 %v2873_v36, 1e-08  ;;  %3990 = vmatprep.subr.bf16.mxu1 %v4535_v15 }
 0x787   :  { %v2874_v39 = vmax.f32 %v2872_v37, 1e-08 }
 0x788   :  { %4605 = vrsqrt.f32 %v2875_v38  ;;  %vm2885_vm12 = vcmp.eq.f32.partialorder %v2875_v38, inf  ;;  %v2888_v46 = vand.u32 2147483648, %v2875_v38  ;;  %vm2887_vm14 = vcmp.eq.f32.partialorder %v2875_v38, 0.0 }
 0x789   :  { %4607 = vrsqrt.f32 %v2874_v39  ;;  %vm2878_vm13 = vcmp.eq.f32.partialorder %v2874_v39, inf  ;;  %v2881_v47 = vand.u32 2147483648, %v2874_v39  ;;  %vm2880_vm15 = vcmp.eq.f32.partialorder %v2874_v39, 0.0  ;;  %3991 = vmatpush3.bf16.msra.mxu1 %v4536_v27 }
 0x78a   :  { %3992 = vmatprep.subr.bf16.mxu1 %v4537_v22 }
 0x792   :  { %v4606_v40 = vpop.eup %4605 }
 0x793   :  { %v4608_v42 = vpop.eup %4607  ;;  %v2884_v44 = vmul.f32 %v4606_v40, %v2875_v38 }
 0x794   :  { %v2877_v45 = vmul.f32 %v4608_v42, %v2874_v39 }
 0x795   :  { %v2886_v48 = vsel %vm2885_vm12, %v2875_v38, %v2884_v44  ;;  %v302_v44 = vld [vmem:[%s5633_s19] sm:$0x3] }
 0x796   :  { %v2879_v49 = vsel %vm2878_vm13, %v2874_v39, %v2877_v45  ;;  %v2889_v50 = vsel %vm2887_vm14, %v2888_v46, %v2886_v48  ;;  %v3156_v45 = vrot.slane %v302_v44, %v5137_v41  ;;  %v3160_v46 = vrot.slane %v302_v44, %v5142_v43 }
 0x797   :  { %v2882_v16 = vsel %vm2880_vm15, %v2881_v47, %v2879_v49 }
 0x798   :  { %v2892_v17 = vpack.c.bf16 %v2889_v50, %v2882_v16 }
 0x79a   :  { %3792 = vmatmul.mubr.msk.bf16.vlgmr.msra.gmra.mrb[32].mxu0 %vm1640_vm7, %v2892_v17 }
 0x79b   :  { %3110 = vmatpush1.bf16.msra.mxu0 %v4485_v51  ;;  %3141 = vmatprep.mubr.bf16.mxu0 %v5372_v34  ;;  %v4494_v34 = vld [vmem:[%s5631_s17 + $0x30] ss:$8 sps:$4 sm:$0xff]  }
 0x79c   :  { %3111 = vmatprep.subr.bf16.mxu0 %v4490_v18 }
 0x79f   :  { %3112 = vmatpush1.bf16.msra.mxu0 %v4488_v19 }
 0x7a0   :  { %3113 = vmatprep.subr.bf16.mxu0 %v4493_v20  ;;  %v3831_v20 = vld [vmem:[%s5635_s22] ss:$0 sm:$0xff] }
 0x7a3   :  { %3114 = vmatpush1.bf16.msra.mxu0 %v4491_v21 }
 0x7a4   :  { %3115 = vmatprep.subr.bf16.mxu0 %v4496_v62 }
 0x7a7   :  { %3116 = vmatpush1.bf16.msra.mxu0 %v4494_v34 }
 0x7a8   :  { %3117 = vmatprep.subr.bf16.mxu0 %v4499_v25 }
 0x7ab   :  { %3118 = vmatpush1.bf16.msra.mxu0 %v4497_v52 }
 0x7ac   :  { %3119 = vmatprep.subr.bf16.mxu0 %v4502_v53 }
 0x7af   :  { %3120 = vmatpush1.bf16.msra.mxu0 %v4500_v54 }
 0x7b0   :  { %3121 = vmatprep.subr.bf16.mxu0 %v4505_v55 }
 0x7b3   :  { %3122 = vmatpush1.bf16.msra.mxu0 %v4503_v56 }
 0x7b4   :  { %3123 = vmatprep.subr.bf16.mxu0 %v4508_v57 }
 0x7b7   :  { %3124 = vmatpush1.bf16.msra.mxu0 %v4506_v58 }
 0x7b8   :  { %3125 = vmatprep.subr.bf16.mxu0 %v4511_v59 }
 0x7bb   :  { %3126 = vmatpush1.bf16.msra.mxu0 %v4509_v60 }
 0x7bc   :  { %3127 = vmatprep.subr.bf16.mxu0 %v4514_v61 }
 0x7bf   :  { %3128 = vmatpush1.bf16.msra.mxu0 %v4512_v0 }
 0x7c0   :  { %3129 = vmatprep.subr.bf16.mxu0 %v4517_v1 }
 0x7c3   :  { %3130 = vmatpush1.bf16.msra.mxu0 %v4515_v6 }
 0x7c4   :  { %3131 = vmatprep.subr.bf16.mxu0 %v4520_v7 }
 0x7c7   :  { %3132 = vmatpush1.bf16.msra.mxu0 %v4518_v8 }
 0x7c8   :  { %3133 = vmatprep.subr.bf16.mxu0 %v4523_v9 }
 0x7cb   :  { %3134 = vmatpush1.bf16.msra.mxu0 %v4521_v10 }
 0x7cc   :  { %3135 = vmatprep.subr.bf16.mxu0 %v4526_v11 }
 0x7cf   :  { %3136 = vmatpush1.bf16.msra.mxu0 %v4524_v12 }
 0x7d0   :  { %3137 = vmatprep.subr.bf16.mxu0 %v4529_v13 }
 0x7d3   :  { %3138 = vmatpush1.bf16.msra.mxu0 %v4527_v14 }
 0x7d4   :  { %3139 = vmatprep.subr.bf16.mxu0 %v4532_v2 }
 0x7d7   :  { %3140 = vmatpush1.bf16.msra.mxu0 %v4530_v3 }
 0x7da   :  { %3142 = vmatmul.mubr.bf16.vlgmr.msra.gmra.mrb[32].mxu0 %v5368_v32  ;;  %v4538_v32 = vld [vmem:[%s5632_s21 + $0x10] sm:$0xff]  }
 0x7db   :  { %3993 = vmatpush3.bf16.msra.mxu1 %v4538_v32 }
 0x7dc   :  { %3994 = vmatprep.subr.bf16.mxu1 %v4539_v23 }
 0x7df   :  { %3995 = vmatpush3.bf16.msra.mxu1 %v4540_v24 }
 0x7e0   :  { %3996 = vmatprep.subr.bf16.mxu1 %v4541_v26 }
 0x7e3   :  { %3997 = vmatpush3.bf16.msra.mxu1 %v4542_v28 }
 0x7e4   :  { %3998 = vmatprep.subr.bf16.mxu1 %v4543_v29 }
 0x7e7   :  { %3999 = vmatpush3.bf16.msra.mxu1 %v4544_v63 }
 0x7e8   :  { %4000 = vmatprep.subr.bf16.mxu1 %v4545_v30 }
 0x7eb   :  { %4001 = vmatpush3.bf16.msra.mxu1 %v4546_v31 }
 0x7ec   :  { %4002 = vmatprep.subr.bf16.mxu1 %v4547_v33 }
 0x7ef   :  { %4003 = vmatpush3.bf16.msra.mxu1 %v4548_v35 }
 0x84f   :  { %v4157_v36 = vpop.f32.mrb[10].mxu1 }
 0x850   :  { %v3239_v37 = vpop.f32.mrb[11].mxu1 }
 0x853   :  { %v4164_v38 = vpop.f32.mrb[16].mxu1 }
 0x854   :  { %v3320_v39 = vpop.f32.mrb[17].mxu1 }
 0x857   :  { %v4171_v40 = vpop.f32.mrb[18].mxu1 }
 0x858   :  { %v3401_v42 = vpop.f32.mrb[19].mxu1 }
 0x8ad   :  { %v3143_v47 = vpop.f32.mrb[32].mxu0 }
 0x8ae   :  { %v3163_v48 = vadd.f32 %v3156_v45, %v3143_v47  ;;  %v3145_v49 = vpop.f32.mrb[33].mxu0 }
 0x8af   :  { %v3164_v50 = vadd.f32 %v3160_v46, %v3145_v49  ;;  %v3147_v51 = vpop.f32.mrb[34].mxu0 }
 0x8b0   :  { %3573 = vst [vmem:[%s5634_s23] sm:$0xff] %v3163_v48  ;;  %v3165_v16 = vadd.f32 %v3156_v45, %v3147_v51  ;;  %v3149_v17 = vpop.f32.mrb[35].mxu0 }
 0x8b1   :  { %3574 = vst [vmem:[%s5634_s23 + $0x8] sm:$0xff] %v3164_v50  ;;  %v3166_v18 = vadd.f32 %v3160_v46, %v3149_v17 }
 0x8b2   :  { %v3410_v19 = vpack.c.bf16 %v3165_v16, %v3163_v48  ;;  %3575 = vst [vmem:[%s5634_s23 + $0x10] sm:$0xff] %v3165_v16 }
 0x8b3   :  { %v3411_v41 = vpack.c.bf16 %v3166_v18, %v3164_v50  ;;  %3576 = vst [vmem:[%s5634_s23 + $0x18] sm:$0xff] %v3166_v18 }
 0x8b5   :  { %3546 = vmatprep.mubr.bf16.mxu1 %v3411_v41 }
 0x8b6   :  { %3547 = vmatmul.mubr.bf16.vlgmr.msra.gmra.mrb[20].mxu1 %v3410_v19 }
 0x989   :  { %v4004_v43 = vpop.f32.mrb[20].mxu1 }
 0x98a   :  { %v4005_v21 = vpop.f32.mrb[21].mxu1 }
 0x98b   :  { %v4006_v62 = vadd.f32 %v4005_v21, %v4004_v43  ;;  %v4007_v34 = vpop.f32.mrb[22].mxu1 }
 0x98c   :  { %v4008_v25 = vpop.f32.mrb[23].mxu1 }
 0x98d   :  { %v3549_v52 = vadd.f32 %v4006_v62, %v3831_v20  ;;  %v4009_v53 = vadd.f32 %v4008_v25, %v4007_v34 }
 0x98f   :  { %v3848_v54 = vmul.f32 -1.442695, %v3549_v52  ;;  %v3552_v55 = vadd.f32 %v4009_v53, %v3831_v20 }
 0x991   :  { %4609 = vpow2.f32 %v3848_v54  ;;  %v3849_v56 = vmul.f32 -1.442695, %v3552_v55 }
 0x993   :  { %4611 = vpow2.f32 %v3849_v56 }
 0x99b   :  { %v4610_v57 = vpop.eup %4609 }
 0x99c   :  { %v3561_v58 = vadd.f32 1.0, %v4610_v57 }
 0x99d   :  { %v4612_v59 = vpop.eup %4611 }
 0x99e   :  { %4613 = vrcp.f32 %v3561_v58  ;;  %v3562_v60 = vadd.f32 1.0, %v4612_v59 }
 0x9a0   :  { %4615 = vrcp.f32 %v3562_v60 }
 0x9a8   :  { %v4614_v61 = vpop.eup %4613 }
 0x9a9   :  { %v3567_v0 = vmul.f32 %v4614_v61, %v3239_v37  ;;  %v3569_v1 = vmul.f32 %v4614_v61, %v3320_v39  ;;  %v3571_v6 = vmul.f32 %v4614_v61, %v3401_v42 }
 0x9aa   :  { %v4616_v7 = vpop.eup %4615 }
 0x9ab   :  { %3577 = vst.msk [vmem:[%s5636_s24] sm:$0xff] %vm1640_vm7, %v3567_v0  ;;  %3850 = vst.msk [vmem:[%s5636_s24 + $0x10] sm:$0xff] %vm1640_vm7, %v3569_v1  ;;  %v3568_v8 = vmul.f32 %v4616_v7, %v4157_v36  ;;  %v3570_v9 = vmul.f32 %v4616_v7, %v4164_v38  ;;  %v3572_v10 = vmul.f32 %v4616_v7, %v4171_v40 }
 0x9ac   :  { %3852 = vst.msk [vmem:[%s5636_s24 + $0x20] sm:$0xff] %vm1640_vm7, %v3571_v6 }
 0x9ad   :  { %3578 = vst.msk [vmem:[%s5636_s24 + $0x8] sm:$0xff] %vm1640_vm7, %v3568_v8  ;;  %3851 = vst.msk [vmem:[%s5636_s24 + $0x18] sm:$0xff] %vm1640_vm7, %v3570_v9 }
 0x9ae   :  { %3853 = vst.msk [vmem:[%s5636_s24 + $0x28] sm:$0xff] %vm1640_vm7, %v3572_v10 }

// kernel: ssemb_forward.14
= control target key start
LH: loop header
LB: loop body
LE: loop exit
PB: predicated region body
PF: predicated region fallthrough
CT: control target
= control target key end

     0   :  { %vm95_vm0 = vcmask 130048   ;;  %v64_v43 = vlaneseq  ;;  %s234_s0 = inlined_call_operand.vmem [shape: f32[8,256], index: 0, kind: input, shape index: {}]   ;;  %s235_s1 = inlined_call_operand.vmem [shape: f32[8,256], index: 1, kind: input, shape index: {}]   ;;  %s236_s2 = inlined_call_operand.vmem [shape: f32[3,8,16], index: 2, kind: input, shape index: {}]   ;;  %s237_s3 = inlined_call_operand.vmem [shape: f32[3,8,16], index: 3, kind: input, shape index: {}]   ;;  %s238_s7 = inlined_call_operand.vmem [shape: f32[3,8,16], index: 7, kind: output, shape index: {1}]   ;;  %s239_s4 = inlined_call_operand.vmem [shape: f32[1,256], index: 4, kind: input, shape index: {}]   ;;  %s240_s5 = inlined_call_operand.vmem [shape: f32[1,256], index: 5, kind: input, shape index: {}]   ;;  %s241_s6 = inlined_call_operand.vmem [shape: f32[8,256], index: 6, kind: output, shape index: {0}]  }
   0x1   :  { %v25_v0 = vld [vmem:[%s234_s0] sm:$0xff]  ;;  %v26_v1 = vld [vmem:[%s234_s0 + $0x8] sm:$0xff]  ;;  %v129_v11 = vld [vmem:[%s236_s2 + $0x10] sm:$0xff] }
   0x2   :  { %v27_v2 = vld [vmem:[%s235_s1] sm:$0xff]  ;;  %v28_v3 = vld [vmem:[%s235_s1 + $0x8] sm:$0xff]  ;;  %v130_v13 = vld [vmem:[%s237_s3 + $0x10] sm:$0xff]  ;;  %v65_v45 = vshrl.u32 %v64_v43, 7 }
   0x3   :  { %v29_v4 = vadd.f32 %v27_v2, %v25_v0  ;;  %v31_v5 = vld [vmem:[%s236_s2] sm:$0xff]  ;;  %v30_v7 = vadd.f32 %v28_v3, %v26_v1  ;;  %v127_v9 = vld [vmem:[%s236_s2 + $0x8] sm:$0xff]  ;;  %v43_v15 = vadd.f32 %v130_v13, %v129_v11 }
   0x4   :  { %v32_v6 = vld [vmem:[%s237_s3] sm:$0xff]  ;;  %v128_v10 = vld [vmem:[%s237_s3 + $0x8] sm:$0xff]  ;;  %v66_v46 = vsub.s32 0, %v65_v45  ;;  %v70_v47 = vsub.s32 1, %v65_v45 }
   0x5   :  { %v33_v8 = vadd.f32 %v32_v6, %v31_v5  ;;  %v38_v12 = vadd.f32 %v128_v10, %v127_v9  ;;  %v46_v14 = vadd.f32 %v30_v7, %v29_v4  ;;  %v92_v18 = vmul.f32 %v43_v15, %v43_v15  ;;  %v44_v48 = vld [vmem:[%s239_s4] sm:$0x3] }
   0x6   :  { %v45_v49 = vld [vmem:[%s240_s5] sm:$0x3]  ;;  %v67_v50 = vrot.slane %v44_v48, %v66_v46  ;;  %v71_v51 = vrot.slane %v44_v48, %v70_v47 }
   0x7   :  { %v89_v16 = vmul.f32 %v33_v8, %v33_v8  ;;  %v90_v17 = vmul.f32 %v38_v12, %v38_v12  ;;  %47 = vadd.xlane.f32.xlu0 %v46_v14  ;;  %v80_v53 = vrot.slane %v45_v49, %v66_v46  ;;  %v84_v54 = vrot.slane %v45_v49, %v70_v47 }
   0x9   :  { %v91_v19 = vadd.f32 %v90_v17, %v89_v16 }
   0xb   :  { %v93_v20 = vadd.f32 %v92_v18, %v91_v19 }
   0xd   :  { %v94_v21 = vmax.f32 %v93_v20, 1e-08 }
   0xf   :  { %v96_v22 = vsel %vm95_vm0, %v94_v21, 0.0 }
  0x10   :  { %97 = vadd.xlane.f32.xlu0 %v96_v22 }
  0x94   :  { %v48_v23 = vpop.xlane.xlu0 %47 }
  0x95   :  { %v50_v24 = vmul.f32 0.00390625, %v48_v23 }
  0x97   :  { %v51_v25 = vsub.f32 %v29_v4, %v50_v24  ;;  %v52_v26 = vsub.f32 %v30_v7, %v50_v24 }
  0x99   :  { %v53_v27 = vmul.f32 %v51_v25, %v51_v25  ;;  %v54_v28 = vmul.f32 %v52_v26, %v52_v26 }
  0x9b   :  { %v55_v29 = vadd.f32 %v54_v28, %v53_v27 }
  0x9d   :  { %v98_v30 = vpop.xlane.xlu0 %97  ;;  %56 = vadd.xlane.f32.xlu1 %v55_v29 }
  0x9e   :  { %v100_v31 = vmul.f32 0.0625, %v98_v30 }
  0xa0   :  { %133 = vrsqrt.f32 %v100_v31  ;;  %vm103_vm1 = vcmp.eq.f32.partialorder %v100_v31, inf  ;;  %v106_v33 = vand.u32 2147483648, %v100_v31  ;;  %vm105_vm2 = vcmp.eq.f32.partialorder %v100_v31, 0.0 }
  0xaa   :  { %v134_v32 = vpop.eup %133 }
  0xab   :  { %v102_v34 = vmul.f32 %v134_v32, %v100_v31 }
  0xad   :  { %v104_v35 = vsel %vm103_vm1, %v100_v31, %v102_v34 }
  0xae   :  { %v107_v36 = vsel %vm105_vm2, %v106_v33, %v104_v35 }
  0xaf   :  { %135 = vrcp.f32 %v107_v36 }
  0xb9   :  { %v136_v37 = vpop.eup %135 }
  0xba   :  { %v109_v38 = vmul.f32 %v136_v37, %v33_v8  ;;  %v110_v39 = vmul.f32 %v136_v37, %v38_v12  ;;  %v111_v40 = vmul.f32 %v136_v37, %v43_v15 }
  0xbc   :  { %114 = vst.msk [vmem:[%s238_s7] sm:$0xff] %vm95_vm0, %v109_v38  ;;  %131 = vst.msk [vmem:[%s238_s7 + $0x8] sm:$0xff] %vm95_vm0, %v110_v39 }
  0xbd   :  { %132 = vst.msk [vmem:[%s238_s7 + $0x10] sm:$0xff] %vm95_vm0, %v111_v40 }
 0x12a   :  { %v57_v41 = vpop.xlane.xlu1 %56 }
 0x12b   :  { %v58_v42 = vmul.f32 0.00390625, %v57_v41 }
 0x12d   :  { %v59_v44 = vadd.f32 1e-05, %v58_v42 }
 0x12f   :  { %137 = vrsqrt.f32 %v59_v44 }
 0x139   :  { %v138_v52 = vpop.eup %137 }
 0x13a   :  { %v61_v55 = vmul.f32 %v138_v52, %v51_v25  ;;  %v62_v56 = vmul.f32 %v138_v52, %v52_v26 }
 0x13c   :  { %v74_v57 = vmul.f32 %v67_v50, %v61_v55  ;;  %v75_v58 = vmul.f32 %v71_v51, %v62_v56 }
 0x13e   :  { %v87_v59 = vadd.f32 %v80_v53, %v74_v57  ;;  %v88_v60 = vadd.f32 %v84_v54, %v75_v58 }
 0x140   :  { %112 = vst [vmem:[%s241_s6] sm:$0xff] %v87_v59  ;;  %113 = vst [vmem:[%s241_s6 + $0x8] sm:$0xff] %v88_v60 }

// kernel: ssemb_forward.19
= control target key start
LH: loop header
LB: loop body
LE: loop exit
PB: predicated region body
PF: predicated region fallthrough
CT: control target
= control target key end

     0   :  { %s1666_s0 = inlined_call_operand.vmem [shape: f32[8,256], index: 0, kind: input, shape index: {}]   ;;  %s1667_s1 = inlined_call_operand.vmem [shape: f32[8,256], index: 1, kind: input, shape index: {}]   ;;  %s1668_s2 = inlined_call_operand.vmem [shape: f32[3,8,16], index: 2, kind: input, shape index: {}]   ;;  %s1669_s3 = inlined_call_operand.vmem [shape: bf16[256,256], index: 3, kind: input, shape index: {}]   ;;  %s1670_s4 = inlined_call_operand.vmem [shape: bf16[256,256], index: 4, kind: input, shape index: {}]   ;;  %s1671_s5 = inlined_call_operand.vmem [shape: f32[1,256], index: 5, kind: input, shape index: {}]   ;;  %s1672_s6 = inlined_call_operand.vmem [shape: f32[16,16], index: 6, kind: input, shape index: {}]   ;;  %s1673_s7 = inlined_call_operand.vmem [shape: bf16[256,20], index: 7, kind: input, shape index: {}]   ;;  %s1674_s8 = inlined_call_operand.vmem [shape: bf16[16,20], index: 8, kind: input, shape index: {}]   ;;  %s1675_s9 = inlined_call_operand.vmem [shape: f32[1,20], index: 9, kind: input, shape index: {}]   ;;  %s1676_s10 = inlined_call_operand.hbm [shape: f32[8,20], index: 10, kind: output, shape index: {}]  }
   0x1   :  { %v1172_v0 = vld [vmem:[%s1670_s4 + $0x4] ss:$8 sps:$4 sm:$0xff]   ;;  %v1176_v2 = vld [vmem:[%s1670_s4] ss:$8 sps:$4 sm:$0xff]   ;;  %v1178_v4 = vld [vmem:[%s1670_s4 + $0x14] ss:$8 sps:$4 sm:$0xff]  }
   0x2   :  { %v1174_v1 = vld [vmem:[%s1669_s3 + $0x4] ss:$8 sps:$4 sm:$0xff]   ;;  %269 = vmatprep.subr.bf16.mxu0 %v1172_v0  ;;  %v1177_v3 = vld [vmem:[%s1669_s3] ss:$8 sps:$4 sm:$0xff]   ;;  %v1180_v5 = vld [vmem:[%s1669_s3 + $0x14] ss:$8 sps:$4 sm:$0xff]  }
   0x3   :  { %470 = vmatprep.subr.bf16.mxu1 %v1174_v1  ;;  %270 = vmatpush1.bf16.msra.mxu0 %v1176_v2  ;;  %v1182_v6 = vld [vmem:[%s1670_s4 + $0x10] ss:$8 sps:$4 sm:$0xff]   ;;  %v1184_v8 = vld [vmem:[%s1670_s4 + $0x24] ss:$8 sps:$4 sm:$0xff]   ;;  %v1188_v10 = vld [vmem:[%s1670_s4 + $0x20] ss:$8 sps:$4 sm:$0xff]  }
   0x4   :  { %471 = vmatpush1.bf16.msra.mxu1 %v1177_v3  ;;  %271 = vmatprep.subr.bf16.mxu0 %v1178_v4  ;;  %v1183_v7 = vld [vmem:[%s1669_s3 + $0x10] ss:$8 sps:$4 sm:$0xff]   ;;  %v1186_v9 = vld [vmem:[%s1669_s3 + $0x24] ss:$8 sps:$4 sm:$0xff]   ;;  %v1189_v11 = vld [vmem:[%s1669_s3 + $0x20] ss:$8 sps:$4 sm:$0xff]  }
   0x5   :  { %472 = vmatprep.subr.bf16.mxu1 %v1180_v5  ;;  %v1190_v12 = vld [vmem:[%s1670_s4 + $0x34] ss:$8 sps:$4 sm:$0xff]   ;;  %v1194_v14 = vld [vmem:[%s1670_s4 + $0x30] ss:$8 sps:$4 sm:$0xff]   ;;  %v1196_v16 = vld [vmem:[%s1670_s4 + $0x44] ss:$8 sps:$4 sm:$0xff]  }
   0x6   :  { %v1192_v13 = vld [vmem:[%s1669_s3 + $0x34] ss:$8 sps:$4 sm:$0xff]   ;;  %v1195_v15 = vld [vmem:[%s1669_s3 + $0x30] ss:$8 sps:$4 sm:$0xff]   ;;  %v1198_v17 = vld [vmem:[%s1669_s3 + $0x44] ss:$8 sps:$4 sm:$0xff]  }
   0x7   :  { %272 = vmatpush1.bf16.msra.mxu0 %v1182_v6  ;;  %v1200_v18 = vld [vmem:[%s1670_s4 + $0x40] ss:$8 sps:$4 sm:$0xff]   ;;  %v1202_v20 = vld [vmem:[%s1670_s4 + $0x54] ss:$8 sps:$4 sm:$0xff]   ;;  %v1206_v22 = vld [vmem:[%s1670_s4 + $0x50] ss:$8 sps:$4 sm:$0xff]  }
   0x8   :  { %473 = vmatpush1.bf16.msra.mxu1 %v1183_v7  ;;  %273 = vmatprep.subr.bf16.mxu0 %v1184_v8  ;;  %v1201_v19 = vld [vmem:[%s1669_s3 + $0x40] ss:$8 sps:$4 sm:$0xff]   ;;  %v1204_v21 = vld [vmem:[%s1669_s3 + $0x54] ss:$8 sps:$4 sm:$0xff]   ;;  %v1207_v23 = vld [vmem:[%s1669_s3 + $0x50] ss:$8 sps:$4 sm:$0xff]  }
   0x9   :  { %474 = vmatprep.subr.bf16.mxu1 %v1186_v9  ;;  %v1208_v24 = vld [vmem:[%s1670_s4 + $0x64] ss:$8 sps:$4 sm:$0xff]   ;;  %v1212_v26 = vld [vmem:[%s1670_s4 + $0x60] ss:$8 sps:$4 sm:$0xff]   ;;  %v1214_v28 = vld [vmem:[%s1670_s4 + $0x74] ss:$8 sps:$4 sm:$0xff]  }
   0xa   :  { %v1210_v25 = vld [vmem:[%s1669_s3 + $0x64] ss:$8 sps:$4 sm:$0xff]   ;;  %v1213_v27 = vld [vmem:[%s1669_s3 + $0x60] ss:$8 sps:$4 sm:$0xff]   ;;  %v1216_v29 = vld [vmem:[%s1669_s3 + $0x74] ss:$8 sps:$4 sm:$0xff]  }
   0xb   :  { %274 = vmatpush1.bf16.msra.mxu0 %v1188_v10  ;;  %v1218_v30 = vld [vmem:[%s1670_s4 + $0x70] ss:$8 sps:$4 sm:$0xff]   ;;  %v1220_v32 = vld [vmem:[%s1670_s4 + $0x84] ss:$8 sps:$4 sm:$0xff]   ;;  %v1224_v34 = vld [vmem:[%s1670_s4 + $0x80] ss:$8 sps:$4 sm:$0xff]  }
   0xc   :  { %475 = vmatpush1.bf16.msra.mxu1 %v1189_v11  ;;  %275 = vmatprep.subr.bf16.mxu0 %v1190_v12  ;;  %v1219_v31 = vld [vmem:[%s1669_s3 + $0x70] ss:$8 sps:$4 sm:$0xff]   ;;  %v1222_v33 = vld [vmem:[%s1669_s3 + $0x84] ss:$8 sps:$4 sm:$0xff]   ;;  %v1225_v35 = vld [vmem:[%s1669_s3 + $0x80] ss:$8 sps:$4 sm:$0xff]  }
   0xd   :  { %476 = vmatprep.subr.bf16.mxu1 %v1192_v13  ;;  %v1226_v36 = vld [vmem:[%s1670_s4 + $0x94] ss:$8 sps:$4 sm:$0xff]   ;;  %v1230_v38 = vld [vmem:[%s1670_s4 + $0x90] ss:$8 sps:$4 sm:$0xff]   ;;  %v1232_v40 = vld [vmem:[%s1670_s4 + $0xa4] ss:$8 sps:$4 sm:$0xff]  }
   0xe   :  { %v1228_v37 = vld [vmem:[%s1669_s3 + $0x94] ss:$8 sps:$4 sm:$0xff]   ;;  %v1231_v39 = vld [vmem:[%s1669_s3 + $0x90] ss:$8 sps:$4 sm:$0xff]   ;;  %v1234_v41 = vld [vmem:[%s1669_s3 + $0xa4] ss:$8 sps:$4 sm:$0xff]  }
   0xf   :  { %276 = vmatpush1.bf16.msra.mxu0 %v1194_v14  ;;  %v1236_v42 = vld [vmem:[%s1670_s4 + $0xa0] ss:$8 sps:$4 sm:$0xff]   ;;  %v1238_v44 = vld [vmem:[%s1670_s4 + $0xb4] ss:$8 sps:$4 sm:$0xff]   ;;  %v1242_v49 = vld [vmem:[%s1670_s4 + $0xb0] ss:$8 sps:$4 sm:$0xff]  }
  0x10   :  { %477 = vmatpush1.bf16.msra.mxu1 %v1195_v15  ;;  %277 = vmatprep.subr.bf16.mxu0 %v1196_v16  ;;  %v1237_v43 = vld [vmem:[%s1669_s3 + $0xa0] ss:$8 sps:$4 sm:$0xff]   ;;  %v1240_v45 = vld [vmem:[%s1669_s3 + $0xb4] ss:$8 sps:$4 sm:$0xff]   ;;  %v1243_v50 = vld [vmem:[%s1669_s3 + $0xb0] ss:$8 sps:$4 sm:$0xff]  }
  0x11   :  { %478 = vmatprep.subr.bf16.mxu1 %v1198_v17  ;;  %v74_v46 = vld [vmem:[%s1667_s1 + $0x8] sm:$0xff]  ;;  %v1250_v56 = vld [vmem:[%s1670_s4 + $0xd4] ss:$8 sps:$4 sm:$0xff]   ;;  %v1254_v58 = vld [vmem:[%s1670_s4 + $0xd0] ss:$8 sps:$4 sm:$0xff]  }
  0x12   :  { %v108_v47 = vpack.c.bf16 %v74_v46, %v74_v46  ;;  %v38_v48 = vld [vmem:[%s1666_s0 + $0x8] sm:$0xff]  ;;  %v1252_v57 = vld [vmem:[%s1669_s3 + $0xd4] ss:$8 sps:$4 sm:$0xff]   ;;  %v1255_v59 = vld [vmem:[%s1669_s3 + $0xd0] ss:$8 sps:$4 sm:$0xff]  }
  0x13   :  { %278 = vmatpush1.bf16.msra.mxu0 %v1200_v18  ;;  %v72_v51 = vpack.c.bf16 %v38_v48, %v38_v48  ;;  %v1244_v52 = vld [vmem:[%s1670_s4 + $0xc4] ss:$8 sps:$4 sm:$0xff]   ;;  %v1248_v54 = vld [vmem:[%s1670_s4 + $0xc0] ss:$8 sps:$4 sm:$0xff]   ;;  %v1262_v0 = vld [vmem:[%s1670_s4 + $0xf4] ss:$8 sps:$4 sm:$0xff]  }
  0x14   :  { %479 = vmatpush1.bf16.msra.mxu1 %v1201_v19  ;;  %279 = vmatprep.subr.bf16.mxu0 %v1202_v20  ;;  %v1246_v53 = vld [vmem:[%s1669_s3 + $0xc4] ss:$8 sps:$4 sm:$0xff]   ;;  %v1249_v55 = vld [vmem:[%s1669_s3 + $0xc0] ss:$8 sps:$4 sm:$0xff]   ;;  %v1264_v1 = vld [vmem:[%s1669_s3 + $0xf4] ss:$8 sps:$4 sm:$0xff]  }
  0x15   :  { %480 = vmatprep.subr.bf16.mxu1 %v1204_v21  ;;  %301 = vmatprep.mubr.bf16.mxu0 %v108_v47  ;;  %v1256_v60 = vld [vmem:[%s1670_s4 + $0xe4] ss:$8 sps:$4 sm:$0xff]   ;;  %v1260_v62 = vld [vmem:[%s1670_s4 + $0xe0] ss:$8 sps:$4 sm:$0xff]   ;;  %v1266_v2 = vld [vmem:[%s1670_s4 + $0xf0] ss:$8 sps:$4 sm:$0xff]  }
  0x16   :  { %502 = vmatprep.mubr.bf16.mxu1 %v72_v51  ;;  %v1258_v61 = vld [vmem:[%s1669_s3 + $0xe4] ss:$8 sps:$4 sm:$0xff]   ;;  %v1261_v63 = vld [vmem:[%s1669_s3 + $0xe0] ss:$8 sps:$4 sm:$0xff]   ;;  %v1267_v3 = vld [vmem:[%s1669_s3 + $0xf0] ss:$8 sps:$4 sm:$0xff]  }
  0x17   :  { %280 = vmatpush1.bf16.msra.mxu0 %v1206_v22  ;;  %v73_v4 = vld [vmem:[%s1667_s1] sm:$0xff]  ;;  %v531_v7 = vld [vmem:[%s1672_s6 + $0x8] sm:$0xff] }
  0x18   :  { %481 = vmatpush1.bf16.msra.mxu1 %v1207_v23  ;;  %281 = vmatprep.subr.bf16.mxu0 %v1208_v24  ;;  %v37_v5 = vld [vmem:[%s1666_s0] sm:$0xff] }
  0x19   :  { %482 = vmatprep.subr.bf16.mxu1 %v1210_v25  ;;  %v530_v6 = vld [vmem:[%s1672_s6] sm:$0xff] }
  0x1a   :  { %v1268_v8 = vld [vmem:[%s1673_s7 + $0x40] sm:$0xff]  }
  0x1b   :  { %282 = vmatpush1.bf16.msra.mxu0 %v1212_v26 }
  0x1c   :  { %483 = vmatpush1.bf16.msra.mxu1 %v1213_v27  ;;  %283 = vmatprep.subr.bf16.mxu0 %v1214_v28 }
  0x1d   :  { %484 = vmatprep.subr.bf16.mxu1 %v1216_v29 }
  0x1f   :  { %284 = vmatpush1.bf16.msra.mxu0 %v1218_v30 }
  0x20   :  { %485 = vmatpush1.bf16.msra.mxu1 %v1219_v31  ;;  %285 = vmatprep.subr.bf16.mxu0 %v1220_v32 }
  0x21   :  { %486 = vmatprep.subr.bf16.mxu1 %v1222_v33 }
  0x23   :  { %286 = vmatpush1.bf16.msra.mxu0 %v1224_v34 }
  0x24   :  { %487 = vmatpush1.bf16.msra.mxu1 %v1225_v35  ;;  %287 = vmatprep.subr.bf16.mxu0 %v1226_v36 }
  0x25   :  { %488 = vmatprep.subr.bf16.mxu1 %v1228_v37 }
  0x27   :  { %288 = vmatpush1.bf16.msra.mxu0 %v1230_v38 }
  0x28   :  { %489 = vmatpush1.bf16.msra.mxu1 %v1231_v39  ;;  %289 = vmatprep.subr.bf16.mxu0 %v1232_v40 }
  0x29   :  { %490 = vmatprep.subr.bf16.mxu1 %v1234_v41 }
  0x2b   :  { %290 = vmatpush1.bf16.msra.mxu0 %v1236_v42 }
  0x2c   :  { %491 = vmatpush1.bf16.msra.mxu1 %v1237_v43  ;;  %291 = vmatprep.subr.bf16.mxu0 %v1238_v44 }
  0x2d   :  { %492 = vmatprep.subr.bf16.mxu1 %v1240_v45 }
  0x2f   :  { %292 = vmatpush1.bf16.msra.mxu0 %v1242_v49 }
  0x30   :  { %493 = vmatpush1.bf16.msra.mxu1 %v1243_v50  ;;  %293 = vmatprep.subr.bf16.mxu0 %v1244_v52 }
  0x31   :  { %494 = vmatprep.subr.bf16.mxu1 %v1246_v53 }
  0x33   :  { %294 = vmatpush1.bf16.msra.mxu0 %v1248_v54 }
  0x34   :  { %495 = vmatpush1.bf16.msra.mxu1 %v1249_v55  ;;  %295 = vmatprep.subr.bf16.mxu0 %v1250_v56 }
  0x35   :  { %496 = vmatprep.subr.bf16.mxu1 %v1252_v57 }
  0x37   :  { %296 = vmatpush1.bf16.msra.mxu0 %v1254_v58 }
  0x38   :  { %497 = vmatpush1.bf16.msra.mxu1 %v1255_v59  ;;  %297 = vmatprep.subr.bf16.mxu0 %v1256_v60 }
  0x39   :  { %498 = vmatprep.subr.bf16.mxu1 %v1258_v61 }
  0x3b   :  { %298 = vmatpush1.bf16.msra.mxu0 %v1260_v62 }
  0x3c   :  { %499 = vmatpush1.bf16.msra.mxu1 %v1261_v63  ;;  %299 = vmatprep.subr.bf16.mxu0 %v1262_v0 }
  0x3d   :  { %500 = vmatprep.subr.bf16.mxu1 %v1264_v1 }
  0x3e   :  { %15 = vsyncpa [#allocation3], 0  ;;  %v107_v9 = vpack.c.bf16 %v73_v4, %v73_v4  ;;  %v71_v10 = vpack.c.bf16 %v37_v5, %v37_v5  ;;  %v1160_v11 = vpack.c.bf16 %v531_v7, %v530_v6  ;;  %v1311_v12 = vmov 0.0|0.0   ;;  %v1269_v13 = vld [vmem:[%s1673_s7] sm:$0xff]   ;;  %v1270_v14 = vld [vmem:[%s1673_s7 + $0x48] sm:$0xff]  }
  0x3f   :  { %300 = vmatpush1.bf16.msra.mxu0 %v1266_v2  ;;  %vm1312_vm0 = vmmov 0   ;;  %v1313_v15 = vmov 0.0   ;;  %v1271_v16 = vld [vmem:[%s1673_s7 + $0x8] sm:$0xff]   ;;  %v1272_v17 = vld [vmem:[%s1673_s7 + $0x50] sm:$0xff]   ;;  %v525_v18 = vld [vmem:[%s1668_s2] sm:$0xff]  ;;  %vm567_vm1 = vcmask 130048   ;;  %v513_v33 = vlaneseq }
  0x40   :  { %501 = vmatpush1.bf16.msra.mxu1 %v1267_v3  ;;  %1110 = vmatprep.subr.bf16.mxu0 %v1268_v8  ;;  %v1273_v19 = vld [vmem:[%s1673_s7 + $0x10] sm:$0xff]   ;;  %v1274_v20 = vld [vmem:[%s1673_s7 + $0x58] sm:$0xff]   ;;  %v1075_v21 = vld [vmem:[%s1668_s2 + $0x8] sm:$0xff]  ;;  %vm995_vm4 = vcmask 162816  }
  0x41   :  { %1159 = vmatprep.subr.bf16.mxu1 %v1311_v12  ;;  %v1275_v22 = vld [vmem:[%s1673_s7 + $0x18] sm:$0xff]   ;;  %v1276_v23 = vld [vmem:[%s1673_s7 + $0x60] sm:$0xff]   ;;  %v1076_v24 = vld [vmem:[%s1668_s2 + $0x10] sm:$0xff]  ;;  %v514_v34 = vshrl.u32 %v513_v33, 7 }
  0x42   :  { %302 = vmatmul.mubr.bf16.vlgmr.msra.gmra.mrb[0].mxu0 %v107_v9  ;;  %v1277_v25 = vld [vmem:[%s1673_s7 + $0x20] sm:$0xff]   ;;  %v1278_v26 = vld [vmem:[%s1673_s7 + $0x68] sm:$0xff]   ;;  %v1280_v28 = vld [vmem:[%s1673_s7 + $0x70] sm:$0xff]  }
  0x43   :  { %503 = vmatmul.mubr.bf16.vlgmr.msra.gmra.mrb[0].mxu1 %v71_v10  ;;  %1111 = vmatpush3.bf16.msra.mxu0 %v1269_v13  ;;  %v1279_v27 = vld [vmem:[%s1673_s7 + $0x28] sm:$0xff]   ;;  %v1281_v29 = vld [vmem:[%s1673_s7 + $0x30] sm:$0xff]   ;;  %v1282_v30 = vld [vmem:[%s1673_s7 + $0x78] sm:$0xff]   ;;  %v515_v35 = vsub.s32 0, %v514_v34  ;;  %v519_v37 = vsub.s32 1, %v514_v34 }
  0x44   :  { %1161 = vmatpush3.bf16.msra.mxu1 %v1160_v11  ;;  %1136 = vmatprep.mubr.msk.f32.mxu1 %vm1312_vm0, %v1313_v15  ;;  %v1283_v31 = vld [vmem:[%s1673_s7 + $0x38] sm:$0xff]   ;;  %v1284_v32 = vld [vmem:[%s1674_s8] sm:$0xff]   ;;  %s1314_s8 = smov [#allocation2]  }
  0x45   :  { %1162 = vmatprep.subr.bf16.mxu1 %v1311_v12  ;;  %1112 = vmatprep.subr.bf16.mxu0 %v1270_v14  ;;  %v511_v36 = vld [vmem:[%s1671_s5] sm:$0x3]  ;;  %s1003_s24 = sshll.u32 %s1314_s8, 4  ;;  %s1004_s24 = int_to_ptr.vmem [resolvable:$true] %s1003_s24 }
  0x46   :  { %v516_v38 = vrot.slane %v511_v36, %v515_v35  ;;  %v520_v41 = vrot.slane %v511_v36, %v519_v37  ;;  %v1098_v13 = vld [vmem:[%s1675_s9] ss:$0 sm:$0xff]  ;;  %s1287_s25 = scalar_lea.vmem %s1004_s24, 128  ;;  %p1292_p1 = scmp.lt.s32.totalorder %s1004_s24, %s1004_s24 }
  0x47   :  { %1113 = vmatpush3.bf16.msra.mxu0 %v1271_v16  ;;  %p1288_p0 = scmp.ne.s32.totalorder %s1004_s24, %s1287_s25  ;;  %p1293_p2 = scmp.lt.s32.totalorder %s1287_s25, %s1287_s25 }
  0x48   :  { %1114 = vmatprep.subr.bf16.mxu0 %v1272_v17 }
  0x49   :  { %p1294_p3 = por %p1293_p2, %p1292_p1 }
  0x4b   :  { %1137 = vmatmul.mubr.msk.f32.vlgmr.msra.gmra.mrb[4].mxu1 %vm567_vm1, %v525_v18  ;;  %1115 = vmatpush3.bf16.msra.mxu0 %v1273_v19  ;;  %p1295_p4 = pnand %p1294_p3, %p1288_p0 }
  0x4c   :  { %1164 = vmatpush3.bf16.msra.mxu1 %v1160_v11  ;;  %1143 = vmatprep.mubr.msk.f32.mxu1 %vm1312_vm0, %v1313_v15 }
  0x4d   :  { %1165 = vmatprep.subr.bf16.mxu1 %v1311_v12  ;;  %1116 = vmatprep.subr.bf16.mxu0 %v1274_v20 }
  0x4f   :  { %1144 = vmatmul.mubr.msk.f32.vlgmr.msra.gmra.mrb[6].mxu1 %vm567_vm1, %v1075_v21  ;;  %1117 = vmatpush3.bf16.msra.mxu0 %v1275_v22 }
  0x50   :  { %1167 = vmatpush3.bf16.msra.mxu1 %v1160_v11  ;;  %1150 = vmatprep.mubr.msk.f32.mxu1 %vm1312_vm0, %v1313_v15 }
  0x51   :  { %1153 = vmatprep.subr.bf16.mxu1 %v1313_v15  ;;  %1118 = vmatprep.subr.bf16.mxu0 %v1276_v23 }
  0x53   :  { %1151 = vmatmul.mubr.msk.f32.vlgmr.msra.gmra.mrb[8].mxu1 %vm567_vm1, %v1076_v24  ;;  %1119 = vmatpush3.bf16.msra.mxu0 %v1277_v25 }
  0x54   :  { %1155 = vmatprep.mubr.msk.bf16.mxu1 %vm1312_vm0, %v1313_v15  ;;  %1120 = vmatprep.subr.bf16.mxu0 %v1278_v26 }
  0x55   :  { %1154 = vmatpush3.bf16.msra.mxu1 %v1284_v32 }
  0x57   :  { %1121 = vmatpush3.bf16.msra.mxu0 %v1279_v27 }
  0x58   :  { %1122 = vmatprep.subr.bf16.mxu0 %v1280_v28 }
  0x5b   :  { %1123 = vmatpush3.bf16.msra.mxu0 %v1281_v29 }
  0x5c   :  { %1124 = vmatprep.subr.bf16.mxu0 %v1282_v30 }
  0x5f   :  { %1125 = vmatpush3.bf16.msra.mxu0 %v1283_v31 }
 0x115   :  { %v303_v39 = vpop.f32.mrb[0].mxu0 }
 0x116   :  { %v504_v40 = vpop.f32.mrb[0].mxu1  ;;  %v305_v43 = vpop.f32.mrb[1].mxu0 }
 0x117   :  { %v505_v42 = vadd.f32 %v504_v40, %v303_v39  ;;  %v506_v44 = vpop.f32.mrb[1].mxu1  ;;  %v307_v47 = vpop.f32.mrb[2].mxu0 }
 0x118   :  { %v507_v45 = vadd.f32 %v506_v44, %v305_v43  ;;  %v508_v46 = vpop.f32.mrb[2].mxu1  ;;  %v308_v50 = vpop.f32.mrb[3].mxu0 }
 0x119   :  { %v523_v48 = vadd.f32 %v516_v38, %v505_v42  ;;  %v509_v49 = vpop.f32.mrb[3].mxu1 }
 0x11a   :  { %v524_v51 = vadd.f32 %v520_v41, %v507_v45 }
 0x11b   :  { %v800_v53 = vpack.c.bf16 %v523_v48, %v523_v48 }
 0x11c   :  { %v801_v52 = vpack.c.bf16 %v524_v51, %v524_v51 }
 0x11e   :  { %v637_v54 = vpop.f32.mrb[4].mxu1  ;;  %980 = vmatprep.mubr.bf16.mxu0 %v801_v52 }
 0x11f   :  { %v1138_v55 = vpop.f32.mrb[5].mxu1  ;;  %981 = vmatmul.mubr.bf16.vlgmr.msra.gmra.mrb[4].mxu0 %v800_v53  ;;  %v787_v57 = vmul.f32 %v637_v54, %v637_v54 }
 0x122   :  { %v710_v56 = vpop.f32.mrb[6].mxu1 }
 0x123   :  { %v788_v58 = vmul.f32 %v710_v56, %v710_v56  ;;  %v1145_v59 = vpop.f32.mrb[7].mxu1 }
 0x125   :  { %v789_v60 = vadd.f32 %v788_v58, %v787_v57 }
 0x126   :  { %v783_v61 = vpop.f32.mrb[8].mxu1 }
 0x127   :  { %v790_v62 = vmul.f32 %v783_v61, %v783_v61  ;;  %v1152_v63 = vpop.f32.mrb[9].mxu1 }
 0x129   :  { %v791_v0 = vadd.f32 %v790_v62, %v789_v60 }
 0x12b   :  { %v792_v1 = vmax.f32 %v791_v0, 1e-08 }
 0x12d   :  { %1285 = vrsqrt.f32 %v792_v1  ;;  %vm795_vm2 = vcmp.eq.f32.partialorder %v792_v1, inf  ;;  %v798_v4 = vand.u32 2147483648, %v792_v1  ;;  %vm797_vm3 = vcmp.eq.f32.partialorder %v792_v1, 0.0 }
 0x137   :  { %v1286_v2 = vpop.eup %1285 }
 0x138   :  { %v794_v3 = vmul.f32 %v1286_v2, %v792_v1 }
 0x13a   :  { %v796_v5 = vsel %vm795_vm2, %v792_v1, %v794_v3 }
 0x13b   :  { %v799_v6 = vsel %vm797_vm3, %v798_v4, %v796_v5 }
 0x13c   :  { %v802_v7 = vpack.c.bf16 %v799_v6, %v799_v6 }
 0x13e   :  { %1156 = vmatmul.mubr.msk.bf16.vlgmr.msra.gmra.mrb[12].mxu1 %vm567_vm1, %v802_v7 }
 0x1f2   :  { %v1126_v8 = vpop.f32.mrb[4].mxu0 }
 0x1f3   :  { %v1127_v9 = vpop.f32.mrb[5].mxu0 }
 0x1f4   :  { %v1128_v10 = vadd.f32 %v1127_v9, %v1126_v8  ;;  %v1129_v11 = vpop.f32.mrb[6].mxu0 }
 0x1f5   :  { %v1130_v12 = vpop.f32.mrb[7].mxu0 }
 0x211   :  { %v846_v14 = vpop.f32.mrb[12].mxu1 }
 0x212   :  { %v983_v15 = vadd.f32 %v1128_v10, %v846_v14  ;;  %v1157_v16 = vpop.f32.mrb[13].mxu1 }
 0x213   :  { %v849_v17 = vpop.f32.mrb[14].mxu1 }
 0x214   :  { %v994_v18 = vadd.f32 %v1098_v13, %v983_v15  ;;  %v1158_v19 = vpop.f32.mrb[15].mxu1 }
 0x216   :  { %996 = vst.msk [vmem:[#allocation2] sm:$0xff] %vm995_vm4, %v994_v18 }
 0x217   :  { %1298 = shalt.err (!%p1295_p4)
}
 0x218   :  { %s1299_s27 = scalar_lea.hbm %s1676_s10, 128 }
 0x219   :  { %p1300_p5 = scmp.ne.s32.totalorder %s1676_s10, %s1299_s27  ;;  %p1303_p6 = scmp.lt.u32.totalorder %s1299_s27, %s1676_s10 }
 0x21b   :  { %p1305_p7 = pnand %p1303_p6, %p1300_p5 }
 0x21d   :  { %1308 = shalt.err (!%p1305_p7)
}
 0x21e   :  { %1006 = dma.vmem_to_hbm [thread:$0]  %s1004_s24, 128, %s1676_s10, [#allocation3]  }
 0x21f   :  { %1309 = dma.done.wait [#allocation3], 128  }
 0x220   :  { %1310 = vsyncadd [#allocation3], 4294967168 }
 0x221   :  { %1010 = vsyncpa [#allocation3], 1 }

// kernel: ssemb_forward.15
= control target key start
LH: loop header
LB: loop body
LE: loop exit
PB: predicated region body
PF: predicated region fallthrough
CT: control target
= control target key end

     0   :  { %v5356_v0 = vmov 0.0|0.0   ;;  %vm5357_vm0 = vmmov 0   ;;  %v5358_v4 = vmov 0.0   ;;  %vm525_vm1 = vcmask 130048   ;;  %s6872_s2 = inlined_call_operand.vmem [shape: f32[16,32], index: 2, kind: input, shape index: {}]   ;;  %s6873_s3 = inlined_call_operand.vmem [shape: bf16[256,1024], index: 3, kind: input, shape index: {}]   ;;  %s6874_s1 = inlined_call_operand.vmem [shape: f32[3,8,16], index: 1, kind: input, shape index: {}]   ;;  %s6875_s0 = inlined_call_operand.vmem [shape: f32[8,256], index: 0, kind: input, shape index: {}]   ;;  %s6876_s4 = inlined_call_operand.vmem [shape: bf16[32,1024], index: 4, kind: input, shape index: {}]   ;;  %s6877_s6 = inlined_call_operand.vmem [shape: f32[32,32], index: 6, kind: input, shape index: {}]   ;;  %s6878_s7 = inlined_call_operand.vmem [shape: bf16[1024,32], index: 7, kind: input, shape index: {}]   ;;  %s6879_s5 = inlined_call_operand.vmem [shape: f32[1,1024], index: 5, kind: input, shape index: {}]   ;;  %s6880_s9 = inlined_call_operand.vmem [shape: f32[32,32], index: 9, kind: input, shape index: {}]   ;;  %s6881_s10 = inlined_call_operand.vmem [shape: bf16[1024,256], index: 10, kind: input, shape index: {}]   ;;  %s6882_s8 = inlined_call_operand.vmem [shape: f32[1,32], index: 8, kind: input, shape index: {}]   ;;  %s6883_s11 = inlined_call_operand.vmem [shape: bf16[32,256], index: 11, kind: input, shape index: {}]   ;;  %s6884_s13 = inlined_call_operand.vmem [shape: f32[32,16], index: 13, kind: input, shape index: {}]   ;;  %s6885_s14 = inlined_call_operand.vmem [shape: bf16[256,16], index: 14, kind: input, shape index: {}]   ;;  %s6886_s12 = inlined_call_operand.vmem [shape: f32[1,256], index: 12, kind: input, shape index: {}]   ;;  %s6887_s15 = inlined_call_operand.vmem [shape: f32[1,16], index: 15, kind: input, shape index: {}]   ;;  %s6888_s16 = inlined_call_operand.vmem [shape: f32[1,256], index: 16, kind: input, shape index: {}]   ;;  %s6889_s17 = inlined_call_operand.vmem [shape: f32[1,256], index: 17, kind: input, shape index: {}]   ;;  %s6890_s18 = inlined_call_operand.vmem [shape: f32[8,256], index: 18, kind: output, shape index: {0}]   ;;  %s6891_s19 = inlined_call_operand.vmem [shape: f32[3,8,16], index: 19, kind: output, shape index: {1}]  }
   0x1   :  { %6896 = sst [smem:[#allocation2_spill]] %s6872_s2  ;;  %4956 = vmatprep.subr.bf16.mxu0 %v5356_v0  ;;  %4959 = vmatprep.subr.bf16.mxu1 %v5356_v0  ;;  %vm841_vm2 = vcmask 261120  }
   0x2   :  { %6897 = sst [smem:[#allocation3_spill]] %s6873_s3  ;;  %s6900_s20 = sld [smem:[#allocation2_spill]]  ;;  %4840 = vmatprep.mubr.msk.f32.mxu0 %vm5357_vm0, %v5358_v4  ;;  %4847 = vmatprep.mubr.msk.f32.mxu1 %vm5357_vm0, %v5358_v4 }
   0x3   :  { %6898 = sst [smem:[#allocation4_spill]] %s6874_s1  ;;  %s6901_s23 = sld [smem:[#allocation3_spill]] }
   0x4   :  { %6899 = sst [smem:[#allocation5_spill]] %s6875_s0  ;;  %s6902_s30 = sld [smem:[#allocation4_spill]] }
   0x5   :  { %s6903_s21 = sld [smem:[#allocation5_spill]] }
   0x8   :  { %v62_v1 = vld [vmem:[%s6900_s20] sm:$0xff]  ;;  %v63_v2 = vld [vmem:[%s6900_s20 + $0x8] sm:$0xff] }
   0x9   :  { %v4957_v3 = vpack.c.bf16 %v63_v2, %v62_v1  ;;  %v64_v5 = vld [vmem:[%s6901_s23] sm:$0xff] }
   0xa   :  { %v68_v6 = vld [vmem:[%s6901_s23 + $0x20] sm:$0xff]  ;;  %v4283_v10 = vld [vmem:[%s6902_s30 + $0x8] sm:$0xff]  ;;  %v4284_v16 = vld [vmem:[%s6902_s30 + $0x10] sm:$0xff] }
   0xb   :  { %v72_v7 = vld [vmem:[%s6901_s23 + $0x40] sm:$0xff]  ;;  %4958 = vmatpush3.bf16.msra.mxu0 %v4957_v3  ;;  %4961 = vmatpush3.bf16.msra.mxu1 %v4957_v3  ;;  %v4309_v11 = vcombine.high %v64_v5, %v68_v6  ;;  %v4308_v12 = vcombine.low %v64_v5, %v68_v6  ;;  %v519_v22 = vld [vmem:[%s6903_s21 + $0x8] sm:$0xff] }
   0xc   :  { %v76_v8 = vld [vmem:[%s6901_s23 + $0x60] sm:$0xff]  ;;  %4962 = vmatprep.subr.bf16.mxu0 %v5356_v0  ;;  %v5514_v24 = vpack.c.bf16 %v519_v22, %v519_v22  ;;  %v86_v22 = vld [vmem:[%s6901_s23 + $0xb0] sm:$0xff] }
   0xd   :  { %v520_v9 = vld [vmem:[%s6902_s30] sm:$0xff]  ;;  %1649 = vmatprep.subr.bf16.mxu1 %v4309_v11  ;;  %v4317_v13 = vcombine.high %v72_v7, %v76_v8  ;;  %v4316_v17 = vcombine.low %v72_v7, %v76_v8  ;;  %v66_v11 = vld [vmem:[%s6901_s23 + $0x10] sm:$0xff] }
   0xe   :  { %4841 = vmatmul.mubr.msk.f32.vlgmr.msra.gmra.mrb[0].mxu0 %vm525_vm1, %v520_v9  ;;  %4848 = vmatmul.mubr.msk.f32.vlgmr.msra.gmra.mrb[0].mxu1 %vm525_vm1, %v4283_v10  ;;  %v80_v14 = vld [vmem:[%s6901_s23 + $0x80] sm:$0xff] }
   0xf   :  { %v84_v15 = vld [vmem:[%s6901_s23 + $0xa0] sm:$0xff]  ;;  %4964 = vmatpush3.bf16.msra.mxu0 %v4957_v3  ;;  %4854 = vmatprep.mubr.msk.f32.mxu0 %vm5357_vm0, %v5358_v4 }
  0x10   :  { %1650 = vmatpush1.bf16.msra.mxu1 %v4308_v12  ;;  %v4325_v18 = vcombine.high %v80_v14, %v84_v15  ;;  %v88_v19 = vld [vmem:[%s6901_s23 + $0xc0] sm:$0xff]  ;;  %v4324_v21 = vcombine.low %v80_v14, %v84_v15  ;;  %1681 = vmatprep.mubr.bf16.mxu1 %v5514_v24  ;;  %v70_v12 = vld [vmem:[%s6901_s23 + $0x30] sm:$0xff] }
  0x11   :  { %1651 = vmatprep.subr.bf16.mxu1 %v4317_v13  ;;  %v92_v20 = vld [vmem:[%s6901_s23 + $0xe0] sm:$0xff]  ;;  %v4313_v15 = vcombine.high %v66_v11, %v70_v12 }
  0x12   :  { %4855 = vmatmul.mubr.msk.f32.vlgmr.msra.gmra.mrb[2].mxu0 %vm525_vm1, %v4284_v16  ;;  %v4333_v23 = vcombine.high %v88_v19, %v92_v20  ;;  %v96_v25 = vld [vmem:[%s6901_s23 + $0x100] sm:$0xff]  ;;  %v4332_v27 = vcombine.low %v88_v19, %v92_v20  ;;  %v74_v16 = vld [vmem:[%s6901_s23 + $0x50] sm:$0xff]  ;;  %v4312_v19 = vcombine.low %v66_v11, %v70_v12 }
  0x13   :  { %v100_v26 = vld [vmem:[%s6901_s23 + $0x120] sm:$0xff] }
  0x14   :  { %1652 = vmatpush1.bf16.msra.mxu1 %v4316_v17  ;;  %v4341_v28 = vcombine.high %v96_v25, %v100_v26  ;;  %v104_v29 = vld [vmem:[%s6901_s23 + $0x140] sm:$0xff]  ;;  %v4340_v31 = vcombine.low %v96_v25, %v100_v26  ;;  %v78_v17 = vld [vmem:[%s6901_s23 + $0x70] sm:$0xff] }
  0x15   :  { %1653 = vmatprep.subr.bf16.mxu1 %v4325_v18  ;;  %v108_v30 = vld [vmem:[%s6901_s23 + $0x160] sm:$0xff]  ;;  %v4321_v20 = vcombine.high %v74_v16, %v78_v17  ;;  %v90_v26 = vld [vmem:[%s6901_s23 + $0xd0] sm:$0xff] }
  0x16   :  { %v4349_v32 = vcombine.high %v104_v29, %v108_v30  ;;  %v112_v33 = vld [vmem:[%s6901_s23 + $0x180] sm:$0xff]  ;;  %v4348_v35 = vcombine.low %v104_v29, %v108_v30  ;;  %v98_v30 = vld [vmem:[%s6901_s23 + $0x110] sm:$0xff] }
  0x17   :  { %v116_v34 = vld [vmem:[%s6901_s23 + $0x1a0] sm:$0xff] }
  0x18   :  { %1654 = vmatpush1.bf16.msra.mxu1 %v4324_v21  ;;  %v4357_v36 = vcombine.high %v112_v33, %v116_v34  ;;  %v120_v37 = vld [vmem:[%s6901_s23 + $0x1c0] sm:$0xff]  ;;  %v4356_v39 = vcombine.low %v112_v33, %v116_v34  ;;  %v82_v21 = vld [vmem:[%s6901_s23 + $0x90] sm:$0xff] }
  0x19   :  { %1655 = vmatprep.subr.bf16.mxu1 %v4333_v23  ;;  %v124_v38 = vld [vmem:[%s6901_s23 + $0x1e0] sm:$0xff]  ;;  %v4320_v23 = vcombine.low %v74_v16, %v78_v17  ;;  %v4329_v25 = vcombine.high %v82_v21, %v86_v22  ;;  %v106_v34 = vld [vmem:[%s6901_s23 + $0x150] sm:$0xff] }
  0x1a   :  { %v4365_v40 = vcombine.high %v120_v37, %v124_v38  ;;  %v128_v41 = vld [vmem:[%s6901_s23 + $0x200] sm:$0xff]  ;;  %v4364_v43 = vcombine.low %v120_v37, %v124_v38  ;;  %v114_v38 = vld [vmem:[%s6901_s23 + $0x190] sm:$0xff] }
  0x1b   :  { %v132_v42 = vld [vmem:[%s6901_s23 + $0x220] sm:$0xff]  ;;  %v170_v17 = vld [vmem:[%s6901_s23 + $0x350] sm:$0xff] }
  0x1c   :  { %1656 = vmatpush1.bf16.msra.mxu1 %v4332_v27  ;;  %v4373_v44 = vcombine.high %v128_v41, %v132_v42  ;;  %v136_v45 = vld [vmem:[%s6901_s23 + $0x240] sm:$0xff]  ;;  %v4372_v47 = vcombine.low %v128_v41, %v132_v42  ;;  %v94_v27 = vld [vmem:[%s6901_s23 + $0xf0] sm:$0xff] }
  0x1d   :  { %1657 = vmatprep.subr.bf16.mxu1 %v4341_v28  ;;  %v140_v46 = vld [vmem:[%s6901_s23 + $0x260] sm:$0xff]  ;;  %v4328_v28 = vcombine.low %v82_v21, %v86_v22  ;;  %v4337_v29 = vcombine.high %v90_v26, %v94_v27  ;;  %v122_v42 = vld [vmem:[%s6901_s23 + $0x1d0] sm:$0xff] }
  0x1e   :  { %v4381_v48 = vcombine.high %v136_v45, %v140_v46  ;;  %v144_v49 = vld [vmem:[%s6901_s23 + $0x280] sm:$0xff]  ;;  %v4380_v51 = vcombine.low %v136_v45, %v140_v46  ;;  %v130_v46 = vld [vmem:[%s6901_s23 + $0x210] sm:$0xff] }
  0x1f   :  { %v148_v50 = vld [vmem:[%s6901_s23 + $0x2a0] sm:$0xff]  ;;  %v178_v22 = vld [vmem:[%s6901_s23 + $0x390] sm:$0xff] }
  0x20   :  { %1658 = vmatpush1.bf16.msra.mxu1 %v4340_v31  ;;  %v4389_v52 = vcombine.high %v144_v49, %v148_v50  ;;  %v152_v53 = vld [vmem:[%s6901_s23 + $0x2c0] sm:$0xff]  ;;  %v4388_v55 = vcombine.low %v144_v49, %v148_v50  ;;  %v102_v31 = vld [vmem:[%s6901_s23 + $0x130] sm:$0xff] }
  0x21   :  { %1659 = vmatprep.subr.bf16.mxu1 %v4349_v32  ;;  %v156_v54 = vld [vmem:[%s6901_s23 + $0x2e0] sm:$0xff]  ;;  %v4336_v32 = vcombine.low %v90_v26, %v94_v27  ;;  %v4345_v33 = vcombine.high %v98_v30, %v102_v31  ;;  %v138_v50 = vld [vmem:[%s6901_s23 + $0x250] sm:$0xff] }
  0x22   :  { %v4397_v56 = vcombine.high %v152_v53, %v156_v54  ;;  %v160_v57 = vld [vmem:[%s6901_s23 + $0x300] sm:$0xff]  ;;  %v4396_v59 = vcombine.low %v152_v53, %v156_v54  ;;  %v146_v53 = vld [vmem:[%s6901_s23 + $0x290] sm:$0xff] }
  0x23   :  { %v164_v58 = vld [vmem:[%s6901_s23 + $0x320] sm:$0xff]  ;;  %v150_v54 = vld [vmem:[%s6901_s23 + $0x2b0] sm:$0xff] }
  0x24   :  { %1660 = vmatpush1.bf16.msra.mxu1 %v4348_v35  ;;  %v4405_v60 = vcombine.high %v160_v57, %v164_v58  ;;  %v168_v61 = vld [vmem:[%s6901_s23 + $0x340] sm:$0xff]  ;;  %v4404_v63 = vcombine.low %v160_v57, %v164_v58  ;;  %v110_v35 = vld [vmem:[%s6901_s23 + $0x170] sm:$0xff]  ;;  %v4392_v11 = vcombine.low %v146_v53, %v150_v54 }
  0x25   :  { %1661 = vmatprep.subr.bf16.mxu1 %v4357_v36  ;;  %v172_v62 = vld [vmem:[%s6901_s23 + $0x360] sm:$0xff]  ;;  %v4344_v36 = vcombine.low %v98_v30, %v102_v31  ;;  %v4353_v37 = vcombine.high %v106_v34, %v110_v35  ;;  %v186_v27 = vld [vmem:[%s6901_s23 + $0x3d0] sm:$0xff] }
  0x26   :  { %v4413_v1 = vcombine.high %v168_v61, %v172_v62  ;;  %v176_v2 = vld [vmem:[%s6901_s23 + $0x380] sm:$0xff]  ;;  %v4412_v5 = vcombine.low %v168_v61, %v172_v62 }
  0x27   :  { %v180_v3 = vld [vmem:[%s6901_s23 + $0x3a0] sm:$0xff] }
  0x28   :  { %1662 = vmatpush1.bf16.msra.mxu1 %v4356_v39  ;;  %v4421_v6 = vcombine.high %v176_v2, %v180_v3  ;;  %v184_v7 = vld [vmem:[%s6901_s23 + $0x3c0] sm:$0xff]  ;;  %v4420_v9 = vcombine.low %v176_v2, %v180_v3  ;;  %v118_v39 = vld [vmem:[%s6901_s23 + $0x1b0] sm:$0xff] }
  0x29   :  { %1663 = vmatprep.subr.bf16.mxu1 %v4365_v40  ;;  %v188_v8 = vld [vmem:[%s6901_s23 + $0x3e0] sm:$0xff]  ;;  %v4352_v40 = vcombine.low %v106_v34, %v110_v35  ;;  %v4361_v41 = vcombine.high %v114_v38, %v118_v39  ;;  %v211_v35 = vld [vmem:[%s6877_s6 + $0x10] sm:$0xff] }
  0x2a   :  { %v4429_v10 = vcombine.high %v184_v7, %v188_v8  ;;  %v4428_v13 = vcombine.low %v184_v7, %v188_v8  ;;  %v518_v14 = vld [vmem:[%s6903_s21] sm:$0xff]  ;;  %v154_v8 = vld [vmem:[%s6901_s23 + $0x2d0] sm:$0xff] }
  0x2b   :  { %v5604_v18 = vpack.c.bf16 %v518_v14, %v518_v14  ;;  %v196_v57 = vld [vmem:[%s6876_s4 + $0x20] sm:$0xff]  ;;  %v166_v14 = vld [vmem:[%s6901_s23 + $0x330] sm:$0xff] }
  0x2c   :  { %1664 = vmatpush1.bf16.msra.mxu1 %v4364_v43  ;;  %v126_v43 = vld [vmem:[%s6901_s23 + $0x1f0] sm:$0xff]  ;;  %v200_v58 = vld [vmem:[%s6876_s4 + $0x40] sm:$0xff] }
  0x2d   :  { %1665 = vmatprep.subr.bf16.mxu1 %v4373_v44  ;;  %v4360_v44 = vcombine.low %v114_v38, %v118_v39  ;;  %v4369_v45 = vcombine.high %v122_v42, %v126_v43  ;;  %v204_v62 = vld [vmem:[%s6876_s4 + $0x60] sm:$0xff] }
  0x2e   :  { %v4297_v2 = vcombine.high %v200_v58, %v204_v62  ;;  %v4296_v7 = vcombine.low %v200_v58, %v204_v62 }
  0x30   :  { %1666 = vmatpush1.bf16.msra.mxu1 %v4372_v47  ;;  %v134_v47 = vld [vmem:[%s6901_s23 + $0x230] sm:$0xff] }
  0x31   :  { %1667 = vmatprep.subr.bf16.mxu1 %v4381_v48  ;;  %v4368_v48 = vcombine.low %v122_v42, %v126_v43  ;;  %v4377_v49 = vcombine.high %v130_v46, %v134_v47 }
  0x34   :  { %1668 = vmatpush1.bf16.msra.mxu1 %v4380_v51  ;;  %v142_v51 = vld [vmem:[%s6901_s23 + $0x270] sm:$0xff] }
  0x35   :  { %1669 = vmatprep.subr.bf16.mxu1 %v4389_v52  ;;  %v4376_v52 = vcombine.low %v130_v46, %v134_v47 }
  0x38   :  { %1670 = vmatpush1.bf16.msra.mxu1 %v4388_v55  ;;  %v4385_v55 = vcombine.high %v138_v50, %v142_v51 }
  0x39   :  { %1671 = vmatprep.subr.bf16.mxu1 %v4397_v56  ;;  %v192_v56 = vld [vmem:[%s6876_s4] sm:$0xff] }
  0x3a   :  { %v4289_v61 = vcombine.high %v192_v56, %v196_v57 }
  0x3c   :  { %1672 = vmatpush1.bf16.msra.mxu1 %v4396_v59  ;;  %v5359_v59 = vmov 0   ;;  %845 = vmatprep.subr.bf16.mxu0 %v4289_v61  ;;  %v198_v61 = vld [vmem:[%s6876_s4 + $0x30] sm:$0xff] }
  0x3d   :  { %1673 = vmatprep.subr.bf16.mxu1 %v4405_v60  ;;  %877 = vmatprep.mubr.bf16.mxu0 %v5359_v59  ;;  %v4288_v60 = vcombine.low %v192_v56, %v196_v57 }
  0x3f   :  { %846 = vmatpush1.bf16.msra.mxu0 %v4288_v60  ;;  %v194_v60 = vld [vmem:[%s6876_s4 + $0x10] sm:$0xff] }
  0x40   :  { %1674 = vmatpush1.bf16.msra.mxu1 %v4404_v63  ;;  %v5678_v63 = vld [vmem:[%s6876_s4 + $0x8] sm:$0xff]  ;;  %847 = vmatprep.subr.bf16.mxu0 %v4297_v2  ;;  %v4293_v2 = vcombine.high %v194_v60, %v198_v61 }
  0x41   :  { %1675 = vmatprep.subr.bf16.mxu1 %v4413_v1  ;;  %v5683_v1 = vld [vmem:[%s6876_s4 + $0x28] sm:$0xff] }
  0x42   :  { %v4290_v3 = vcombine.low %v5678_v63, %v5683_v1 }
  0x43   :  { %848 = vmatpush1.bf16.msra.mxu0 %v4296_v7  ;;  %v4292_v7 = vcombine.low %v194_v60, %v198_v61  ;;  %v137_v60 = vld [vmem:[%s6901_s23 + $0x248] sm:$0xff] }
  0x44   :  { %1676 = vmatpush1.bf16.msra.mxu1 %v4412_v5  ;;  %v4384_v5 = vcombine.low %v138_v50, %v142_v51  ;;  %v141_v61 = vld [vmem:[%s6901_s23 + $0x268] sm:$0xff] }
  0x45   :  { %1677 = vmatprep.subr.bf16.mxu1 %v4421_v6  ;;  %v4393_v6 = vcombine.high %v146_v53, %v150_v54  ;;  %v201_v53 = vld [vmem:[%s6876_s4 + $0x48] sm:$0xff] }
  0x46   :  { %v205_v54 = vld [vmem:[%s6876_s4 + $0x68] sm:$0xff] }
  0x47   :  { %v4299_v58 = vcombine.high %v201_v53, %v205_v54  ;;  %v4298_v62 = vcombine.low %v201_v53, %v205_v54 }
  0x48   :  { %1678 = vmatpush1.bf16.msra.mxu1 %v4420_v9  ;;  %v158_v9 = vld [vmem:[%s6901_s23 + $0x2f0] sm:$0xff] }
  0x49   :  { %1679 = vmatprep.subr.bf16.mxu1 %v4429_v10  ;;  %v4291_v10 = vcombine.high %v5678_v63, %v5683_v1  ;;  %v4401_v12 = vcombine.high %v154_v8, %v158_v9  ;;  %v195_v63 = vld [vmem:[%s6876_s4 + $0x18] sm:$0xff] }
  0x4a   :  { %v199_v1 = vld [vmem:[%s6876_s4 + $0x38] sm:$0xff] }
  0x4b   :  { %886 = vmatprep.subr.bf16.mxu0 %v4291_v10  ;;  %v203_v10 = vld [vmem:[%s6876_s4 + $0x58] sm:$0xff] }
  0x4c   :  { %1680 = vmatpush1.bf16.msra.mxu1 %v4428_v13  ;;  %v162_v13 = vld [vmem:[%s6901_s23 + $0x310] sm:$0xff] }
  0x4d   :  { %1731 = vmatprep.subr.bf16.mxu1 %v4313_v15  ;;  %v4400_v15 = vcombine.low %v154_v8, %v158_v9  ;;  %v4409_v16 = vcombine.high %v162_v13, %v166_v14  ;;  %v4295_v9 = vcombine.high %v195_v63, %v199_v1 }
  0x4f   :  { %1682 = vmatmul.mubr.bf16.vlgmr.msra.gmra.mrb[4].mxu1 %v5604_v18 }
  0x50   :  { %1732 = vmatpush1.bf16.msra.mxu1 %v4312_v19  ;;  %1763 = vmatprep.mubr.bf16.mxu1 %v5514_v24  ;;  %v174_v19 = vld [vmem:[%s6901_s23 + $0x370] sm:$0xff] }
  0x51   :  { %1733 = vmatprep.subr.bf16.mxu1 %v4321_v20  ;;  %v4408_v20 = vcombine.low %v162_v13, %v166_v14  ;;  %v4417_v21 = vcombine.high %v170_v17, %v174_v19  ;;  %v65_v14 = vld [vmem:[%s6901_s23 + $0x8] sm:$0xff] }
  0x54   :  { %1734 = vmatpush1.bf16.msra.mxu1 %v4320_v23  ;;  %v182_v23 = vld [vmem:[%s6901_s23 + $0x3b0] sm:$0xff] }
  0x55   :  { %1735 = vmatprep.subr.bf16.mxu1 %v4329_v25  ;;  %v4416_v25 = vcombine.low %v170_v17, %v174_v19  ;;  %v4425_v26 = vcombine.high %v178_v22, %v182_v23  ;;  %v73_v19 = vld [vmem:[%s6901_s23 + $0x48] sm:$0xff] }
  0x58   :  { %1736 = vmatpush1.bf16.msra.mxu1 %v4328_v28  ;;  %v190_v28 = vld [vmem:[%s6901_s23 + $0x3f0] sm:$0xff] }
  0x59   :  { %1737 = vmatprep.subr.bf16.mxu1 %v4337_v29  ;;  %v4424_v29 = vcombine.low %v178_v22, %v182_v23  ;;  %v4433_v30 = vcombine.high %v186_v27, %v190_v28  ;;  %v4432_v31 = vcombine.low %v186_v27, %v190_v28  ;;  %v81_v23 = vld [vmem:[%s6901_s23 + $0x88] sm:$0xff] }
  0x5a   :  { %v89_v28 = vld [vmem:[%s6901_s23 + $0xc8] sm:$0xff] }
  0x5c   :  { %1738 = vmatpush1.bf16.msra.mxu1 %v4336_v32  ;;  %v209_v32 = vld [vmem:[%s6877_s6] sm:$0xff] }
  0x5d   :  { %1739 = vmatprep.subr.bf16.mxu1 %v4345_v33  ;;  %v210_v33 = vld [vmem:[%s6877_s6 + $0x8] sm:$0xff] }
  0x5e   :  { %v5725_v34 = vpack.c.bf16 %v210_v33, %v209_v32  ;;  %v97_v32 = vld [vmem:[%s6901_s23 + $0x108] sm:$0xff] }
  0x5f   :  { %v101_v33 = vld [vmem:[%s6901_s23 + $0x128] sm:$0xff] }
  0x60   :  { %1740 = vmatpush1.bf16.msra.mxu1 %v4344_v36  ;;  %v212_v36 = vld [vmem:[%s6877_s6 + $0x18] sm:$0xff] }
  0x61   :  { %1741 = vmatprep.subr.bf16.mxu1 %v4353_v37  ;;  %v5736_v37 = vpack.c.bf16 %v212_v36, %v211_v35  ;;  %v4343_v36 = vcombine.high %v97_v32, %v101_v33 }
  0x64   :  { %1742 = vmatpush1.bf16.msra.mxu1 %v4352_v40 }
  0x65   :  { %1743 = vmatprep.subr.bf16.mxu1 %v4361_v41 }
  0x68   :  { %1744 = vmatpush1.bf16.msra.mxu1 %v4360_v44 }
  0x69   :  { %1745 = vmatprep.subr.bf16.mxu1 %v4369_v45 }
  0x6c   :  { %1746 = vmatpush1.bf16.msra.mxu1 %v4368_v48 }
  0x6d   :  { %1747 = vmatprep.subr.bf16.mxu1 %v4377_v49 }
  0x70   :  { %1748 = vmatpush1.bf16.msra.mxu1 %v4376_v52 }
  0x71   :  { %1749 = vmatprep.subr.bf16.mxu1 %v4385_v55 }
  0x74   :  { %1750 = vmatpush1.bf16.msra.mxu1 %v4384_v5  ;;  %v202_v5 = vld [vmem:[%s6876_s4 + $0x50] sm:$0xff] }
  0x75   :  { %1751 = vmatprep.subr.bf16.mxu1 %v4393_v6  ;;  %v206_v6 = vld [vmem:[%s6876_s4 + $0x70] sm:$0xff] }
  0x76   :  { %v4301_v8 = vcombine.high %v202_v5, %v206_v6 }
  0x78   :  { %1752 = vmatpush1.bf16.msra.mxu1 %v4392_v11  ;;  %v207_v11 = vld [vmem:[%s6876_s4 + $0x78] sm:$0xff] }
  0x79   :  { %1753 = vmatprep.subr.bf16.mxu1 %v4401_v12  ;;  %v4294_v12 = vcombine.low %v195_v63, %v199_v1  ;;  %v4303_v13 = vcombine.high %v203_v10, %v207_v11  ;;  %v153_v63 = vld [vmem:[%s6901_s23 + $0x2c8] sm:$0xff] }
  0x7a   :  { %v157_v1 = vld [vmem:[%s6901_s23 + $0x2e8] sm:$0xff] }
  0x7c   :  { %1754 = vmatpush1.bf16.msra.mxu1 %v4400_v15  ;;  %v69_v15 = vld [vmem:[%s6901_s23 + $0x28] sm:$0xff] }
  0x7d   :  { %1755 = vmatprep.subr.bf16.mxu1 %v4409_v16  ;;  %v4302_v16 = vcombine.low %v203_v10, %v207_v11  ;;  %v4311_v17 = vcombine.high %v65_v14, %v69_v15  ;;  %v161_v10 = vld [vmem:[%s6901_s23 + $0x308] sm:$0xff] }
  0x7e   :  { %v165_v11 = vld [vmem:[%s6901_s23 + $0x328] sm:$0xff] }
  0x80   :  { %1756 = vmatpush1.bf16.msra.mxu1 %v4408_v20  ;;  %v77_v20 = vld [vmem:[%s6901_s23 + $0x68] sm:$0xff] }
  0x81   :  { %1757 = vmatprep.subr.bf16.mxu1 %v4417_v21  ;;  %v4310_v21 = vcombine.low %v65_v14, %v69_v15  ;;  %v4319_v22 = vcombine.high %v73_v19, %v77_v20  ;;  %v169_v14 = vld [vmem:[%s6901_s23 + $0x348] sm:$0xff] }
  0x82   :  { %v173_v15 = vld [vmem:[%s6901_s23 + $0x368] sm:$0xff] }
  0x84   :  { %1758 = vmatpush1.bf16.msra.mxu1 %v4416_v25  ;;  %v85_v25 = vld [vmem:[%s6901_s23 + $0xa8] sm:$0xff] }
  0x85   :  { %1759 = vmatprep.subr.bf16.mxu1 %v4425_v26  ;;  %v4318_v26 = vcombine.low %v73_v19, %v77_v20  ;;  %v4327_v27 = vcombine.high %v81_v23, %v85_v25  ;;  %v177_v19 = vld [vmem:[%s6901_s23 + $0x388] sm:$0xff] }
  0x86   :  { %v181_v20 = vld [vmem:[%s6901_s23 + $0x3a8] sm:$0xff] }
  0x88   :  { %1760 = vmatpush1.bf16.msra.mxu1 %v4424_v29  ;;  %v93_v29 = vld [vmem:[%s6901_s23 + $0xe8] sm:$0xff] }
  0x89   :  { %1761 = vmatprep.subr.bf16.mxu1 %v4433_v30  ;;  %v4326_v30 = vcombine.low %v81_v23, %v85_v25  ;;  %v4334_v35 = vcombine.low %v89_v28, %v93_v29  ;;  %v185_v23 = vld [vmem:[%s6901_s23 + $0x3c8] sm:$0xff] }
  0x8a   :  { %v189_v25 = vld [vmem:[%s6901_s23 + $0x3e8] sm:$0xff] }
  0x8c   :  { %1762 = vmatpush1.bf16.msra.mxu1 %v4432_v31  ;;  %v4335_v31 = vcombine.high %v89_v28, %v93_v29  ;;  %v67_v28 = vld [vmem:[%s6901_s23 + $0x18] sm:$0xff] }
  0x8d   :  { %4965 = vmatprep.subr.bf16.mxu1 %v5356_v0  ;;  %v71_v29 = vld [vmem:[%s6901_s23 + $0x38] sm:$0xff] }
  0x8f   :  { %1764 = vmatmul.mubr.bf16.vlgmr.msra.gmra.mrb[8].mxu1 %v5604_v18 }
  0x90   :  { %4967 = vmatpush3.bf16.msra.mxu1 %v5725_v34  ;;  %4865 = vmatprep.mubr.msk.f32.mxu1 %vm5357_vm0, %v5358_v4 }
  0x91   :  { %4968 = vmatprep.subr.bf16.mxu1 %v5356_v0 }
  0x94   :  { %4970 = vmatpush3.bf16.msra.mxu1 %v5736_v37 }
  0x95   :  { %4977 = vmatprep.subr.bf16.mxu1 %v5356_v0 }
  0xe1   :  { %v595_v38 = vpop.f32.mrb[0].mxu0  ;;  %v5743_v39 = vpop.f32.mrb[0].mxu1 }
  0xe2   :  { %v745_v40 = vmul.f32 %v595_v38, %v595_v38  ;;  %v4842_v41 = vpop.f32.mrb[1].mxu0  ;;  %v746_v42 = vmul.f32 %v5743_v39, %v5743_v39  ;;  %4866 = vmatmul.mubr.msk.f32.vlgmr.msra.gmra.mrb[2].mxu1 %vm841_vm2, %v595_v38  ;;  %v4849_v43 = vpop.f32.mrb[1].mxu1  ;;  %v105_v38 = vld [vmem:[%s6901_s23 + $0x148] sm:$0xff] }
  0xe3   :  { %4979 = vmatpush3.bf16.msra.mxu1 %v5725_v34  ;;  %4887 = vmatprep.mubr.msk.f32.mxu1 %vm5357_vm0, %v5358_v4  ;;  %v4342_v41 = vcombine.low %v97_v32, %v101_v33  ;;  %v75_v32 = vld [vmem:[%s6901_s23 + $0x58] sm:$0xff] }
  0xe4   :  { %v747_v44 = vadd.f32 %v746_v42, %v745_v40  ;;  %4980 = vmatprep.subr.bf16.mxu1 %v5356_v0  ;;  %v109_v40 = vld [vmem:[%s6901_s23 + $0x168] sm:$0xff]  ;;  %v79_v33 = vld [vmem:[%s6901_s23 + $0x78] sm:$0xff] }
  0xe5   :  { %v741_v45 = vpop.f32.mrb[2].mxu0  ;;  %v4351_v43 = vcombine.high %v105_v38, %v109_v40 }
  0xe6   :  { %v748_v46 = vmul.f32 %v741_v45, %v741_v45  ;;  %v4856_v47 = vpop.f32.mrb[3].mxu0 }
  0xe7   :  { %4982 = vmatpush3.bf16.msra.mxu1 %v5736_v37 }
  0xe8   :  { %v749_v48 = vadd.f32 %v748_v46, %v747_v44  ;;  %v117_v46 = vld [vmem:[%s6901_s23 + $0x1a8] sm:$0xff] }
  0xea   :  { %v750_v49 = vmax.f32 %v749_v48, 1e-08  ;;  %4888 = vmatmul.mubr.msk.f32.vlgmr.msra.gmra.mrb[12].mxu1 %vm841_vm2, %v741_v45  ;;  %v113_v45 = vld [vmem:[%s6901_s23 + $0x188] sm:$0xff] }
  0xeb   :  { %v4358_v53 = vcombine.low %v113_v45, %v117_v46 }
  0xec   :  { %5301 = vrsqrt.f32 %v750_v49  ;;  %vm753_vm3 = vcmp.eq.f32.partialorder %v750_v49, inf  ;;  %v756_v52 = vand.u32 2147483648, %v750_v49  ;;  %vm755_vm4 = vcmp.eq.f32.partialorder %v750_v49, 0.0 }
  0xf6   :  { %v5302_v50 = vpop.eup %5301 }
  0xf7   :  { %v752_v51 = vmul.f32 %v5302_v50, %v750_v49  ;;  %v4359_v50 = vcombine.high %v113_v45, %v117_v46  ;;  %v95_v45 = vld [vmem:[%s6901_s23 + $0xf8] sm:$0xff] }
  0xf9   :  { %v754_v55 = vsel %vm753_vm3, %v750_v49, %v752_v51  ;;  %v4350_v49 = vcombine.low %v105_v38, %v109_v40  ;;  %v121_v51 = vld [vmem:[%s6901_s23 + $0x1c8] sm:$0xff]  ;;  %v87_v38 = vld [vmem:[%s6901_s23 + $0xb8] sm:$0xff]  ;;  %v4323_v40 = vcombine.high %v75_v32, %v79_v33 }
  0xfa   :  { %v757_v56 = vsel %vm755_vm4, %v756_v52, %v754_v55  ;;  %v125_v52 = vld [vmem:[%s6901_s23 + $0x1e8] sm:$0xff] }
  0xfb   :  { %v760_v57 = vpack.c.bf16 %v757_v56, %v757_v56  ;;  %v4367_v54 = vcombine.high %v121_v51, %v125_v52  ;;  %v129_v55 = vld [vmem:[%s6901_s23 + $0x208] sm:$0xff] }
  0xfc   :  { %v133_v56 = vld [vmem:[%s6901_s23 + $0x228] sm:$0xff] }
  0xfd   :  { %4304 = vmatmul.mubr.msk.bf16.vlgmr.msra.gmra.mrb[4].mxu0 %vm841_vm2, %v760_v57 }
  0xfe   :  { %887 = vmatpush1.bf16.msra.mxu0 %v4290_v3  ;;  %918 = vmatprep.mubr.bf16.mxu0 %v5359_v59  ;;  %v4300_v3 = vcombine.low %v202_v5, %v206_v6  ;;  %v145_v5 = vld [vmem:[%s6901_s23 + $0x288] sm:$0xff] }
  0xff   :  { %888 = vmatprep.subr.bf16.mxu0 %v4299_v58  ;;  %v4375_v58 = vcombine.high %v129_v55, %v133_v56  ;;  %v149_v6 = vld [vmem:[%s6901_s23 + $0x2a8] sm:$0xff] }
 0x102   :  { %889 = vmatpush1.bf16.msra.mxu0 %v4298_v62  ;;  %v4374_v62 = vcombine.low %v129_v55, %v133_v56 }
 0x103   :  { %927 = vmatprep.subr.bf16.mxu0 %v4293_v2  ;;  %v4383_v2 = vcombine.high %v137_v60, %v141_v61 }
 0x105   :  { %4305 = vmatmul.mubr.msk.bf16.vlgmr.msra.gmra.mrb[8].mxu0 %vm841_vm2, %v760_v57 }
 0x106   :  { %928 = vmatpush1.bf16.msra.mxu0 %v4292_v7  ;;  %959 = vmatprep.mubr.bf16.mxu0 %v5359_v59  ;;  %v4382_v7 = vcombine.low %v137_v60, %v141_v61  ;;  %v119_v60 = vld [vmem:[%s6901_s23 + $0x1b8] sm:$0xff] }
 0x107   :  { %929 = vmatprep.subr.bf16.mxu0 %v4301_v8  ;;  %v4391_v8 = vcombine.high %v145_v5, %v149_v6 }
 0x10a   :  { %930 = vmatpush1.bf16.msra.mxu0 %v4300_v3  ;;  %v4390_v3 = vcombine.low %v145_v5, %v149_v6  ;;  %v123_v5 = vld [vmem:[%s6901_s23 + $0x1d8] sm:$0xff] }
 0x10b   :  { %968 = vmatprep.subr.bf16.mxu0 %v4295_v9  ;;  %v4399_v9 = vcombine.high %v153_v63, %v157_v1  ;;  %v127_v6 = vld [vmem:[%s6901_s23 + $0x1f8] sm:$0xff] }
 0x10d   :  { %4306 = vmatmul.mubr.msk.bf16.vlgmr.msra.gmra.mrb[12].mxu0 %vm841_vm2, %v760_v57 }
 0x10e   :  { %969 = vmatpush1.bf16.msra.mxu0 %v4294_v12  ;;  %1000 = vmatprep.mubr.bf16.mxu0 %v5359_v59  ;;  %v4398_v12 = vcombine.low %v153_v63, %v157_v1  ;;  %v131_v63 = vld [vmem:[%s6901_s23 + $0x218] sm:$0xff] }
 0x10f   :  { %970 = vmatprep.subr.bf16.mxu0 %v4303_v13  ;;  %v4407_v13 = vcombine.high %v161_v10, %v165_v11  ;;  %v135_v1 = vld [vmem:[%s6901_s23 + $0x238] sm:$0xff] }
 0x112   :  { %971 = vmatpush1.bf16.msra.mxu0 %v4302_v16  ;;  %v4406_v16 = vcombine.low %v161_v10, %v165_v11  ;;  %v139_v10 = vld [vmem:[%s6901_s23 + $0x258] sm:$0xff] }
 0x113   :  { %1690 = vmatprep.subr.bf16.mxu0 %v4311_v17  ;;  %v4415_v17 = vcombine.high %v169_v14, %v173_v15  ;;  %v143_v11 = vld [vmem:[%s6901_s23 + $0x278] sm:$0xff] }
 0x115   :  { %4307 = vmatmul.mubr.msk.bf16.vlgmr.msra.gmra.mrb[16].mxu0 %vm841_vm2, %v760_v57  ;;  %v4366_v57 = vcombine.low %v121_v51, %v125_v52 }
 0x116   :  { %1691 = vmatpush1.bf16.msra.mxu0 %v4310_v21  ;;  %1722 = vmatprep.mubr.bf16.mxu0 %v5514_v24  ;;  %v4414_v21 = vcombine.low %v169_v14, %v173_v15  ;;  %v147_v14 = vld [vmem:[%s6901_s23 + $0x298] sm:$0xff]  ;;  %v4387_v15 = vcombine.high %v139_v10, %v143_v11 }
 0x117   :  { %1692 = vmatprep.subr.bf16.mxu0 %v4319_v22  ;;  %v4423_v22 = vcombine.high %v177_v19, %v181_v20 }
 0x11a   :  { %1693 = vmatpush1.bf16.msra.mxu0 %v4318_v26  ;;  %v4422_v26 = vcombine.low %v177_v19, %v181_v20  ;;  %v155_v19 = vld [vmem:[%s6901_s23 + $0x2d8] sm:$0xff] }
 0x11b   :  { %1694 = vmatprep.subr.bf16.mxu0 %v4327_v27  ;;  %v4431_v27 = vcombine.high %v185_v23, %v189_v25 }
 0x11e   :  { %1695 = vmatpush1.bf16.msra.mxu0 %v4326_v30  ;;  %v4430_v30 = vcombine.low %v185_v23, %v189_v25  ;;  %v163_v23 = vld [vmem:[%s6901_s23 + $0x318] sm:$0xff] }
 0x11f   :  { %1696 = vmatprep.subr.bf16.mxu0 %v4335_v31  ;;  %v4315_v31 = vcombine.high %v67_v28, %v71_v29 }
 0x122   :  { %1697 = vmatpush1.bf16.msra.mxu0 %v4334_v35  ;;  %v5831_v42 = vpop.f32.mrb[4].mxu1  ;;  %v4314_v35 = vcombine.low %v67_v28, %v71_v29  ;;  %v171_v28 = vld [vmem:[%s6901_s23 + $0x358] sm:$0xff] }
 0x123   :  { %1698 = vmatprep.subr.bf16.mxu0 %v4343_v36  ;;  %v5833_v44 = vpop.f32.mrb[5].mxu1  ;;  %v83_v36 = vld [vmem:[%s6901_s23 + $0x98] sm:$0xff] }
 0x124   :  { %v1687_v47 = vpop.f32.mrb[6].mxu1  ;;  %v4331_v46 = vcombine.high %v83_v36, %v87_v38 }
 0x125   :  { %v1688_v48 = vpop.f32.mrb[7].mxu1  ;;  %v4330_v47 = vcombine.low %v83_v36, %v87_v38 }
 0x126   :  { %1699 = vmatpush1.bf16.msra.mxu0 %v4342_v41  ;;  %v4322_v41 = vcombine.low %v75_v32, %v79_v33  ;;  %v99_v48 = vld [vmem:[%s6901_s23 + $0x118] sm:$0xff] }
 0x127   :  { %1700 = vmatprep.subr.bf16.mxu0 %v4351_v43  ;;  %v91_v43 = vld [vmem:[%s6901_s23 + $0xd8] sm:$0xff] }
 0x128   :  { %v4338_v51 = vcombine.low %v91_v43, %v95_v45  ;;  %v179_v32 = vld [vmem:[%s6901_s23 + $0x398] sm:$0xff] }
 0x12a   :  { %1701 = vmatpush1.bf16.msra.mxu0 %v4350_v49  ;;  %v103_v49 = vld [vmem:[%s6901_s23 + $0x138] sm:$0xff] }
 0x12b   :  { %1702 = vmatprep.subr.bf16.mxu0 %v4359_v50  ;;  %v4339_v50 = vcombine.high %v91_v43, %v95_v45  ;;  %v4347_v52 = vcombine.high %v99_v48, %v103_v49 }
 0x12e   :  { %1703 = vmatpush1.bf16.msra.mxu0 %v4358_v53  ;;  %v111_v53 = vld [vmem:[%s6901_s23 + $0x178] sm:$0xff] }
 0x12f   :  { %1704 = vmatprep.subr.bf16.mxu0 %v4367_v54  ;;  %v4346_v54 = vcombine.low %v99_v48, %v103_v49  ;;  %v5024_v48 = vld [vmem:[%s6878_s7] sm:$0xff]   ;;  %v5028_v49 = vld [vmem:[%s6878_s7 + $0x10] sm:$0xff]  }
 0x132   :  { %1705 = vmatpush1.bf16.msra.mxu0 %v4366_v57  ;;  %v115_v57 = vld [vmem:[%s6901_s23 + $0x198] sm:$0xff] }
 0x133   :  { %1706 = vmatprep.subr.bf16.mxu0 %v4375_v58 }
 0x136   :  { %1707 = vmatpush1.bf16.msra.mxu0 %v4374_v62 }
 0x137   :  { %1708 = vmatprep.subr.bf16.mxu0 %v4383_v2 }
 0x13a   :  { %1709 = vmatpush1.bf16.msra.mxu0 %v4382_v7  ;;  %v4363_v7 = vcombine.high %v115_v57, %v119_v60 }
 0x13b   :  { %1710 = vmatprep.subr.bf16.mxu0 %v4391_v8  ;;  %v4362_v8 = vcombine.low %v115_v57, %v119_v60  ;;  %v5034_v57 = vld [vmem:[%s6878_s7 + $0x28] sm:$0xff]  }
 0x13c   :  { %v5058_v60 = vld [vmem:[%s6878_s7 + $0x88] sm:$0xff]  }
 0x13e   :  { %1711 = vmatpush1.bf16.msra.mxu0 %v4390_v3  ;;  %v4371_v3 = vcombine.high %v123_v5, %v127_v6 }
 0x13f   :  { %1712 = vmatprep.subr.bf16.mxu0 %v4399_v9  ;;  %v4370_v9 = vcombine.low %v123_v5, %v127_v6  ;;  %v5060_v5 = vld [vmem:[%s6878_s7 + $0x90] sm:$0xff]   ;;  %v5037_v6 = vld [vmem:[%s6878_s7 + $0x78] sm:$0xff]  }
 0x142   :  { %1713 = vmatpush1.bf16.msra.mxu0 %v4398_v12  ;;  %v4379_v12 = vcombine.high %v131_v63, %v135_v1 }
 0x143   :  { %1714 = vmatprep.subr.bf16.mxu0 %v4407_v13  ;;  %v4378_v13 = vcombine.low %v131_v63, %v135_v1  ;;  %v5038_v1 = vld [vmem:[%s6878_s7 + $0x38] sm:$0xff]  }
 0x146   :  { %1715 = vmatpush1.bf16.msra.mxu0 %v4406_v16  ;;  %v151_v16 = vld [vmem:[%s6901_s23 + $0x2b8] sm:$0xff] }
 0x147   :  { %1716 = vmatprep.subr.bf16.mxu0 %v4415_v17  ;;  %v4386_v17 = vcombine.low %v139_v10, %v143_v11  ;;  %v4395_v20 = vcombine.high %v147_v14, %v151_v16  ;;  %v5063_v10 = vld [vmem:[%s6878_s7 + $0xe0] sm:$0xff]  }
 0x148   :  { %v5064_v11 = vld [vmem:[%s6878_s7 + $0xa0] sm:$0xff]  }
 0x14a   :  { %1717 = vmatpush1.bf16.msra.mxu0 %v4414_v21  ;;  %v159_v21 = vld [vmem:[%s6901_s23 + $0x2f8] sm:$0xff] }
 0x14b   :  { %1718 = vmatprep.subr.bf16.mxu0 %v4423_v22  ;;  %v4394_v22 = vcombine.low %v147_v14, %v151_v16  ;;  %v4403_v25 = vcombine.high %v155_v19, %v159_v21 }
 0x14e   :  { %1719 = vmatpush1.bf16.msra.mxu0 %v4422_v26  ;;  %v167_v26 = vld [vmem:[%s6901_s23 + $0x338] sm:$0xff] }
 0x14f   :  { %1720 = vmatprep.subr.bf16.mxu0 %v4431_v27  ;;  %v4402_v27 = vcombine.low %v155_v19, %v159_v21  ;;  %v4411_v29 = vcombine.high %v163_v23, %v167_v26  ;;  %v5069_v19 = vld [vmem:[%s6878_s7 + $0xf8] sm:$0xff]  }
 0x150   :  { %v5070_v21 = vld [vmem:[%s6878_s7 + $0xb8] sm:$0xff]  }
 0x152   :  { %1721 = vmatpush1.bf16.msra.mxu0 %v4430_v30  ;;  %v175_v30 = vld [vmem:[%s6901_s23 + $0x378] sm:$0xff] }
 0x153   :  { %1772 = vmatprep.subr.bf16.mxu0 %v4315_v31  ;;  %v4410_v31 = vcombine.low %v163_v23, %v167_v26  ;;  %v4419_v33 = vcombine.high %v171_v28, %v175_v30  ;;  %v4418_v36 = vcombine.low %v171_v28, %v175_v30 }
 0x155   :  { %1723 = vmatmul.mubr.bf16.vlgmr.msra.gmra.mrb[20].mxu0 %v5604_v18 }
 0x156   :  { %1773 = vmatpush1.bf16.msra.mxu0 %v4314_v35  ;;  %1804 = vmatprep.mubr.bf16.mxu0 %v5514_v24  ;;  %v107_v24 = vld [vmem:[%s6901_s23 + $0x158] sm:$0xff] }
 0x157   :  { %1774 = vmatprep.subr.bf16.mxu0 %v4323_v40  ;;  %v4355_v56 = vcombine.high %v107_v24, %v111_v53  ;;  %v4354_v2 = vcombine.low %v107_v24, %v111_v53  ;;  %v183_v35 = vld [vmem:[%s6901_s23 + $0x3b8] sm:$0xff]  ;;  %v5055_v24 = vld [vmem:[%s6878_s7 + $0xc0] sm:$0xff]  }
 0x158   :  { %v4427_v38 = vcombine.high %v179_v32, %v183_v35  ;;  %v187_v40 = vld [vmem:[%s6901_s23 + $0x3d8] sm:$0xff]  ;;  %v4426_v43 = vcombine.low %v179_v32, %v183_v35  ;;  %v5056_v53 = vld [vmem:[%s6878_s7 + $0x80] sm:$0xff]   ;;  %4718 = vmatprep.subr.bf16.mxu1 %v5055_v24 }
 0x159   :  { %4719 = vmatpush3.bf16.msra.mxu1 %v5056_v53 }
 0x15a   :  { %1775 = vmatpush1.bf16.msra.mxu0 %v4322_v41  ;;  %v191_v41 = vld [vmem:[%s6901_s23 + $0x3f8] sm:$0xff] }
 0x15b   :  { %1776 = vmatprep.subr.bf16.mxu0 %v4331_v46  ;;  %v4435_v45 = vcombine.high %v187_v40, %v191_v41  ;;  %v4434_v46 = vcombine.low %v187_v40, %v191_v41 }
 0x15e   :  { %1777 = vmatpush1.bf16.msra.mxu0 %v4330_v47  ;;  %v5023_v47 = vld [vmem:[%s6878_s7 + $0x40] sm:$0xff]  }
 0x15f   :  { %1778 = vmatprep.subr.bf16.mxu0 %v4339_v50  ;;  %v5030_v50 = vld [vmem:[%s6878_s7 + $0x18] sm:$0xff]  }
 0x162   :  { %1779 = vmatpush1.bf16.msra.mxu0 %v4338_v51  ;;  %v5933_v55 = vpop.f32.mrb[8].mxu1  ;;  %v5031_v51 = vld [vmem:[%s6878_s7 + $0x60] sm:$0xff]  }
 0x163   :  { %1780 = vmatprep.subr.bf16.mxu0 %v4347_v52  ;;  %v5938_v58 = vpop.f32.mrb[9].mxu1  ;;  %v5032_v52 = vld [vmem:[%s6878_s7 + $0x20] sm:$0xff]  }
 0x164   :  { %v1769_v61 = vpop.f32.mrb[10].mxu1 }
 0x165   :  { %v1770_v62 = vpop.f32.mrb[11].mxu1  ;;  %v5035_v61 = vld [vmem:[%s6878_s7 + $0x70] sm:$0xff]  }
 0x166   :  { %1781 = vmatpush1.bf16.msra.mxu0 %v4346_v54  ;;  %v5033_v54 = vld [vmem:[%s6878_s7 + $0x68] sm:$0xff]   ;;  %v5059_v62 = vld [vmem:[%s6878_s7 + $0xd0] sm:$0xff]  }
 0x167   :  { %1782 = vmatprep.subr.bf16.mxu0 %v4355_v56  ;;  %v5057_v56 = vld [vmem:[%s6878_s7 + $0xc8] sm:$0xff]  }
 0x168   :  { %4720 = vmatprep.subr.bf16.mxu1 %v5057_v56 }
 0x169   :  { %4721 = vmatpush3.bf16.msra.mxu1 %v5058_v60 }
 0x16a   :  { %1783 = vmatpush1.bf16.msra.mxu0 %v4354_v2  ;;  %v5036_v2 = vld [vmem:[%s6878_s7 + $0x30] sm:$0xff]   ;;  %4722 = vmatprep.subr.bf16.mxu1 %v5059_v62 }
 0x16b   :  { %1784 = vmatprep.subr.bf16.mxu0 %v4363_v7 }
 0x16d   :  { %4723 = vmatpush3.bf16.msra.mxu1 %v5060_v5 }
 0x16e   :  { %1785 = vmatpush1.bf16.msra.mxu0 %v4362_v8  ;;  %v5061_v8 = vld [vmem:[%s6878_s7 + $0xd8] sm:$0xff]  }
 0x16f   :  { %1786 = vmatprep.subr.bf16.mxu0 %v4371_v3  ;;  %v5062_v3 = vld [vmem:[%s6878_s7 + $0x98] sm:$0xff]   ;;  %4724 = vmatprep.subr.bf16.mxu1 %v5061_v8 }
 0x171   :  { %4725 = vmatpush3.bf16.msra.mxu1 %v5062_v3 }
 0x172   :  { %1787 = vmatpush1.bf16.msra.mxu0 %v4370_v9  ;;  %v5039_v9 = vld [vmem:[%s6878_s7 + $0x140] sm:$0xff]   ;;  %4726 = vmatprep.subr.bf16.mxu1 %v5063_v10 }
 0x173   :  { %1788 = vmatprep.subr.bf16.mxu0 %v4379_v12  ;;  %v5065_v12 = vld [vmem:[%s6878_s7 + $0xe8] sm:$0xff]  }
 0x175   :  { %4727 = vmatpush3.bf16.msra.mxu1 %v5064_v11 }
 0x176   :  { %1789 = vmatpush1.bf16.msra.mxu0 %v4378_v13  ;;  %v5066_v13 = vld [vmem:[%s6878_s7 + $0xa8] sm:$0xff]   ;;  %4728 = vmatprep.subr.bf16.mxu1 %v5065_v12 }
 0x177   :  { %1790 = vmatprep.subr.bf16.mxu0 %v4387_v15  ;;  %v5067_v15 = vld [vmem:[%s6878_s7 + $0xf0] sm:$0xff]   ;;  %v5042_v12 = vld [vmem:[%s6878_s7 + $0x108] sm:$0xff]  }
 0x179   :  { %4729 = vmatpush3.bf16.msra.mxu1 %v5066_v13  ;;  %v5043_v13 = vld [vmem:[%s6878_s7 + $0x150] sm:$0xff]  }
 0x17a   :  { %1791 = vmatpush1.bf16.msra.mxu0 %v4386_v17  ;;  %v5068_v17 = vld [vmem:[%s6878_s7 + $0xb0] sm:$0xff]   ;;  %4730 = vmatprep.subr.bf16.mxu1 %v5067_v15 }
 0x17b   :  { %1792 = vmatprep.subr.bf16.mxu0 %v4395_v20  ;;  %v1814_v20 = vlaneseq  ;;  %v5044_v15 = vld [vmem:[%s6878_s7 + $0x110] sm:$0xff]  }
 0x17d   :  { %4731 = vmatpush3.bf16.msra.mxu1 %v5068_v17  ;;  %v5046_v17 = vld [vmem:[%s6878_s7 + $0x118] sm:$0xff]  }
 0x17e   :  { %1793 = vmatpush1.bf16.msra.mxu0 %v4394_v22  ;;  %4732 = vmatprep.subr.bf16.mxu1 %v5069_v19  ;;  %v6109_v22 = vshrl.u32 %v1814_v20, 7  ;;  %v5047_v20 = vld [vmem:[%s6878_s7 + $0x160] sm:$0xff]  }
 0x17f   :  { %1794 = vmatprep.subr.bf16.mxu0 %v4403_v25  ;;  %v6117_v25 = vld [vmem:[%s6879_s5] sm:$0xff] }
 0x180   :  { %v6112_v23 = vsub.s32 0, %v6109_v22  ;;  %v6120_v26 = vsub.s32 1, %v6109_v22  ;;  %v1832_v24 = vsub.s32 4, %v6109_v22 }
 0x181   :  { %4733 = vmatpush3.bf16.msra.mxu1 %v5070_v21 }
 0x182   :  { %1795 = vmatpush1.bf16.msra.mxu0 %v4402_v27  ;;  %v1817_v27 = vrot.slane %v6117_v25, %v6112_v23 }
 0x183   :  { %1796 = vmatprep.subr.bf16.mxu0 %v4411_v29  ;;  %v1821_v29 = vrot.slane %v6117_v25, %v6120_v26 }
 0x186   :  { %1797 = vmatpush1.bf16.msra.mxu0 %v4410_v31 }
 0x187   :  { %1798 = vmatprep.subr.bf16.mxu0 %v4419_v33 }
 0x18a   :  { %1799 = vmatpush1.bf16.msra.mxu0 %v4418_v36 }
 0x18b   :  { %1800 = vmatprep.subr.bf16.mxu0 %v4427_v38 }
 0x18e   :  { %1801 = vmatpush1.bf16.msra.mxu0 %v4426_v43 }
 0x18f   :  { %1802 = vmatprep.subr.bf16.mxu0 %v4435_v45 }
 0x192   :  { %1803 = vmatpush1.bf16.msra.mxu0 %v4434_v46 }
 0x193   :  { %4971 = vmatprep.subr.bf16.mxu0 %v5356_v0 }
 0x195   :  { %1805 = vmatmul.mubr.bf16.vlgmr.msra.gmra.mrb[24].mxu0 %v5604_v18  ;;  %v5025_v18 = vld [vmem:[%s6878_s7 + $0x48] sm:$0xff]  }
 0x196   :  { %4973 = vmatpush3.bf16.msra.mxu0 %v5725_v34  ;;  %4876 = vmatprep.mubr.msk.f32.mxu0 %vm5357_vm0, %v5358_v4  ;;  %v5026_v34 = vld [vmem:[%s6878_s7 + $0x8] sm:$0xff]  }
 0x197   :  { %4974 = vmatprep.subr.bf16.mxu0 %v5356_v0 }
 0x19a   :  { %4976 = vmatpush3.bf16.msra.mxu0 %v5736_v37  ;;  %v5027_v37 = vld [vmem:[%s6878_s7 + $0x50] sm:$0xff]  }
 0x19b   :  { %4696 = vmatprep.subr.bf16.mxu0 %v5023_v47 }
 0x19d   :  { %4877 = vmatmul.mubr.msk.f32.vlgmr.msra.gmra.mrb[28].mxu0 %vm841_vm2, %v5743_v39  ;;  %v5029_v39 = vld [vmem:[%s6878_s7 + $0x58] sm:$0xff]  }
 0x19e   :  { %4697 = vmatpush3.bf16.msra.mxu0 %v5024_v48 }
 0x19f   :  { %4698 = vmatprep.subr.bf16.mxu0 %v5025_v18 }
 0x1a2   :  { %4699 = vmatpush3.bf16.msra.mxu0 %v5026_v34 }
 0x1a3   :  { %4700 = vmatprep.subr.bf16.mxu0 %v5027_v37 }
 0x1a6   :  { %4701 = vmatpush3.bf16.msra.mxu0 %v5028_v49 }
 0x1a7   :  { %4702 = vmatprep.subr.bf16.mxu0 %v5029_v39 }
 0x1aa   :  { %4703 = vmatpush3.bf16.msra.mxu0 %v5030_v50 }
 0x1ab   :  { %4704 = vmatprep.subr.bf16.mxu0 %v5031_v51 }
 0x1ae   :  { %4705 = vmatpush3.bf16.msra.mxu0 %v5032_v52 }
 0x1af   :  { %4706 = vmatprep.subr.bf16.mxu0 %v5033_v54 }
 0x1b2   :  { %4707 = vmatpush3.bf16.msra.mxu0 %v5034_v57  ;;  %v1833_v57 = vrot.slane %v6117_v25, %v1832_v24 }
 0x1b3   :  { %4708 = vmatprep.subr.bf16.mxu0 %v5035_v61 }
 0x1b5   :  { %v6069_v7 = vpop.f32.mrb[2].mxu1 }
 0x1b6   :  { %v4867_v63 = vpop.f32.mrb[3].mxu1  ;;  %4709 = vmatpush3.bf16.msra.mxu0 %v5036_v2 }
 0x1b7   :  { %4710 = vmatprep.subr.bf16.mxu0 %v5037_v6 }
 0x1ba   :  { %4711 = vmatpush3.bf16.msra.mxu0 %v5038_v1  ;;  %v5040_v1 = vld [vmem:[%s6878_s7 + $0x100] sm:$0xff]  }
 0x1bb   :  { %4740 = vmatprep.subr.bf16.mxu0 %v5039_v9  ;;  %v5041_v9 = vld [vmem:[%s6878_s7 + $0x148] sm:$0xff]  }
 0x1bd   :  { %v6095_v14 = vpop.f32.mrb[12].mxu1 }
 0x1be   :  { %v4889_v16 = vpop.f32.mrb[13].mxu1 }
 0x1bf   :  { %v5045_v16 = vld [vmem:[%s6878_s7 + $0x158] sm:$0xff]  }
 0x1d0   :  { %v879_v28 = vpop.f32.mrb[4].mxu0 }
 0x1d1   :  { %v1684_v30 = vadd.f32 %v5831_v42, %v879_v28  ;;  %v881_v31 = vpop.f32.mrb[5].mxu0 }
 0x1d2   :  { %v1686_v32 = vadd.f32 %v5833_v44, %v881_v31  ;;  %v883_v33 = vpop.f32.mrb[6].mxu0  ;;  %v1836_v44 = vsub.s32 5, %v6109_v22  ;;  %v5050_v31 = vld [vmem:[%s6878_s7 + $0x128] sm:$0xff]  }
 0x1d3   :  { %v6128_v35 = vadd.f32 %v1817_v27, %v1684_v30  ;;  %v884_v36 = vpop.f32.mrb[7].mxu0  ;;  %v5049_v30 = vld [vmem:[%s6878_s7 + $0x168] sm:$0xff]   ;;  %v5052_v33 = vld [vmem:[%s6878_s7 + $0x130] sm:$0xff]  }
 0x1d4   :  { %v6130_v38 = vadd.f32 %v1821_v29, %v1686_v32  ;;  %v1837_v48 = vrot.slane %v6117_v25, %v1836_v44  ;;  %v5048_v29 = vld [vmem:[%s6878_s7 + $0x120] sm:$0xff]   ;;  %v5051_v32 = vld [vmem:[%s6878_s7 + $0x170] sm:$0xff]   ;;  %v5053_v36 = vld [vmem:[%s6878_s7 + $0x178] sm:$0xff]   ;;  %v1828_v44 = vsub.s32 3, %v6109_v22 }
 0x1d5   :  { %v4439_v40 = vmul.f32 -1.442695, %v6128_v35 }
 0x1d6   :  { %v4440_v41 = vmul.f32 -1.442695, %v6130_v38 }
 0x1d7   :  { %5303 = vpow2.f32 %v4439_v40  ;;  %v5054_v40 = vld [vmem:[%s6878_s7 + $0x138] sm:$0xff]  }
 0x1d8   :  { %5305 = vpow2.f32 %v4440_v41  ;;  %v6134_v43 = vpop.f32.mrb[8].mxu0 }
 0x1d9   :  { %v6136_v45 = vpop.f32.mrb[9].mxu0 }
 0x1da   :  { %v924_v42 = vpop.f32.mrb[10].mxu0 }
 0x1db   :  { %v925_v46 = vpop.f32.mrb[11].mxu0 }
 0x1dc   :  { %v1824_v46 = vsub.s32 2, %v6109_v22 }
 0x1e0   :  { %v961_v47 = vpop.f32.mrb[12].mxu0 }
 0x1e1   :  { %v5304_v18 = vpop.eup %5303  ;;  %v1766_v34 = vadd.f32 %v5933_v55, %v961_v47  ;;  %v963_v37 = vpop.f32.mrb[13].mxu0  ;;  %v1825_v47 = vrot.slane %v6117_v25, %v1824_v46 }
 0x1e2   :  { %v5306_v49 = vpop.eup %5305  ;;  %v2105_v39 = vadd.f32 1.0, %v5304_v18  ;;  %v1768_v50 = vadd.f32 %v5938_v58, %v963_v37  ;;  %v965_v51 = vpop.f32.mrb[14].mxu0  ;;  %v5071_v58 = vld [vmem:[%s6878_s7 + $0x1c0] sm:$0xff]   ;;  %v1829_v18 = vrot.slane %v6117_v25, %v1828_v44 }
 0x1e3   :  { %v966_v52 = vpop.f32.mrb[15].mxu0  ;;  %v2106_v53 = vadd.f32 1.0, %v5306_v49  ;;  %v6154_v62 = vadd.f32 %v1833_v57, %v1766_v34  ;;  %4762 = vmatprep.subr.bf16.mxu1 %v5071_v58 }
 0x1e4   :  { %5307 = vrcp.f32 %v2105_v39  ;;  %v6143_v54 = vadd.f32 %v1837_v48, %v1768_v50 }
 0x1e5   :  { %5309 = vrcp.f32 %v2106_v53  ;;  %v4443_v8 = vmul.f32 -1.442695, %v6154_v62 }
 0x1e6   :  { %v4444_v56 = vmul.f32 -1.442695, %v6143_v54 }
 0x1e8   :  { %5311 = vpow2.f32 %v4444_v56  ;;  %v6147_v55 = vpop.f32.mrb[16].mxu0 }
 0x1e9   :  { %v6149_v60 = vpop.f32.mrb[17].mxu0  ;;  %5313 = vpow2.f32 %v4443_v8  ;;  %v5073_v8 = vld [vmem:[%s6878_s7 + $0x1c8] sm:$0xff]  }
 0x1ea   :  { %v1006_v61 = vpop.f32.mrb[18].mxu0 }
 0x1eb   :  { %v1007_v2 = vpop.f32.mrb[19].mxu0 }
 0x1ee   :  { %v5308_v5 = vpop.eup %5307 }
 0x1ef   :  { %v5310_v6 = vpop.eup %5309  ;;  %v2129_v3 = vpack.c.bf16 %v5308_v5, %v5308_v5  ;;  %v5072_v5 = vld [vmem:[%s6878_s7 + $0x180] sm:$0xff]  }
 0x1f0   :  { %v2130_v63 = vpack.c.bf16 %v5310_v6, %v5310_v6 }
 0x1f2   :  { %v5312_v10 = vpop.eup %5311  ;;  %2559 = vmatprep.mubr.bf16.mxu0 %v2130_v63  ;;  %v5074_v63 = vld [vmem:[%s6878_s7 + $0x188] sm:$0xff]  }
 0x1f3   :  { %2560 = vmatmul.mubr.bf16.vlgmr.msra.gmra.mrb[32].mxu0 %v2129_v3  ;;  %v2110_v11 = vadd.f32 1.0, %v5312_v10  ;;  %v5314_v19 = vpop.eup %5313  ;;  %v5076_v3 = vld [vmem:[%s6878_s7 + $0x190] sm:$0xff]   ;;  %v5078_v10 = vld [vmem:[%s6878_s7 + $0x198] sm:$0xff]  }
 0x1f4   :  { %4741 = vmatpush3.bf16.msra.mxu0 %v5040_v1  ;;  %v2109_v27 = vadd.f32 1.0, %v5314_v19  ;;  %v5075_v1 = vld [vmem:[%s6878_s7 + $0x1d0] sm:$0xff]   ;;  %v5085_v19 = vld [vmem:[%s6878_s7 + $0x1f8] sm:$0xff]  }
 0x1f5   :  { %4742 = vmatprep.subr.bf16.mxu0 %v5041_v9  ;;  %5315 = vrcp.f32 %v2110_v11  ;;  %v5077_v9 = vld [vmem:[%s6878_s7 + $0x1d8] sm:$0xff]   ;;  %v5079_v11 = vld [vmem:[%s6878_s7 + $0x1e0] sm:$0xff]  }
 0x1f6   :  { %5317 = vrcp.f32 %v2109_v27  ;;  %v5086_v27 = vld [vmem:[%s6878_s7 + $0x1b8] sm:$0xff]  }
 0x1f8   :  { %4743 = vmatpush3.bf16.msra.mxu0 %v5042_v12  ;;  %v5080_v12 = vld [vmem:[%s6878_s7 + $0x1a0] sm:$0xff]  }
 0x1f9   :  { %4744 = vmatprep.subr.bf16.mxu0 %v5043_v13  ;;  %v5081_v13 = vld [vmem:[%s6878_s7 + $0x1e8] sm:$0xff]  }
 0x1fc   :  { %4745 = vmatpush3.bf16.msra.mxu0 %v5044_v15  ;;  %v5082_v15 = vld [vmem:[%s6878_s7 + $0x1a8] sm:$0xff]  }
 0x1fd   :  { %4746 = vmatprep.subr.bf16.mxu0 %v5045_v16  ;;  %v5083_v16 = vld [vmem:[%s6878_s7 + $0x1f0] sm:$0xff]  }
 0x1ff   :  { %v5316_v21 = vpop.eup %5315 }
 0x200   :  { %4747 = vmatpush3.bf16.msra.mxu0 %v5046_v17  ;;  %v2134_v28 = vpack.c.bf16 %v5316_v21, %v5316_v21  ;;  %v5318_v41 = vpop.eup %5317  ;;  %v5084_v17 = vld [vmem:[%s6878_s7 + $0x1b0] sm:$0xff]   ;;  %v1844_v21 = vsub.s32 7, %v6109_v22 }
 0x201   :  { %4748 = vmatprep.subr.bf16.mxu0 %v5047_v20  ;;  %v2133_v42 = vpack.c.bf16 %v5318_v41, %v5318_v41  ;;  %v1840_v20 = vsub.s32 6, %v6109_v22 }
 0x202   :  { %2639 = vmatprep.mubr.bf16.mxu0 %v2134_v28 }
 0x203   :  { %v1841_v28 = vrot.slane %v6117_v25, %v1840_v20 }
 0x204   :  { %4749 = vmatpush3.bf16.msra.mxu0 %v5048_v29 }
 0x205   :  { %4750 = vmatprep.subr.bf16.mxu0 %v5049_v30  ;;  %v1845_v30 = vrot.slane %v6117_v25, %v1844_v21 }
 0x208   :  { %4751 = vmatpush3.bf16.msra.mxu0 %v5050_v31 }
 0x209   :  { %4752 = vmatprep.subr.bf16.mxu0 %v5051_v32 }
 0x20c   :  { %4753 = vmatpush3.bf16.msra.mxu0 %v5052_v33 }
 0x20d   :  { %4754 = vmatprep.subr.bf16.mxu0 %v5053_v36 }
 0x210   :  { %4755 = vmatpush3.bf16.msra.mxu0 %v5054_v40 }
 0x211   :  { %4983 = vmatprep.subr.bf16.mxu0 %v5356_v0 }
 0x213   :  { %2640 = vmatmul.mubr.bf16.vlgmr.msra.gmra.mrb[36].mxu0 %v2133_v42 }
 0x214   :  { %4898 = vmatprep.mubr.msk.f32.mxu0 %vm5357_vm0, %v5358_v4 }
 0x228   :  { %v1724_v48 = vpop.f32.mrb[20].mxu0 }
 0x229   :  { %v1725_v34 = vadd.f32 %v1724_v48, %v6134_v43  ;;  %v1726_v37 = vpop.f32.mrb[21].mxu0 }
 0x22a   :  { %v1727_v49 = vadd.f32 %v1726_v37, %v6136_v45  ;;  %v1728_v39 = vpop.f32.mrb[22].mxu0 }
 0x22b   :  { %v6211_v50 = vadd.f32 %v1825_v47, %v1725_v34  ;;  %v1729_v51 = vpop.f32.mrb[23].mxu0 }
 0x22c   :  { %v6213_v24 = vadd.f32 %v1829_v18, %v1727_v49 }
 0x22d   :  { %v4441_v52 = vmul.f32 -1.442695, %v6211_v50 }
 0x22e   :  { %v4442_v53 = vmul.f32 -1.442695, %v6213_v24 }
 0x22f   :  { %5319 = vpow2.f32 %v4441_v52 }
 0x230   :  { %5321 = vpow2.f32 %v4442_v53 }
 0x239   :  { %v5320_v56 = vpop.eup %5319 }
 0x23a   :  { %v5322_v57 = vpop.eup %5321  ;;  %v2107_v58 = vadd.f32 1.0, %v5320_v56 }
 0x23b   :  { %v2108_v61 = vadd.f32 1.0, %v5322_v57 }
 0x23c   :  { %5323 = vrcp.f32 %v2107_v58 }
 0x23d   :  { %5325 = vrcp.f32 %v2108_v61 }
 0x246   :  { %v5324_v43 = vpop.eup %5323 }
 0x247   :  { %v5326_v45 = vpop.eup %5325  ;;  %v2131_v6 = vpack.c.bf16 %v5324_v43, %v5324_v43 }
 0x248   :  { %v2132_v2 = vpack.c.bf16 %v5326_v45, %v5326_v45 }
 0x24a   :  { %2599 = vmatprep.mubr.bf16.mxu1 %v2132_v2  ;;  %v342_v2 = vld [vmem:[%s6880_s9] sm:$0xff] }
 0x24b   :  { %2600 = vmatmul.mubr.bf16.vlgmr.msra.gmra.mrb[16].mxu1 %v2131_v6  ;;  %v344_v6 = vld [vmem:[%s6880_s9 + $0x10] sm:$0xff] }
 0x24c   :  { %4763 = vmatpush3.bf16.msra.mxu1 %v5072_v5  ;;  %v343_v5 = vld [vmem:[%s6880_s9 + $0x8] sm:$0xff] }
 0x24d   :  { %4764 = vmatprep.subr.bf16.mxu1 %v5073_v8  ;;  %v4984_v8 = vpack.c.bf16 %v343_v5, %v342_v2  ;;  %v5120_v2 = vld [vmem:[%s6881_s10 + $0xb0] ss:$8 sps:$4 sm:$0xff]   ;;  %v5125_v5 = vld [vmem:[%s6881_s10 + $0xc4] ss:$8 sps:$4 sm:$0xff]  }
 0x24f   :  { %4985 = vmatpush3.bf16.msra.mxu0 %v4984_v8 }
 0x250   :  { %4765 = vmatpush3.bf16.msra.mxu1 %v5074_v63  ;;  %v345_v63 = vld [vmem:[%s6880_s9 + $0x18] sm:$0xff]  ;;  %4986 = vmatprep.subr.bf16.mxu0 %v5356_v0 }
 0x251   :  { %4766 = vmatprep.subr.bf16.mxu1 %v5075_v1  ;;  %v4987_v1 = vpack.c.bf16 %v345_v63, %v344_v6  ;;  %v5123_v6 = vld [vmem:[%s6881_s10 + $0xc0] ss:$8 sps:$4 sm:$0xff]   ;;  %v5126_v63 = vld [vmem:[%s6881_s10 + $0xd0] ss:$8 sps:$4 sm:$0xff]  }
 0x253   :  { %4988 = vmatpush3.bf16.msra.mxu0 %v4987_v1 }
 0x254   :  { %4767 = vmatpush3.bf16.msra.mxu1 %v5076_v3  ;;  %4995 = vmatprep.subr.bf16.mxu0 %v5356_v0  ;;  %v4447_v3 = vld [vmem:[%s6882_s8] ss:$0 sm:$0xff] }
 0x255   :  { %4768 = vmatprep.subr.bf16.mxu1 %v5077_v9 }
 0x258   :  { %4769 = vmatpush3.bf16.msra.mxu1 %v5078_v10 }
 0x259   :  { %4770 = vmatprep.subr.bf16.mxu1 %v5079_v11 }
 0x25c   :  { %4771 = vmatpush3.bf16.msra.mxu1 %v5080_v12 }
 0x25d   :  { %4772 = vmatprep.subr.bf16.mxu1 %v5081_v13 }
 0x260   :  { %4773 = vmatpush3.bf16.msra.mxu1 %v5082_v15 }
 0x261   :  { %4774 = vmatprep.subr.bf16.mxu1 %v5083_v16 }
 0x264   :  { %4775 = vmatpush3.bf16.msra.mxu1 %v5084_v17 }
 0x265   :  { %4776 = vmatprep.subr.bf16.mxu1 %v5085_v19 }
 0x268   :  { %v1806_v29 = vpop.f32.mrb[24].mxu0  ;;  %4777 = vmatpush3.bf16.msra.mxu1 %v5086_v27 }
 0x269   :  { %v1807_v31 = vadd.f32 %v1806_v29, %v6147_v55  ;;  %v1808_v32 = vpop.f32.mrb[25].mxu0  ;;  %4989 = vmatprep.subr.bf16.mxu1 %v5356_v0 }
 0x26a   :  { %v1809_v33 = vadd.f32 %v1808_v32, %v6149_v60  ;;  %v1810_v22 = vpop.f32.mrb[26].mxu0 }
 0x26b   :  { %v6269_v36 = vadd.f32 %v1841_v28, %v1807_v31  ;;  %v1811_v40 = vpop.f32.mrb[27].mxu0 }
 0x26c   :  { %v6271_v41 = vadd.f32 %v1845_v30, %v1809_v33 }
 0x26d   :  { %v4445_v42 = vmul.f32 -1.442695, %v6269_v36 }
 0x26e   :  { %v4446_v46 = vmul.f32 -1.442695, %v6271_v41 }
 0x26f   :  { %5327 = vpow2.f32 %v4445_v42 }
 0x270   :  { %5329 = vpow2.f32 %v4446_v46  ;;  %v6275_v25 = vpop.f32.mrb[28].mxu0  ;;  %v5089_v46 = vld [vmem:[%s6881_s10 + $0x4] ss:$8 sps:$4 sm:$0xff]  }
 0x271   :  { %v4878_v55 = vpop.f32.mrb[29].mxu0 }
 0x279   :  { %v5328_v44 = vpop.eup %5327 }
 0x27a   :  { %v5330_v47 = vpop.eup %5329  ;;  %v2111_v48 = vadd.f32 1.0, %v5328_v44  ;;  %v5093_v44 = vld [vmem:[%s6881_s10 + $0x20] ss:$8 sps:$4 sm:$0xff]  }
 0x27b   :  { %v2112_v18 = vadd.f32 1.0, %v5330_v47  ;;  %v5098_v47 = vld [vmem:[%s6881_s10 + $0x34] ss:$8 sps:$4 sm:$0xff]  }
 0x27c   :  { %5331 = vrcp.f32 %v2111_v48  ;;  %v5096_v48 = vld [vmem:[%s6881_s10 + $0x30] ss:$8 sps:$4 sm:$0xff]  }
 0x27d   :  { %5333 = vrcp.f32 %v2112_v18  ;;  %v5101_v18 = vld [vmem:[%s6881_s10 + $0x44] ss:$8 sps:$4 sm:$0xff]  }
 0x286   :  { %v5332_v60 = vpop.eup %5331 }
 0x287   :  { %v5334_v34 = vpop.eup %5333  ;;  %v2135_v49 = vpack.c.bf16 %v5332_v60, %v5332_v60  ;;  %v5099_v60 = vld [vmem:[%s6881_s10 + $0x40] ss:$8 sps:$4 sm:$0xff]  }
 0x288   :  { %v2136_v37 = vpack.c.bf16 %v5334_v34, %v5334_v34  ;;  %v5104_v34 = vld [vmem:[%s6881_s10 + $0x54] ss:$8 sps:$4 sm:$0xff]  }
 0x28a   :  { %2679 = vmatprep.mubr.bf16.mxu1 %v2136_v37  ;;  %v5102_v37 = vld [vmem:[%s6881_s10 + $0x50] ss:$8 sps:$4 sm:$0xff]  }
 0x28b   :  { %2680 = vmatmul.mubr.bf16.vlgmr.msra.gmra.mrb[20].mxu1 %v2135_v49  ;;  %v5107_v49 = vld [vmem:[%s6881_s10 + $0x64] ss:$8 sps:$4 sm:$0xff]  }
 0x28c   :  { %4909 = vmatprep.mubr.msk.f32.mxu1 %vm5357_vm0, %v5358_v4  ;;  %4991 = vmatpush3.bf16.msra.mxu1 %v4984_v8 }
 0x28d   :  { %4992 = vmatprep.subr.bf16.mxu1 %v5356_v0 }
 0x290   :  { %4994 = vmatpush3.bf16.msra.mxu1 %v4987_v1 }
 0x2c6   :  { %v4712_v39 = vpop.f32.mrb[32].mxu0 }
 0x2c7   :  { %v4713_v51 = vpop.f32.mrb[33].mxu0 }
 0x2c8   :  { %v4714_v52 = vadd.f32 %v4713_v51, %v4712_v39  ;;  %v4715_v53 = vpop.f32.mrb[34].mxu0  ;;  %v5105_v39 = vld [vmem:[%s6881_s10 + $0x60] ss:$8 sps:$4 sm:$0xff]   ;;  %v5110_v51 = vld [vmem:[%s6881_s10 + $0x74] ss:$8 sps:$4 sm:$0xff]  }
 0x2c9   :  { %v4716_v56 = vpop.f32.mrb[35].mxu0  ;;  %v5113_v53 = vld [vmem:[%s6881_s10 + $0x84] ss:$8 sps:$4 sm:$0xff]  }
 0x2ca   :  { %v2562_v11 = vadd.f32 %v4714_v52, %v4447_v3  ;;  %v5108_v52 = vld [vmem:[%s6881_s10 + $0x70] ss:$8 sps:$4 sm:$0xff]   ;;  %v5111_v56 = vld [vmem:[%s6881_s10 + $0x80] ss:$8 sps:$4 sm:$0xff]  }
 0x2cb   :  { %v5129_v3 = vld [vmem:[%s6881_s10 + $0xe0] ss:$8 sps:$4 sm:$0xff]  }
 0x2e6   :  { %v4756_v57 = vpop.f32.mrb[36].mxu0 }
 0x2e7   :  { %v4757_v58 = vpop.f32.mrb[37].mxu0 }
 0x2e8   :  { %v4758_v61 = vadd.f32 %v4757_v58, %v4756_v57  ;;  %v4759_v43 = vpop.f32.mrb[38].mxu0  ;;  %v5116_v57 = vld [vmem:[%s6881_s10 + $0x94] ss:$8 sps:$4 sm:$0xff]   ;;  %v5114_v58 = vld [vmem:[%s6881_s10 + $0x90] ss:$8 sps:$4 sm:$0xff]  }
 0x2e9   :  { %v4760_v45 = vpop.f32.mrb[39].mxu0  ;;  %v5117_v43 = vld [vmem:[%s6881_s10 + $0xa0] ss:$8 sps:$4 sm:$0xff]  }
 0x2ea   :  { %v5122_v45 = vld [vmem:[%s6881_s10 + $0xb4] ss:$8 sps:$4 sm:$0xff]  }
 0x31e   :  { %v4734_v9 = vpop.f32.mrb[16].mxu1 }
 0x31f   :  { %v4735_v10 = vpop.f32.mrb[17].mxu1 }
 0x320   :  { %v4736_v12 = vadd.f32 %v4735_v10, %v4734_v9  ;;  %v4737_v13 = vpop.f32.mrb[18].mxu1  ;;  %v5134_v9 = vld [vmem:[%s6881_s10 + $0xf4] ss:$8 sps:$4 sm:$0xff]   ;;  %v5132_v10 = vld [vmem:[%s6881_s10 + $0xf0] ss:$8 sps:$4 sm:$0xff]  }
 0x321   :  { %v4738_v15 = vpop.f32.mrb[19].mxu1  ;;  %v2701_v13 = vmax.f32 %v6143_v54, 0.0  ;;  %v5143_v54 = vld [vmem:[%s6881_s10 + $0x224] ss:$8 sps:$4 sm:$0xff]  }
 0x322   :  { %v2602_v16 = vadd.f32 %v4736_v12, %v2562_v11  ;;  %v2696_v11 = vmax.f32 %v6128_v35, 0.0  ;;  %v5137_v12 = vld [vmem:[%s6881_s10 + $0x204] ss:$8 sps:$4 sm:$0xff]   ;;  %v5135_v15 = vld [vmem:[%s6881_s10 + $0x200] ss:$8 sps:$4 sm:$0xff]  }
 0x323   :  { %v5138_v35 = vld [vmem:[%s6881_s10 + $0x210] ss:$8 sps:$4 sm:$0xff]  }
 0x324   :  { %v2642_v17 = vadd.f32 %v4758_v61, %v2602_v16  ;;  %v5119_v61 = vld [vmem:[%s6881_s10 + $0xa4] ss:$8 sps:$4 sm:$0xff]   ;;  %v2936_v16 = vpack.c.bf16 %v2696_v11, %v2696_v11 }
 0x35e   :  { %v4778_v19 = vpop.f32.mrb[20].mxu1 }
 0x35f   :  { %v4779_v20 = vpop.f32.mrb[21].mxu1 }
 0x360   :  { %v4780_v21 = vadd.f32 %v4779_v20, %v4778_v19  ;;  %v4781_v27 = vpop.f32.mrb[22].mxu1  ;;  %v2941_v19 = vpack.c.bf16 %v2701_v13, %v2701_v13  ;;  %v5141_v20 = vld [vmem:[%s6881_s10 + $0x220] ss:$8 sps:$4 sm:$0xff]  }
 0x361   :  { %v4782_v28 = vpop.f32.mrb[23].mxu1  ;;  %v5144_v27 = vld [vmem:[%s6881_s10 + $0x230] ss:$8 sps:$4 sm:$0xff]  }
 0x362   :  { %v2682_v29 = vadd.f32 %v4780_v21, %v2642_v17  ;;  %v5140_v17 = vld [vmem:[%s6881_s10 + $0x214] ss:$8 sps:$4 sm:$0xff]   ;;  %v5149_v28 = vld [vmem:[%s6881_s10 + $0x244] ss:$8 sps:$4 sm:$0xff]  }
 0x363   :  { %v5146_v21 = vld [vmem:[%s6881_s10 + $0x234] ss:$8 sps:$4 sm:$0xff]  }
 0x364   :  { %v4512_v30 = vmul.f32 -1.442695, %v2682_v29  ;;  %v5147_v29 = vld [vmem:[%s6881_s10 + $0x240] ss:$8 sps:$4 sm:$0xff]  }
 0x366   :  { %5335 = vpow2.f32 %v4512_v30  ;;  %v5152_v30 = vld [vmem:[%s6881_s10 + $0x254] ss:$8 sps:$4 sm:$0xff]  }
 0x370   :  { %v5336_v31 = vpop.eup %5335 }
 0x371   :  { %v2690_v32 = vadd.f32 1.0, %v5336_v31  ;;  %v5150_v31 = vld [vmem:[%s6881_s10 + $0x250] ss:$8 sps:$4 sm:$0xff]  }
 0x373   :  { %5337 = vrcp.f32 %v2690_v32  ;;  %v5155_v32 = vld [vmem:[%s6881_s10 + $0x264] ss:$8 sps:$4 sm:$0xff]  }
 0x37d   :  { %v5338_v33 = vpop.eup %5337 }
 0x37e   :  { %v2693_v22 = vmul.f32 %v5338_v33, %v6069_v7  ;;  %v2694_v40 = vmul.f32 %v5338_v33, %v6275_v25  ;;  %v2695_v42 = vmul.f32 %v5338_v33, %v6095_v14  ;;  %v2697_v7 = vmax.f32 %v6130_v38, 0.0  ;;  %v5087_v14 = vld [vmem:[%s6881_s10] ss:$8 sps:$4 sm:$0xff]   ;;  %v5092_v25 = vld [vmem:[%s6881_s10 + $0x14] ss:$8 sps:$4 sm:$0xff]  }
 0x37f   :  { %v5095_v38 = vld [vmem:[%s6881_s10 + $0x24] ss:$8 sps:$4 sm:$0xff]   ;;  %v5153_v33 = vld [vmem:[%s6881_s10 + $0x260] ss:$8 sps:$4 sm:$0xff]  }
 0x380   :  { %4899 = vmatmul.mubr.msk.f32.vlgmr.msra.gmra.mrb[30].mxu0 %vm841_vm2, %v2693_v22  ;;  %4910 = vmatmul.mubr.msk.f32.vlgmr.msra.gmra.mrb[14].mxu1 %vm841_vm2, %v2694_v40  ;;  %v2937_v55 = vpack.c.bf16 %v2697_v7, %v2697_v7  ;;  %v5158_v22 = vld [vmem:[%s6881_s10 + $0x274] ss:$8 sps:$4 sm:$0xff]   ;;  %v5156_v40 = vld [vmem:[%s6881_s10 + $0x270] ss:$8 sps:$4 sm:$0xff]   ;;  %v5185_v7 = vld [vmem:[%s6883_s11 + $0x4] ss:$8 sps:$4 sm:$0xff]  }
 0x381   :  { %4997 = vmatpush3.bf16.msra.mxu0 %v4984_v8  ;;  %4920 = vmatprep.mubr.msk.f32.mxu0 %vm5357_vm0, %v5358_v4  ;;  %v5128_v8 = vld [vmem:[%s6881_s10 + $0xd4] ss:$8 sps:$4 sm:$0xff]  }
 0x382   :  { %4998 = vmatprep.subr.bf16.mxu0 %v5356_v0  ;;  %3000 = vmatprep.mubr.bf16.mxu1 %v5359_v59  ;;  %v5090_v59 = vld [vmem:[%s6881_s10 + $0x10] ss:$8 sps:$4 sm:$0xff]  }
 0x383   :  { %2968 = vmatprep.subr.bf16.mxu1 %v5185_v7  ;;  %v5204_v7 = vld [vmem:[%s6881_s10 + $0x150] ss:$8 sps:$4 sm:$0xff]  }
 0x385   :  { %5000 = vmatpush3.bf16.msra.mxu0 %v4987_v1  ;;  %v5131_v1 = vld [vmem:[%s6881_s10 + $0xe4] ss:$8 sps:$4 sm:$0xff]  }
 0x386   :  { %3649 = vmatprep.subr.bf16.mxu0 %v5089_v46  ;;  %v5183_v46 = vld [vmem:[%s6883_s11] ss:$8 sps:$4 sm:$0xff]  }
 0x387   :  { %2969 = vmatpush1.bf16.msra.mxu1 %v5183_v46  ;;  %v5206_v46 = vld [vmem:[%s6881_s10 + $0x154] ss:$8 sps:$4 sm:$0xff]  }
 0x388   :  { %4921 = vmatmul.mubr.msk.f32.vlgmr.msra.gmra.mrb[40].mxu0 %vm841_vm2, %v2695_v42  ;;  %v5161_v42 = vld [vmem:[%s6881_s10 + $0x284] ss:$8 sps:$4 sm:$0xff]  }
 0x389   :  { %3650 = vmatpush1.bf16.msra.mxu0 %v5087_v14  ;;  %3681 = vmatprep.mubr.bf16.mxu0 %v2937_v55  ;;  %v5159_v14 = vld [vmem:[%s6881_s10 + $0x280] ss:$8 sps:$4 sm:$0xff]   ;;  %v5164_v55 = vld [vmem:[%s6881_s10 + $0x294] ss:$8 sps:$4 sm:$0xff]  }
 0x38a   :  { %3651 = vmatprep.subr.bf16.mxu0 %v5092_v25  ;;  %v5188_v25 = vld [vmem:[%s6883_s11 + $0x14] ss:$8 sps:$4 sm:$0xff]  }
 0x38b   :  { %2970 = vmatprep.subr.bf16.mxu1 %v5188_v25  ;;  %v5207_v25 = vld [vmem:[%s6881_s10 + $0x160] ss:$8 sps:$4 sm:$0xff]  }
 0x38d   :  { %3652 = vmatpush1.bf16.msra.mxu0 %v5090_v59  ;;  %v5186_v59 = vld [vmem:[%s6883_s11 + $0x10] ss:$8 sps:$4 sm:$0xff]  }
 0x38e   :  { %3653 = vmatprep.subr.bf16.mxu0 %v5095_v38  ;;  %v5191_v38 = vld [vmem:[%s6881_s10 + $0x104] ss:$8 sps:$4 sm:$0xff]   ;;  %2971 = vmatpush1.bf16.msra.mxu1 %v5186_v59  ;;  %v5210_v59 = vld [vmem:[%s6881_s10 + $0x170] ss:$8 sps:$4 sm:$0xff]  }
 0x38f   :  { %3690 = vmatprep.subr.bf16.mxu1 %v5191_v38  ;;  %v5215_v38 = vld [vmem:[%s6881_s10 + $0x184] ss:$8 sps:$4 sm:$0xff]  }
 0x391   :  { %3654 = vmatpush1.bf16.msra.mxu0 %v5093_v44  ;;  %v5162_v44 = vld [vmem:[%s6881_s10 + $0x290] ss:$8 sps:$4 sm:$0xff]  }
 0x392   :  { %3655 = vmatprep.subr.bf16.mxu0 %v5098_v47  ;;  %v5167_v47 = vld [vmem:[%s6881_s10 + $0x2a4] ss:$8 sps:$4 sm:$0xff]  }
 0x395   :  { %3656 = vmatpush1.bf16.msra.mxu0 %v5096_v48  ;;  %v5165_v48 = vld [vmem:[%s6881_s10 + $0x2a0] ss:$8 sps:$4 sm:$0xff]  }
 0x396   :  { %3657 = vmatprep.subr.bf16.mxu0 %v5101_v18  ;;  %v5170_v18 = vld [vmem:[%s6881_s10 + $0x2b4] ss:$8 sps:$4 sm:$0xff]  }
 0x399   :  { %3658 = vmatpush1.bf16.msra.mxu0 %v5099_v60  ;;  %v5168_v60 = vld [vmem:[%s6881_s10 + $0x2b0] ss:$8 sps:$4 sm:$0xff]  }
 0x39a   :  { %3659 = vmatprep.subr.bf16.mxu0 %v5104_v34  ;;  %v5173_v34 = vld [vmem:[%s6881_s10 + $0x2c4] ss:$8 sps:$4 sm:$0xff]  }
 0x39d   :  { %3660 = vmatpush1.bf16.msra.mxu0 %v5102_v37  ;;  %v5171_v37 = vld [vmem:[%s6881_s10 + $0x2c0] ss:$8 sps:$4 sm:$0xff]  }
 0x39e   :  { %3661 = vmatprep.subr.bf16.mxu0 %v5107_v49  ;;  %v5176_v49 = vld [vmem:[%s6881_s10 + $0x2d4] ss:$8 sps:$4 sm:$0xff]  }
 0x3a1   :  { %3662 = vmatpush1.bf16.msra.mxu0 %v5105_v39  ;;  %v5174_v39 = vld [vmem:[%s6881_s10 + $0x2d0] ss:$8 sps:$4 sm:$0xff]  }
 0x3a2   :  { %3663 = vmatprep.subr.bf16.mxu0 %v5110_v51  ;;  %v5179_v51 = vld [vmem:[%s6881_s10 + $0x2e4] ss:$8 sps:$4 sm:$0xff]  }
 0x3a5   :  { %3664 = vmatpush1.bf16.msra.mxu0 %v5108_v52  ;;  %v5177_v52 = vld [vmem:[%s6881_s10 + $0x2e0] ss:$8 sps:$4 sm:$0xff]  }
 0x3a6   :  { %3665 = vmatprep.subr.bf16.mxu0 %v5113_v53  ;;  %v5182_v53 = vld [vmem:[%s6881_s10 + $0x2f4] ss:$8 sps:$4 sm:$0xff]  }
 0x3a9   :  { %3666 = vmatpush1.bf16.msra.mxu0 %v5111_v56  ;;  %v5180_v56 = vld [vmem:[%s6881_s10 + $0x2f0] ss:$8 sps:$4 sm:$0xff]  }
 0x3aa   :  { %3667 = vmatprep.subr.bf16.mxu0 %v5116_v57  ;;  %v2700_v57 = vmax.f32 %v6154_v62, 0.0  ;;  %v482_v62 = vld [vmem:[%s6884_s13 + $0x18] sm:$0xff] }
 0x3ad   :  { %3668 = vmatpush1.bf16.msra.mxu0 %v5114_v58  ;;  %v479_v58 = vld [vmem:[%s6884_s13] sm:$0xff] }
 0x3ae   :  { %3669 = vmatprep.subr.bf16.mxu0 %v5119_v61  ;;  %v480_v61 = vld [vmem:[%s6884_s13 + $0x8] sm:$0xff] }
 0x3b1   :  { %3670 = vmatpush1.bf16.msra.mxu0 %v5117_v43  ;;  %v6524_v43 = vpack.c.bf16 %v480_v61, %v479_v58  ;;  %v5228_v58 = vld [vmem:[%s6881_s10 + $0x1d0] ss:$8 sps:$4 sm:$0xff]   ;;  %v5233_v61 = vld [vmem:[%s6881_s10 + $0x1e4] ss:$8 sps:$4 sm:$0xff]  }
 0x3b2   :  { %3671 = vmatprep.subr.bf16.mxu0 %v5122_v45  ;;  %v2940_v45 = vpack.c.bf16 %v2700_v57, %v2700_v57  ;;  %v5230_v57 = vld [vmem:[%s6881_s10 + $0x1d4] ss:$8 sps:$4 sm:$0xff]  }
 0x3b5   :  { %3672 = vmatpush1.bf16.msra.mxu0 %v5120_v2  ;;  %v481_v2 = vld [vmem:[%s6884_s13 + $0x10] sm:$0xff] }
 0x3b6   :  { %3673 = vmatprep.subr.bf16.mxu0 %v5125_v5  ;;  %v6534_v5 = vpack.c.bf16 %v482_v62, %v481_v2  ;;  %v5236_v2 = vld [vmem:[%s6881_s10 + $0x1f4] ss:$8 sps:$4 sm:$0xff]   ;;  %v5234_v62 = vld [vmem:[%s6881_s10 + $0x1f0] ss:$8 sps:$4 sm:$0xff]  }
 0x3b9   :  { %3674 = vmatpush1.bf16.msra.mxu0 %v5123_v6 }
 0x3ba   :  { %3675 = vmatprep.subr.bf16.mxu0 %v5128_v8 }
 0x3bd   :  { %3676 = vmatpush1.bf16.msra.mxu0 %v5126_v63 }
 0x3be   :  { %3677 = vmatprep.subr.bf16.mxu0 %v5131_v1 }
 0x3c1   :  { %3678 = vmatpush1.bf16.msra.mxu0 %v5129_v3 }
 0x3c2   :  { %3679 = vmatprep.subr.bf16.mxu0 %v5134_v9 }
 0x3c5   :  { %3680 = vmatpush1.bf16.msra.mxu0 %v5132_v10 }
 0x3c6   :  { %3731 = vmatprep.subr.bf16.mxu0 %v5137_v12 }
 0x3c8   :  { %3682 = vmatmul.mubr.bf16.vlgmr.msra.gmra.mrb[44].mxu0 %v2936_v16 }
 0x3c9   :  { %3732 = vmatpush1.bf16.msra.mxu0 %v5135_v15  ;;  %3763 = vmatprep.mubr.bf16.mxu0 %v2941_v19 }
 0x3ca   :  { %3733 = vmatprep.subr.bf16.mxu0 %v5140_v17 }
 0x3cd   :  { %3734 = vmatpush1.bf16.msra.mxu0 %v5138_v35 }
 0x3ce   :  { %3735 = vmatprep.subr.bf16.mxu0 %v5143_v54  ;;  %v2699_v54 = vmax.f32 %v6213_v24, 0.0  ;;  %v5192_v24 = vld [vmem:[%s6881_s10 + $0x110] ss:$8 sps:$4 sm:$0xff]  }
 0x3d1   :  { %3736 = vmatpush1.bf16.msra.mxu0 %v5141_v20 }
 0x3d2   :  { %3737 = vmatprep.subr.bf16.mxu0 %v5146_v21  ;;  %v5189_v21 = vld [vmem:[%s6881_s10 + $0x100] ss:$8 sps:$4 sm:$0xff]  }
 0x3d5   :  { %3738 = vmatpush1.bf16.msra.mxu0 %v5144_v27 }
 0x3d6   :  { %3739 = vmatprep.subr.bf16.mxu0 %v5149_v28 }
 0x3d9   :  { %3740 = vmatpush1.bf16.msra.mxu0 %v5147_v29  ;;  %v5194_v29 = vld [vmem:[%s6881_s10 + $0x114] ss:$8 sps:$4 sm:$0xff]  }
 0x3da   :  { %3741 = vmatprep.subr.bf16.mxu0 %v5152_v30  ;;  %v2939_v30 = vpack.c.bf16 %v2699_v54, %v2699_v54  ;;  %v5257_v54 = vld [vmem:[%s6881_s10 + $0x364] ss:$8 sps:$4 sm:$0xff]  }
 0x3dd   :  { %3742 = vmatpush1.bf16.msra.mxu0 %v5150_v31  ;;  %v5197_v31 = vld [vmem:[%s6881_s10 + $0x124] ss:$8 sps:$4 sm:$0xff]  }
 0x3de   :  { %3743 = vmatprep.subr.bf16.mxu0 %v5155_v32  ;;  %v5195_v32 = vld [vmem:[%s6881_s10 + $0x120] ss:$8 sps:$4 sm:$0xff]  }
 0x3e1   :  { %3744 = vmatpush1.bf16.msra.mxu0 %v5153_v33  ;;  %v5200_v33 = vld [vmem:[%s6881_s10 + $0x134] ss:$8 sps:$4 sm:$0xff]  }
 0x3e2   :  { %3745 = vmatprep.subr.bf16.mxu0 %v5158_v22  ;;  %v5198_v22 = vld [vmem:[%s6881_s10 + $0x130] ss:$8 sps:$4 sm:$0xff]  }
 0x3e5   :  { %3746 = vmatpush1.bf16.msra.mxu0 %v5156_v40  ;;  %v5203_v40 = vld [vmem:[%s6881_s10 + $0x144] ss:$8 sps:$4 sm:$0xff]  }
 0x3e6   :  { %3747 = vmatprep.subr.bf16.mxu0 %v5161_v42  ;;  %v5201_v42 = vld [vmem:[%s6881_s10 + $0x140] ss:$8 sps:$4 sm:$0xff]  }
 0x3e9   :  { %3748 = vmatpush1.bf16.msra.mxu0 %v5159_v14  ;;  %v5209_v14 = vld [vmem:[%s6881_s10 + $0x164] ss:$8 sps:$4 sm:$0xff]  }
 0x3ea   :  { %3749 = vmatprep.subr.bf16.mxu0 %v5164_v55  ;;  %v5212_v55 = vld [vmem:[%s6881_s10 + $0x174] ss:$8 sps:$4 sm:$0xff]  }
 0x3ed   :  { %3750 = vmatpush1.bf16.msra.mxu0 %v5162_v44  ;;  %v5213_v44 = vld [vmem:[%s6881_s10 + $0x180] ss:$8 sps:$4 sm:$0xff]  }
 0x3ee   :  { %3751 = vmatprep.subr.bf16.mxu0 %v5167_v47  ;;  %v5218_v47 = vld [vmem:[%s6881_s10 + $0x194] ss:$8 sps:$4 sm:$0xff]  }
 0x3f1   :  { %3752 = vmatpush1.bf16.msra.mxu0 %v5165_v48  ;;  %v5216_v48 = vld [vmem:[%s6881_s10 + $0x190] ss:$8 sps:$4 sm:$0xff]  }
 0x3f2   :  { %3753 = vmatprep.subr.bf16.mxu0 %v5170_v18  ;;  %v5221_v18 = vld [vmem:[%s6881_s10 + $0x1a4] ss:$8 sps:$4 sm:$0xff]  }
 0x3f5   :  { %3754 = vmatpush1.bf16.msra.mxu0 %v5168_v60  ;;  %v5219_v60 = vld [vmem:[%s6881_s10 + $0x1a0] ss:$8 sps:$4 sm:$0xff]  }
 0x3f6   :  { %3755 = vmatprep.subr.bf16.mxu0 %v5173_v34  ;;  %v5224_v34 = vld [vmem:[%s6881_s10 + $0x1b4] ss:$8 sps:$4 sm:$0xff]  }
 0x3f9   :  { %3756 = vmatpush1.bf16.msra.mxu0 %v5171_v37 }
 0x3fa   :  { %3757 = vmatprep.subr.bf16.mxu0 %v5176_v49 }
 0x3fd   :  { %3758 = vmatpush1.bf16.msra.mxu0 %v5174_v39  ;;  %v5222_v39 = vld [vmem:[%s6881_s10 + $0x1b0] ss:$8 sps:$4 sm:$0xff]  }
 0x3fe   :  { %3759 = vmatprep.subr.bf16.mxu0 %v5179_v51 }
 0x401   :  { %3760 = vmatpush1.bf16.msra.mxu0 %v5177_v52  ;;  %v5227_v52 = vld [vmem:[%s6881_s10 + $0x1c4] ss:$8 sps:$4 sm:$0xff]  }
 0x402   :  { %3761 = vmatprep.subr.bf16.mxu0 %v5182_v53 }
 0x405   :  { %3762 = vmatpush1.bf16.msra.mxu0 %v5180_v56  ;;  %v5225_v56 = vld [vmem:[%s6881_s10 + $0x1c0] ss:$8 sps:$4 sm:$0xff]  }
 0x406   :  { %5001 = vmatprep.subr.bf16.mxu0 %v5356_v0 }
 0x408   :  { %3764 = vmatmul.mubr.bf16.vlgmr.msra.gmra.mrb[48].mxu0 %v2940_v45  ;;  %v5231_v45 = vld [vmem:[%s6881_s10 + $0x1e0] ss:$8 sps:$4 sm:$0xff]  }
 0x409   :  { %5003 = vmatpush3.bf16.msra.mxu0 %v6524_v43  ;;  %4931 = vmatprep.mubr.msk.f32.mxu0 %vm5357_vm0, %v5358_v4 }
 0x40a   :  { %5004 = vmatprep.subr.bf16.mxu0 %v5356_v0 }
 0x40d   :  { %5006 = vmatpush3.bf16.msra.mxu0 %v6534_v5 }
 0x40e   :  { %5013 = vmatprep.subr.bf16.mxu0 %v5356_v0 }
 0x453   :  { %v2773_v6 = vpop.f32.mrb[30].mxu0  ;;  %v6541_v8 = vpop.f32.mrb[14].mxu1 }
 0x454   :  { %v2923_v63 = vmul.f32 %v2773_v6, %v2773_v6  ;;  %v2924_v1 = vmul.f32 %v6541_v8, %v6541_v8  ;;  %v4900_v3 = vpop.f32.mrb[31].mxu0  ;;  %v4911_v9 = vpop.f32.mrb[15].mxu1  ;;  %4932 = vmatmul.mubr.msk.f32.vlgmr.msra.gmra.mrb[42].mxu0 %vm841_vm2, %v2773_v6  ;;  %v2698_v6 = vmax.f32 %v6211_v50, 0.0  ;;  %v5240_v50 = vld [vmem:[%s6881_s10 + $0x310] ss:$8 sps:$4 sm:$0xff]  }
 0x455   :  { %5015 = vmatpush3.bf16.msra.mxu0 %v6524_v43  ;;  %4953 = vmatprep.mubr.msk.f32.mxu0 %vm5357_vm0, %v5358_v4  ;;  %v5237_v3 = vld [vmem:[%s6881_s10 + $0x300] ss:$8 sps:$4 sm:$0xff]  }
 0x456   :  { %v2925_v10 = vadd.f32 %v2924_v1, %v2923_v63  ;;  %5016 = vmatprep.subr.bf16.mxu0 %v5356_v0  ;;  %v5239_v63 = vld [vmem:[%s6881_s10 + $0x304] ss:$8 sps:$4 sm:$0xff]   ;;  %v2703_v1 = vmax.f32 %v6271_v41, 0.0  ;;  %v2938_v9 = vpack.c.bf16 %v2698_v6, %v2698_v6  ;;  %v5298_v6 = vld [vmem:[%s6885_s14 + $0x30] sm:$0xff]  }
 0x457   :  { %v5245_v41 = vld [vmem:[%s6881_s10 + $0x324] ss:$8 sps:$4 sm:$0xff]  }
 0x459   :  { %5018 = vmatpush3.bf16.msra.mxu0 %v6534_v5 }
 0x45b   :  { %v2919_v11 = vpop.f32.mrb[40].mxu0 }
 0x45c   :  { %v2926_v12 = vmul.f32 %v2919_v11, %v2919_v11  ;;  %v4922_v13 = vpop.f32.mrb[41].mxu0  ;;  %4954 = vmatmul.mubr.msk.f32.vlgmr.msra.gmra.mrb[52].mxu0 %vm841_vm2, %v2919_v11  ;;  %v2943_v11 = vpack.c.bf16 %v2703_v1, %v2703_v1 }
 0x45d   :  { %v5248_v13 = vld [vmem:[%s6881_s10 + $0x334] ss:$8 sps:$4 sm:$0xff]  }
 0x45e   :  { %v2927_v15 = vadd.f32 %v2926_v12, %v2925_v10  ;;  %v5242_v10 = vld [vmem:[%s6881_s10 + $0x314] ss:$8 sps:$4 sm:$0xff]   ;;  %v5243_v12 = vld [vmem:[%s6881_s10 + $0x320] ss:$8 sps:$4 sm:$0xff]  }
 0x460   :  { %v2928_v16 = vmax.f32 %v2927_v15, 1e-08  ;;  %v5246_v15 = vld [vmem:[%s6881_s10 + $0x330] ss:$8 sps:$4 sm:$0xff]  }
 0x462   :  { %5339 = vrsqrt.f32 %v2928_v16  ;;  %vm2931_vm5 = vcmp.eq.f32.partialorder %v2928_v16, inf  ;;  %v2934_v35 = vand.u32 2147483648, %v2928_v16  ;;  %vm2933_vm6 = vcmp.eq.f32.partialorder %v2928_v16, 0.0 }
 0x46c   :  { %v5340_v17 = vpop.eup %5339 }
 0x46d   :  { %v2930_v19 = vmul.f32 %v5340_v17, %v2928_v16  ;;  %v5249_v17 = vld [vmem:[%s6881_s10 + $0x340] ss:$8 sps:$4 sm:$0xff]  }
 0x46f   :  { %v2932_v20 = vsel %vm2931_vm5, %v2928_v16, %v2930_v19  ;;  %v5251_v16 = vld [vmem:[%s6881_s10 + $0x344] ss:$8 sps:$4 sm:$0xff]   ;;  %v5254_v19 = vld [vmem:[%s6881_s10 + $0x354] ss:$8 sps:$4 sm:$0xff]  }
 0x470   :  { %v2935_v27 = vsel %vm2933_vm6, %v2934_v35, %v2932_v20  ;;  %v5252_v35 = vld [vmem:[%s6881_s10 + $0x350] ss:$8 sps:$4 sm:$0xff]   ;;  %v5255_v20 = vld [vmem:[%s6881_s10 + $0x360] ss:$8 sps:$4 sm:$0xff]  }
 0x471   :  { %v2944_v28 = vpack.c.bf16 %v2935_v27, %v2935_v27  ;;  %v5258_v27 = vld [vmem:[%s6881_s10 + $0x370] ss:$8 sps:$4 sm:$0xff]  }
 0x473   :  { %4520 = vmatmul.mubr.msk.bf16.vlgmr.msra.gmra.mrb[24].mxu1 %vm841_vm2, %v2944_v28  ;;  %v5263_v28 = vld [vmem:[%s6881_s10 + $0x384] ss:$8 sps:$4 sm:$0xff]  }
 0x474   :  { %3691 = vmatpush1.bf16.msra.mxu1 %v5189_v21  ;;  %3722 = vmatprep.mubr.bf16.mxu1 %v2939_v30  ;;  %v5260_v21 = vld [vmem:[%s6881_s10 + $0x374] ss:$8 sps:$4 sm:$0xff]  }
 0x475   :  { %3692 = vmatprep.subr.bf16.mxu1 %v5194_v29  ;;  %v5261_v29 = vld [vmem:[%s6881_s10 + $0x380] ss:$8 sps:$4 sm:$0xff]   ;;  %v5266_v30 = vld [vmem:[%s6881_s10 + $0x394] ss:$8 sps:$4 sm:$0xff]  }
 0x478   :  { %3693 = vmatpush1.bf16.msra.mxu1 %v5192_v24  ;;  %v5264_v24 = vld [vmem:[%s6881_s10 + $0x390] ss:$8 sps:$4 sm:$0xff]  }
 0x479   :  { %3694 = vmatprep.subr.bf16.mxu1 %v5197_v31  ;;  %v5269_v31 = vld [vmem:[%s6881_s10 + $0x3a4] ss:$8 sps:$4 sm:$0xff]  }
 0x47c   :  { %3695 = vmatpush1.bf16.msra.mxu1 %v5195_v32  ;;  %v5267_v32 = vld [vmem:[%s6881_s10 + $0x3a0] ss:$8 sps:$4 sm:$0xff]  }
 0x47d   :  { %3696 = vmatprep.subr.bf16.mxu1 %v5200_v33  ;;  %v5272_v33 = vld [vmem:[%s6881_s10 + $0x3b4] ss:$8 sps:$4 sm:$0xff]  }
 0x480   :  { %3697 = vmatpush1.bf16.msra.mxu1 %v5198_v22 }
 0x481   :  { %3698 = vmatprep.subr.bf16.mxu1 %v5203_v40 }
 0x484   :  { %3699 = vmatpush1.bf16.msra.mxu1 %v5201_v42  ;;  %v5270_v42 = vld [vmem:[%s6881_s10 + $0x3b0] ss:$8 sps:$4 sm:$0xff]  }
 0x485   :  { %3700 = vmatprep.subr.bf16.mxu1 %v5206_v46 }
 0x488   :  { %3701 = vmatpush1.bf16.msra.mxu1 %v5204_v7  ;;  %v5275_v7 = vld [vmem:[%s6881_s10 + $0x3c4] ss:$8 sps:$4 sm:$0xff]  }
 0x489   :  { %3702 = vmatprep.subr.bf16.mxu1 %v5209_v14 }
 0x48c   :  { %3703 = vmatpush1.bf16.msra.mxu1 %v5207_v25  ;;  %v5273_v25 = vld [vmem:[%s6881_s10 + $0x3c0] ss:$8 sps:$4 sm:$0xff]  }
 0x48d   :  { %3704 = vmatprep.subr.bf16.mxu1 %v5212_v55  ;;  %v5278_v55 = vld [vmem:[%s6881_s10 + $0x3d4] ss:$8 sps:$4 sm:$0xff]  }
 0x490   :  { %3705 = vmatpush1.bf16.msra.mxu1 %v5210_v59  ;;  %v5276_v59 = vld [vmem:[%s6881_s10 + $0x3d0] ss:$8 sps:$4 sm:$0xff]  }
 0x491   :  { %3706 = vmatprep.subr.bf16.mxu1 %v5215_v38  ;;  %v5281_v38 = vld [vmem:[%s6881_s10 + $0x3e4] ss:$8 sps:$4 sm:$0xff]  }
 0x494   :  { %3707 = vmatpush1.bf16.msra.mxu1 %v5213_v44  ;;  %v5279_v44 = vld [vmem:[%s6881_s10 + $0x3e0] ss:$8 sps:$4 sm:$0xff]  }
 0x495   :  { %3708 = vmatprep.subr.bf16.mxu1 %v5218_v47  ;;  %v5284_v47 = vld [vmem:[%s6881_s10 + $0x3f4] ss:$8 sps:$4 sm:$0xff]  }
 0x498   :  { %3709 = vmatpush1.bf16.msra.mxu1 %v5216_v48  ;;  %v5282_v48 = vld [vmem:[%s6881_s10 + $0x3f0] ss:$8 sps:$4 sm:$0xff]  }
 0x499   :  { %3710 = vmatprep.subr.bf16.mxu1 %v5221_v18  ;;  %v2702_v18 = vmax.f32 %v6269_v36, 0.0  ;;  %v5285_v36 = vld [vmem:[%s6885_s14 + $0x40] sm:$0xff]  }
 0x49b   :  { %v6620_v37 = vpop.f32.mrb[44].mxu0 }
 0x49c   :  { %3711 = vmatpush1.bf16.msra.mxu1 %v5219_v60  ;;  %v6622_v49 = vpop.f32.mrb[45].mxu0  ;;  %v2942_v60 = vpack.c.bf16 %v2702_v18, %v2702_v18 }
 0x49d   :  { %v3687_v51 = vpop.f32.mrb[46].mxu0  ;;  %3712 = vmatprep.subr.bf16.mxu1 %v5224_v34  ;;  %v5286_v34 = vld [vmem:[%s6885_s14] sm:$0xff]  }
 0x49e   :  { %v3688_v53 = vpop.f32.mrb[47].mxu0  ;;  %v5293_v51 = vld [vmem:[%s6885_s14 + $0x60] sm:$0xff]  }
 0x49f   :  { %v5295_v53 = vld [vmem:[%s6885_s14 + $0x68] sm:$0xff]  }
 0x4a0   :  { %3713 = vmatpush1.bf16.msra.mxu1 %v5222_v39  ;;  %v5292_v39 = vld [vmem:[%s6885_s14 + $0x18] sm:$0xff]  }
 0x4a1   :  { %3714 = vmatprep.subr.bf16.mxu1 %v5227_v52  ;;  %v5294_v52 = vld [vmem:[%s6885_s14 + $0x20] sm:$0xff]  }
 0x4a4   :  { %3715 = vmatpush1.bf16.msra.mxu1 %v5225_v56  ;;  %v5296_v56 = vld [vmem:[%s6885_s14 + $0x28] sm:$0xff]  }
 0x4a5   :  { %3716 = vmatprep.subr.bf16.mxu1 %v5230_v57 }
 0x4a8   :  { %3717 = vmatpush1.bf16.msra.mxu1 %v5228_v58 }
 0x4a9   :  { %3718 = vmatprep.subr.bf16.mxu1 %v5233_v61 }
 0x4ac   :  { %3719 = vmatpush1.bf16.msra.mxu1 %v5231_v45 }
 0x4ad   :  { %3720 = vmatprep.subr.bf16.mxu1 %v5236_v2  ;;  %v5297_v2 = vld [vmem:[%s6885_s14 + $0x70] sm:$0xff]  }
 0x4b0   :  { %3721 = vmatpush1.bf16.msra.mxu1 %v5234_v62 }
 0x4b1   :  { %3772 = vmatprep.subr.bf16.mxu1 %v5239_v63 }
 0x4b3   :  { %3723 = vmatmul.mubr.bf16.vlgmr.msra.gmra.mrb[28].mxu1 %v2938_v9 }
 0x4b4   :  { %3773 = vmatpush1.bf16.msra.mxu1 %v5237_v3  ;;  %3804 = vmatprep.mubr.bf16.mxu1 %v2943_v11  ;;  %v5299_v11 = vld [vmem:[%s6885_s14 + $0x78] sm:$0xff]  }
 0x4b5   :  { %3774 = vmatprep.subr.bf16.mxu1 %v5242_v10 }
 0x4b8   :  { %3775 = vmatpush1.bf16.msra.mxu1 %v5240_v50  ;;  %v5300_v50 = vld [vmem:[%s6885_s14 + $0x38] sm:$0xff]  }
 0x4b9   :  { %3776 = vmatprep.subr.bf16.mxu1 %v5245_v41 }
 0x4bc   :  { %3777 = vmatpush1.bf16.msra.mxu1 %v5243_v12 }
 0x4bd   :  { %3778 = vmatprep.subr.bf16.mxu1 %v5248_v13 }
 0x4c0   :  { %3779 = vmatpush1.bf16.msra.mxu1 %v5246_v15 }
 0x4c1   :  { %3780 = vmatprep.subr.bf16.mxu1 %v5251_v16 }
 0x4c4   :  { %3781 = vmatpush1.bf16.msra.mxu1 %v5249_v17 }
 0x4c5   :  { %3782 = vmatprep.subr.bf16.mxu1 %v5254_v19  ;;  %v478_v19 = vld [vmem:[%s6886_s12] sm:$0x3] }
 0x4c8   :  { %3783 = vmatpush1.bf16.msra.mxu1 %v5252_v35  ;;  %v3817_v35 = vrot.slane %v478_v19, %v6112_v23 }
 0x4c9   :  { %3784 = vmatprep.subr.bf16.mxu1 %v5257_v54 }
 0x4cc   :  { %3785 = vmatpush1.bf16.msra.mxu1 %v5255_v20  ;;  %v3821_v20 = vrot.slane %v478_v19, %v6120_v26 }
 0x4cd   :  { %3786 = vmatprep.subr.bf16.mxu1 %v5260_v21 }
 0x4d0   :  { %3787 = vmatpush1.bf16.msra.mxu1 %v5258_v27 }
 0x4d1   :  { %3788 = vmatprep.subr.bf16.mxu1 %v5263_v28 }
 0x4d4   :  { %3789 = vmatpush1.bf16.msra.mxu1 %v5261_v29 }
 0x4d5   :  { %3790 = vmatprep.subr.bf16.mxu1 %v5266_v30 }
 0x4d8   :  { %3791 = vmatpush1.bf16.msra.mxu1 %v5264_v24 }
 0x4d9   :  { %3792 = vmatprep.subr.bf16.mxu1 %v5269_v31 }
 0x4db   :  { %v6722_v22 = vpop.f32.mrb[48].mxu0 }
 0x4dc   :  { %3793 = vmatpush1.bf16.msra.mxu1 %v5267_v32  ;;  %v6724_v40 = vpop.f32.mrb[49].mxu0  ;;  %v5351_v32 = vld [vmem:[%s6903_s21] sm:$0xff] }
 0x4dd   :  { %v3769_v46 = vpop.f32.mrb[50].mxu0  ;;  %3794 = vmatprep.subr.bf16.mxu1 %v5272_v33 }
 0x4de   :  { %v3770_v14 = vpop.f32.mrb[51].mxu0 }
 0x4e0   :  { %3795 = vmatpush1.bf16.msra.mxu1 %v5270_v42 }
 0x4e1   :  { %3796 = vmatprep.subr.bf16.mxu1 %v5275_v7 }
 0x4e4   :  { %3797 = vmatpush1.bf16.msra.mxu1 %v5273_v25 }
 0x4e5   :  { %3798 = vmatprep.subr.bf16.mxu1 %v5278_v55 }
 0x4e8   :  { %3799 = vmatpush1.bf16.msra.mxu1 %v5276_v59 }
 0x4e9   :  { %3800 = vmatprep.subr.bf16.mxu1 %v5281_v38 }
 0x4ec   :  { %3801 = vmatpush1.bf16.msra.mxu1 %v5279_v44 }
 0x4ed   :  { %3802 = vmatprep.subr.bf16.mxu1 %v5284_v47 }
 0x4f0   :  { %3803 = vmatpush1.bf16.msra.mxu1 %v5282_v48 }
 0x4f1   :  { %5007 = vmatprep.subr.bf16.mxu1 %v5356_v0 }
 0x4f3   :  { %3805 = vmatmul.mubr.bf16.vlgmr.msra.gmra.mrb[32].mxu1 %v2942_v60 }
 0x4f4   :  { %5009 = vmatpush3.bf16.msra.mxu1 %v6524_v43  ;;  %4942 = vmatprep.mubr.msk.f32.mxu1 %vm5357_vm0, %v5358_v4  ;;  %v5287_v4 = vld [vmem:[%s6885_s14 + $0x48] sm:$0xff]   ;;  %v5289_v43 = vld [vmem:[%s6885_s14 + $0x50] sm:$0xff]  }
 0x4f5   :  { %5010 = vmatprep.subr.bf16.mxu1 %v5356_v0  ;;  %v5288_v0 = vld [vmem:[%s6885_s14 + $0x8] sm:$0xff]  }
 0x4f8   :  { %5012 = vmatpush3.bf16.msra.mxu1 %v6534_v5  ;;  %v5290_v5 = vld [vmem:[%s6885_s14 + $0x10] sm:$0xff]  }
 0x4f9   :  { %4814 = vmatprep.subr.bf16.mxu1 %v5285_v36  ;;  %v4652_v36 = vld [vmem:[%s6887_s15] ss:$0 sm:$0xff] }
 0x4fb   :  { %4943 = vmatmul.mubr.msk.f32.vlgmr.msra.gmra.mrb[36].mxu1 %vm841_vm2, %v6541_v8  ;;  %v5291_v8 = vld [vmem:[%s6885_s14 + $0x58] sm:$0xff]  }
 0x4fc   :  { %4815 = vmatpush3.bf16.msra.mxu1 %v5286_v34 }
 0x4fd   :  { %4816 = vmatprep.subr.bf16.mxu1 %v5287_v4 }
 0x500   :  { %4817 = vmatpush3.bf16.msra.mxu1 %v5288_v0 }
 0x501   :  { %4818 = vmatprep.subr.bf16.mxu1 %v5289_v43 }
 0x504   :  { %4819 = vmatpush3.bf16.msra.mxu1 %v5290_v5 }
 0x505   :  { %4820 = vmatprep.subr.bf16.mxu1 %v5291_v8 }
 0x508   :  { %4821 = vmatpush3.bf16.msra.mxu1 %v5292_v39 }
 0x509   :  { %4822 = vmatprep.subr.bf16.mxu1 %v5293_v51 }
 0x50c   :  { %4823 = vmatpush3.bf16.msra.mxu1 %v5294_v52 }
 0x50d   :  { %4824 = vmatprep.subr.bf16.mxu1 %v5295_v53 }
 0x510   :  { %4825 = vmatpush3.bf16.msra.mxu1 %v5296_v56 }
 0x511   :  { %4826 = vmatprep.subr.bf16.mxu1 %v5297_v2 }
 0x514   :  { %4827 = vmatpush3.bf16.msra.mxu1 %v5298_v6 }
 0x515   :  { %4828 = vmatprep.subr.bf16.mxu1 %v5299_v11 }
 0x518   :  { %4829 = vmatpush3.bf16.msra.mxu1 %v5300_v50 }
 0x527   :  { %v6798_v57 = vpop.f32.mrb[42].mxu0 }
 0x528   :  { %v4933_v58 = vpop.f32.mrb[43].mxu0 }
 0x52f   :  { %v6800_v61 = vpop.f32.mrb[52].mxu0 }
 0x530   :  { %v4955_v45 = vpop.f32.mrb[53].mxu0 }
 0x531   :  { %v5353_v45 = vld [vmem:[%s6902_s30] sm:$0xff] }
 0x546   :  { %v3002_v62 = vpop.f32.mrb[24].mxu1 }
 0x547   :  { %v3684_v63 = vadd.f32 %v6620_v37, %v3002_v62  ;;  %v3004_v1 = vpop.f32.mrb[25].mxu1  ;;  %v5354_v62 = vld [vmem:[%s6902_s30 + $0x8] sm:$0xff] }
 0x548   :  { %v3686_v3 = vadd.f32 %v6622_v49, %v3004_v1  ;;  %v3006_v9 = vpop.f32.mrb[26].mxu1 }
 0x549   :  { %v3007_v10 = vpop.f32.mrb[27].mxu1 }
 0x586   :  { %v3724_v41 = vpop.f32.mrb[28].mxu1 }
 0x587   :  { %v3725_v12 = vadd.f32 %v3724_v41, %v3684_v63  ;;  %v3726_v37 = vpop.f32.mrb[29].mxu1  ;;  %v5355_v63 = vld [vmem:[%s6902_s30 + $0x10] sm:$0xff] }
 0x588   :  { %v3727_v13 = vadd.f32 %v3726_v37, %v3686_v3  ;;  %v3728_v15 = vpop.f32.mrb[30].mxu1 }
 0x589   :  { %v3729_v16 = vpop.f32.mrb[31].mxu1  ;;  %v3766_v49 = vadd.f32 %v6722_v22, %v3725_v12  ;;  %v517_v15 = vld [vmem:[%s6889_s17] sm:$0x3] }
 0x58a   :  { %v3768_v17 = vadd.f32 %v6724_v40, %v3727_v13  ;;  %v5352_v40 = vld [vmem:[%s6903_s21 + $0x8] sm:$0xff]  ;;  %v516_v13 = vld [vmem:[%s6888_s16] sm:$0x3]  ;;  %v4237_v19 = vrot.slane %v517_v15, %v6112_v23 }
 0x58b   :  { %v4224_v16 = vrot.slane %v516_v13, %v6112_v23 }
 0x5c6   :  { %v3806_v54 = vpop.f32.mrb[32].mxu1 }
 0x5c7   :  { %v3807_v21 = vadd.f32 %v3806_v54, %v3766_v49  ;;  %v3808_v27 = vpop.f32.mrb[33].mxu1  ;;  %v4228_v49 = vrot.slane %v516_v13, %v6120_v26 }
 0x5c8   :  { %v3809_v28 = vadd.f32 %v3808_v27, %v3768_v17  ;;  %v3810_v29 = vpop.f32.mrb[34].mxu1 }
 0x5c9   :  { %v3824_v30 = vadd.f32 %v3817_v35, %v3807_v21  ;;  %v3811_v24 = vpop.f32.mrb[35].mxu1  ;;  %v4241_v35 = vrot.slane %v517_v15, %v6120_v26 }
 0x5ca   :  { %v3825_v31 = vadd.f32 %v3821_v20, %v3809_v28 }
 0x5cb   :  { %v4198_v33 = vadd.f32 %v5351_v32, %v3824_v30  ;;  %v4045_v46 = vpack.c.bf16 %v3824_v30, %v3824_v30 }
 0x5cc   :  { %v4046_v22 = vpack.c.bf16 %v3825_v31, %v3825_v31  ;;  %v4199_v42 = vadd.f32 %v5352_v40, %v3825_v31 }
 0x5ce   :  { %v3968_v7 = vpop.f32.mrb[36].mxu1  ;;  %4181 = vmatprep.mubr.bf16.mxu1 %v4046_v22  ;;  %v4203_v14 = vadd.f32 %v4199_v42, %v4198_v33 }
 0x5cf   :  { %v4944_v25 = vpop.f32.mrb[37].mxu1  ;;  %4182 = vmatmul.mubr.bf16.vlgmr.msra.gmra.mrb[40].mxu1 %v4045_v46 }
 0x5d0   :  { %4204 = vadd.xlane.f32.xlu0 %v4203_v14 }
 0x65d   :  { %v4205_v55 = vpop.xlane.xlu0 %4204 }
 0x65e   :  { %v4207_v59 = vmul.f32 0.00390625, %v4205_v55 }
 0x660   :  { %v4208_v38 = vsub.f32 %v4198_v33, %v4207_v59  ;;  %v4209_v44 = vsub.f32 %v4199_v42, %v4207_v59 }
 0x662   :  { %v4210_v47 = vmul.f32 %v4208_v38, %v4208_v38  ;;  %v4211_v48 = vmul.f32 %v4209_v44, %v4209_v44 }
 0x664   :  { %v4212_v18 = vadd.f32 %v4211_v48, %v4210_v47 }
 0x666   :  { %4213 = vadd.xlane.f32.xlu1 %v4212_v18 }
 0x6a2   :  { %v4830_v60 = vpop.f32.mrb[40].mxu1 }
 0x6a3   :  { %v4831_v34 = vpop.f32.mrb[41].mxu1 }
 0x6a4   :  { %v4832_v4 = vadd.f32 %v4831_v34, %v4830_v60  ;;  %v4833_v0 = vpop.f32.mrb[42].mxu1 }
 0x6a5   :  { %v4834_v43 = vpop.f32.mrb[43].mxu1 }
 0x6a6   :  { %v4184_v5 = vadd.f32 %v4832_v4, %v4652_v36 }
 0x6a8   :  { %v4669_v8 = vmul.f32 -1.442695, %v4184_v5 }
 0x6aa   :  { %5341 = vpow2.f32 %v4669_v8 }
 0x6b4   :  { %v5342_v39 = vpop.eup %5341 }
 0x6b5   :  { %v4192_v51 = vadd.f32 1.0, %v5342_v39 }
 0x6b7   :  { %5343 = vrcp.f32 %v4192_v51 }
 0x6c1   :  { %v5344_v52 = vpop.eup %5343 }
 0x6c2   :  { %v4195_v53 = vmul.f32 %v5344_v52, %v6798_v57  ;;  %v4196_v56 = vmul.f32 %v5344_v52, %v3968_v7  ;;  %v4197_v58 = vmul.f32 %v5344_v52, %v6800_v61 }
 0x6c4   :  { %v4200_v2 = vadd.f32 %v5353_v45, %v4195_v53  ;;  %v4201_v6 = vadd.f32 %v5354_v62, %v4196_v56  ;;  %v4202_v1 = vadd.f32 %v5355_v63, %v4197_v58 }
 0x6c6   :  { %v4246_v3 = vmul.f32 %v4200_v2, %v4200_v2  ;;  %v4247_v57 = vmul.f32 %v4201_v6, %v4201_v6  ;;  %v4249_v10 = vmul.f32 %v4202_v1, %v4202_v1 }
 0x6c8   :  { %v4248_v9 = vadd.f32 %v4247_v57, %v4246_v3 }
 0x6ca   :  { %v4250_v61 = vadd.f32 %v4249_v10, %v4248_v9 }
 0x6cc   :  { %v4251_v11 = vmax.f32 %v4250_v61, 1e-08 }
 0x6ce   :  { %v4252_v50 = vsel %vm525_vm1, %v4251_v11, 0.0 }
 0x6cf   :  { %4253 = vadd.xlane.f32.xlu0 %v4252_v50 }
 0x6f3   :  { %v4214_v41 = vpop.xlane.xlu1 %4213 }
 0x6f4   :  { %v4215_v12 = vmul.f32 0.00390625, %v4214_v41 }
 0x6f6   :  { %v4216_v37 = vadd.f32 1e-05, %v4215_v12 }
 0x6f8   :  { %5345 = vrsqrt.f32 %v4216_v37 }
 0x702   :  { %v5346_v17 = vpop.eup %5345 }
 0x703   :  { %v4218_v54 = vmul.f32 %v5346_v17, %v4208_v38  ;;  %v4219_v20 = vmul.f32 %v5346_v17, %v4209_v44 }
 0x705   :  { %v4231_v21 = vmul.f32 %v4224_v16, %v4218_v54  ;;  %v4232_v27 = vmul.f32 %v4228_v49, %v4219_v20 }
 0x707   :  { %v4244_v28 = vadd.f32 %v4237_v19, %v4231_v21  ;;  %v4245_v29 = vadd.f32 %v4241_v35, %v4232_v27 }
 0x709   :  { %4268 = vst [vmem:[%s6890_s18] sm:$0xff] %v4244_v28  ;;  %4269 = vst [vmem:[%s6890_s18 + $0x8] sm:$0xff] %v4245_v29 }
 0x75c   :  { %v4254_v30 = vpop.xlane.xlu0 %4253 }
 0x75d   :  { %v4256_v24 = vmul.f32 0.0625, %v4254_v30 }
 0x75f   :  { %5347 = vrsqrt.f32 %v4256_v24  ;;  %vm4259_vm7 = vcmp.eq.f32.partialorder %v4256_v24, inf  ;;  %v4262_v26 = vand.u32 2147483648, %v4256_v24  ;;  %vm4261_vm8 = vcmp.eq.f32.partialorder %v4256_v24, 0.0 }
 0x769   :  { %v5348_v23 = vpop.eup %5347 }
 0x76a   :  { %v4258_v31 = vmul.f32 %v5348_v23, %v4256_v24 }
 0x76c   :  { %v4260_v32 = vsel %vm4259_vm7, %v4256_v24, %v4258_v31 }
 0x76d   :  { %v4263_v33 = vsel %vm4261_vm8, %v4262_v26, %v4260_v32 }
 0x76e   :  { %5349 = vrcp.f32 %v4263_v33 }
 0x778   :  { %v5350_v22 = vpop.eup %5349 }
 0x779   :  { %v4265_v40 = vmul.f32 %v5350_v22, %v4200_v2  ;;  %v4266_v42 = vmul.f32 %v5350_v22, %v4201_v6  ;;  %v4267_v46 = vmul.f32 %v5350_v22, %v4202_v1 }
 0x77b   :  { %4270 = vst.msk [vmem:[%s6891_s19] sm:$0xff] %vm525_vm1, %v4265_v40  ;;  %4670 = vst.msk [vmem:[%s6891_s19 + $0x8] sm:$0xff] %vm525_vm1, %v4266_v42 }
 0x77c   :  { %4671 = vst.msk [vmem:[%s6891_s19 + $0x10] sm:$0xff] %vm525_vm1, %v4267_v46 }

</bundles_post_ra>
